<compile_context>
chip_gen: v7x
topology: tpu7x:2x2x1
jax: 0.10.0
libtpu: 0.0.40
codegen_flags: <defaults>
</compile_context>

<pallas_src>
import jax
import jax.numpy as jnp
from jax.experimental import pallas as pl
from jax.experimental.pallas import tpu as pltpu

SLOPE = 0.01          # negative_slope of LeakyReLU
BN_EPS = 1e-5


def _round_up(v, m):
    return ((v + m - 1) // m) * m


# ------------------------------ Pallas kernel ------------------------------ #

def _make_block_kernel(num_layers, H, W):
    """Fused BasicBlockRN kernel for one image (grid iterates over the batch)."""
    M = H * W
    halo = _round_up(W + 1, 8)   # >= W+1 zero rows above/below the image, 8-aligned

    def kernel(*refs):
        x_ref = refs[0]                                    # (1, M, Cin)       bf16
        w_refs = refs[1:1 + num_layers]                    # (9*Cmax, Ppad)    bf16 (BN-folded)
        b_refs = refs[1 + num_layers:1 + 2 * num_layers]   # (1, Ppad)         f32
        ws_ref = refs[1 + 2 * num_layers]                  # (Cmax, Ppad)      bf16 (BN-folded)
        o_ref = refs[2 + 2 * num_layers]                   # (1, M, Ppad)      bf16
        act_ref = refs[3 + 2 * num_layers]                 # (M+2*halo, Cmax)  bf16 scratch
        col_ref = refs[4 + 2 * num_layers]                 # (M, 9*Cmax)       bf16 scratch
        sc_ref = refs[5 + 2 * num_layers]                  # (M, Ppad)         f32 scratch

        cin = x_ref.shape[2]
        cmax = act_ref.shape[1]

        # --- per-image slab (re)initialization -------------------------------
        # Zero only the halo bands (they implement 'SAME' padding for every 3x3
        # conv) and the padded interior columns (so no stale / uninitialized
        # data can ever reach the MXU).  The real interior is fully overwritten
        # below, so a full-slab zero would be pure vst waste.
        zband = jnp.zeros((halo, cmax), act_ref.dtype)
        act_ref[0:halo, :] = zband
        act_ref[halo + M:halo + M + halo, :] = zband

        # Stage the input image (already bf16) into the slab.
        act_ref[halo:halo + M, 0:cin] = x_ref[0]
        if cin < cmax:
            act_ref[halo:halo + M, cin:cmax] = jnp.zeros((M, cmax - cin), act_ref.dtype)

        # Column-validity masks for the horizontal taps (hoisted, shared by all
        # layers).  Applied as selects (no bf16 arithmetic -> v5e friendly).
        col = jax.lax.broadcasted_iota(jnp.int32, (M, 1), 0) % W
        mask_l = jnp.broadcast_to(col >= 1, (M, cmax))       # tap at w-1 is inside image
        mask_r = jnp.broadcast_to(col <= W - 2, (M, cmax))   # tap at w+1 is inside image
        zero_tap = jnp.zeros((M, cmax), act_ref.dtype)

        def leaky(v):  # f32 elementwise
            return jnp.where(v >= 0, v, SLOPE * v)

        def pack_taps():
            # Copy the 9 shifted (M, Cmax) views of the slab into the packed
            # im2col scratch.  The copy absorbs the +/-1 sublane shifts; the
            # resulting matmul operand is aligned and unmasked.
            k = 0
            for dy in (-1, 0, 1):
                for dx in (-1, 0, 1):
                    start = halo + dy * W + dx
                    tap = act_ref[start:start + M, :]
                    if dx == -1:
                        tap = jnp.where(mask_l, tap, zero_tap)
                    elif dx == 1:
                        tap = jnp.where(mask_r, tap, zero_tap)
                    col_ref[:, k * cmax:(k + 1) * cmax] = tap
                    k += 1

        # Fused 1x1-conv + BN shortcut (weight rows beyond cin are zero-padded),
        # kept in an explicit f32 VMEM scratch until the final epilogue.
        sc_ref[...] = jnp.dot(act_ref[halo:halo + M, :], ws_ref[...],
                              preferred_element_type=jnp.float32)

        # branch1: (conv3x3 + BN [+ LeakyReLU]) x num_layers.  BN scale is folded
        # into the weights, so each epilogue is a per-channel shift (f32).
        for i in range(num_layers):
            pack_taps()
            y = jnp.dot(col_ref[...], w_refs[i][...],
                        preferred_element_type=jnp.float32) + b_refs[i][...]
            if i < num_layers - 1:
                h = leaky(y)
                act_ref[halo:halo + M, 0:h.shape[1]] = h.astype(act_ref.dtype)
                if h.shape[1] < cmax:
                    act_ref[halo:halo + M, h.shape[1]:cmax] = (
                        jnp.zeros((M, cmax - h.shape[1]), act_ref.dtype))
            else:
                # residual add + post-activation; the last shift already contains
                # the shortcut-BN shift.  Lane-dense bf16 store.
                o_ref[0] = leaky(y + sc_ref[...]).astype(o_ref.dtype)

    return kernel


# ------------------------------ host wrapper ------------------------------- #

def basic_block_rn(x_nchw, kparams):
    """Forward pass. Input NCHW (PyTorch convention), output NCHW (float32)."""
    x = jnp.transpose(x_nchw, (0, 2, 3, 1)).astype(jnp.float32)   # NHWC
    N, H, W, Cin = x.shape
    M = H * W
    planes = kparams["planes"]
    p_pad = kparams["p_pad"]
    cmax = kparams["cmax"]
    nl = len(kparams["w"])
    halo = _round_up(W + 1, 8)

    x_flat = x.reshape(N, M, Cin).astype(jnp.bfloat16)            # bf16 halves input DMA

    in_specs = [pl.BlockSpec((1, M, Cin), lambda n: (n, 0, 0))]
    # Weights / biases / shortcut weight: constant index maps -> fetched once and
    # VMEM-resident for the whole grid.  (Single-buffering them would reclaim a
    # little more VMEM at real ResNet sizes.)
    for w in kparams["w"]:
        in_specs.append(pl.BlockSpec(w.shape, lambda n: (0, 0)))
    for b in kparams["b"]:
        in_specs.append(pl.BlockSpec(b.shape, lambda n: (0, 0)))
    in_specs.append(pl.BlockSpec(kparams["ws"].shape, lambda n: (0, 0)))

    out = pl.pallas_call(
        _make_block_kernel(nl, H, W),
        out_shape=jax.ShapeDtypeStruct((N, M, p_pad), jnp.bfloat16),   # lane-dense (Ppad%128==0)
        grid=(N,),
        in_specs=in_specs,
        out_specs=pl.BlockSpec((1, M, p_pad), lambda n: (n, 0, 0)),
        scratch_shapes=[
            pltpu.VMEM((M + 2 * halo, cmax), jnp.bfloat16),   # zero-halo'd activation slab
            pltpu.VMEM((M, 9 * cmax), jnp.bfloat16),          # packed im2col (K = 9*Cmax)
            pltpu.VMEM((M, p_pad), jnp.float32),              # shortcut accumulator
        ],
        compiler_params=pltpu.CompilerParams(
            dimension_semantics=("parallel",),   # batch axis: pipelined / megacore-shardable
            # 64 MiB scoped VMEM: exploits v5e/v6e's 128 MiB; actual demo usage is
            # ~2 MiB so this is also safe on v7x (row-band tiling would be used at
            # real sizes there).
            vmem_limit_bytes=64 * 1024 * 1024,
        ),
    )(x_flat, *kparams["w"], *kparams["b"], kparams["ws"])

    out = out.reshape(N, H, W, p_pad)[..., :planes].astype(jnp.float32)
    return jnp.transpose(out, (0, 3, 1, 2))                       # back to NCHW


# -------------------------- parameters & BN folding ------------------------- #

def init_raw_params(key, in_planes, planes, number_layer=3):
    """Random module parameters in PyTorch-equivalent form (HWIO conv weights)."""
    keys = jax.random.split(key, 5 * number_layer + 5)
    it = iter(keys)
    nk = lambda: next(it)
    raw = {"conv_w": [], "bn": []}
    for i in range(number_layer):
        cin = in_planes if i == 0 else planes
        w = 0.2 * jax.random.normal(nk(), (3, 3, cin, planes), jnp.float32)
        gamma = 1.0 + 0.1 * jax.random.normal(nk(), (planes,), jnp.float32)
        beta = 0.1 * jax.random.normal(nk(), (planes,), jnp.float32)
        mean = 0.1 * jax.random.normal(nk(), (planes,), jnp.float32)
        var = 0.5 + 0.5 * jnp.abs(jax.random.normal(nk(), (planes,), jnp.float32))
        raw["conv_w"].append(w)
        raw["bn"].append((gamma, beta, mean, var))
    raw["sc_w"] = 0.2 * jax.random.normal(nk(), (in_planes, planes), jnp.float32)
    gamma = 1.0 + 0.1 * jax.random.normal(nk(), (planes,), jnp.float32)
    beta = 0.1 * jax.random.normal(nk(), (planes,), jnp.float32)
    mean = 0.1 * jax.random.normal(nk(), (planes,), jnp.float32)
    var = 0.5 + 0.5 * jnp.abs(jax.random.normal(nk(), (planes,), jnp.float32))
    raw["sc_bn"] = (gamma, beta, mean, var)
    return raw


def _bn_affine(bn):
    gamma, beta, mean, var = bn
    scale = gamma / jnp.sqrt(var + BN_EPS)
    return scale, beta - mean * scale


def prepare_kernel_params(raw):
    """Fold inference-mode BN scale into weights, zero-pad channels to lane-aligned
    widths, reshape conv weights to the packed (9*Cmax, Ppad) im2col layout, cast bf16."""
    in_planes = raw["conv_w"][0].shape[2]
    planes = raw["conv_w"][0].shape[3]
    p_pad = _round_up(planes, 128)                      # lane-dense output / N dim
    cmax = _round_up(max(in_planes, planes), 128)       # slab width / per-tap K width

    w_list, b_list = [], []
    for w, bn in zip(raw["conv_w"], raw["bn"]):
        scale, shift = _bn_affine(bn)
        wf = w * scale                                                  # (3,3,cin,planes)
        cin = wf.shape[2]
        wf = jnp.pad(wf, ((0, 0), (0, 0), (0, cmax - cin), (0, p_pad - planes)))
        # (ky,kx)-major packed layout: row index = tap_k * Cmax + channel.
        w_list.append(wf.reshape(9 * cmax, p_pad).astype(jnp.bfloat16))
        b_list.append(jnp.pad(shift, (0, p_pad - planes)).reshape(1, p_pad)
                      .astype(jnp.float32))

    sc_scale, sc_shift = _bn_affine(raw["sc_bn"])
    wsc = raw["sc_w"] * sc_scale                                        # (in_planes, planes)
    wsc = jnp.pad(wsc, ((0, cmax - in_planes), (0, p_pad - planes)))
    # Fold the shortcut-BN shift into the last layer's shift.
    b_list[-1] = b_list[-1] + jnp.pad(sc_shift, (0, p_pad - planes)).reshape(1, p_pad)

    return {"w": w_list, "b": b_list, "ws": wsc.astype(jnp.bfloat16),
            "planes": planes, "in_planes": in_planes, "cmax": cmax, "p_pad": p_pad}


# ----------------------------- JAX references ------------------------------ #

def reference_f32(x_nchw, raw):
    """Module-faithful forward (inference-mode BN), all float32."""
    x = jnp.transpose(x_nchw, (0, 2, 3, 1)).astype(jnp.float32)
    leaky = lambda v: jnp.where(v >= 0, v, SLOPE * v)
    h = x
    nl = len(raw["conv_w"])
    for i in range(nl):
        h = jax.lax.conv_general_dilated(
            h, raw["conv_w"][i], (1, 1), "SAME",
            dimension_numbers=("NHWC", "HWIO", "NHWC"),
            precision=jax.lax.Precision.HIGHEST)
        scale, shift = _bn_affine(raw["bn"][i])
        h = h * scale + shift
        if i < nl - 1:
            h = leaky(h)
    scale, shift = _bn_affine(raw["sc_bn"])
    sc = jnp.einsum("nhwc,cp->nhwp", x, raw["sc_w"],
                    precision=jax.lax.Precision.HIGHEST) * scale + shift
    return jnp.transpose(leaky(h + sc), (0, 3, 1, 2))


def reference_matched(x_nchw, raw):
    """Same math as the Pallas kernel (BN folded into bf16 weights, bf16 MXU inputs,
    f32 accumulation) expressed with lax.conv — used for the tight numerical check."""
    x = jnp.transpose(x_nchw, (0, 2, 3, 1)).astype(jnp.float32)
    x = x.astype(jnp.bfloat16).astype(jnp.float32)        # mirror the wrapper's cast
    leaky = lambda v: jnp.where(v >= 0, v, SLOPE * v)
    h = x
    nl = len(raw["conv_w"])
    for i in range(nl):
        scale, shift = _bn_affine(raw["bn"][i])
        wf = (raw["conv_w"][i] * scale).astype(jnp.bfloat16)
        h = jax.lax.conv_general_dilated(
            h.astype(jnp.bfloat16), wf, (1, 1), "SAME",
            dimension_numbers=("NHWC", "HWIO", "NHWC"),
            preferred_element_type=jnp.float32) + shift
        if i < nl - 1:
            h = leaky(h)
    sc_scale, sc_shift = _bn_affine(raw["sc_bn"])
    wsf = (raw["sc_w"] * sc_scale).astype(jnp.bfloat16)
    sc = jnp.einsum("nhwc,cp->nhwp", x.astype(jnp.bfloat16), wsf,
                    preferred_element_type=jnp.float32) + sc_shift
    return jnp.transpose(leaky(h + sc), (0, 3, 1, 2))


# ---------------------------------- main ------------------------------------ #

if __name__ == "__main__":
    key = jax.random.PRNGKey(0)
    k_x, k_p = jax.random.split(key)

    N, Cin, H, W = 2, 4, 16, 16
    planes = 8
    x = jax.random.normal(k_x, (N, Cin, H, W), jnp.float32)       # NCHW, like PyTorch
    raw = init_raw_params(k_p, Cin, planes, number_layer=3)
    kparams = prepare_kernel_params(raw)

    out = jax.block_until_ready(basic_block_rn(x, kparams))
    assert out.shape == (N, planes, H, W), out.shape

    # Tight check: kernel vs a pure-JAX implementation of the *same* math
    # (folded BN, bf16 MXU inputs, f32 accumulation).  Residual = accumulation
    # order + the final bf16 output store.
    ref_m = jax.block_until_ready(reference_matched(x, raw))
    tight_err = float(jnp.max(jnp.abs(out - ref_m) / (1.0 + jnp.abs(ref_m))))
    assert tight_err < 2e-2, f"kernel vs matched-precision reference: {tight_err}"

    # Loose consistency check: kernel (bf16 MXU, bf16 output) vs the module-faithful
    # full-f32 reference; residual is the expected bf16 quantization effect.
    ref_f = jax.block_until_ready(reference_f32(x, raw))
    loose_err = float(jnp.max(jnp.abs(out - ref_f) / (1.0 + jnp.abs(ref_f))))
    assert loose_err < 0.2, f"kernel vs f32 module reference: {loose_err}"

    print("KERNEL_OK")
</pallas_src>

<mosaic_0001>
module attributes {stable_mosaic.version = 11 : i64} {
  func.func @kernel(%arg0: i32, %arg1: memref<1x256x4xbf16, #tpu.memory_space<vmem>>, %arg2: memref<1152x128xbf16, #tpu.memory_space<vmem>>, %arg3: memref<1152x128xbf16, #tpu.memory_space<vmem>>, %arg4: memref<1152x128xbf16, #tpu.memory_space<vmem>>, %arg5: memref<1x128xf32, #tpu.memory_space<vmem>>, %arg6: memref<1x128xf32, #tpu.memory_space<vmem>>, %arg7: memref<1x128xf32, #tpu.memory_space<vmem>>, %arg8: memref<128x128xbf16, #tpu.memory_space<vmem>>, %arg9: memref<1x256x128xbf16, #tpu.memory_space<vmem>>, %arg10: memref<304x128xbf16, #tpu.memory_space<vmem>>, %arg11: memref<256x1152xbf16, #tpu.memory_space<vmem>>, %arg12: memref<256x128xf32, #tpu.memory_space<vmem>>) attributes {dimension_semantics = [#tpu.dimension_semantics<parallel>], iteration_bounds = array<i64: 2>, scalar_prefetch = 0 : i64, scratch_operands = 3 : i64, tpu.core_type = #tpu.core_type<tc>, window_params = [{transform_indices = @transform_0, window_bounds = array<i64: 1, 256, 4>}, {pipeline_mode = #tpu.pipeline_mode<synchronous>, transform_indices = @transform_1, window_bounds = array<i64: 1152, 128>}, {pipeline_mode = #tpu.pipeline_mode<synchronous>, transform_indices = @transform_2, window_bounds = array<i64: 1152, 128>}, {pipeline_mode = #tpu.pipeline_mode<synchronous>, transform_indices = @transform_3, window_bounds = array<i64: 1152, 128>}, {pipeline_mode = #tpu.pipeline_mode<synchronous>, transform_indices = @transform_4, window_bounds = array<i64: 1, 128>}, {pipeline_mode = #tpu.pipeline_mode<synchronous>, transform_indices = @transform_5, window_bounds = array<i64: 1, 128>}, {pipeline_mode = #tpu.pipeline_mode<synchronous>, transform_indices = @transform_6, window_bounds = array<i64: 1, 128>}, {pipeline_mode = #tpu.pipeline_mode<synchronous>, transform_indices = @transform_7, window_bounds = array<i64: 128, 128>}, {transform_indices = @transform_8, window_bounds = array<i64: 1, 256, 128>}]} {
    %cst = arith.constant 0.000000e+00 : bf16
    %0 = vector.broadcast %cst : bf16 to vector<24x128xbf16>
    %c0 = arith.constant 0 : index
    %c0_0 = arith.constant 0 : index
    %1 = vector.load %arg10[%c0, %c0_0] : memref<304x128xbf16, #tpu.memory_space<vmem>>, vector<24x128xbf16>
    tpu.vector_store %arg10[%c0, %c0_0], %0 {strides = array<i32>} : memref<304x128xbf16, #tpu.memory_space<vmem>>, vector<24x128xbf16>,
    %c280 = arith.constant 280 : index
    %c0_1 = arith.constant 0 : index
    %2 = vector.load %arg10[%c280, %c0_1] : memref<304x128xbf16, #tpu.memory_space<vmem>>, vector<24x128xbf16>
    tpu.vector_store %arg10[%c280, %c0_1], %0 {strides = array<i32>} : memref<304x128xbf16, #tpu.memory_space<vmem>>, vector<24x128xbf16>,
    %c0_2 = arith.constant 0 : index
    %c0_3 = arith.constant 0 : index
    %c0_4 = arith.constant 0 : index
    %3 = vector.load %arg1[%c0_2, %c0_3, %c0_4] : memref<1x256x4xbf16, #tpu.memory_space<vmem>>, vector<1x256x4xbf16>
    %4 = vector.shape_cast %3 : vector<1x256x4xbf16> to vector<256x4xbf16>
    %c24 = arith.constant 24 : index
    %c0_5 = arith.constant 0 : index
    %5 = vector.load %arg10[%c24, %c0_5] : memref<304x128xbf16, #tpu.memory_space<vmem>>, vector<256x4xbf16>
    tpu.vector_store %arg10[%c24, %c0_5], %4 {strides = array<i32>} : memref<304x128xbf16, #tpu.memory_space<vmem>>, vector<256x4xbf16>,
    %cst_6 = arith.constant 0.000000e+00 : bf16
    %6 = vector.broadcast %cst_6 : bf16 to vector<256x124xbf16>
    %c24_7 = arith.constant 24 : index
    %c4 = arith.constant 4 : index
    %7 = vector.load %arg10[%c24_7, %c4] : memref<304x128xbf16, #tpu.memory_space<vmem>>, vector<256x124xbf16>
    tpu.vector_store %arg10[%c24_7, %c4], %6 {strides = array<i32>} : memref<304x128xbf16, #tpu.memory_space<vmem>>, vector<256x124xbf16>,
    %8 = tpu.iota {dimensions = array<i32: 0>} : vector<256x1xi32>
    %c16_i32 = arith.constant 16 : i32
    %c0_i32 = arith.constant 0 : i32
    %9 = arith.cmpi eq, %c16_i32, %c0_i32 : i32
    %c1_i32 = arith.constant 1 : i32
    %10 = arith.select %9, %c1_i32, %c16_i32 : i32
    %11 = vector.broadcast %10 : i32 to vector<256x1xi32>
    %12 = arith.remsi %8, %11 : vector<256x1xi32>
    %c0_i32_8 = arith.constant 0 : i32
    %13 = vector.broadcast %c0_i32_8 : i32 to vector<256x1xi32>
    %14 = arith.cmpi ne, %12, %13 : vector<256x1xi32>
    %c0_i32_9 = arith.constant 0 : i32
    %15 = vector.broadcast %c0_i32_9 : i32 to vector<256x1xi32>
    %16 = arith.cmpi slt, %12, %15 : vector<256x1xi32>
    %c0_i32_10 = arith.constant 0 : i32
    %17 = arith.cmpi slt, %10, %c0_i32_10 : i32
    %18 = vector.broadcast %17 : i1 to vector<256x1xi1>
    %19 = vector.broadcast %18 : vector<256x1xi1> to vector<256x1xi1>
    %20 = arith.xori %16, %19 : vector<256x1xi1>
    %21 = arith.andi %20, %14 : vector<256x1xi1>
    %22 = vector.broadcast %10 : i32 to vector<256x1xi32>
    %23 = arith.addi %12, %22 : vector<256x1xi32>
    %24 = arith.select %21, %23, %12 : vector<256x1xi1>, vector<256x1xi32>
    %c1_i32_11 = arith.constant 1 : i32
    %25 = vector.broadcast %c1_i32_11 : i32 to vector<256x1xi32>
    %26 = arith.cmpi sge, %24, %25 : vector<256x1xi32>
    %27 = vector.shape_cast %26 : vector<256x1xi1> to vector<256x1xi1>
    %28 = vector.broadcast %27 : vector<256x1xi1> to vector<256x128xi1>
    %c14_i32 = arith.constant 14 : i32
    %29 = vector.broadcast %c14_i32 : i32 to vector<256x1xi32>
    %30 = arith.cmpi sle, %24, %29 : vector<256x1xi32>
    %31 = vector.shape_cast %30 : vector<256x1xi1> to vector<256x1xi1>
    %32 = vector.broadcast %31 : vector<256x1xi1> to vector<256x128xi1>
    %cst_12 = arith.constant 0.000000e+00 : bf16
    %33 = vector.broadcast %cst_12 : bf16 to vector<256x128xbf16>
    %c24_13 = arith.constant 24 : index
    %c0_14 = arith.constant 0 : index
    %34 = vector.load %arg10[%c24_13, %c0_14] : memref<304x128xbf16, #tpu.memory_space<vmem>>, vector<256x128xbf16>
    %c0_15 = arith.constant 0 : index
    %c0_16 = arith.constant 0 : index
    %35 = vector.load %arg8[%c0_15, %c0_16] : memref<128x128xbf16, #tpu.memory_space<vmem>>, vector<128x128xbf16>
    %cst_17 = arith.constant dense<0.000000e+00> : vector<256x128xf32>
    %36 = tpu.matmul %34, %35, %cst_17 {dimension_numbers = #tpu.dot_dimension_numbers<[1], [0], [0], [1], [0, 0, 1, 1], [], []>} : vector<256x128xbf16>, vector<128x128xbf16>, vector<256x128xf32> -> vector<256x128xf32>
    %c0_18 = arith.constant 0 : index
    %c0_19 = arith.constant 0 : index
    %37 = vector.load %arg12[%c0_18, %c0_19] : memref<256x128xf32, #tpu.memory_space<vmem>>, vector<256x128xf32>
    tpu.vector_store %arg12[%c0_18, %c0_19], %36 {strides = array<i32>} : memref<256x128xf32, #tpu.memory_space<vmem>>, vector<256x128xf32>,
    %c7 = arith.constant 7 : index
    %c0_20 = arith.constant 0 : index
    %38 = vector.load %arg10[%c7, %c0_20] : memref<304x128xbf16, #tpu.memory_space<vmem>>, vector<256x128xbf16>
    %39 = arith.select %28, %38, %33 : vector<256x128xi1>, vector<256x128xbf16>
    %c0_21 = arith.constant 0 : index
    %c0_22 = arith.constant 0 : index
    %40 = vector.load %arg11[%c0_21, %c0_22] : memref<256x1152xbf16, #tpu.memory_space<vmem>>, vector<256x128xbf16>
    tpu.vector_store %arg11[%c0_21, %c0_22], %39 {strides = array<i32>} : memref<256x1152xbf16, #tpu.memory_space<vmem>>, vector<256x128xbf16>,
    %c8 = arith.constant 8 : index
    %c0_23 = arith.constant 0 : index
    %41 = vector.load %arg10[%c8, %c0_23] : memref<304x128xbf16, #tpu.memory_space<vmem>>, vector<256x128xbf16>
    %c0_24 = arith.constant 0 : index
    %c128 = arith.constant 128 : index
    %42 = vector.load %arg11[%c0_24, %c128] : memref<256x1152xbf16, #tpu.memory_space<vmem>>, vector<256x128xbf16>
    tpu.vector_store %arg11[%c0_24, %c128], %41 {strides = array<i32>} : memref<256x1152xbf16, #tpu.memory_space<vmem>>, vector<256x128xbf16>,
    %c9 = arith.constant 9 : index
    %c0_25 = arith.constant 0 : index
    %43 = vector.load %arg10[%c9, %c0_25] : memref<304x128xbf16, #tpu.memory_space<vmem>>, vector<256x128xbf16>
    %44 = arith.select %32, %43, %33 : vector<256x128xi1>, vector<256x128xbf16>
    %c0_26 = arith.constant 0 : index
    %c256 = arith.constant 256 : index
    %45 = vector.load %arg11[%c0_26, %c256] : memref<256x1152xbf16, #tpu.memory_space<vmem>>, vector<256x128xbf16>
    tpu.vector_store %arg11[%c0_26, %c256], %44 {strides = array<i32>} : memref<256x1152xbf16, #tpu.memory_space<vmem>>, vector<256x128xbf16>,
    %c23 = arith.constant 23 : index
    %c0_27 = arith.constant 0 : index
    %46 = vector.load %arg10[%c23, %c0_27] : memref<304x128xbf16, #tpu.memory_space<vmem>>, vector<256x128xbf16>
    %47 = arith.select %28, %46, %33 : vector<256x128xi1>, vector<256x128xbf16>
    %c0_28 = arith.constant 0 : index
    %c384 = arith.constant 384 : index
    %48 = vector.load %arg11[%c0_28, %c384] : memref<256x1152xbf16, #tpu.memory_space<vmem>>, vector<256x128xbf16>
    tpu.vector_store %arg11[%c0_28, %c384], %47 {strides = array<i32>} : memref<256x1152xbf16, #tpu.memory_space<vmem>>, vector<256x128xbf16>,
    %c24_29 = arith.constant 24 : index
    %c0_30 = arith.constant 0 : index
    %49 = vector.load %arg10[%c24_29, %c0_30] : memref<304x128xbf16, #tpu.memory_space<vmem>>, vector<256x128xbf16>
    %c0_31 = arith.constant 0 : index
    %c512 = arith.constant 512 : index
    %50 = vector.load %arg11[%c0_31, %c512] : memref<256x1152xbf16, #tpu.memory_space<vmem>>, vector<256x128xbf16>
    tpu.vector_store %arg11[%c0_31, %c512], %49 {strides = array<i32>} : memref<256x1152xbf16, #tpu.memory_space<vmem>>, vector<256x128xbf16>,
    %c25 = arith.constant 25 : index
    %c0_32 = arith.constant 0 : index
    %51 = vector.load %arg10[%c25, %c0_32] : memref<304x128xbf16, #tpu.memory_space<vmem>>, vector<256x128xbf16>
    %52 = arith.select %32, %51, %33 : vector<256x128xi1>, vector<256x128xbf16>
    %c0_33 = arith.constant 0 : index
    %c640 = arith.constant 640 : index
    %53 = vector.load %arg11[%c0_33, %c640] : memref<256x1152xbf16, #tpu.memory_space<vmem>>, vector<256x128xbf16>
    tpu.vector_store %arg11[%c0_33, %c640], %52 {strides = array<i32>} : memref<256x1152xbf16, #tpu.memory_space<vmem>>, vector<256x128xbf16>,
    %c39 = arith.constant 39 : index
    %c0_34 = arith.constant 0 : index
    %54 = vector.load %arg10[%c39, %c0_34] : memref<304x128xbf16, #tpu.memory_space<vmem>>, vector<256x128xbf16>
    %55 = arith.select %28, %54, %33 : vector<256x128xi1>, vector<256x128xbf16>
    %c0_35 = arith.constant 0 : index
    %c768 = arith.constant 768 : index
    %56 = vector.load %arg11[%c0_35, %c768] : memref<256x1152xbf16, #tpu.memory_space<vmem>>, vector<256x128xbf16>
    tpu.vector_store %arg11[%c0_35, %c768], %55 {strides = array<i32>} : memref<256x1152xbf16, #tpu.memory_space<vmem>>, vector<256x128xbf16>,
    %c40 = arith.constant 40 : index
    %c0_36 = arith.constant 0 : index
    %57 = vector.load %arg10[%c40, %c0_36] : memref<304x128xbf16, #tpu.memory_space<vmem>>, vector<256x128xbf16>
    %c0_37 = arith.constant 0 : index
    %c896 = arith.constant 896 : index
    %58 = vector.load %arg11[%c0_37, %c896] : memref<256x1152xbf16, #tpu.memory_space<vmem>>, vector<256x128xbf16>
    tpu.vector_store %arg11[%c0_37, %c896], %57 {strides = array<i32>} : memref<256x1152xbf16, #tpu.memory_space<vmem>>, vector<256x128xbf16>,
    %c41 = arith.constant 41 : index
    %c0_38 = arith.constant 0 : index
    %59 = vector.load %arg10[%c41, %c0_38] : memref<304x128xbf16, #tpu.memory_space<vmem>>, vector<256x128xbf16>
    %60 = arith.select %32, %59, %33 : vector<256x128xi1>, vector<256x128xbf16>
    %c0_39 = arith.constant 0 : index
    %c1024 = arith.constant 1024 : index
    %61 = vector.load %arg11[%c0_39, %c1024] : memref<256x1152xbf16, #tpu.memory_space<vmem>>, vector<256x128xbf16>
    tpu.vector_store %arg11[%c0_39, %c1024], %60 {strides = array<i32>} : memref<256x1152xbf16, #tpu.memory_space<vmem>>, vector<256x128xbf16>,
    %c0_40 = arith.constant 0 : index
    %c0_41 = arith.constant 0 : index
    %62 = vector.load %arg11[%c0_40, %c0_41] : memref<256x1152xbf16, #tpu.memory_space<vmem>>, vector<256x1152xbf16>
    %c0_42 = arith.constant 0 : index
    %c0_43 = arith.constant 0 : index
    %63 = vector.load %arg2[%c0_42, %c0_43] : memref<1152x128xbf16, #tpu.memory_space<vmem>>, vector<1152x128xbf16>
    %cst_44 = arith.constant dense<0.000000e+00> : vector<256x128xf32>
    %64 = tpu.matmul %62, %63, %cst_44 {dimension_numbers = #tpu.dot_dimension_numbers<[1], [0], [0], [1], [0, 0, 1, 1], [], []>} : vector<256x1152xbf16>, vector<1152x128xbf16>, vector<256x128xf32> -> vector<256x128xf32>
    %c0_45 = arith.constant 0 : index
    %c0_46 = arith.constant 0 : index
    %65 = vector.load %arg5[%c0_45, %c0_46] : memref<1x128xf32, #tpu.memory_space<vmem>>, vector<1x128xf32>
    %66 = vector.broadcast %65 : vector<1x128xf32> to vector<256x128xf32>
    %67 = arith.addf %64, %66 : vector<256x128xf32>
    %cst_47 = arith.constant 0.000000e+00 : f32
    %68 = vector.broadcast %cst_47 : f32 to vector<256x128xf32>
    %69 = arith.cmpf oge, %67, %68 : vector<256x128xf32>
    %cst_48 = arith.constant 0.00999999977 : f32
    %70 = vector.broadcast %cst_48 : f32 to vector<256x128xf32>
    %71 = arith.mulf %70, %67 : vector<256x128xf32>
    %72 = arith.select %69, %67, %71 : vector<256x128xi1>, vector<256x128xf32>
    %73 = arith.truncf %72 : vector<256x128xf32> to vector<256x128xbf16>
    %c24_49 = arith.constant 24 : index
    %c0_50 = arith.constant 0 : index
    %74 = vector.load %arg10[%c24_49, %c0_50] : memref<304x128xbf16, #tpu.memory_space<vmem>>, vector<256x128xbf16>
    tpu.vector_store %arg10[%c24_49, %c0_50], %73 {strides = array<i32>} : memref<304x128xbf16, #tpu.memory_space<vmem>>, vector<256x128xbf16>,
    %c7_51 = arith.constant 7 : index
    %c0_52 = arith.constant 0 : index
    %75 = vector.load %arg10[%c7_51, %c0_52] : memref<304x128xbf16, #tpu.memory_space<vmem>>, vector<256x128xbf16>
    %76 = arith.select %28, %75, %33 : vector<256x128xi1>, vector<256x128xbf16>
    %c0_53 = arith.constant 0 : index
    %c0_54 = arith.constant 0 : index
    %77 = vector.load %arg11[%c0_53, %c0_54] : memref<256x1152xbf16, #tpu.memory_space<vmem>>, vector<256x128xbf16>
    tpu.vector_store %arg11[%c0_53, %c0_54], %76 {strides = array<i32>} : memref<256x1152xbf16, #tpu.memory_space<vmem>>, vector<256x128xbf16>,
    %c8_55 = arith.constant 8 : index
    %c0_56 = arith.constant 0 : index
    %78 = vector.load %arg10[%c8_55, %c0_56] : memref<304x128xbf16, #tpu.memory_space<vmem>>, vector<256x128xbf16>
    %c0_57 = arith.constant 0 : index
    %c128_58 = arith.constant 128 : index
    %79 = vector.load %arg11[%c0_57, %c128_58] : memref<256x1152xbf16, #tpu.memory_space<vmem>>, vector<256x128xbf16>
    tpu.vector_store %arg11[%c0_57, %c128_58], %78 {strides = array<i32>} : memref<256x1152xbf16, #tpu.memory_space<vmem>>, vector<256x128xbf16>,
    %c9_59 = arith.constant 9 : index
    %c0_60 = arith.constant 0 : index
    %80 = vector.load %arg10[%c9_59, %c0_60] : memref<304x128xbf16, #tpu.memory_space<vmem>>, vector<256x128xbf16>
    %81 = arith.select %32, %80, %33 : vector<256x128xi1>, vector<256x128xbf16>
    %c0_61 = arith.constant 0 : index
    %c256_62 = arith.constant 256 : index
    %82 = vector.load %arg11[%c0_61, %c256_62] : memref<256x1152xbf16, #tpu.memory_space<vmem>>, vector<256x128xbf16>
    tpu.vector_store %arg11[%c0_61, %c256_62], %81 {strides = array<i32>} : memref<256x1152xbf16, #tpu.memory_space<vmem>>, vector<256x128xbf16>,
    %c23_63 = arith.constant 23 : index
    %c0_64 = arith.constant 0 : index
    %83 = vector.load %arg10[%c23_63, %c0_64] : memref<304x128xbf16, #tpu.memory_space<vmem>>, vector<256x128xbf16>
    %84 = arith.select %28, %83, %33 : vector<256x128xi1>, vector<256x128xbf16>
    %c0_65 = arith.constant 0 : index
    %c384_66 = arith.constant 384 : index
    %85 = vector.load %arg11[%c0_65, %c384_66] : memref<256x1152xbf16, #tpu.memory_space<vmem>>, vector<256x128xbf16>
    tpu.vector_store %arg11[%c0_65, %c384_66], %84 {strides = array<i32>} : memref<256x1152xbf16, #tpu.memory_space<vmem>>, vector<256x128xbf16>,
    %c24_67 = arith.constant 24 : index
    %c0_68 = arith.constant 0 : index
    %86 = vector.load %arg10[%c24_67, %c0_68] : memref<304x128xbf16, #tpu.memory_space<vmem>>, vector<256x128xbf16>
    %c0_69 = arith.constant 0 : index
    %c512_70 = arith.constant 512 : index
    %87 = vector.load %arg11[%c0_69, %c512_70] : memref<256x1152xbf16, #tpu.memory_space<vmem>>, vector<256x128xbf16>
    tpu.vector_store %arg11[%c0_69, %c512_70], %86 {strides = array<i32>} : memref<256x1152xbf16, #tpu.memory_space<vmem>>, vector<256x128xbf16>,
    %c25_71 = arith.constant 25 : index
    %c0_72 = arith.constant 0 : index
    %88 = vector.load %arg10[%c25_71, %c0_72] : memref<304x128xbf16, #tpu.memory_space<vmem>>, vector<256x128xbf16>
    %89 = arith.select %32, %88, %33 : vector<256x128xi1>, vector<256x128xbf16>
    %c0_73 = arith.constant 0 : index
    %c640_74 = arith.constant 640 : index
    %90 = vector.load %arg11[%c0_73, %c640_74] : memref<256x1152xbf16, #tpu.memory_space<vmem>>, vector<256x128xbf16>
    tpu.vector_store %arg11[%c0_73, %c640_74], %89 {strides = array<i32>} : memref<256x1152xbf16, #tpu.memory_space<vmem>>, vector<256x128xbf16>,
    %c39_75 = arith.constant 39 : index
    %c0_76 = arith.constant 0 : index
    %91 = vector.load %arg10[%c39_75, %c0_76] : memref<304x128xbf16, #tpu.memory_space<vmem>>, vector<256x128xbf16>
    %92 = arith.select %28, %91, %33 : vector<256x128xi1>, vector<256x128xbf16>
    %c0_77 = arith.constant 0 : index
    %c768_78 = arith.constant 768 : index
    %93 = vector.load %arg11[%c0_77, %c768_78] : memref<256x1152xbf16, #tpu.memory_space<vmem>>, vector<256x128xbf16>
    tpu.vector_store %arg11[%c0_77, %c768_78], %92 {strides = array<i32>} : memref<256x1152xbf16, #tpu.memory_space<vmem>>, vector<256x128xbf16>,
    %c40_79 = arith.constant 40 : index
    %c0_80 = arith.constant 0 : index
    %94 = vector.load %arg10[%c40_79, %c0_80] : memref<304x128xbf16, #tpu.memory_space<vmem>>, vector<256x128xbf16>
    %c0_81 = arith.constant 0 : index
    %c896_82 = arith.constant 896 : index
    %95 = vector.load %arg11[%c0_81, %c896_82] : memref<256x1152xbf16, #tpu.memory_space<vmem>>, vector<256x128xbf16>
    tpu.vector_store %arg11[%c0_81, %c896_82], %94 {strides = array<i32>} : memref<256x1152xbf16, #tpu.memory_space<vmem>>, vector<256x128xbf16>,
    %c41_83 = arith.constant 41 : index
    %c0_84 = arith.constant 0 : index
    %96 = vector.load %arg10[%c41_83, %c0_84] : memref<304x128xbf16, #tpu.memory_space<vmem>>, vector<256x128xbf16>
    %97 = arith.select %32, %96, %33 : vector<256x128xi1>, vector<256x128xbf16>
    %c0_85 = arith.constant 0 : index
    %c1024_86 = arith.constant 1024 : index
    %98 = vector.load %arg11[%c0_85, %c1024_86] : memref<256x1152xbf16, #tpu.memory_space<vmem>>, vector<256x128xbf16>
    tpu.vector_store %arg11[%c0_85, %c1024_86], %97 {strides = array<i32>} : memref<256x1152xbf16, #tpu.memory_space<vmem>>, vector<256x128xbf16>,
    %c0_87 = arith.constant 0 : index
    %c0_88 = arith.constant 0 : index
    %99 = vector.load %arg11[%c0_87, %c0_88] : memref<256x1152xbf16, #tpu.memory_space<vmem>>, vector<256x1152xbf16>
    %c0_89 = arith.constant 0 : index
    %c0_90 = arith.constant 0 : index
    %100 = vector.load %arg3[%c0_89, %c0_90] : memref<1152x128xbf16, #tpu.memory_space<vmem>>, vector<1152x128xbf16>
    %cst_91 = arith.constant dense<0.000000e+00> : vector<256x128xf32>
    %101 = tpu.matmul %99, %100, %cst_91 {dimension_numbers = #tpu.dot_dimension_numbers<[1], [0], [0], [1], [0, 0, 1, 1], [], []>} : vector<256x1152xbf16>, vector<1152x128xbf16>, vector<256x128xf32> -> vector<256x128xf32>
    %c0_92 = arith.constant 0 : index
    %c0_93 = arith.constant 0 : index
    %102 = vector.load %arg6[%c0_92, %c0_93] : memref<1x128xf32, #tpu.memory_space<vmem>>, vector<1x128xf32>
    %103 = vector.broadcast %102 : vector<1x128xf32> to vector<256x128xf32>
    %104 = arith.addf %101, %103 : vector<256x128xf32>
    %cst_94 = arith.constant 0.000000e+00 : f32
    %105 = vector.broadcast %cst_94 : f32 to vector<256x128xf32>
    %106 = arith.cmpf oge, %104, %105 : vector<256x128xf32>
    %cst_95 = arith.constant 0.00999999977 : f32
    %107 = vector.broadcast %cst_95 : f32 to vector<256x128xf32>
    %108 = arith.mulf %107, %104 : vector<256x128xf32>
    %109 = arith.select %106, %104, %108 : vector<256x128xi1>, vector<256x128xf32>
    %110 = arith.truncf %109 : vector<256x128xf32> to vector<256x128xbf16>
    %c24_96 = arith.constant 24 : index
    %c0_97 = arith.constant 0 : index
    %111 = vector.load %arg10[%c24_96, %c0_97] : memref<304x128xbf16, #tpu.memory_space<vmem>>, vector<256x128xbf16>
    tpu.vector_store %arg10[%c24_96, %c0_97], %110 {strides = array<i32>} : memref<304x128xbf16, #tpu.memory_space<vmem>>, vector<256x128xbf16>,
    %c7_98 = arith.constant 7 : index
    %c0_99 = arith.constant 0 : index
    %112 = vector.load %arg10[%c7_98, %c0_99] : memref<304x128xbf16, #tpu.memory_space<vmem>>, vector<256x128xbf16>
    %113 = arith.select %28, %112, %33 : vector<256x128xi1>, vector<256x128xbf16>
    %c0_100 = arith.constant 0 : index
    %c0_101 = arith.constant 0 : index
    %114 = vector.load %arg11[%c0_100, %c0_101] : memref<256x1152xbf16, #tpu.memory_space<vmem>>, vector<256x128xbf16>
    tpu.vector_store %arg11[%c0_100, %c0_101], %113 {strides = array<i32>} : memref<256x1152xbf16, #tpu.memory_space<vmem>>, vector<256x128xbf16>,
    %c8_102 = arith.constant 8 : index
    %c0_103 = arith.constant 0 : index
    %115 = vector.load %arg10[%c8_102, %c0_103] : memref<304x128xbf16, #tpu.memory_space<vmem>>, vector<256x128xbf16>
    %c0_104 = arith.constant 0 : index
    %c128_105 = arith.constant 128 : index
    %116 = vector.load %arg11[%c0_104, %c128_105] : memref<256x1152xbf16, #tpu.memory_space<vmem>>, vector<256x128xbf16>
    tpu.vector_store %arg11[%c0_104, %c128_105], %115 {strides = array<i32>} : memref<256x1152xbf16, #tpu.memory_space<vmem>>, vector<256x128xbf16>,
    %c9_106 = arith.constant 9 : index
    %c0_107 = arith.constant 0 : index
    %117 = vector.load %arg10[%c9_106, %c0_107] : memref<304x128xbf16, #tpu.memory_space<vmem>>, vector<256x128xbf16>
    %118 = arith.select %32, %117, %33 : vector<256x128xi1>, vector<256x128xbf16>
    %c0_108 = arith.constant 0 : index
    %c256_109 = arith.constant 256 : index
    %119 = vector.load %arg11[%c0_108, %c256_109] : memref<256x1152xbf16, #tpu.memory_space<vmem>>, vector<256x128xbf16>
    tpu.vector_store %arg11[%c0_108, %c256_109], %118 {strides = array<i32>} : memref<256x1152xbf16, #tpu.memory_space<vmem>>, vector<256x128xbf16>,
    %c23_110 = arith.constant 23 : index
    %c0_111 = arith.constant 0 : index
    %120 = vector.load %arg10[%c23_110, %c0_111] : memref<304x128xbf16, #tpu.memory_space<vmem>>, vector<256x128xbf16>
    %121 = arith.select %28, %120, %33 : vector<256x128xi1>, vector<256x128xbf16>
    %c0_112 = arith.constant 0 : index
    %c384_113 = arith.constant 384 : index
    %122 = vector.load %arg11[%c0_112, %c384_113] : memref<256x1152xbf16, #tpu.memory_space<vmem>>, vector<256x128xbf16>
    tpu.vector_store %arg11[%c0_112, %c384_113], %121 {strides = array<i32>} : memref<256x1152xbf16, #tpu.memory_space<vmem>>, vector<256x128xbf16>,
    %c24_114 = arith.constant 24 : index
    %c0_115 = arith.constant 0 : index
    %123 = vector.load %arg10[%c24_114, %c0_115] : memref<304x128xbf16, #tpu.memory_space<vmem>>, vector<256x128xbf16>
    %c0_116 = arith.constant 0 : index
    %c512_117 = arith.constant 512 : index
    %124 = vector.load %arg11[%c0_116, %c512_117] : memref<256x1152xbf16, #tpu.memory_space<vmem>>, vector<256x128xbf16>
    tpu.vector_store %arg11[%c0_116, %c512_117], %123 {strides = array<i32>} : memref<256x1152xbf16, #tpu.memory_space<vmem>>, vector<256x128xbf16>,
    %c25_118 = arith.constant 25 : index
    %c0_119 = arith.constant 0 : index
    %125 = vector.load %arg10[%c25_118, %c0_119] : memref<304x128xbf16, #tpu.memory_space<vmem>>, vector<256x128xbf16>
    %126 = arith.select %32, %125, %33 : vector<256x128xi1>, vector<256x128xbf16>
    %c0_120 = arith.constant 0 : index
    %c640_121 = arith.constant 640 : index
    %127 = vector.load %arg11[%c0_120, %c640_121] : memref<256x1152xbf16, #tpu.memory_space<vmem>>, vector<256x128xbf16>
    tpu.vector_store %arg11[%c0_120, %c640_121], %126 {strides = array<i32>} : memref<256x1152xbf16, #tpu.memory_space<vmem>>, vector<256x128xbf16>,
    %c39_122 = arith.constant 39 : index
    %c0_123 = arith.constant 0 : index
    %128 = vector.load %arg10[%c39_122, %c0_123] : memref<304x128xbf16, #tpu.memory_space<vmem>>, vector<256x128xbf16>
    %129 = arith.select %28, %128, %33 : vector<256x128xi1>, vector<256x128xbf16>
    %c0_124 = arith.constant 0 : index
    %c768_125 = arith.constant 768 : index
    %130 = vector.load %arg11[%c0_124, %c768_125] : memref<256x1152xbf16, #tpu.memory_space<vmem>>, vector<256x128xbf16>
    tpu.vector_store %arg11[%c0_124, %c768_125], %129 {strides = array<i32>} : memref<256x1152xbf16, #tpu.memory_space<vmem>>, vector<256x128xbf16>,
    %c40_126 = arith.constant 40 : index
    %c0_127 = arith.constant 0 : index
    %131 = vector.load %arg10[%c40_126, %c0_127] : memref<304x128xbf16, #tpu.memory_space<vmem>>, vector<256x128xbf16>
    %c0_128 = arith.constant 0 : index
    %c896_129 = arith.constant 896 : index
    %132 = vector.load %arg11[%c0_128, %c896_129] : memref<256x1152xbf16, #tpu.memory_space<vmem>>, vector<256x128xbf16>
    tpu.vector_store %arg11[%c0_128, %c896_129], %131 {strides = array<i32>} : memref<256x1152xbf16, #tpu.memory_space<vmem>>, vector<256x128xbf16>,
    %c41_130 = arith.constant 41 : index
    %c0_131 = arith.constant 0 : index
    %133 = vector.load %arg10[%c41_130, %c0_131] : memref<304x128xbf16, #tpu.memory_space<vmem>>, vector<256x128xbf16>
    %134 = arith.select %32, %133, %33 : vector<256x128xi1>, vector<256x128xbf16>
    %c0_132 = arith.constant 0 : index
    %c1024_133 = arith.constant 1024 : index
    %135 = vector.load %arg11[%c0_132, %c1024_133] : memref<256x1152xbf16, #tpu.memory_space<vmem>>, vector<256x128xbf16>
    tpu.vector_store %arg11[%c0_132, %c1024_133], %134 {strides = array<i32>} : memref<256x1152xbf16, #tpu.memory_space<vmem>>, vector<256x128xbf16>,
    %c0_134 = arith.constant 0 : index
    %c0_135 = arith.constant 0 : index
    %136 = vector.load %arg11[%c0_134, %c0_135] : memref<256x1152xbf16, #tpu.memory_space<vmem>>, vector<256x1152xbf16>
    %c0_136 = arith.constant 0 : index
    %c0_137 = arith.constant 0 : index
    %137 = vector.load %arg4[%c0_136, %c0_137] : memref<1152x128xbf16, #tpu.memory_space<vmem>>, vector<1152x128xbf16>
    %cst_138 = arith.constant dense<0.000000e+00> : vector<256x128xf32>
    %138 = tpu.matmul %136, %137, %cst_138 {dimension_numbers = #tpu.dot_dimension_numbers<[1], [0], [0], [1], [0, 0, 1, 1], [], []>} : vector<256x1152xbf16>, vector<1152x128xbf16>, vector<256x128xf32> -> vector<256x128xf32>
    %c0_139 = arith.constant 0 : index
    %c0_140 = arith.constant 0 : index
    %139 = vector.load %arg7[%c0_139, %c0_140] : memref<1x128xf32, #tpu.memory_space<vmem>>, vector<1x128xf32>
    %140 = vector.broadcast %139 : vector<1x128xf32> to vector<256x128xf32>
    %141 = arith.addf %138, %140 : vector<256x128xf32>
    %c0_141 = arith.constant 0 : index
    %c0_142 = arith.constant 0 : index
    %142 = vector.load %arg12[%c0_141, %c0_142] : memref<256x128xf32, #tpu.memory_space<vmem>>, vector<256x128xf32>
    %143 = arith.addf %141, %142 : vector<256x128xf32>
    %cst_143 = arith.constant 0.000000e+00 : f32
    %144 = vector.broadcast %cst_143 : f32 to vector<256x128xf32>
    %145 = arith.cmpf oge, %143, %144 : vector<256x128xf32>
    %cst_144 = arith.constant 0.00999999977 : f32
    %146 = vector.broadcast %cst_144 : f32 to vector<256x128xf32>
    %147 = arith.mulf %146, %143 : vector<256x128xf32>
    %148 = arith.select %145, %143, %147 : vector<256x128xi1>, vector<256x128xf32>
    %149 = arith.truncf %148 : vector<256x128xf32> to vector<256x128xbf16>
    %c0_145 = arith.constant 0 : index
    %c0_146 = arith.constant 0 : index
    %c0_147 = arith.constant 0 : index
    %150 = vector.load %arg9[%c0_145, %c0_146, %c0_147] : memref<1x256x128xbf16, #tpu.memory_space<vmem>>, vector<1x256x128xbf16>
    %151 = vector.shape_cast %150 : vector<1x256x128xbf16> to vector<256x128xbf16>
    %152 = vector.shape_cast %149 : vector<256x128xbf16> to vector<1x256x128xbf16>
    tpu.vector_store %arg9[%c0_145, %c0_146, %c0_147], %152 {strides = array<i32>} : memref<1x256x128xbf16, #tpu.memory_space<vmem>>, vector<1x256x128xbf16>,
    return
  }
  func.func @transform_0(%arg0: i32) -> (i32, i32, i32) {
    %c0_i32 = arith.constant 0 : i32
    %c0_i32_0 = arith.constant 0 : i32
    %c0_i32_1 = arith.constant 0 : i32
    return %arg0, %c0_i32, %c0_i32_0 : i32, i32, i32
  }
  func.func @transform_1(%arg0: i32) -> (i32, i32) {
    %c0_i32 = arith.constant 0 : i32
    %c0_i32_0 = arith.constant 0 : i32
    %c0_i32_1 = arith.constant 0 : i32
    return %c0_i32, %c0_i32_0 : i32, i32
  }
  func.func @transform_2(%arg0: i32) -> (i32, i32) {
    %c0_i32 = arith.constant 0 : i32
    %c0_i32_0 = arith.constant 0 : i32
    %c0_i32_1 = arith.constant 0 : i32
    return %c0_i32, %c0_i32_0 : i32, i32
  }
  func.func @transform_3(%arg0: i32) -> (i32, i32) {
    %c0_i32 = arith.constant 0 : i32
    %c0_i32_0 = arith.constant 0 : i32
    %c0_i32_1 = arith.constant 0 : i32
    return %c0_i32, %c0_i32_0 : i32, i32
  }
  func.func @transform_4(%arg0: i32) -> (i32, i32) {
    %c0_i32 = arith.constant 0 : i32
    %c0_i32_0 = arith.constant 0 : i32
    %c0_i32_1 = arith.constant 0 : i32
    return %c0_i32, %c0_i32_0 : i32, i32
  }
  func.func @transform_5(%arg0: i32) -> (i32, i32) {
    %c0_i32 = arith.constant 0 : i32
    %c0_i32_0 = arith.constant 0 : i32
    %c0_i32_1 = arith.constant 0 : i32
    return %c0_i32, %c0_i32_0 : i32, i32
  }
  func.func @transform_6(%arg0: i32) -> (i32, i32) {
    %c0_i32 = arith.constant 0 : i32
    %c0_i32_0 = arith.constant 0 : i32
    %c0_i32_1 = arith.constant 0 : i32
    return %c0_i32, %c0_i32_0 : i32, i32
  }
  func.func @transform_7(%arg0: i32) -> (i32, i32) {
    %c0_i32 = arith.constant 0 : i32
    %c0_i32_0 = arith.constant 0 : i32
    %c0_i32_1 = arith.constant 0 : i32
    return %c0_i32, %c0_i32_0 : i32, i32
  }
  func.func @transform_8(%arg0: i32) -> (i32, i32, i32) {
    %c0_i32 = arith.constant 0 : i32
    %c0_i32_0 = arith.constant 0 : i32
    %c0_i32_1 = arith.constant 0 : i32
    return %arg0, %c0_i32, %c0_i32_0 : i32, i32, i32
  }
}

</mosaic_0001>

<bundles_post_ra>
// kernel: tpu_custom_call.1
= control target key start
LH: loop header
LB: loop body
LE: loop exit
PB: predicated region body
PF: predicated region fallthrough
CT: control target
= control target key end

     0   :  { %s19436_s0 = inlined_call_operand.hbm [shape: bf16[2,256,4], index: 0, kind: input, shape index: {}]   ;;  %s19437_s1 = inlined_call_operand.hbm [shape: bf16[1152,128], index: 1, kind: input, shape index: {}]   ;;  %s19438_s2 = inlined_call_operand.hbm [shape: bf16[1152,128], index: 2, kind: input, shape index: {}]   ;;  %s19439_s3 = inlined_call_operand.hbm [shape: bf16[1152,128], index: 3, kind: input, shape index: {}]   ;;  %s19440_s4 = inlined_call_operand.hbm [shape: f32[1,128], index: 4, kind: input, shape index: {}]   ;;  %s19441_s5 = inlined_call_operand.hbm [shape: f32[1,128], index: 5, kind: input, shape index: {}]   ;;  %s19442_s6 = inlined_call_operand.hbm [shape: f32[1,128], index: 6, kind: input, shape index: {}]   ;;  %s19443_s7 = inlined_call_operand.hbm [shape: bf16[128,128], index: 7, kind: input, shape index: {}]   ;;  %s19444_s8 = inlined_call_operand.hbm [shape: bf16[2,256,128], index: 8, kind: output, shape index: {}]  }
   0x1   :  { %19569 = sst [smem:[#allocation92_spill]] %s19437_s1 }
   0x2   :  { %19570 = sst [smem:[#allocation93_spill]] %s19438_s2 }
   0x3   :  { %13 = vsyncpa [#allocation6], 0 }
   0x4   :  { %15 = vsyncpa [#allocation6 + $0x1], 0 }
   0x5   :  { %16 = vsyncpa [#allocation9], 0 }
   0x6   :  { %17 = vsyncpa [#allocation12], 0 }
   0x7   :  { %18 = vsyncpa [#allocation15], 0 }
   0x8   :  { %19 = vsyncpa [#allocation18], 0 }
   0x9   :  { %20 = vsyncpa [#allocation7], 0 }
   0xa   :  { %22 = vsyncpa [#allocation7 + $0x1], 0  ;;  %s15271_s27 = smov 0   ;;  %s15273_s28 = smov 0  }
   0xb   :  { %s15275_s29 = smov 0   ;;  %s15277_s30 = smov 0  }
   0xc LB: > { %s15211_s9 = smov [#allocation8]   ;;  %s15292_s11 = sadd.s32 4294967295, %s15209_s30   ;;  %s15209_s30 = sphi %s15277_s30, %s20055_s30   ;;  %s15205_s29 = sphi %s15275_s29, %s20054_s29   ;;  %s15201_s28 = sphi %s15273_s28, %s20053_s28   ;;  %s15197_s27 = sphi %s15271_s27, %s20052_s27  }
   0xd   : > { %s244_s10 = sshll.u32 %s15211_s9, 4  ;;  %p12365_p0 = scmp.ge.s32.totalorder %s15209_s30, 1  ;;  %s15297_s10 = int_to_ptr.vmem [resolvable:$true] %s244_s10 }
   0xe   : > { %p19447_p1 = scmp.eq.s32.totalorder %s15292_s11, 0  ;;  %p232_p2 = scmp.lt.s32.totalorder %s15209_s30, 3 }
   0xf   : > { %s15212_s13 = smov [#allocation11]   ;;  %s15213_s16 = smov [#allocation14]  }
  0x10   : > { %p15299_p3 = pnand %p12365_p0, %p232_p2  ;;  %s270_s14 = sshll.u32 %s15212_s13, 4  ;;  %s15312_s14 = int_to_ptr.vmem [resolvable:$true] %s270_s14 }
  0x11   : > { %s295_s17 = sshll.u32 %s15213_s16, 4  ;;  %s19573_s1 = sld [smem:[#allocation92_spill]]  ;;  %s15314_s17 = int_to_ptr.vmem [resolvable:$true] %s295_s17 }
  0x12   : > { %s19571_s12 = scalar_select %p15299_p3, 1, 0 }
  0x13   : > { %p14557_p5 = pneg %p15299_p3 }
  0x15   : > { %p15308_p6 = pnand %p14557_p5, %p19447_p1 }
  0x17   : > { %s14901_s20 = scalar_lea.hbm %s19573_s1, 9216  ;;  %p15324_p8 = pneg %p15308_p6 }
  0x18   : > { %p14902_p7 = scmp.ne.s32.totalorder %s19573_s1, %s14901_s20  ;;  %p14908_p11 = scmp.lt.u32.totalorder %s14901_s20, %s19573_s1 }
  0x1a   : > { %p14904_p9 = pnand %p15324_p8, %p14902_p7 }
  0x1c   : > { %p14905_p10 = pneg %p14904_p9 }
  0x1e   : > { %p14910_p12 = pnand %p14908_p11, %p14905_p10 }
  0x20   : > { %14913 = shalt.err (!%p14910_p12)
}
  0x21   : > { %s14914_s26 = scalar_lea.vmem %s15297_s10, 9216  ;;  %p14922_p5 = scmp.lt.s32.totalorder %s15297_s10, %s15297_s10 }
  0x22   : > { %p14915_p13 = scmp.ne.s32.totalorder %s15297_s10, %s14914_s26  ;;  %p14923_p4 = scmp.lt.s32.totalorder %s14914_s26, %s14914_s26 }
  0x24   : > { %p14917_p0 = pnand %p14915_p13, %p15324_p8  ;;  %p14924_p7 = por %p14923_p4, %p14922_p5 }
  0x26   : > { %p14918_p2 = pneg %p14917_p0 }
  0x28   : > { %p14925_p9 = pnand %p14924_p7, %p14918_p2 }
  0x2a   : > { %14928 = shalt.err (!%p14925_p9)
}
  0x2b   : > { %s19445_s9 = smov 64   ;;  %s19449_s13 = smov 4  }
  0x2c   : > { %14560 = dma.hbm_to_vmem [thread:$0]  (!%p15308_p6), %s19573_s1, 9216, %s15297_s10, [#allocation9], %s19445_s9, %s19445_s9, %s19449_s13  }
  0x2d   : > { %s14929_s21 = scalar_lea.hbm %s19439_s3, 9216 }
  0x2e   : > { %p14930_p4 = scmp.ne.s32.totalorder %s19439_s3, %s14929_s21  ;;  %p14936_p12 = scmp.lt.u32.totalorder %s14929_s21, %s19439_s3 }
  0x30   : > { %p14932_p10 = pnand %p14930_p4, %p15324_p8 }
  0x32   : > { %p14933_p11 = pneg %p14932_p10 }
  0x34   : > { %p14938_p13 = pnand %p14936_p12, %p14933_p11 }
  0x36   : > { %14941 = shalt.err (!%p14938_p13)
}
  0x37   : > { %s14942_s10 = scalar_lea.vmem %s15312_s14, 9216  ;;  %p14950_p7 = scmp.lt.s32.totalorder %s15312_s14, %s15312_s14 }
  0x38   : > { %p14943_p0 = scmp.ne.s32.totalorder %s15312_s14, %s14942_s10  ;;  %p14951_p9 = scmp.lt.s32.totalorder %s14942_s10, %s14942_s10 }
  0x3a   : > { %p14945_p2 = pnand %p14943_p0, %p15324_p8  ;;  %p14952_p4 = por %p14951_p9, %p14950_p7 }
  0x3c   : > { %p14946_p5 = pneg %p14945_p2 }
  0x3e   : > { %p14953_p10 = pnand %p14952_p4, %p14946_p5 }
  0x40   : > { %14956 = shalt.err (!%p14953_p10)
}
  0x41   : > { %14566 = dma.hbm_to_vmem [thread:$0]  (!%p15308_p6), %s19439_s3, 9216, %s15312_s14, [#allocation12], %s19445_s9, %s19445_s9, %s19449_s13  }
  0x42   : > { %s14957_s21 = scalar_lea.hbm %s19441_s5, 16 }
  0x43   : > { %p14958_p11 = scmp.ne.s32.totalorder %s19441_s5, %s14957_s21  ;;  %p14964_p0 = scmp.lt.u32.totalorder %s14957_s21, %s19441_s5 }
  0x45   : > { %p14960_p12 = pnand %p14958_p11, %p15324_p8 }
  0x47   : > { %p14961_p13 = pneg %p14960_p12 }
  0x49   : > { %p14966_p2 = pnand %p14964_p0, %p14961_p13 }
  0x4b   : > { %14969 = shalt.err (!%p14966_p2)
}
  0x4c   : > { %s14970_s14 = scalar_lea.vmem %s15314_s17, 16  ;;  %s14977_s10 = scalar_lea.vmem %s15314_s17, 32 }
  0x4d   : > { %p14971_p5 = scmp.ne.s32.totalorder %s15314_s17, %s14970_s14  ;;  %p14978_p4 = scmp.lt.s32.totalorder %s15314_s17, %s15314_s17 }
  0x4e   : > { %p14979_p10 = scmp.lt.s32.totalorder %s14977_s10, %s14970_s14 }
  0x4f   : > { %p14973_p7 = pnand %p14971_p5, %p15324_p8 }
  0x50   : > { %p14980_p11 = por %p14979_p10, %p14978_p4 }
  0x51   : > { %p14974_p9 = pneg %p14973_p7 }
  0x53   : > { %p14981_p12 = pnand %p14980_p11, %p14974_p9 }
  0x55   : > { %14984 = shalt.err (!%p14981_p12)
}
  0x56   : > { %14572 = dma.hbm_to_vmem [thread:$0]  (!%p15308_p6), %s19441_s5, 16, %s15314_s17, [#allocation15]  }
  0x57   : > { %s15216_s19 = smov [#allocation10]   ;;  %s15217_s21 = smov [#allocation13]  }
  0x58   : > { %s257_s20 = sshll.u32 %s15216_s19, 4  ;;  %s284_s22 = sshll.u32 %s15217_s21, 4  ;;  %s258_s20 = int_to_ptr.vmem [resolvable:$true] %s257_s20  ;;  %s285_s22 = int_to_ptr.vmem [resolvable:$true] %s284_s22 }
  0x59   : > { %s19575_s2 = sld [smem:[#allocation93_spill]] }
  0x5f   : > { %s14985_s26 = scalar_lea.hbm %s19575_s2, 9216 }
  0x60   : > { %p14986_p13 = scmp.ne.s32.totalorder %s19575_s2, %s14985_s26  ;;  %p14992_p5 = scmp.lt.u32.totalorder %s14985_s26, %s19575_s2 }
  0x62   : > { %p14988_p0 = pnand %p14986_p13, %p15324_p8 }
  0x64   : > { %p14989_p2 = pneg %p14988_p0 }
  0x66   : > { %p14994_p7 = pnand %p14992_p5, %p14989_p2 }
  0x68   : > { %14997 = shalt.err (!%p14994_p7)
}
  0x69   : > { %s14998_s17 = scalar_lea.vmem %s258_s20, 9216  ;;  %p15006_p11 = scmp.lt.s32.totalorder %s258_s20, %s258_s20 }
  0x6a   : > { %p14999_p9 = scmp.ne.s32.totalorder %s258_s20, %s14998_s17  ;;  %p15007_p12 = scmp.lt.s32.totalorder %s14998_s17, %s14998_s17 }
  0x6c   : > { %p15001_p4 = pnand %p14999_p9, %p15324_p8  ;;  %p15008_p1 = por %p15007_p12, %p15006_p11 }
  0x6e   : > { %p15002_p10 = pneg %p15001_p4 }
  0x70   : > { %p15009_p3 = pnand %p15008_p1, %p15002_p10 }
  0x72   : > { %15012 = shalt.err (!%p15009_p3)
}
  0x73   : > { %s19576_s18 = smov 64   ;;  %s15013_s25 = scalar_lea.hbm %s19440_s4, 16 }
  0x74   : > { %14563 = dma.hbm_to_vmem [thread:$0]  (!%p15308_p6), %s19575_s2, 9216, %s258_s20, [#allocation9], %s19576_s18, %s19576_s18, %s19449_s13  }
  0x75   : > { %p15014_p1 = scmp.ne.s32.totalorder %s19440_s4, %s15013_s25  ;;  %p15020_p0 = scmp.lt.u32.totalorder %s15013_s25, %s19440_s4 }
  0x77   : > { %p15016_p3 = pnand %p15014_p1, %p15324_p8 }
  0x79   : > { %p15017_p13 = pneg %p15016_p3 }
  0x7b   : > { %p15022_p2 = pnand %p15020_p0, %p15017_p13 }
  0x7d   : > { %15025 = shalt.err (!%p15022_p2)
}
  0x7e   : > { %s15026_s17 = scalar_lea.vmem %s285_s22, 16  ;;  %s15033_s20 = scalar_lea.vmem %s285_s22, 32 }
  0x7f   : > { %p15027_p5 = scmp.ne.s32.totalorder %s285_s22, %s15026_s17  ;;  %p15034_p4 = scmp.lt.s32.totalorder %s285_s22, %s285_s22 }
  0x80   : > { %p15035_p10 = scmp.lt.s32.totalorder %s15033_s20, %s15026_s17 }
  0x81   : > { %p15029_p7 = pnand %p15027_p5, %p15324_p8 }
  0x82   : > { %p15036_p11 = por %p15035_p10, %p15034_p4 }
  0x83   : > { %p15030_p9 = pneg %p15029_p7 }
  0x85   : > { %p15037_p12 = pnand %p15036_p11, %p15030_p9 }
  0x87   : > { %15040 = shalt.err (!%p15037_p12)
}
  0x88   : > { %14569 = dma.hbm_to_vmem [thread:$0]  (!%p15308_p6), %s19440_s4, 16, %s285_s22, [#allocation12]  }
  0x89   : > { %s15218_s21 = smov [#allocation16]   ;;  %s15219_s25 = smov [#allocation17]  }
  0x8a   : > { %s306_s24 = sshll.u32 %s15218_s21, 4  ;;  %s316_s26 = sshll.u32 %s15219_s25, 4  ;;  %s307_s24 = int_to_ptr.vmem [resolvable:$true] %s306_s24  ;;  %s317_s26 = int_to_ptr.vmem [resolvable:$true] %s316_s26 }
  0x8b   : > { %s15041_s16 = scalar_lea.hbm %s19442_s6, 16 }
  0x8c   : > { %p15042_p1 = scmp.ne.s32.totalorder %s19442_s6, %s15041_s16  ;;  %p15048_p0 = scmp.lt.u32.totalorder %s15041_s16, %s19442_s6 }
  0x8e   : > { %p15044_p3 = pnand %p15042_p1, %p15324_p8 }
  0x90   : > { %p15045_p13 = pneg %p15044_p3 }
  0x92   : > { %p15050_p2 = pnand %p15048_p0, %p15045_p13 }
  0x94   : > { %15053 = shalt.err (!%p15050_p2)
}
  0x95   : > { %s15054_s22 = scalar_lea.vmem %s307_s24, 16  ;;  %s15061_s19 = scalar_lea.vmem %s307_s24, 32 }
  0x96   : > { %p15055_p5 = scmp.ne.s32.totalorder %s307_s24, %s15054_s22  ;;  %p15062_p4 = scmp.lt.s32.totalorder %s307_s24, %s307_s24 }
  0x97   : > { %p15063_p10 = scmp.lt.s32.totalorder %s15061_s19, %s15054_s22 }
  0x98   : > { %p15057_p7 = pnand %p15055_p5, %p15324_p8 }
  0x99   : > { %p15064_p11 = por %p15063_p10, %p15062_p4 }
  0x9a   : > { %p15058_p9 = pneg %p15057_p7 }
  0x9c   : > { %p15065_p12 = pnand %p15064_p11, %p15058_p9 }
  0x9e   : > { %15068 = shalt.err (!%p15065_p12)
}
  0x9f   : > { %14575 = dma.hbm_to_vmem [thread:$0]  (!%p15308_p6), %s19442_s6, 16, %s307_s24, [#allocation15]  }
  0xa0   : > { %s15069_s10 = scalar_lea.hbm %s19443_s7, 1024 }
  0xa1   : > { %p15070_p1 = scmp.ne.s32.totalorder %s19443_s7, %s15069_s10  ;;  %p15076_p0 = scmp.lt.u32.totalorder %s15069_s10, %s19443_s7 }
  0xa3   : > { %p15072_p3 = pnand %p15070_p1, %p15324_p8 }
  0xa5   : > { %p15073_p13 = pneg %p15072_p3 }
  0xa7   : > { %p15078_p2 = pnand %p15076_p0, %p15073_p13 }
  0xa9   : > { %15081 = shalt.err (!%p15078_p2)
}
  0xaa   : > { %s15082_s22 = scalar_lea.vmem %s317_s26, 1024  ;;  %p15090_p4 = scmp.lt.s32.totalorder %s317_s26, %s317_s26 }
  0xab   : > { %p15083_p5 = scmp.ne.s32.totalorder %s317_s26, %s15082_s22  ;;  %p15091_p10 = scmp.lt.s32.totalorder %s15082_s22, %s15082_s22 }
  0xad   : > { %p15085_p7 = pnand %p15083_p5, %p15324_p8  ;;  %p15092_p11 = por %p15091_p10, %p15090_p4 }
  0xaf   : > { %p15086_p9 = pneg %p15085_p7 }
  0xb1   : > { %p15093_p12 = pnand %p15092_p11, %p15086_p9 }
  0xb3   : > { %15096 = shalt.err (!%p15093_p12)
}
  0xb4   : > { %s19577_s24 = smov 4   ;;  %s12364_s15 = sadd.s32 4294967294, %s15209_s30  }
  0xb5   : > { %14578 = dma.hbm_to_vmem [thread:$0]  (!%p15308_p6), %s19443_s7, 1024, %s317_s26, [#allocation18], %s19576_s18, %s19576_s18, %s19577_s24  }
  0xb6   : > { %s15478_s23 = sadd.s32 1, %s15209_s30   ;;  %s35_s25 = sadd.s32 1, %s15205_s29 }
  0xb7   : > { %s32_s13 = ssub.s32 %s15209_s30, %s15478_s23  ;;  %p42_p8 = scmp.ne.s32.totalorder %s15205_s29, %s15201_s28 }
  0xb8   : > { %p33_p1 = scmp.eq.s32.totalorder %s32_s13, 0  ;;  %p43_p3 = scmp.eq.s32.totalorder %s15209_s30, 0 }
  0xb9   : > { %p48_p13 = scmp.ne.s32.totalorder %s15201_s28, %s15197_s27  ;;  %p219_p0 = scmp.eq.s32.totalorder %s15292_s11, 1 }
  0xba   : > { %s15490_s14 = scalar_select %p33_p1, %s15205_s29, %s35_s25  }
  0xbb   : > { %p44_p2 = por %p43_p3, %p42_p8  ;;  %p19578_p5 = scmp.eq.s32.totalorder %s15292_s11, 0 }
  0xbc   : > { %p15498_p6 = por %p219_p0, %p42_p8  ;;  %p225_p9 = scmp.eq.s32.totalorder %s12364_s15, 1 }
  0xbd   : > { %p15494_p7 = por %p19578_p5, %p48_p13  ;;  %p14594_p4 = scmp.lt.s32.totalorder %s15209_s30, 2 }
  0xbe   : > { %s19580_s26 = scalar_select %p15498_p6, 1, 0 }
  0xbf   : > { %s330_s16 = sand.u32 1, %s15205_s29   ;;  %p15504_p10 = por %p225_p9, %p48_p13 }
  0xc0   : > { %s12374_s20 = sshll.u32 %s330_s16, 7  ;;  %s12700_s9 = sshll.u32 %s15209_s30, 11 }
  0xc1   : > { %s19581_s17 = scalar_select %p15504_p10, 1, 0 }
  0xc2   : > { %s15512_s21 = scalar_lea.hbm %s19436_s0, %s12700_s9  ;;  %s334_s25 = scalar_lea.vmem [#allocation5], %s12374_s20 }
  0xc3   : > { %s341_s13 = sshll.u32 %s334_s25, 4  ;;  %p15514_p11 = pnand %p14594_p4, %p44_p2  ;;  %s15518_s13 = int_to_ptr.vmem [resolvable:$true] %s341_s13 }
  0xc4   : > { %s15520_s1 = scalar_lea.sflag [#allocation6], %s330_s16  ;;  %s15097_s2 = scalar_lea.hbm %s15512_s21, 2048 }
  0xc5   : > { %p15098_p12 = scmp.ne.s32.totalorder %s15512_s21, %s15097_s2  ;;  %p15099_p8 = pneg %p15514_p11 }
  0xc6   : > { %s15102_s22 = scalar_lea.hbm %s19436_s0, 4096  ;;  %p15103_p13 = scmp.lt.u32.totalorder %s15512_s21, %s19436_s0 }
  0xc7   : > { %p15100_p1 = pnand %p15099_p8, %p15098_p12  ;;  %p15104_p0 = scmp.lt.u32.totalorder %s15102_s22, %s15097_s2 }
  0xc8   : > { %p15106_p5 = scmp.lt.u32.totalorder %s15097_s2, %s15512_s21 }
  0xc9   : > { %p15101_p3 = pneg %p15100_p1  ;;  %p15105_p2 = por %p15104_p0, %p15103_p13 }
  0xcb   : > { %p15107_p9 = por %p15106_p5, %p15105_p2 }
  0xcd   : > { %p15108_p4 = pnand %p15107_p9, %p15101_p3 }
  0xcf   : > { %15111 = shalt.err (!%p15108_p4)
}
  0xd0   : > { %s15112_s16 = scalar_lea.vmem %s15518_s13, 2048  ;;  %s15220_s20 = smov [#allocation5]  }
  0xd1   : > { %p15113_p12 = scmp.ne.s32.totalorder %s15518_s13, %s15112_s16  ;;  %s15117_s9 = sshll.u32 %s15220_s20, 4  ;;  %s15118_s9 = int_to_ptr.vmem [resolvable:$false] %s15117_s9 }
  0xd2   : > { %s15119_s19 = scalar_lea.vmem %s15118_s9, 4096  ;;  %p15120_p6 = scmp.lt.s32.totalorder %s15518_s13, %s15118_s9 }
  0xd3   : > { %p15115_p1 = pnand %p15113_p12, %p15099_p8  ;;  %p15121_p13 = scmp.lt.s32.totalorder %s15119_s19, %s15112_s16 }
  0xd5   : > { %p15116_p10 = pneg %p15115_p1  ;;  %p15122_p0 = por %p15121_p13, %p15120_p6 }
  0xd7   : > { %p15123_p2 = pnand %p15122_p0, %p15116_p10 }
  0xd9   : > { %15126 = shalt.err (!%p15123_p2)
}
  0xda   : > { %14582 = dma.hbm_to_vmem [thread:$0]  (!%p15514_p11), %s15512_s21, 2048, %s15518_s13, %s15520_s1, %s19576_s18, %s19576_s18, %s19577_s24  }
  0xdb   : > { %p19583_p8 = scmp.ne.s32.totalorder %s19571_s12, 0 }
  0xdd   : > { %353 = sbr.rel (%p19583_p8) target bundleno = 1961 (0x7a9), region = 52 }
  0xe4   : > { %s15554_s2 = sand.u32 1, %s15201_s28  }
  0xe5   : > { %s12378_s22 = sshll.u32 %s15554_s2, 7  ;;  %s356_s25 = scalar_lea.sflag [#allocation6], %s15554_s2 }
  0xe6   : > { %s15560_s15 = scalar_lea.vmem [#allocation5], %s12378_s22 }
  0xe7   : > { %15172 = dma.done.wait (%p15494_p7), %s356_s25, 2048  }
  0xe8   : > { %15174 = vsyncadd (%p15494_p7), %s356_s25, 4294965248  ;;  %p19584_p6 = scmp.eq.s32.totalorder %s15292_s11, 0 }
  0xea   : > { %15176 = dma.done.wait (%p19584_p6), [#allocation9], 18432   ;;  %p19585_p10 = pmov %p19584_p6 }
  0xeb   : > { %p19586_p11 = pmov %p19584_p6 }
  0xec   : > { %15178 = vsyncadd (%p19585_p10), [#allocation9], 4294948864 }
  0xed   : > { %15180 = dma.done.wait (%p19586_p11), [#allocation12], 9232   ;;  %p19587_p3 = pmov %p19584_p6 }
  0xef   : > { %15182 = vsyncadd (%p19587_p3), [#allocation12], 4294958064  ;;  %p19588_p5 = pmov %p19587_p3 }
  0xf0   : > { %p19589_p9 = pmov %p19587_p3 }
  0xf1   : > { %15184 = dma.done.wait (%p19588_p5), [#allocation15], 32  }
  0xf2   : > { %15186 = vsyncadd (%p19589_p9), [#allocation15], 4294967264  ;;  %p19590_p7 = pmov %p19587_p3 }
  0xf3   : > { %p19591_p4 = pmov %p19587_p3 }
  0xf4   : > { %15188 = dma.done.wait (%p19590_p7), [#allocation18], 1024  }
  0xf5   : > { %15190 = vsyncadd (%p19591_p4), [#allocation18], 4294966272  ;;  %v15221_v0 = vmov 0   ;;  %v14648_v1 = vld [vmem:[#allocation17] sm:$0xff]   ;;  %v14649_v2 = vld [vmem:[#allocation17 + $0x8] sm:$0xff]   ;;  %vm557_vm0 = vcmask 31748   ;;  %v597_v11 = vlaneseq }
  0xf6   : > { %423 = vst [vmem:[#allocation2] sm:$0xff] %v15221_v0  ;;  %424 = vst [vmem:[#allocation2 + $0x8] sm:$0xf] %v15221_v0  ;;  %14269 = vmatprep.subr.bf16.mxu1 %v14648_v1  ;;  %v14650_v3 = vld [vmem:[#allocation17 + $0x10] sm:$0xff]   ;;  %vm559_vm1 = vcmask 31744   ;;  %v14651_v4 = vld [vmem:[#allocation17 + $0x18] sm:$0xff]  }
  0xf7   : > { %425 = vst [vmem:[#allocation2 + $0x88] sm:$0xf0] %v15221_v0  ;;  %426 = vst [vmem:[#allocation2 + $0x90] sm:$0xff] %v15221_v0  ;;  %14270 = vmatpush3.bf16.msra.mxu1 %v14648_v1  ;;  %vm577_vm2 = vcmask 1047588   ;;  %v14656_v5 = vld [vmem:[%s15560_s15] ss:$0 sps:$4 sm:$0xff]  }
  0xf8   : > { %14271 = vmatprep.subr.bf16.mxu1 %v14649_v2  ;;  %v14657_v6 = vld [vmem:[%s15560_s15 + $0x4] sm:$0xff]   ;;  %vm579_vm3 = vcmask 1047584   ;;  %v14658_v7 = vld [vmem:[%s15560_s15 + $0xc] sm:$0xff]   ;;  %558 = vst.msk [vmem:[#allocation2 + $0x8] sm:$0xf0] %vm557_vm0, %v14656_v5  ;;  %v14661_v9 = vld [vmem:[%s15560_s15 + $0x14] sm:$0xff]  }
  0xf9   : > { %560 = vst.msk [vmem:[#allocation2 + $0x10] sm:$0xff] %vm559_vm1, %v14657_v6  ;;  %v14652_v8 = vld [vmem:[#allocation17 + $0x20] sm:$0xff]   ;;  %561 = vst.msk [vmem:[#allocation2 + $0x18] sm:$0xff] %vm559_vm1, %v14658_v7  ;;  %v14662_v10 = vld [vmem:[%s15560_s15 + $0x1c] sm:$0xff]   ;;  %vm1256_vm4 = vcmask 1043456   ;;  %v15609_v17 = vshrl.u32 %v597_v11, 7 }
  0xfa   : > { %578 = vst.msk [vmem:[#allocation2 + $0x8] sm:$0xf0] %vm577_vm2, %v15221_v0  ;;  %v14653_v12 = vld [vmem:[#allocation17 + $0x28] sm:$0xff]   ;;  %v14665_v13 = vld [vmem:[%s15560_s15 + $0x24] sm:$0xff]   ;;  %v14654_v18 = vld [vmem:[#allocation17 + $0x30] sm:$0xff]   ;;  %vm15222_vm5 = vmmov 1  }
  0xfb   : > { %14272 = vmatpush3.bf16.msra.mxu1 %v14649_v2  ;;  %580 = vst.msk [vmem:[#allocation2 + $0x10] sm:$0xff] %vm579_vm3, %v15221_v0  ;;  %581 = vst.msk [vmem:[#allocation2 + $0x18] sm:$0xff] %vm579_vm3, %v15221_v0  ;;  %v14666_v14 = vld [vmem:[%s15560_s15 + $0x2c] sm:$0xff]   ;;  %v14669_v23 = vld [vmem:[%s15560_s15 + $0x34] sm:$0xff]   ;;  %v15628_v26 = vadd.s32 16, %v15609_v17  ;;  %v15634_v28 = vadd.s32 8, %v15609_v17 }
  0xfc   : > { %14273 = vmatprep.subr.bf16.mxu1 %v14650_v3  ;;  %562 = vst.msk [vmem:[#allocation2 + $0x20] sm:$0xff] %vm559_vm1, %v14661_v9  ;;  %563 = vst.msk [vmem:[#allocation2 + $0x28] sm:$0xff] %vm559_vm1, %v14662_v10  ;;  %v14655_v24 = vld [vmem:[#allocation17 + $0x38] sm:$0xff]   ;;  %v15642_v30 = vadd.s32 24, %v15609_v17  ;;  %v15652_v32 = vadd.s32 32, %v15609_v17  ;;  %v634_v35 = vand.u32 15, %v15609_v17 }
  0xfd   : > { %582 = vst.msk [vmem:[#allocation2 + $0x20] sm:$0xff] %vm579_vm3, %v15221_v0  ;;  %583 = vst.msk [vmem:[#allocation2 + $0x28] sm:$0xff] %vm579_vm3, %v15221_v0  ;;  %v14670_v25 = vld [vmem:[%s15560_s15 + $0x3c] sm:$0xff]   ;;  %v14673_v34 = vld [vmem:[%s15560_s15 + $0x44] sm:$0xff]   ;;  %v648_v36 = vand.u32 15, %v15628_v26  ;;  %v641_v40 = vand.u32 15, %v15634_v28 }
  0xfe   : > { %564 = vst.msk [vmem:[#allocation2 + $0x30] sm:$0xff] %vm559_vm1, %v14665_v13  ;;  %565 = vst.msk [vmem:[#allocation2 + $0x38] sm:$0xff] %vm559_vm1, %v14666_v14  ;;  %v14659_v37 = vld [vmem:[#allocation8 + $0x40] sm:$0xff]   ;;  %v14674_v39 = vld [vmem:[%s15560_s15 + $0x4c] sm:$0xff]   ;;  %v655_v42 = vand.u32 15, %v15642_v30  ;;  %v662_v44 = vand.u32 15, %v15652_v32 }
  0xff   : > { %14274 = vmatpush3.bf16.msra.mxu1 %v14650_v3  ;;  %584 = vst.msk [vmem:[#allocation2 + $0x30] sm:$0xff] %vm579_vm3, %v15221_v0  ;;  %585 = vst.msk [vmem:[#allocation2 + $0x38] sm:$0xff] %vm579_vm3, %v15221_v0  ;;  %v14660_v41 = vld [vmem:[#allocation8] sm:$0xff]   ;;  %v14663_v43 = vld [vmem:[#allocation8 + $0x48] sm:$0xff]   ;;  %v15676_v47 = vadd.s32 40, %v15609_v17  ;;  %v15683_v50 = vadd.s32 48, %v15609_v17 }
 0x100   : > { %14275 = vmatprep.subr.bf16.mxu1 %v14651_v4  ;;  %vm15619_vm6 = vmpackc.low %vm15222_vm5, %vm15222_vm5  ;;  %566 = vst.msk [vmem:[#allocation2 + $0x40] sm:$0xff] %vm559_vm1, %v14669_v23  ;;  %v14677_v46 = vld [vmem:[#allocation8 + $0xc0] sm:$0xff]   ;;  %v14664_v51 = vld [vmem:[#allocation8 + $0x8] sm:$0xff]   ;;  %v15688_v54 = vadd.s32 56, %v15609_v17  ;;  %v15691_v55 = vadd.s32 64, %v15609_v17  ;;  %v15695_v58 = vadd.s32 72, %v15609_v17 }
 0x101   : > { %v1206_v15 = vld [vmem:[#allocation2 + $0x8] sm:$0xf0]  ;;  %586 = vst.msk [vmem:[#allocation2 + $0x40] sm:$0xff] %vm579_vm3, %v15221_v0  ;;  %v15649_v31 = vsel %vm15619_vm6, 65537, %v15221_v0  ;;  %12965 = vmatprep.subr.bf16.mxu0 %v14677_v46  ;;  %v14678_v53 = vld [vmem:[#allocation8 + $0x80] sm:$0xff]   ;;  %v14679_v57 = vld [vmem:[#allocation8 + $0xc8] sm:$0xff]  }
 0x102   : > { %v15606_v16 = vld [vmem:[#allocation2 + $0x10] sm:$0xff]  ;;  %v1257_v19 = vrot.slane %v1206_v15, 4  ;;  %v15630_v27 = vld [vmem:[#allocation2 + $0x18] sm:$0xff]  ;;  %567 = vst.msk [vmem:[#allocation2 + $0x48] sm:$0xff] %vm559_vm1, %v14670_v25  ;;  %568 = vst.msk [vmem:[#allocation2 + $0x50] sm:$0xff] %vm559_vm1, %v14673_v34  ;;  %12966 = vmatpush3.bf16.msra.mxu0 %v14678_v53  ;;  %v669_v2 = vand.u32 15, %v15676_v47 }
 0x103   : > { %14276 = vmatpush3.bf16.msra.mxu1 %v14651_v4  ;;  %v15612_v20 = vrot.slane %v15606_v16, 4  ;;  %587 = vst.msk [vmem:[#allocation2 + $0x48] sm:$0xff] %vm579_vm3, %v15221_v0  ;;  %v1260_v33 = vrot.slane %v15630_v27, 4  ;;  %588 = vst.msk [vmem:[#allocation2 + $0x50] sm:$0xff] %vm579_vm3, %v15221_v0  ;;  %v14667_v56 = vld [vmem:[#allocation8 + $0x50] sm:$0xff]   ;;  %v14681_v62 = vld [vmem:[#allocation8 + $0x88] sm:$0xff]   ;;  %12967 = vmatprep.subr.bf16.mxu0 %v14679_v57 }
 0x104   : > { %14277 = vmatprep.subr.bf16.mxu1 %v14652_v8  ;;  %v15636_v29 = vld [vmem:[#allocation2 + $0x20] sm:$0xff]  ;;  %569 = vst.msk [vmem:[#allocation2 + $0x58] sm:$0xff] %vm559_vm1, %v14674_v39  ;;  %v1210_v49 = vld [vmem:[#allocation2 + $0x28] sm:$0xff]  ;;  %v14682_v1 = vld [vmem:[%s15560_s15 + $0x5c] sm:$0xff]   ;;  %v676_v3 = vand.u32 15, %v15683_v50  ;;  %v683_v5 = vand.u32 15, %v15688_v54 }
 0x105   : > { %v1259_v22 = vsel %vm1256_vm4, %v1257_v19, %v15612_v20  ;;  %v15659_v38 = vrot.slane %v15636_v29, 4  ;;  %v15671_v45 = vsel %vm1256_vm4, %v15612_v20, %v1260_v33  ;;  %589 = vst.msk [vmem:[#allocation2 + $0x58] sm:$0xff] %vm579_vm3, %v15221_v0  ;;  %v1264_v59 = vrot.slane %v1210_v49, 4  ;;  %v14680_v60 = vld [vmem:[%s15560_s15 + $0x54] sm:$0xff]   ;;  %v14675_v21 = vld [vmem:[#allocation8 + $0x60] sm:$0xff]   ;;  %v14690_v49 = vld [vmem:[%s15560_s15 + $0x6c] sm:$0xff]  }
 0x106   : > { %14285 = vmatprep.mubr.bf16.mxu1 %v1259_v22  ;;  %v15685_v52 = vld [vmem:[#allocation2 + $0x30] sm:$0xff]  ;;  %v14668_v63 = vld [vmem:[#allocation8 + $0x10] sm:$0xff]   ;;  %570 = vst.msk [vmem:[#allocation2 + $0x60] sm:$0xff] %vm559_vm1, %v14680_v60  ;;  %v1212_v7 = vld [vmem:[#allocation2 + $0x38] sm:$0xff]  ;;  %12968 = vmatpush3.bf16.msra.mxu0 %v14681_v62  ;;  %v697_v11 = vand.u32 15, %v15695_v58  ;;  %v15718_v14 = vadd.s32 80, %v15609_v17 }
 0x107   : > { %14278 = vmatpush3.bf16.msra.mxu1 %v14652_v8  ;;  %v15680_v48 = vsel %vm1256_vm4, %v1260_v33, %v15659_v38  ;;  %v1266_v61 = vrot.slane %v15685_v52, 4  ;;  %v14671_v4 = vld [vmem:[#allocation8 + $0x58] sm:$0xff]   ;;  %590 = vst.msk [vmem:[#allocation2 + $0x60] sm:$0xff] %vm579_vm3, %v15221_v0  ;;  %v1265_v6 = vsel %vm1256_vm4, %v15659_v38, %v1264_v59  ;;  %v690_v8 = vand.u32 15, %v15691_v55  ;;  %v14685_v13 = vld [vmem:[#allocation8 + $0xd0] sm:$0xff]   ;;  %v14688_v33 = vld [vmem:[%s15560_s15 + $0x64] sm:$0xff]  }
 0x108   : > { %14279 = vmatprep.subr.bf16.mxu1 %v14653_v12  ;;  %571 = vst.msk [vmem:[#allocation2 + $0x68] sm:$0xff] %vm559_vm1, %v14682_v1  ;;  %v15712_v10 = vld [vmem:[#allocation2 + $0x40] sm:$0xff]  ;;  %v1268_v15 = vrot.slane %v1212_v7, 4  ;;  %v14686_v22 = vld [vmem:[#allocation8 + $0x90] sm:$0xff]   ;;  %v14687_v23 = vld [vmem:[#allocation8 + $0xd8] sm:$0xff]   ;;  %12969 = vmatprep.subr.bf16.mxu0 %v14685_v13  ;;  %vm575_vm7 = vcmask 27648  }
 0x109   : > { %v1267_v9 = vsel %vm1256_vm4, %v1264_v59, %v1266_v61  ;;  %591 = vst.msk [vmem:[#allocation2 + $0x68] sm:$0xff] %vm579_vm3, %v15221_v0  ;;  %v1270_v25 = vrot.slane %v15712_v10, 4  ;;  %v14689_v39 = vld [vmem:[#allocation8 + $0x98] sm:$0xff]   ;;  %vm595_vm8 = vcmask 1043488   ;;  %v15747_v57 = vadd.s32 112, %v15609_v17  ;;  %v14693_v1 = vld [vmem:[#allocation8 + $0xe0] sm:$0xff]  }
 0x10a   : > { %v15722_v19 = vld [vmem:[#allocation2 + $0x50] sm:$0xff]  ;;  %12970 = vmatpush3.bf16.msra.mxu0 %v14686_v22  ;;  %v1269_v46 = vsel %vm1256_vm4, %v1266_v61, %v1268_v15  ;;  %572 = vst.msk [vmem:[#allocation2 + $0x70] sm:$0xff] %vm559_vm1, %v14688_v33  ;;  %v14683_v61 = vld [vmem:[#allocation8 + $0x68] sm:$0xff]   ;;  %573 = vst.msk [vmem:[#allocation2 + $0x78] sm:$0xff] %vm559_vm1, %v14690_v49  ;;  %vm15759_vm9 = vcmp.ge.s32.totalorder %v634_v35, 1  ;;  %vm15772_vm10 = vcmp.ge.s32.totalorder %v648_v36, 1 }
 0x10b   : > { %14280 = vmatpush3.bf16.msra.mxu1 %v14653_v12  ;;  %v14672_v12 = vld [vmem:[#allocation8 + $0x18] sm:$0xff]   ;;  %12971 = vmatprep.subr.bf16.mxu0 %v14687_v23  ;;  %v1274_v53 = vrot.slane %v15722_v19, 4  ;;  %592 = vst.msk [vmem:[#allocation2 + $0x70] sm:$0xff] %vm579_vm3, %v15221_v0  ;;  %v1271_v59 = vsel %vm1256_vm4, %v1268_v15, %v1270_v25  ;;  %593 = vst.msk [vmem:[#allocation2 + $0x78] sm:$0xff] %vm579_vm3, %v15221_v0  ;;  %v14694_v7 = vld [vmem:[#allocation8 + $0xa0] sm:$0xff]   ;;  %v15767_v15 = vadd.s32 120, %v15609_v17 }
 0x10c   : > { %14281 = vmatprep.subr.bf16.mxu1 %v14654_v18  ;;  %v15729_v34 = vld [vmem:[#allocation2 + $0x58] sm:$0xff]  ;;  %v14695_v13 = vld [vmem:[#allocation8 + $0xe8] sm:$0xff]   ;;  %v14692_v22 = vld [vmem:[#allocation8 + $0x30] sm:$0xff]   ;;  %v15778_v33 = vadd.s32 128, %v15609_v17  ;;  %vm15785_vm11 = vcmp.le.s32.totalorder %v641_v40, 14  ;;  %vm15794_vm12 = vcmp.le.s32.totalorder %v655_v42, 14 }
 0x10d   : > { %v1276_v60 = vrot.slane %v15729_v34, 4  ;;  %v14697_v23 = vld [vmem:[#allocation8 + $0xa8] sm:$0xff]   ;;  %v14699_v49 = vld [vmem:[#allocation8 + $0x78] sm:$0xff]   ;;  %vm15806_vm13 = vcmp.ge.s32.totalorder %v662_v44, 1  ;;  %vm15814_vm14 = vcmp.le.s32.totalorder %v669_v2, 14  ;;  %v14701_v32 = vld [vmem:[#allocation8 + $0xf0] sm:$0xff]  }
 0x10e   : > { %v15752_v62 = vld [vmem:[#allocation2 + $0x60] sm:$0xff]  ;;  %12972 = vmatpush3.bf16.msra.mxu0 %v14689_v39  ;;  %v14700_v42 = vld [vmem:[#allocation8 + $0x38] sm:$0xff]   ;;  %v15822_v44 = vadd.s32 144, %v15609_v17  ;;  %vm1564_vm15 = vmpackc.low %vm15759_vm9, %vm15759_vm9  ;;  %vm1676_vm0 = vsmask.f32 3328  ;;  %s19340_s1 = scalar_lea.vmem [#allocation19], %s12378_s22 }
 0x10f   : > { %14282 = vmatpush3.bf16.msra.mxu1 %v14654_v18  ;;  %v15720_v18 = vld [vmem:[#allocation2 + $0x48] sm:$0xff]  ;;  %12973 = vmatprep.subr.bf16.mxu0 %v14693_v1  ;;  %v14703_v47 = vld [vmem:[#allocation8 + $0xf8] sm:$0xff]   ;;  %v2039_v2 = vld [vmem:[#allocation2] sm:$0xf0]  ;;  %s12733_s12 = sshll.u32 %s15292_s11, 11  ;;  %s12224_s18 = sshll.u32 %s19340_s1, 4  ;;  %s19390_s18 = int_to_ptr.vmem [resolvable:$true] %s12224_s18 }
 0x110   : > { %14283 = vmatprep.subr.bf16.mxu1 %v14655_v24  ;;  %v1272_v52 = vrot.slane %v15720_v18, 4  ;;  %v14696_v18 = vld [vmem:[%s15560_s15 + $0x74] sm:$0xff]   ;;  %vm2156_vm2 = vmpackc.low %vm15785_vm11, %vm15785_vm11  ;;  %s19388_s21 = scalar_lea.hbm %s19444_s8, %s12733_s12  ;;  %s12211_s11 = scalar_lea.sflag [#allocation7], %s15554_s2 }
 0x111   : > { %574 = vst.msk [vmem:[#allocation2 + $0x80] sm:$0xff] %vm559_vm1, %v14696_v18  ;;  %v14702_v1 = vld [vmem:[#allocation8 + $0xb0] sm:$0xff]   ;;  %v14704_v19 = vld [vmem:[#allocation8 + $0xb8] sm:$0xff]   ;;  %vm1566_vm1 = vmpackc.low %vm15772_vm10, %vm15772_vm10  ;;  %vm15909_vm10 = vcmp.le.s32.totalorder %v683_v5, 14  ;;  %s15127_s13 = scalar_lea.vmem %s19390_s18, 2048  ;;  %p20049_p1 = scmp.ne.s32.totalorder %s19580_s26, 0 }
 0x112   : > { %12974 = vmatpush3.bf16.msra.mxu0 %v14694_v7  ;;  %v1219_v39 = vld [vmem:[#allocation2 + $0x70] sm:$0xff]  ;;  %v1273_v36 = vsel %vm1256_vm4, %v1270_v25, %v1272_v52  ;;  %594 = vst.msk [vmem:[#allocation2 + $0x80] sm:$0xff] %vm579_vm3, %v15221_v0  ;;  %v1275_v28 = vsel %vm1256_vm4, %v1272_v52, %v1274_v53  ;;  %v1220_v25 = vld [vmem:[#allocation2 + $0x78] sm:$0xff]  ;;  %v15824_v7 = vld [vmem:[#allocation2 + $0x8] sm:$0xff]  ;;  %p15128_p12 = scmp.ne.s32.totalorder %s19390_s18, %s15127_s13  ;;  %s15223_s16 = smov [#allocation19]  }
 0x113   : > { %14284 = vmatpush3.bf16.msra.mxu1 %v14655_v24  ;;  %v15725_v24 = vadd.s32 88, %v15609_v17  ;;  %12975 = vmatprep.subr.bf16.mxu0 %v14695_v13  ;;  %v1277_v13 = vsel %vm1256_vm4, %v1274_v53, %v1276_v60  ;;  %v1596_v53 = vsel %vm1564_vm15, 65537, %v15221_v0  ;;  %vm2158_vm3 = vmpackc.low %vm15794_vm12, %vm15794_vm12  ;;  %vm15935_vm12 = vcmp.ge.s32.totalorder %v690_v8, 1  ;;  %s15131_s20 = sshll.u32 %s15223_s16, 4  ;;  %s15132_s20 = int_to_ptr.vmem [resolvable:$false] %s15131_s20 }
 0x114   : > { %12853 = vmatprep.subr.bf16.mxu1 %v14659_v37  ;;  %v14676_v37 = vld [vmem:[#allocation8 + $0x20] sm:$0xff]   ;;  %vm1568_vm5 = vmpackc.low %vm15806_vm13, %vm15806_vm13  ;;  %vm15945_vm15 = vcmp.le.s32.totalorder %v697_v11, 14  ;;  %p15129_p13 = pnand %p15128_p12, %p20049_p1  ;;  %s15133_s9 = scalar_lea.vmem %s15132_s20, 4096 }
 0x115   : > { %vm2160_vm6 = vmpackc.low %vm15814_vm14, %vm15814_vm14  ;;  %p15134_p2 = scmp.lt.s32.totalorder %s19390_s18, %s15132_s20  ;;  %p15135_p8 = scmp.lt.s32.totalorder %s15133_s9, %s15127_s13 }
 0x116   : > { %14286 = vmatmul.mubr.bf16.vlgmr.msra.gmra.mrb[0].mxu1 %v15671_v45  ;;  %12976 = vmatpush3.bf16.msra.mxu0 %v14697_v23  ;;  %v2074_v23 = vrot.slane %v15824_v7, 4  ;;  %v2192_v52 = vsel %vm2160_vm6, 65537, %v15221_v0  ;;  %vm2164_vm6 = vmpackc.low %vm15945_vm15, %vm15945_vm15  ;;  %p15130_p0 = pneg %p15129_p13 }
 0x117   : > { %12854 = vmatpush3.bf16.msra.mxu1 %v14660_v41  ;;  %14289 = vmatprep.mubr.bf16.mxu1 %v15680_v48  ;;  %v14721_v41 = vld [vmem:[#allocation8 + $0x1c8] sm:$0xff]   ;;  %p15136_p6 = por %p15135_p8, %p15134_p2 }
 0x118   : > { %12855 = vmatprep.subr.bf16.mxu1 %v14663_v43  ;;  %v15733_v43 = vadd.s32 96, %v15609_v17  ;;  %12977 = vmatprep.subr.bf16.mxu0 %v14701_v32  ;;  %v1598_v32 = vsel %vm1566_vm1, 65537, %v15221_v0 }
 0x119   : > { %p15137_p10 = pnand %p15136_p6, %p15130_p0 }
 0x11a   : > { %12978 = vmatpush3.bf16.msra.mxu0 %v14702_v1  ;;  %v14705_v1 = vld [vmem:[#allocation8 + $0x140] sm:$0xff]  }
 0x11b   : > { %12856 = vmatpush3.bf16.msra.mxu1 %v14664_v51  ;;  %v15739_v51 = vadd.s32 104, %v15609_v17  ;;  %12979 = vmatprep.subr.bf16.mxu0 %v14703_v47  ;;  %v15861_v47 = vadd.s32 160, %v15609_v17 }
 0x11c   : > { %12857 = vmatprep.subr.bf16.mxu1 %v14667_v56 }
 0x11e   : > { %14290 = vmatmul.mubr.bf16.gmra.mrb[4].mxu1 %v1265_v6  ;;  %v14691_v6 = vld [vmem:[#allocation8 + $0x70] sm:$0xff]   ;;  %12980 = vmatpush3.bf16.msra.mxu0 %v14704_v19  ;;  %v15879_v19 = vsel %vm1256_vm4, %v2074_v23, %v15612_v20  ;;  %v1600_v20 = vsel %vm1568_vm5, 65537, %v15221_v0  ;;  %vm1572_vm5 = vmpackc.low %vm15935_vm12, %vm15935_vm12 }
 0x11f   : > { %14293 = vmatprep.mubr.bf16.mxu1 %v1267_v9  ;;  %12858 = vmatpush3.bf16.msra.mxu1 %v14668_v63  ;;  %v14684_v63 = vld [vmem:[#allocation8 + $0x28] sm:$0xff]   ;;  %v12412_v9 = vcombine.low %v1596_v53, %v15649_v31 }
 0x120   : > { %12859 = vmatprep.subr.bf16.mxu1 %v14671_v4 }
 0x121   : > { %v1681_v53 = vshll.u32 %v12412_v9, 16 }
 0x123   : > { %12860 = vmatpush3.bf16.msra.mxu1 %v14672_v12  ;;  %v15764_v12 = vld [vmem:[#allocation2 + $0x68] sm:$0xff] }
 0x124   : > { %12861 = vmatprep.subr.bf16.mxu1 %v14675_v21  ;;  %v1280_v40 = vrot.slane %v15764_v12, 4  ;;  %v15827_v12 = vadd.s32 152, %v15609_v17 }
 0x126   : > { %14294 = vmatmul.mubr.bf16.gmra.mrb[8].mxu1 %v1269_v46  ;;  %v14698_v46 = vld [vmem:[%s15560_s15 + $0x7c] ss:$0 sps:$4 sm:$0xff]  }
 0x127   : > { %14297 = vmatprep.mubr.bf16.mxu1 %v1271_v59  ;;  %12862 = vmatpush3.bf16.msra.mxu1 %v14676_v37  ;;  %v1278_v37 = vrot.slane %v15752_v62, 4  ;;  %576 = vst.msk [vmem:[#allocation2 + $0x88] sm:$0xf] %vm575_vm7, %v14698_v46  ;;  %v15819_v62 = vadd.s32 136, %v15609_v17  ;;  %v1221_v46 = vld [vmem:[#allocation2 + $0x80] sm:$0xff]  ;;  %vm15895_vm7 = vcmp.ge.s32.totalorder %v676_v3, 1 }
 0x128   : > { %12863 = vmatprep.subr.bf16.mxu1 %v14683_v61  ;;  %596 = vst.msk [vmem:[#allocation2 + $0x88] sm:$0xf] %vm595_vm8, %v15221_v0  ;;  %v1547_v59 = vld [vmem:[#allocation2] sm:$0xf8]  ;;  %vm1854_vm8 = vsmask.f32 4352  ;;  %vm1570_vm14 = vmpackc.low %vm15895_vm7, %vm15895_vm7 }
 0x129   : > { %v1279_v18 = vsel %vm1256_vm4, %v1276_v60, %v1278_v37 }
 0x12b   : > { %12864 = vmatpush3.bf16.msra.mxu1 %v14684_v63  ;;  %v1282_v63 = vrot.slane %v1219_v39, 4  ;;  %v15842_v39 = vsel %vm1256_vm4, %v1278_v37, %v1280_v40 }
 0x12c   : > { %12865 = vmatprep.subr.bf16.mxu1 %v14691_v6  ;;  %v1284_v6 = vrot.slane %v1220_v25, 4 }
 0x12e   : > { %14298 = vmatmul.mubr.bf16.gmra.mrb[12].mxu1 %v1273_v36  ;;  %v15848_v36 = vsel %vm1256_vm4, %v1280_v40, %v1282_v63 }
 0x12f   : > { %14301 = vmatprep.mubr.bf16.mxu1 %v1275_v28  ;;  %12866 = vmatpush3.bf16.msra.mxu1 %v14692_v22  ;;  %v2073_v22 = vrot.slane %v2039_v2, 4  ;;  %v15856_v28 = vsel %vm1256_vm4, %v1282_v63, %v1284_v6  ;;  %v1222_v25 = vld [vmem:[#allocation2 + $0x88] sm:$0xf]  ;;  %v12413_v2 = vcombine.low %v1598_v32, %v15649_v31  ;;  %v2190_v32 = vsel %vm2158_vm3, 65537, %v15221_v0 }
 0x130   : > { %12867 = vmatprep.subr.bf16.mxu1 %v14699_v49  ;;  %v1286_v49 = vrot.slane %v1221_v46, 4  ;;  %v1678_v46 = vshrl.u32 %v12412_v9, 16  ;;  %v1683_v9 = vrot.slane %v1681_v53, 5 }
 0x131   : > { %v15864_v35 = vsel %vm1256_vm4, %v2073_v22, %v2074_v23  ;;  %v2188_v22 = vsel %vm2156_vm2, 65537, %v15221_v0  ;;  %vm2162_vm2 = vmpackc.low %vm15909_vm10, %vm15909_vm10 }
 0x132   : > { %v15871_v63 = vsel %vm1256_vm4, %v1284_v6, %v1286_v49  ;;  %v1689_v6 = vshll.u32 %v12413_v2, 16 }
 0x133   : > { %12868 = vmatpush3.bf16.msra.mxu1 %v14700_v42  ;;  %v1288_v42 = vrot.slane %v1222_v25, 4  ;;  %v1686_v25 = vshrl.u32 %v12413_v2, 16 }
 0x134   : > { %13077 = vmatprep.subr.bf16.mxu1 %v14705_v1  ;;  %v12428_v1 = vcombine.low %v15649_v31, %v2188_v22  ;;  %v1691_v23 = vrot.slane %v1689_v6, 5 }
 0x135   : > { %v15882_v26 = vsel %vm1256_vm4, %v1286_v49, %v1288_v42  ;;  %v1688_v30 = vrot.slane %v1686_v25, 4  ;;  %v12429_v49 = vcombine.low %v15649_v31, %v2190_v32  ;;  %v12414_v42 = vcombine.low %v1600_v20, %v15649_v31 }
 0x136   : > { %14302 = vmatmul.mubr.bf16.gmra.mrb[16].mxu1 %v1277_v13  ;;  %v1680_v13 = vrot.slane %v1678_v46, 4  ;;  %v2628_v46 = vld [vmem:[#allocation2 + $0x8] sm:$0xf8]  ;;  %v2268_v53 = vshrl.u32 %v12428_v1, 16  ;;  %v2271_v22 = vshll.u32 %v12428_v1, 16 }
 0x137   : > { %14305 = vmatprep.mubr.bf16.mxu1 %v1279_v18  ;;  %v15904_v40 = vor.u32 %v1691_v23, %v1688_v30  ;;  %v2276_v50 = vshrl.u32 %v12429_v49, 16  ;;  %v2279_v3 = vshll.u32 %v12429_v49, 16  ;;  %v1695_v37 = vshrl.u32 %v12414_v42, 16 }
 0x138   : > { %v15901_v2 = vor.u32 %v1683_v9, %v1680_v13  ;;  %v2270_v25 = vrot.slane %v2268_v53, 3  ;;  %v2273_v6 = vrot.slane %v2271_v22, 4  ;;  %v1698_v32 = vshll.u32 %v12414_v42, 16 }
 0x139   : > { %v2278_v30 = vrot.slane %v2276_v50, 3  ;;  %v2281_v56 = vrot.slane %v2279_v3, 4 }
 0x13a   : > { %19608 = vst [vmem:[#allocation26_spill] sm:$0xff] %v15901_v2  ;;  %vm1820_vm9 = vcmp.ne.s16.totalorder %v15901_v2, 0  ;;  %v15916_v9 = vsel %vm1676_vm0, %v15901_v2, %v15904_v40  ;;  %v15931_v53 = vor.u32 %v2273_v6, %v2270_v25  ;;  %v1700_v18 = vrot.slane %v1698_v32, 5 }
 0x13b   : > { %19611 = vst [vmem:[#allocation27_spill] sm:$0xff] %v15916_v9  ;;  %v1837_v1 = vsel %vm1820_vm9, %v1547_v59, 0  ;;  %v2645_v20 = vsel %vm1820_vm9, %v2628_v46, 0  ;;  %vm19478_vm11 = vcmp.ne.s16.totalorder %v15916_v9, 0  ;;  %v2138_v46 = vld [vmem:[#allocation2] sm:$0xf0]  ;;  %v2282_v8 = vor.u32 %v2281_v56, %v2278_v30 }
 0x13c   : > { %v1856_v54 = vshrl.u32 %v1837_v1, 16  ;;  %v1859_v5 = vshll.u32 %v1837_v1, 16  ;;  %v2663_v23 = vshrl.u32 %v2645_v20, 16  ;;  %v1838_v49 = vsel %vm19478_vm11, %v15824_v7, 0  ;;  %19612 = vst [vmem:[#allocation28_spill] sm:$0xff] %v15931_v53 }
 0x13d   : > { %v2646_v59 = vsel %vm19478_vm11, %v15606_v16, 0  ;;  %v2666_v42 = vshll.u32 %v2645_v20, 16  ;;  %v1864_v50 = vshrl.u32 %v1838_v49, 16  ;;  %v1867_v60 = vshll.u32 %v1838_v49, 16 }
 0x13e   : > { %14306 = vmatmul.mubr.bf16.gmra.mrb[20].mxu1 %v15842_v39  ;;  %v1858_v39 = vrot.slane %v1856_v54, 3  ;;  %v1861_v22 = vrot.slane %v1859_v5, 4  ;;  %v2665_v1 = vrot.slane %v2663_v23, 3  ;;  %v2671_v61 = vshrl.u32 %v2646_v59, 16 }
 0x13f   : > { %14309 = vmatprep.mubr.bf16.mxu1 %v15848_v36  ;;  %v2668_v34 = vrot.slane %v2666_v42, 4  ;;  %v2674_v36 = vshll.u32 %v2646_v59, 16  ;;  %v1866_v10 = vrot.slane %v1864_v50, 3  ;;  %v1869_v4 = vrot.slane %v1867_v60, 4  ;;  %v14707_v60 = vld [vmem:[#allocation8 + $0x148] sm:$0xff]  }
 0x140   : > { %v1862_v21 = vor.u32 %v1861_v22, %v1858_v39  ;;  %v2673_v6 = vrot.slane %v2671_v61, 3  ;;  %vm19472_vm13 = vcmp.ne.s16.totalorder %v15931_v53, 0  ;;  %v1697_v61 = vrot.slane %v1695_v37, 4 }
 0x141   : > { %v2669_v25 = vor.u32 %v2668_v34, %v2665_v1  ;;  %v2676_v20 = vrot.slane %v2674_v36, 4  ;;  %v15949_v55 = vor.u32 %v1869_v4, %v1866_v10  ;;  %v2427_v34 = vsel %vm19472_vm13, %v2138_v46, 0 }
 0x142   : > { %v2445_v54 = vshrl.u32 %v2427_v34, 16  ;;  %v2448_v5 = vshll.u32 %v2427_v34, 16  ;;  %v15962_v11 = vsel %vm1854_vm8, %v15931_v53, %v2282_v8  ;;  %v12430_v56 = vcombine.low %v15649_v31, %v2192_v52 }
 0x143   : > { %v15953_v3 = vor.u32 %v2676_v20, %v2673_v6  ;;  %v15958_v58 = vsel %vm1854_vm8, %v1862_v21, %v15949_v55  ;;  %19617 = vst [vmem:[#allocation29_spill] sm:$0xff] %v15962_v11  ;;  %v1602_v4 = vsel %vm1570_vm14, 65537, %v15221_v0  ;;  %vm2411_vm1 = vcmp.ne.s16.totalorder %v15962_v11, 0 }
 0x144   : > { %v2447_v37 = vrot.slane %v2445_v54, 4  ;;  %v2428_v21 = vsel %vm2411_vm1, %v15824_v7, 0  ;;  %v1701_v52 = vor.u32 %v1700_v18, %v1697_v61  ;;  %v2285_v32 = vshrl.u32 %v12430_v56, 16 }
 0x145   : > { %v2678_v10 = vsel %vm1854_vm8, %v2669_v25, %v15953_v3  ;;  %v2288_v30 = vshll.u32 %v12430_v56, 16  ;;  %v2453_v23 = vshrl.u32 %v2428_v21, 16  ;;  %v2456_v49 = vshll.u32 %v2428_v21, 16 }
 0x146   : > { %14310 = vmatmul.mubr.bf16.gmra.mrb[24].mxu1 %v15856_v28  ;;  %v2450_v28 = vrot.slane %v2448_v5, 5  ;;  %4618 = vmatprep.mubr.bf16.mxu0 %v2678_v10  ;;  %v12415_v59 = vcombine.low %v1602_v4, %v15649_v31  ;;  %v15979_v42 = vsel %vm1676_vm0, %v15904_v40, %v1701_v52  ;;  %v2287_v13 = vrot.slane %v2285_v32, 3 }
 0x147   : > { %14313 = vmatprep.mubr.bf16.mxu1 %v15871_v63  ;;  %19618 = vst [vmem:[#allocation30_spill] sm:$0xff] %v15979_v42  ;;  %v2290_v46 = vrot.slane %v2288_v30, 4  ;;  %v2194_v39 = vsel %vm2162_vm2, 65537, %v15221_v0  ;;  %v2455_v22 = vrot.slane %v2453_v23, 4  ;;  %v2458_v50 = vrot.slane %v2456_v49, 5  ;;  %v16028_v49 = vld [vmem:[#allocation2] sm:$0xff] }
 0x148   : > { %v2451_v63 = vor.u32 %v2450_v28, %v2447_v37  ;;  %vm19479_vm3 = vcmp.ne.s16.totalorder %v15979_v42, 0  ;;  %v1704_v7 = vshrl.u32 %v12415_v59, 16  ;;  %v1707_v40 = vshll.u32 %v12415_v59, 16 }
 0x149   : > { %v1839_v1 = vsel %vm19479_vm3, %v15606_v16, 0  ;;  %v2647_v36 = vsel %vm19479_vm3, %v15630_v27, 0  ;;  %v15989_v25 = vor.u32 %v2290_v46, %v2287_v13  ;;  %v15991_v6 = vor.u32 %v2458_v50, %v2455_v22  ;;  %v14719_v13 = vld [vmem:[#allocation8 + $0x1c0] sm:$0xff]  }
 0x14a   : > { %v1873_v20 = vshrl.u32 %v1839_v1, 16  ;;  %v1876_v0 = vshll.u32 %v1839_v1, 16  ;;  %v2680_v34 = vshrl.u32 %v2647_v36, 16  ;;  %v2683_v61 = vshll.u32 %v2647_v36, 16  ;;  %v14720_v50 = vld [vmem:[#allocation8 + $0x180] sm:$0xff]   ;;  %13189 = vmatprep.subr.bf16.mxu0 %v14719_v13 }
 0x14b   : > { %v15999_v54 = vsel %vm1854_vm8, %v2282_v8, %v15989_v25  ;;  %v1706_v5 = vrot.slane %v1704_v7, 4  ;;  %v1709_v18 = vrot.slane %v1707_v40, 5  ;;  %v19620_v56 = vand.u32 15, %v15718_v14 }
 0x14c   : > { %19619 = vst [vmem:[#allocation31_spill] sm:$0xff] %v15999_v54  ;;  %v1875_v10 = vrot.slane %v1873_v20, 3  ;;  %v1878_v8 = vrot.slane %v1876_v0, 4  ;;  %v2682_v37 = vrot.slane %v2680_v34, 3  ;;  %v2685_v28 = vrot.slane %v2683_v61, 4  ;;  %v14722_v34 = vld [vmem:[#allocation8 + $0x188] sm:$0xff]  }
 0x14d   : > { %vm16006_vm7 = vcmp.ge.s32.totalorder %v19620_v56, 1  ;;  %vm2412_vm10 = vcmp.ne.s16.totalorder %v15999_v54, 0  ;;  %v16014_v21 = vor.u32 %v1709_v18, %v1706_v5  ;;  %v12431_v14 = vcombine.low %v15649_v31, %v2194_v39  ;;  %v14708_v18 = vld [vmem:[#allocation8 + $0x108] sm:$0xff]  }
 0x14e   : > { %14314 = vmatmul.mubr.bf16.gmra.mrb[28].mxu1 %v15882_v26  ;;  %v2460_v26 = vsel %vm1676_vm0, %v2451_v63, %v15991_v6  ;;  %v19623_v32 = vand.u32 15, %v15725_v24  ;;  %v16023_v23 = vor.u32 %v1878_v8, %v1875_v10  ;;  %v2429_v63 = vsel %vm2412_vm10, %v15606_v16, 0  ;;  %vm1574_vm15 = vmpackc.low %vm16006_vm7, %vm16006_vm7 }
 0x14f   : > { %4457 = vmatprep.mubr.bf16.mxu1 %v15864_v35  ;;  %4619 = vmatmul.mubr.bf16.vlgmr.msra.gmra.mrb[0].mxu0 %v2460_v26  ;;  %v14706_v35 = vld [vmem:[#allocation8 + $0x100] sm:$0xff]   ;;  %v1604_v24 = vsel %vm1572_vm5, 65537, %v16028_v49  ;;  %v2196_v59 = vsel %vm2164_vm6, 65537, %v16028_v49  ;;  %v16042_v46 = vor.u32 %v2685_v28, %v2682_v37  ;;  %v2462_v16 = vshrl.u32 %v2429_v63, 16 }
 0x150   : > { %vm16019_vm14 = vcmp.le.s32.totalorder %v19623_v32, 14  ;;  %v2465_v39 = vshll.u32 %v2429_v63, 16  ;;  %v16046_v22 = vsel %vm1676_vm0, %v1701_v52, %v16014_v21  ;;  %v16051_v7 = vsel %vm1854_vm8, %v15949_v55, %v16023_v23  ;;  %13190 = vmatpush3.bf16.msra.mxu0 %v14720_v50  ;;  %v16069_v32 = vld [vmem:[#allocation2 + $0x28] sm:$0xff] }
 0x151   : > { %19626 = vst [vmem:[#allocation32_spill] sm:$0xff] %v16046_v22  ;;  %vm19452_vm12 = vcmp.ne.s16.totalorder %v16046_v22, 0  ;;  %v2294_v1 = vshrl.u32 %v12431_v14, 16  ;;  %v2297_v36 = vshll.u32 %v12431_v14, 16  ;;  %v2687_v40 = vsel %vm1854_vm8, %v15953_v3, %v16042_v46  ;;  %13191 = vmatprep.subr.bf16.mxu0 %v14721_v41  ;;  %vm2166_vm6 = vmpackc.low %vm16019_vm14, %vm16019_vm14 }
 0x152   : > { %v2464_v20 = vrot.slane %v2462_v16, 4  ;;  %v2467_v52 = vrot.slane %v2465_v39, 5  ;;  %v1840_v0 = vsel %vm19452_vm12, %v15630_v27, 0  ;;  %4626 = vmatprep.mubr.bf16.mxu0 %v2687_v40  ;;  %v2648_v5 = vsel %vm19452_vm12, %v15636_v29, 0  ;;  %v14709_v27 = vld [vmem:[#allocation8 + $0x150] sm:$0xff]   ;;  %v14711_v40 = vld [vmem:[#allocation8 + $0x158] sm:$0xff]  }
 0x153   : > { %v1882_v55 = vshrl.u32 %v1840_v0, 16  ;;  %v1885_v61 = vshll.u32 %v1840_v0, 16  ;;  %v2296_v56 = vrot.slane %v2294_v1, 3  ;;  %v2689_v26 = vshrl.u32 %v2648_v5, 16 }
 0x154   : > { %v16064_v3 = vor.u32 %v2467_v52, %v2464_v20  ;;  %v2692_v10 = vshll.u32 %v2648_v5, 16  ;;  %v2299_v8 = vrot.slane %v2297_v36, 4  ;;  %v12416_v14 = vcombine.low %v1604_v24, %v15649_v31  ;;  %13192 = vmatpush3.bf16.msra.mxu0 %v14722_v34  ;;  %v14710_v24 = vld [vmem:[#allocation8 + $0x110] sm:$0xff]  }
 0x155   : > { %v1884_v37 = vrot.slane %v1882_v55, 3  ;;  %v1887_v28 = vrot.slane %v1885_v61, 4  ;;  %v12432_v29 = vcombine.low %v15649_v31, %v2196_v59  ;;  %v2691_v63 = vrot.slane %v2689_v26, 3  ;;  %v14723_v20 = vld [vmem:[#allocation8 + $0x1d0] sm:$0xff]   ;;  %v14890_v61 = vld [vmem:[#allocation2 + $0x18] sm:$0xff]  ;;  %v14725_v26 = vld [vmem:[#allocation8 + $0x1d8] sm:$0xff]  }
 0x156   : > { %4458 = vmatmul.mubr.bf16.vlgmr.msra.gmra.mrb[32].mxu1 %v15958_v58  ;;  %v2469_v58 = vsel %vm1676_vm0, %v15991_v6, %v16064_v3  ;;  %v2694_v13 = vrot.slane %v2692_v10, 4  ;;  %v2300_v16 = vor.u32 %v2299_v8, %v2296_v56  ;;  %v1716_v39 = vshll.u32 %v12416_v14, 16  ;;  %v14724_v55 = vld [vmem:[#allocation8 + $0x190] sm:$0xff]   ;;  %13193 = vmatprep.subr.bf16.mxu0 %v14723_v20  ;;  %v14714_v20 = vld [vmem:[#allocation8 + $0x120] sm:$0xff]  }
 0x157   : > { %13078 = vmatpush3.bf16.msra.mxu1 %v14706_v35  ;;  %4465 = vmatprep.mubr.bf16.mxu1 %v15879_v19  ;;  %v16074_v35 = vor.u32 %v1887_v28, %v1884_v37  ;;  %v1713_v19 = vshrl.u32 %v12416_v14, 16  ;;  %v2303_v50 = vshrl.u32 %v12432_v29, 16  ;;  %v19627_v59 = vand.u32 15, %v15733_v43  ;;  %v16118_v28 = vld [vmem:[#allocation2 + $0x30] sm:$0xff]  ;;  %v2142_v14 = vld [vmem:[#allocation2 + $0x20] sm:$0xff] }
 0x158   : > { %13079 = vmatprep.subr.bf16.mxu1 %v14707_v60  ;;  %4627 = vmatmul.mubr.bf16.gmra.mrb[4].mxu0 %v2469_v58  ;;  %v16085_v41 = vor.u32 %v2694_v13, %v2691_v63  ;;  %v16089_v60 = vsel %vm1854_vm8, %v15989_v25, %v2300_v16  ;;  %v2306_v1 = vshll.u32 %v12432_v29, 16  ;;  %v2082_v36 = vrot.slane %v16069_v32, 4 }
 0x159   : > { %vm16081_vm2 = vcmp.ge.s32.totalorder %v19627_v59, 1  ;;  %v16095_v52 = vsel %vm1854_vm8, %v16023_v23, %v16074_v35  ;;  %vm19456_vm5 = vcmp.ne.s16.totalorder %v16089_v60, 0  ;;  %v1715_v43 = vrot.slane %v1713_v19, 4  ;;  %13194 = vmatpush3.bf16.msra.mxu0 %v14724_v55  ;;  %v14891_v59 = vld [vmem:[#allocation2 + $0x20] sm:$0xff] }
 0x15a   : > { %v1718_v0 = vrot.slane %v1716_v39, 5  ;;  %v19630_v25 = vand.u32 15, %v15739_v51  ;;  %v2696_v23 = vsel %vm1854_vm8, %v16042_v46, %v16085_v41  ;;  %v2430_v5 = vsel %vm19456_vm5, %v14890_v61, 0  ;;  %v14726_v46 = vld [vmem:[#allocation8 + $0x198] sm:$0xff]   ;;  %13195 = vmatprep.subr.bf16.mxu0 %v14725_v26 }
 0x15b   : > { %13080 = vmatpush3.bf16.msra.mxu1 %v14708_v18  ;;  %v2305_v18 = vrot.slane %v2303_v50, 3  ;;  %v2308_v56 = vrot.slane %v2306_v1, 4  ;;  %4634 = vmatprep.mubr.bf16.mxu0 %v2696_v23  ;;  %v2471_v51 = vshrl.u32 %v2430_v5, 16  ;;  %v2474_v10 = vshll.u32 %v2430_v5, 16  ;;  %v14713_v50 = vld [vmem:[#allocation8 + $0x160] sm:$0xff]   ;;  %v14892_v1 = vld [vmem:[#allocation2 + $0x28] sm:$0xff] }
 0x15c   : > { %vm16103_vm12 = vcmp.le.s32.totalorder %v19630_v25, 14  ;;  %13081 = vmatprep.subr.bf16.mxu1 %v14709_v27  ;;  %v16112_v8 = vor.u32 %v1718_v0, %v1715_v43  ;;  %v16116_v37 = vsel %vm1256_vm4, %v15659_v38, %v2082_v36  ;;  %v1606_v27 = vsel %vm1574_vm15, 65537, %v16028_v49 }
 0x15d   : > { %v16121_v29 = vor.u32 %v2308_v56, %v2305_v18  ;;  %v2198_v38 = vsel %vm2166_vm6, 65537, %v16028_v49  ;;  %v2084_v58 = vrot.slane %v16118_v28, 4  ;;  %v2473_v63 = vrot.slane %v2471_v51, 4  ;;  %13196 = vmatpush3.bf16.msra.mxu0 %v14726_v46  ;;  %v14715_v56 = vld [vmem:[#allocation8 + $0x168] sm:$0xff]   ;;  %vm1576_vm6 = vmpackc.low %vm16081_vm2, %vm16081_vm2 }
 0x15e   : > { %4466 = vmatmul.mubr.bf16.gmra.mrb[36].mxu1 %v16051_v7  ;;  %v14712_v7 = vld [vmem:[#allocation8 + $0x118] sm:$0xff]   ;;  %v2476_v13 = vrot.slane %v2474_v10, 5  ;;  %v16140_v4 = vsel %vm1676_vm0, %v16014_v21, %v16112_v8  ;;  %v12417_v19 = vcombine.low %v1606_v27, %v15649_v31  ;;  %v12433_v39 = vcombine.low %v15649_v31, %v2198_v38 }
 0x15f   : > { %4473 = vmatprep.mubr.bf16.mxu1 %v15671_v45  ;;  %19633 = vst [vmem:[#allocation33_spill] sm:$0xff] %v16140_v4  ;;  %13082 = vmatpush3.bf16.msra.mxu1 %v14710_v24  ;;  %vm19453_vm7 = vcmp.ne.s16.totalorder %v16140_v4, 0  ;;  %v16146_v30 = vsel %vm1854_vm8, %v2300_v16, %v16121_v29  ;;  %v16152_v45 = vsel %vm1256_vm4, %v2082_v36, %v2084_v58  ;;  %v19634_v5 = vand.u32 15, %v15747_v57 }
 0x160   : > { %13083 = vmatprep.subr.bf16.mxu1 %v14711_v40  ;;  %v16154_v21 = vor.u32 %v2476_v13, %v2473_v63  ;;  %v1841_v24 = vsel %vm19453_vm7, %v14891_v59, 0  ;;  %v2649_v16 = vsel %vm19453_vm7, %v14892_v1, 0  ;;  %vm19454_vm14 = vcmp.ne.s16.totalorder %v16146_v30, 0  ;;  %v14716_v1 = vld [vmem:[#allocation8 + $0x128] sm:$0xff]  }
 0x161   : > { %v1891_v43 = vshrl.u32 %v1841_v24, 16  ;;  %v1894_v0 = vshll.u32 %v1841_v24, 16  ;;  %v2698_v36 = vshrl.u32 %v2649_v16, 16  ;;  %v2701_v25 = vshll.u32 %v2649_v16, 16 }
 0x162   : > { %v2478_v40 = vsel %vm1676_vm0, %v16064_v3, %v16154_v21  ;;  %v2431_v55 = vsel %vm19454_vm14, %v2142_v14, 0  ;;  %v1722_v23 = vshrl.u32 %v12417_v19, 16  ;;  %v1725_v61 = vshll.u32 %v12417_v19, 16  ;;  %vm2168_vm14 = vmpackc.low %vm16103_vm12, %vm16103_vm12 }
 0x163   : > { %vm16168_vm15 = vcmp.ge.s32.totalorder %v19634_v5, 1  ;;  %13084 = vmatpush3.bf16.msra.mxu1 %v14712_v7  ;;  %4635 = vmatmul.mubr.bf16.gmra.mrb[8].mxu0 %v2478_v40  ;;  %v1893_v26 = vrot.slane %v1891_v43, 3  ;;  %v1896_v51 = vrot.slane %v1894_v0, 4  ;;  %v2700_v10 = vrot.slane %v2698_v36, 3  ;;  %v14717_v0 = vld [vmem:[#allocation8 + $0x170] sm:$0xff]   ;;  %v14729_v36 = vld [vmem:[#allocation8 + $0x1e0] sm:$0xff]  }
 0x164   : > { %v2703_v46 = vrot.slane %v2701_v25, 4  ;;  %v19637_v3 = vand.u32 15, %v15767_v15  ;;  %13085 = vmatprep.subr.bf16.mxu1 %v14713_v50  ;;  %v2480_v57 = vshrl.u32 %v2431_v55, 16  ;;  %v2483_v27 = vshll.u32 %v2431_v55, 16  ;;  %v14730_v40 = vld [vmem:[#allocation8 + $0x1a0] sm:$0xff]   ;;  %v14727_v5 = vld [vmem:[#allocation8 + $0x178] sm:$0xff]   ;;  %13197 = vmatprep.subr.bf16.mxu0 %v14729_v36  ;;  %vm1578_vm12 = vmpackc.low %vm16168_vm15, %vm16168_vm15 }
 0x165   : > { %v1724_v38 = vrot.slane %v1722_v23, 4  ;;  %v1727_v7 = vrot.slane %v1725_v61, 5  ;;  %v16182_v63 = vor.u32 %v1896_v51, %v1893_v26  ;;  %v2312_v19 = vshrl.u32 %v12433_v39, 16  ;;  %v14718_v61 = vld [vmem:[#allocation8 + $0x130] sm:$0xff]   ;;  %13198 = vmatpush3.bf16.msra.mxu0 %v14730_v40 }
 0x166   : > { %vm16177_vm7 = vcmp.le.s32.totalorder %v19637_v3, 14  ;;  %4474 = vmatmul.mubr.bf16.gmra.mrb[40].mxu1 %v16095_v52  ;;  %v16184_v13 = vor.u32 %v2703_v46, %v2700_v10  ;;  %v2315_v59 = vshll.u32 %v12433_v39, 16  ;;  %v2482_v15 = vrot.slane %v2480_v57, 4  ;;  %v14732_v46 = vld [vmem:[#allocation8 + $0x1a8] sm:$0xff]   ;;  %v14733_v40 = vld [vmem:[#allocation8 + $0x1f0] sm:$0xff]  }
 0x167   : > { %4481 = vmatprep.mubr.bf16.mxu1 %v15680_v48  ;;  %v2485_v50 = vrot.slane %v2483_v27, 5  ;;  %v16190_v24 = vor.u32 %v1727_v7, %v1724_v38  ;;  %v1608_v52 = vsel %vm1576_vm6, 65537, %v16028_v49  ;;  %13086 = vmatpush3.bf16.msra.mxu1 %v14714_v20  ;;  %v1898_v39 = vsel %vm1854_vm8, %v16074_v35, %v16182_v63  ;;  %v16212_v35 = vld [vmem:[#allocation2 + $0x38] sm:$0xff] }
 0x168   : > { %v2705_v48 = vsel %vm1854_vm8, %v16085_v41, %v16184_v13  ;;  %v2314_v16 = vrot.slane %v2312_v19, 3  ;;  %v2317_v43 = vrot.slane %v2315_v59, 4  ;;  %13087 = vmatprep.subr.bf16.mxu1 %v14715_v56  ;;  %v12418_v20 = vcombine.low %v1608_v52, %v15649_v31  ;;  %v14731_v56 = vld [vmem:[#allocation8 + $0x1e8] sm:$0xff]  }
 0x169   : > { %4642 = vmatprep.mubr.bf16.mxu0 %v2705_v48  ;;  %v16204_v25 = vor.u32 %v2485_v50, %v2482_v15  ;;  %v16209_v6 = vsel %vm1676_vm0, %v16112_v8, %v16190_v24  ;;  %v2200_v41 = vsel %vm2168_vm14, 65537, %v16028_v49  ;;  %v2086_v8 = vrot.slane %v16212_v35, 4  ;;  %13199 = vmatprep.subr.bf16.mxu0 %v14731_v56 }
 0x16a   : > { %19640 = vst [vmem:[#allocation34_spill] sm:$0xff] %v16209_v6  ;;  %vm19455_vm2 = vcmp.ne.s16.totalorder %v16209_v6, 0  ;;  %v16221_v55 = vor.u32 %v2317_v43, %v2314_v16  ;;  %v12434_v23 = vcombine.low %v15649_v31, %v2200_v41  ;;  %v1731_v10 = vshrl.u32 %v12418_v20, 16  ;;  %13200 = vmatpush3.bf16.msra.mxu0 %v14732_v46 }
 0x16b   : > { %v2487_v26 = vsel %vm1676_vm0, %v16154_v21, %v16204_v25  ;;  %v1842_v34 = vsel %vm19455_vm2, %v16069_v32, 0  ;;  %v2650_v51 = vsel %vm19455_vm2, %v16118_v28, 0  ;;  %13088 = vmatpush3.bf16.msra.mxu1 %v14716_v1  ;;  %v1734_v19 = vshll.u32 %v12418_v20, 16  ;;  %vm2170_vm2 = vmpackc.low %vm16177_vm7, %vm16177_vm7  ;;  %13201 = vmatprep.subr.bf16.mxu0 %v14733_v40 }
 0x16c   : > { %4643 = vmatmul.mubr.bf16.gmra.mrb[12].mxu0 %v2487_v26  ;;  %v1900_v3 = vshrl.u32 %v1842_v34, 16  ;;  %v1903_v57 = vshll.u32 %v1842_v34, 16  ;;  %v2707_v27 = vshrl.u32 %v2650_v51, 16  ;;  %v2710_v38 = vshll.u32 %v2650_v51, 16  ;;  %13089 = vmatprep.subr.bf16.mxu1 %v14717_v0  ;;  %v14734_v34 = vld [vmem:[#allocation8 + $0x1b0] sm:$0xff]  }
 0x16d   : > { %v16237_v21 = vsel %vm1854_vm8, %v16121_v29, %v16221_v55  ;;  %v1733_v7 = vrot.slane %v1731_v10, 4  ;;  %v2321_v59 = vshrl.u32 %v12434_v23, 16  ;;  %v19641_v48 = vand.u32 15, %v15778_v33  ;;  %v14728_v33 = vld [vmem:[#allocation8 + $0x138] sm:$0xff]  }
 0x16e   : > { %4482 = vmatmul.mubr.bf16.gmra.mrb[44].mxu1 %v1898_v39  ;;  %v1902_v15 = vrot.slane %v1900_v3, 3  ;;  %v1905_v50 = vrot.slane %v1903_v57, 4  ;;  %v2709_v52 = vrot.slane %v2707_v27, 3  ;;  %v2712_v1 = vrot.slane %v2710_v38, 4  ;;  %v14735_v10 = vld [vmem:[#allocation8 + $0x1f8] sm:$0xff]   ;;  %13202 = vmatpush3.bf16.msra.mxu0 %v14734_v34  ;;  %v14737_v38 = vld [vmem:[#allocation8 + $0x200] sm:$0xff]  }
 0x16f   : > { %vm16244_vm14 = vcmp.ge.s32.totalorder %v19641_v48, 1  ;;  %4489 = vmatprep.mubr.bf16.mxu1 %v16116_v37  ;;  %vm2415_vm6 = vcmp.ne.s16.totalorder %v16237_v21, 0  ;;  %v1736_v29 = vrot.slane %v1734_v19, 5  ;;  %v2323_v39 = vrot.slane %v2321_v59, 3  ;;  %13090 = vmatpush3.bf16.msra.mxu1 %v14718_v61 }
 0x170   : > { %v2324_v43 = vshll.u32 %v12434_v23, 16  ;;  %v19644_v0 = vand.u32 15, %v15819_v62  ;;  %v16259_v20 = vor.u32 %v1905_v50, %v1902_v15  ;;  %v16261_v37 = vor.u32 %v2712_v1, %v2709_v52  ;;  %13091 = vmatprep.subr.bf16.mxu1 %v14727_v5  ;;  %v16287_v5 = vld [vmem:[#allocation2 + $0x40] sm:$0xff]  ;;  %13203 = vmatprep.subr.bf16.mxu0 %v14735_v10  ;;  %v14736_v15 = vld [vmem:[#allocation8 + $0x1b8] sm:$0xff]  }
 0x171   : > { %v2432_v41 = vsel %vm2415_vm6, %v16069_v32, 0  ;;  %v16271_v62 = vsel %vm1256_vm4, %v2084_v58, %v2086_v8  ;;  %v16273_v56 = vor.u32 %v1736_v29, %v1733_v7  ;;  %v1610_v58 = vsel %vm1578_vm12, 65537, %v16028_v49 }
 0x172   : > { %vm16255_vm5 = vcmp.le.s32.totalorder %v19644_v0, 14  ;;  %v2489_v23 = vshrl.u32 %v2432_v41, 16  ;;  %v2492_v61 = vshll.u32 %v2432_v41, 16  ;;  %v2326_v26 = vrot.slane %v2324_v43, 4  ;;  %13204 = vmatpush3.bf16.msra.mxu0 %v14736_v15  ;;  %v16364_v15 = vld [vmem:[#allocation2 + $0x48] sm:$0xff] }
 0x173   : > { %v1907_v32 = vsel %vm1854_vm8, %v16182_v63, %v16259_v20  ;;  %v2714_v51 = vsel %vm1854_vm8, %v16184_v13, %v16261_v37  ;;  %v2202_v63 = vsel %vm2170_vm2, 65537, %v16028_v49  ;;  %v16298_v18 = vsel %vm1676_vm0, %v16190_v24, %v16273_v56  ;;  %13092 = vmatpush3.bf16.msra.mxu1 %v14728_v33  ;;  %vm1580_vm2 = vmpackc.low %vm16244_vm14, %vm16244_vm14 }
 0x174   : > { %4650 = vmatprep.mubr.bf16.mxu0 %v2714_v51  ;;  %v2491_v13 = vrot.slane %v2489_v23, 4  ;;  %v2494_v46 = vrot.slane %v2492_v61, 5  ;;  %19647 = vst [vmem:[#allocation35_spill] sm:$0xff] %v16298_v18  ;;  %v16300_v3 = vor.u32 %v2326_v26, %v2323_v39  ;;  %vm19457_vm15 = vcmp.ne.s16.totalorder %v16298_v18, 0  ;;  %14317 = vmatprep.subr.bf16.mxu1 %v14737_v38 }
 0x175   : > { %v12419_v57 = vcombine.low %v1610_v58, %v15649_v31  ;;  %v12435_v14 = vcombine.low %v15649_v31, %v2202_v63  ;;  %v2088_v27 = vrot.slane %v16287_v5, 4  ;;  %v1843_v19 = vsel %vm19457_vm15, %v16118_v28, 0 }
 0x176   : > { %v2495_v7 = vor.u32 %v2494_v46, %v2491_v13  ;;  %v2651_v24 = vsel %vm19457_vm15, %v16212_v35, 0  ;;  %v16315_v59 = vsel %vm1854_vm8, %v16221_v55, %v16300_v3  ;;  %4490 = vmatmul.mubr.bf16.gmra.mrb[48].mxu1 %v1907_v32  ;;  %v1909_v50 = vshrl.u32 %v1843_v19, 16  ;;  %vm2172_vm15 = vmpackc.low %vm16255_vm5, %vm16255_vm5 }
 0x177   : > { %v1912_v52 = vshll.u32 %v1843_v19, 16  ;;  %v2716_v1 = vshrl.u32 %v2651_v24, 16  ;;  %v2719_v48 = vshll.u32 %v2651_v24, 16  ;;  %4497 = vmatprep.mubr.bf16.mxu1 %v16152_v45  ;;  %vm19458_vm7 = vcmp.ne.s16.totalorder %v16315_v59, 0 }
 0x178   : > { %v2496_v29 = vsel %vm1676_vm0, %v16204_v25, %v2495_v7  ;;  %v1740_v39 = vshrl.u32 %v12419_v57, 16  ;;  %v1743_v43 = vshll.u32 %v12419_v57, 16  ;;  %v1911_v55 = vrot.slane %v1909_v50, 3 }
 0x179   : > { %4651 = vmatmul.mubr.bf16.gmra.mrb[16].mxu0 %v2496_v29  ;;  %v1914_v0 = vrot.slane %v1912_v52, 4  ;;  %v2718_v33 = vrot.slane %v2716_v1, 3  ;;  %v2721_v41 = vrot.slane %v2719_v48, 4  ;;  %v2433_v40 = vsel %vm19458_vm7, %v16118_v28, 0 }
 0x17a   : > { %v1742_v23 = vrot.slane %v1740_v39, 4  ;;  %v1745_v61 = vrot.slane %v1743_v43, 5  ;;  %v2330_v26 = vshrl.u32 %v12435_v14, 16  ;;  %v19648_v45 = vand.u32 15, %v15822_v44 }
 0x17b   : > { %v1915_v34 = vor.u32 %v1914_v0, %v1911_v55  ;;  %v2722_v32 = vor.u32 %v2721_v41, %v2718_v33  ;;  %v2498_v51 = vshrl.u32 %v2433_v40, 16  ;;  %v2501_v58 = vshll.u32 %v2433_v40, 16 }
 0x17c   : > { %vm16329_vm12 = vcmp.ge.s32.totalorder %v19648_v45, 1  ;;  %v19651_v28 = vand.u32 15, %v15827_v12  ;;  %v1746_v44 = vor.u32 %v1745_v61, %v1742_v23  ;;  %v2332_v10 = vrot.slane %v2330_v26, 3 }
 0x17d   : > { %v2333_v13 = vshll.u32 %v12435_v14, 16  ;;  %v2089_v46 = vsel %vm1256_vm4, %v2086_v8, %v2088_v27  ;;  %v1916_v36 = vsel %vm1854_vm8, %v16259_v20, %v1915_v34  ;;  %v2723_v57 = vsel %vm1854_vm8, %v16261_v37, %v2722_v32 }
 0x17e   : > { %vm16338_vm7 = vcmp.le.s32.totalorder %v19651_v28, 14  ;;  %v2500_v12 = vrot.slane %v2498_v51, 4  ;;  %v2503_v38 = vrot.slane %v2501_v58, 5  ;;  %4658 = vmatprep.mubr.bf16.mxu0 %v2723_v57  ;;  %v16353_v19 = vsel %vm1676_vm0, %v16273_v56, %v1746_v44  ;;  %4498 = vmatmul.mubr.bf16.gmra.mrb[52].mxu1 %v1916_v36 }
 0x17f   : > { %19654 = vst [vmem:[#allocation36_spill] sm:$0xff] %v16353_v19  ;;  %v2335_v14 = vrot.slane %v2333_v13, 4  ;;  %v1612_v8 = vsel %vm1580_vm2, 65537, %v16028_v49  ;;  %v2204_v20 = vsel %vm2172_vm15, 65537, %v16028_v49  ;;  %vm19461_vm5 = vcmp.ne.s16.totalorder %v16353_v19, 0  ;;  %4505 = vmatprep.mubr.bf16.mxu1 %v16271_v62  ;;  %vm1582_vm15 = vmpackc.low %vm16329_vm12, %vm16329_vm12 }
 0x180   : > { %v2504_v24 = vor.u32 %v2503_v38, %v2500_v12  ;;  %v12420_v37 = vcombine.low %v1612_v8, %v15649_v31  ;;  %v12436_v56 = vcombine.low %v15649_v31, %v2204_v20  ;;  %v1844_v16 = vsel %vm19461_vm5, %v16212_v35, 0  ;;  %vm2174_vm2 = vmpackc.low %vm16338_vm7, %vm16338_vm7 }
 0x181   : > { %v2652_v50 = vsel %vm19461_vm5, %v16287_v5, 0  ;;  %v2336_v52 = vor.u32 %v2335_v14, %v2332_v10  ;;  %v2090_v1 = vrot.slane %v16364_v15, 4  ;;  %v1918_v29 = vshrl.u32 %v1844_v16, 16 }
 0x182   : > { %v2505_v48 = vsel %vm1676_vm0, %v2495_v7, %v2504_v24  ;;  %v1921_v39 = vshll.u32 %v1844_v16, 16  ;;  %v2725_v43 = vshrl.u32 %v2652_v50, 16  ;;  %v2728_v55 = vshll.u32 %v2652_v50, 16 }
 0x183   : > { %4659 = vmatmul.mubr.bf16.gmra.mrb[20].mxu0 %v2505_v48  ;;  %v16378_v62 = vsel %vm1854_vm8, %v16300_v3, %v2336_v52  ;;  %v1749_v0 = vshrl.u32 %v12420_v37, 16  ;;  %v1752_v33 = vshll.u32 %v12420_v37, 16  ;;  %v1920_v41 = vrot.slane %v1918_v29, 3 }
 0x184   : > { %v1923_v40 = vrot.slane %v1921_v39, 4  ;;  %v2727_v23 = vrot.slane %v2725_v43, 3  ;;  %vm2417_vm14 = vcmp.ne.s16.totalorder %v16378_v62, 0  ;;  %v2730_v61 = vrot.slane %v2728_v55, 4 }
 0x185   : > { %v2434_v7 = vsel %vm2417_vm14, %v16212_v35, 0  ;;  %v1751_v26 = vrot.slane %v1749_v0, 4  ;;  %v1754_v45 = vrot.slane %v1752_v33, 5  ;;  %v2339_v10 = vshrl.u32 %v12436_v56, 16 }
 0x186   : > { %v1924_v51 = vor.u32 %v1923_v40, %v1920_v41  ;;  %v2507_v58 = vshrl.u32 %v2434_v7, 16  ;;  %v2510_v28 = vshll.u32 %v2434_v7, 16  ;;  %v2731_v3 = vor.u32 %v2730_v61, %v2727_v23 }
 0x187   : > { %v1755_v13 = vor.u32 %v1754_v45, %v1751_v26  ;;  %v2342_v36 = vshll.u32 %v12436_v56, 16  ;;  %v2091_v57 = vsel %vm1256_vm4, %v2088_v27, %v2090_v1  ;;  %v2341_v25 = vrot.slane %v2339_v10, 3 }
 0x188   : > { %v1925_v35 = vsel %vm1854_vm8, %v1915_v34, %v1924_v51  ;;  %v2509_v12 = vrot.slane %v2507_v58, 4  ;;  %v2512_v38 = vrot.slane %v2510_v28, 5  ;;  %v2732_v14 = vsel %vm1854_vm8, %v2722_v32, %v2731_v3  ;;  %v16419_v28 = vld [vmem:[#allocation2 + $0x50] sm:$0xff] }
 0x189   : > { %4506 = vmatmul.mubr.bf16.gmra.mrb[56].mxu1 %v1925_v35  ;;  %v16398_v8 = vsel %vm1676_vm0, %v1746_v44, %v1755_v13  ;;  %v2344_v20 = vrot.slane %v2342_v36, 4  ;;  %v1614_v37 = vsel %vm1582_vm15, 65537, %v16028_v49  ;;  %4666 = vmatprep.mubr.bf16.mxu0 %v2732_v14  ;;  %v2206_v34 = vsel %vm2174_vm2, 65537, %v16028_v49 }
 0x18a   : > { %19655 = vst [vmem:[#allocation37_spill] sm:$0xff] %v16398_v8  ;;  %v2513_v27 = vor.u32 %v2512_v38, %v2509_v12  ;;  %4513 = vmatprep.mubr.bf16.mxu1 %v2089_v46  ;;  %vm19460_vm12 = vcmp.ne.s16.totalorder %v16398_v8, 0  ;;  %v12421_v63 = vcombine.low %v1614_v37, %v15649_v31  ;;  %v12437_v16 = vcombine.low %v15649_v31, %v2206_v34 }
 0x18b   : > { %v1845_v56 = vsel %vm19460_vm12, %v16287_v5, 0  ;;  %v2653_v32 = vsel %vm19460_vm12, %v16364_v15, 0  ;;  %v2345_v44 = vor.u32 %v2344_v20, %v2341_v25  ;;  %v2092_v12 = vrot.slane %v16419_v28, 4 }
 0x18c   : > { %v2514_v50 = vsel %vm1676_vm0, %v2504_v24, %v2513_v27  ;;  %v1927_v46 = vshrl.u32 %v1845_v56, 16  ;;  %v1930_v48 = vshll.u32 %v1845_v56, 16  ;;  %v2734_v29 = vshrl.u32 %v2653_v32, 16 }
 0x18d   : > { %4667 = vmatmul.mubr.bf16.gmra.mrb[24].mxu0 %v2514_v50  ;;  %v2737_v39 = vshll.u32 %v2653_v32, 16  ;;  %v16413_v43 = vsel %vm1854_vm8, %v2336_v52, %v2345_v44  ;;  %v1758_v55 = vshrl.u32 %v12421_v63, 16  ;;  %v1761_v0 = vshll.u32 %v12421_v63, 16  ;;  %v16435_v32 = vld [vmem:[#allocation2 + $0x58] sm:$0xff] }
 0x18e   : > { %19656 = vst [vmem:[#allocation38_spill] sm:$0xff] %v16413_v43  ;;  %v1929_v33 = vrot.slane %v1927_v46, 3  ;;  %v1932_v41 = vrot.slane %v1930_v48, 4  ;;  %v2736_v40 = vrot.slane %v2734_v29, 3  ;;  %vm19462_vm7 = vcmp.ne.s16.totalorder %v16413_v43, 0 }
 0x18f   : > { %v2739_v23 = vrot.slane %v2737_v39, 4  ;;  %v2435_v24 = vsel %vm19462_vm7, %v16287_v5, 0  ;;  %v1760_v61 = vrot.slane %v1758_v55, 4  ;;  %v1763_v7 = vrot.slane %v1761_v0, 5 }
 0x190   : > { %v1933_v26 = vor.u32 %v1932_v41, %v1929_v33  ;;  %v2516_v45 = vshrl.u32 %v2435_v24, 16  ;;  %v2519_v58 = vshll.u32 %v2435_v24, 16  ;;  %v2348_v52 = vshrl.u32 %v12437_v16, 16 }
 0x191   : > { %v2740_v10 = vor.u32 %v2739_v23, %v2736_v40  ;;  %v16421_v36 = vor.u32 %v1763_v7, %v1760_v61  ;;  %v2351_v35 = vshll.u32 %v12437_v16, 16  ;;  %v2093_v34 = vsel %vm1256_vm4, %v2090_v1, %v2092_v12 }
 0x192   : > { %v1934_v38 = vsel %vm1854_vm8, %v1924_v51, %v1933_v26  ;;  %v2518_v25 = vrot.slane %v2516_v45, 4  ;;  %v2521_v14 = vrot.slane %v2519_v58, 5  ;;  %v2350_v20 = vrot.slane %v2348_v52, 3 }
 0x193   : > { %4514 = vmatmul.mubr.bf16.gmra.mrb[60].mxu1 %v1934_v38  ;;  %v2741_v5 = vsel %vm1854_vm8, %v2731_v3, %v2740_v10  ;;  %v16428_v37 = vsel %vm1676_vm0, %v1755_v13, %v16421_v36  ;;  %v2353_v63 = vrot.slane %v2351_v35, 4  ;;  %v774_v51 = vand.u32 15, %v15861_v47 }
 0x194   : > { %19657 = vst [vmem:[#allocation39_spill] sm:$0xff] %v16428_v37  ;;  %4674 = vmatprep.mubr.bf16.mxu0 %v2741_v5  ;;  %v2522_v56 = vor.u32 %v2521_v14, %v2518_v25  ;;  %4521 = vmatprep.mubr.bf16.mxu1 %v2091_v57  ;;  %vm19459_vm15 = vcmp.ne.s16.totalorder %v16428_v37, 0  ;;  %v619_v3 = vadd.s32 168, %v15609_v17  ;;  %v2094_v57 = vrot.slane %v16435_v32, 4 }
 0x195   : > { %v1846_v13 = vsel %vm19459_vm15, %v16364_v15, 0  ;;  %v2654_v16 = vsel %vm19459_vm15, %v16419_v28, 0  ;;  %v16444_v1 = vor.u32 %v2353_v63, %v2350_v20  ;;  %vm1034_vm2 = vcmp.ge.s32.totalorder %v774_v51, 1  ;;  %v16469_v20 = vld [vmem:[#allocation2 + $0x60] sm:$0xff] }
 0x196   : > { %v2523_v50 = vsel %vm1676_vm0, %v2513_v27, %v2522_v56  ;;  %v1936_v46 = vshrl.u32 %v1846_v13, 16  ;;  %v1939_v47 = vshll.u32 %v1846_v13, 16  ;;  %v2743_v48 = vshrl.u32 %v2654_v16, 16  ;;  %vm1584_vm12 = vmpackc.low %vm1034_vm2, %vm1034_vm2 }
 0x197   : > { %4675 = vmatmul.mubr.bf16.gmra.mrb[28].mxu0 %v2523_v50  ;;  %v2746_v29 = vshll.u32 %v2654_v16, 16  ;;  %v16450_v39 = vsel %vm1854_vm8, %v2345_v44, %v16444_v1  ;;  %v781_v55 = vand.u32 15, %v619_v3  ;;  %v1616_v23 = vsel %vm1584_vm12, 65537, %v16028_v49 }
 0x198   : > { %19658 = vst [vmem:[#allocation40_spill] sm:$0xff] %v16450_v39  ;;  %v1938_v0 = vrot.slane %v1936_v46, 3  ;;  %v1941_v33 = vrot.slane %v1939_v47, 4  ;;  %v2745_v41 = vrot.slane %v2743_v48, 3  ;;  %vm2419_vm15 = vcmp.ne.s16.totalorder %v16450_v39, 0 }
 0x199   : > { %v2748_v40 = vrot.slane %v2746_v29, 4  ;;  %v2436_v27 = vsel %vm2419_vm15, %v16364_v15, 0  ;;  %vm1131_vm5 = vcmp.le.s32.totalorder %v781_v55, 14  ;;  %v12422_v7 = vcombine.low %v1616_v23, %v15649_v31 }
 0x19a   : > { %v16457_v24 = vor.u32 %v1941_v33, %v1938_v0  ;;  %v2525_v44 = vshrl.u32 %v2436_v27, 16  ;;  %v2528_v61 = vshll.u32 %v2436_v27, 16  ;;  %vm2176_vm7 = vmpackc.low %vm1131_vm5, %vm1131_vm5  ;;  %v16464_v52 = vsel %vm1256_vm4, %v2092_v12, %v2094_v57  ;;  %v16486_v33 = vld [vmem:[#allocation2] sm:$0xff]  ;;  %v16490_v27 = vld [vmem:[#allocation2 + $0x68] sm:$0xff] }
 0x19b   : > { %v16460_v45 = vor.u32 %v2748_v40, %v2745_v41  ;;  %v2208_v58 = vsel %vm2176_vm7, 65537, %v16028_v49  ;;  %v620_v35 = vadd.s32 176, %v15609_v17  ;;  %v1767_v14 = vshrl.u32 %v12422_v7, 16 }
 0x19c   : > { %v1943_v15 = vsel %vm1854_vm8, %v1933_v26, %v16457_v24  ;;  %v2527_v38 = vrot.slane %v2525_v44, 4  ;;  %v2530_v25 = vrot.slane %v2528_v61, 5  ;;  %v1770_v63 = vshll.u32 %v12422_v7, 16 }
 0x19d   : > { %4522 = vmatmul.mubr.bf16.gmra.mrb[64].mxu1 %v1943_v15  ;;  %v2750_v5 = vsel %vm1854_vm8, %v2740_v10, %v16460_v45  ;;  %v12438_v49 = vcombine.low %v15649_v31, %v2208_v58  ;;  %v788_v51 = vand.u32 15, %v620_v35  ;;  %v1769_v3 = vrot.slane %v1767_v14, 4 }
 0x19e   : > { %4682 = vmatprep.mubr.bf16.mxu0 %v2750_v5  ;;  %v16474_v12 = vor.u32 %v2530_v25, %v2527_v38  ;;  %4529 = vmatprep.mubr.bf16.mxu1 %v2093_v34  ;;  %v621_v26 = vadd.s32 184, %v15609_v17  ;;  %v2096_v13 = vrot.slane %v16469_v20, 4  ;;  %v1772_v16 = vrot.slane %v1770_v63, 5 }
 0x19f   : > { %v2357_v50 = vshrl.u32 %v12438_v49, 16  ;;  %v2360_v46 = vshll.u32 %v12438_v49, 16  ;;  %vm1036_vm5 = vcmp.ge.s32.totalorder %v788_v51, 1  ;;  %v622_v34 = vadd.s32 192, %v15609_v17 }
 0x1a0   : > { %v2532_v10 = vsel %vm1676_vm0, %v2522_v56, %v16474_v12  ;;  %vm1586_vm12 = vmpackc.low %vm1036_vm5, %vm1036_vm5  ;;  %v795_v47 = vand.u32 15, %v621_v26  ;;  %v16483_v48 = vsel %vm1256_vm4, %v2094_v57, %v2096_v13  ;;  %v1773_v29 = vor.u32 %v1772_v16, %v1769_v3 }
 0x1a1   : > { %4683 = vmatmul.mubr.bf16.gmra.mrb[32].mxu0 %v2532_v10  ;;  %v2359_v55 = vrot.slane %v2357_v50, 3  ;;  %v2362_v0 = vrot.slane %v2360_v46, 4  ;;  %v1618_v41 = vsel %vm1586_vm12, 65537, %v16486_v33  ;;  %v802_v56 = vand.u32 15, %v622_v34 }
 0x1a2   : > { %v12423_v40 = vcombine.low %v1618_v41, %v15649_v31  ;;  %vm1133_vm7 = vcmp.le.s32.totalorder %v795_v47, 14  ;;  %v623_v23 = vadd.s32 200, %v15609_v17  ;;  %v16495_v57 = vsel %vm1676_vm0, %v16421_v36, %v1773_v29 }
 0x1a3   : > { %19659 = vst [vmem:[#allocation41_spill] sm:$0xff] %v16495_v57  ;;  %v2363_v44 = vor.u32 %v2362_v0, %v2359_v55  ;;  %vm2178_vm2 = vmpackc.low %vm1133_vm7, %vm1133_vm7  ;;  %v2098_v61 = vrot.slane %v16490_v27, 4  ;;  %v16499_v7 = vadd.s32 208, %v15609_v17  ;;  %vm19463_vm5 = vcmp.ne.s16.totalorder %v16495_v57, 0 }
 0x1a4   : > { %v1776_v58 = vshrl.u32 %v12423_v40, 16  ;;  %v1779_v35 = vshll.u32 %v12423_v40, 16  ;;  %v2210_v15 = vsel %vm2178_vm2, 65537, %v16486_v33  ;;  %v1847_v38 = vsel %vm19463_vm5, %v16419_v28, 0 }
 0x1a5   : > { %v2655_v36 = vsel %vm19463_vm5, %v16435_v32, 0  ;;  %v16511_v25 = vsel %vm1854_vm8, %v16444_v1, %v2363_v44  ;;  %v12439_v14 = vcombine.low %v15649_v31, %v2210_v15  ;;  %v1945_v5 = vshrl.u32 %v1847_v38, 16 }
 0x1a6   : > { %19660 = vst [vmem:[#allocation42_spill] sm:$0xff] %v16511_v25  ;;  %v1948_v63 = vshll.u32 %v1847_v38, 16  ;;  %v2752_v49 = vshrl.u32 %v2655_v36, 16  ;;  %v2755_v51 = vshll.u32 %v2655_v36, 16  ;;  %vm19464_vm12 = vcmp.ne.s16.totalorder %v16511_v25, 0 }
 0x1a7   : > { %v1778_v3 = vrot.slane %v1776_v58, 4  ;;  %v1781_v26 = vrot.slane %v1779_v35, 5  ;;  %v2366_v16 = vshrl.u32 %v12439_v14, 16  ;;  %v1947_v50 = vrot.slane %v1945_v5, 3 }
 0x1a8   : > { %v1950_v46 = vrot.slane %v1948_v63, 4  ;;  %v2754_v10 = vrot.slane %v2752_v49, 3  ;;  %v2757_v47 = vrot.slane %v2755_v51, 4  ;;  %v2437_v1 = vsel %vm19464_vm12, %v16419_v28, 0 }
 0x1a9   : > { %v1782_v34 = vor.u32 %v1781_v26, %v1778_v3  ;;  %v2368_v55 = vrot.slane %v2366_v16, 3  ;;  %v2369_v0 = vshll.u32 %v12439_v14, 16  ;;  %v2534_v15 = vshrl.u32 %v2437_v1, 16 }
 0x1aa   : > { %v1951_v41 = vor.u32 %v1950_v46, %v1947_v50  ;;  %v2758_v40 = vor.u32 %v2757_v47, %v2754_v10  ;;  %v2537_v38 = vshll.u32 %v2437_v1, 16  ;;  %vm1038_vm7 = vcmp.ge.s32.totalorder %v802_v56, 1 }
 0x1ab   : > { %v16519_v36 = vsel %vm1676_vm0, %v1773_v29, %v1782_v34  ;;  %v2371_v58 = vrot.slane %v2369_v0, 4  ;;  %v809_v35 = vand.u32 15, %v623_v23  ;;  %v2536_v28 = vrot.slane %v2534_v15, 4  ;;  %vm1588_vm2 = vmpackc.low %vm1038_vm7, %vm1038_vm7 }
 0x1ac   : > { %19661 = vst [vmem:[#allocation43_spill] sm:$0xff] %v16519_v36  ;;  %v1952_v5 = vsel %vm1854_vm8, %v16457_v24, %v1951_v41  ;;  %v2759_v63 = vsel %vm1854_vm8, %v16460_v45, %v2758_v40  ;;  %v2539_v49 = vrot.slane %v2537_v38, 5  ;;  %vm19465_vm5 = vcmp.ne.s16.totalorder %v16519_v36, 0 }
 0x1ad   : > { %4530 = vmatmul.mubr.bf16.gmra.mrb[68].mxu1 %v1952_v5  ;;  %4690 = vmatprep.mubr.bf16.mxu0 %v2759_v63  ;;  %v16526_v14 = vor.u32 %v2371_v58, %v2368_v55  ;;  %v1620_v29 = vsel %vm1588_vm2, 65537, %v16486_v33  ;;  %vm16529_vm12 = vcmp.le.s32.totalorder %v809_v35, 14  ;;  %v1848_v24 = vsel %vm19465_vm5, %v16435_v32, 0 }
 0x1ae   : > { %v2540_v23 = vor.u32 %v2539_v49, %v2536_v28  ;;  %4537 = vmatprep.mubr.bf16.mxu1 %v16464_v52  ;;  %v2656_v45 = vsel %vm19465_vm5, %v16469_v20, 0  ;;  %v12424_v51 = vcombine.low %v1620_v29, %v15649_v31  ;;  %v1954_v3 = vshrl.u32 %v1848_v24, 16  ;;  %vm2180_vm7 = vmpackc.low %vm16529_vm12, %vm16529_vm12 }
 0x1af   : > { %v1957_v26 = vshll.u32 %v1848_v24, 16  ;;  %v2761_v16 = vshrl.u32 %v2656_v45, 16  ;;  %v2764_v50 = vshll.u32 %v2656_v45, 16  ;;  %v16548_v46 = vsel %vm1854_vm8, %v2363_v44, %v16526_v14 }
 0x1b0   : > { %v2541_v52 = vsel %vm1676_vm0, %v16474_v12, %v2540_v23  ;;  %19664 = vst [vmem:[#allocation44_spill] sm:$0xff] %v16548_v46  ;;  %v1785_v10 = vshrl.u32 %v12424_v51, 16  ;;  %v1788_v47 = vshll.u32 %v12424_v51, 16  ;;  %v1956_v1 = vrot.slane %v1954_v3, 3 }
 0x1b1   : > { %4691 = vmatmul.mubr.bf16.gmra.mrb[36].mxu0 %v2541_v52  ;;  %v1959_v55 = vrot.slane %v1957_v26, 4  ;;  %v2763_v0 = vrot.slane %v2761_v16, 3  ;;  %v2766_v15 = vrot.slane %v2764_v50, 4  ;;  %vm19468_vm2 = vcmp.ne.s16.totalorder %v16548_v46, 0 }
 0x1b2   : > { %v1787_v38 = vrot.slane %v1785_v10, 4  ;;  %v1790_v58 = vrot.slane %v1788_v47, 5  ;;  %v2212_v35 = vsel %vm2180_vm7, 65537, %v16486_v33  ;;  %v2438_v12 = vsel %vm19468_vm2, %v16435_v32, 0 }
 0x1b3   : > { %v1960_v5 = vor.u32 %v1959_v55, %v1956_v1  ;;  %v2767_v63 = vor.u32 %v2766_v15, %v2763_v0  ;;  %v12440_v44 = vcombine.low %v15649_v31, %v2212_v35  ;;  %v2543_v28 = vshrl.u32 %v2438_v12, 16 }
 0x1b4   : > { %v2546_v49 = vshll.u32 %v2438_v12, 16  ;;  %v16556_v29 = vor.u32 %v1790_v58, %v1787_v38  ;;  %v2099_v56 = vsel %vm1256_vm4, %v2096_v13, %v2098_v61  ;;  %v816_v50 = vand.u32 15, %v16499_v7 }
 0x1b5   : > { %v1961_v24 = vsel %vm1854_vm8, %v1951_v41, %v1960_v5  ;;  %v2768_v45 = vsel %vm1854_vm8, %v2758_v40, %v2767_v63  ;;  %v2375_v51 = vshrl.u32 %v12440_v44, 16  ;;  %v2378_v3 = vshll.u32 %v12440_v44, 16 }
 0x1b6   : > { %4538 = vmatmul.mubr.bf16.gmra.mrb[72].mxu1 %v1961_v24  ;;  %4698 = vmatprep.mubr.bf16.mxu0 %v2768_v45  ;;  %v2545_v32 = vrot.slane %v2543_v28, 4  ;;  %v2548_v26 = vrot.slane %v2546_v49, 5  ;;  %v16567_v16 = vsel %vm1676_vm0, %v1782_v34, %v16556_v29  ;;  %v625_v40 = vadd.s32 216, %v15609_v17  ;;  %v16583_v28 = vld [vmem:[#allocation2 + $0x70] sm:$0xff] }
 0x1b7   : > { %19665 = vst [vmem:[#allocation45_spill] sm:$0xff] %v16567_v16  ;;  %4545 = vmatprep.mubr.bf16.mxu1 %v16483_v48  ;;  %vm19466_vm12 = vcmp.ne.s16.totalorder %v16567_v16, 0  ;;  %v2377_v13 = vrot.slane %v2375_v51, 3  ;;  %v2380_v41 = vrot.slane %v2378_v3, 4  ;;  %vm1040_vm7 = vcmp.ge.s32.totalorder %v816_v50, 1 }
 0x1b8   : > { %v2549_v52 = vor.u32 %v2548_v26, %v2545_v32  ;;  %v1849_v10 = vsel %vm19466_vm12, %v16469_v20, 0  ;;  %v2657_v34 = vsel %vm19466_vm12, %v16490_v27, 0  ;;  %vm1590_vm5 = vmpackc.low %vm1040_vm7, %vm1040_vm7  ;;  %v823_v38 = vand.u32 15, %v625_v40 }
 0x1b9   : > { %v1963_v47 = vshrl.u32 %v1849_v10, 16  ;;  %v1966_v7 = vshll.u32 %v1849_v10, 16  ;;  %v2770_v1 = vshrl.u32 %v2657_v34, 16  ;;  %v2773_v48 = vshll.u32 %v2657_v34, 16  ;;  %v16606_v34 = vld [vmem:[#allocation2 + $0x78] sm:$0xff] }
 0x1ba   : > { %v2550_v55 = vsel %vm1676_vm0, %v2540_v23, %v2549_v52  ;;  %v16580_v0 = vor.u32 %v2380_v41, %v2377_v13  ;;  %v1622_v15 = vsel %vm1590_vm5, 65537, %v16486_v33  ;;  %vm1137_vm7 = vcmp.le.s32.totalorder %v823_v38, 14 }
 0x1bb   : > { %4699 = vmatmul.mubr.bf16.gmra.mrb[40].mxu0 %v2550_v55  ;;  %v1965_v58 = vrot.slane %v1963_v47, 3  ;;  %v1968_v35 = vrot.slane %v1966_v7, 4  ;;  %v2772_v12 = vrot.slane %v2770_v1, 3  ;;  %v2775_v44 = vrot.slane %v2773_v48, 4  ;;  %vm2182_vm12 = vmpackc.low %vm1137_vm7, %vm1137_vm7 }
 0x1bc   : > { %v16588_v49 = vsel %vm1854_vm8, %v16526_v14, %v16580_v0  ;;  %v12425_v24 = vcombine.low %v1622_v15, %v15649_v31  ;;  %v2100_v23 = vrot.slane %v16583_v28, 4  ;;  %v626_v3 = vadd.s32 224, %v15609_v17 }
 0x1bd   : > { %19666 = vst [vmem:[#allocation46_spill] sm:$0xff] %v16588_v49  ;;  %v16592_v45 = vor.u32 %v1968_v35, %v1965_v58  ;;  %v16594_v51 = vor.u32 %v2775_v44, %v2772_v12  ;;  %vm19467_vm5 = vcmp.ne.s16.totalorder %v16588_v49, 0  ;;  %v2214_v50 = vsel %vm2182_vm12, 65537, %v16486_v33 }
 0x1be   : > { %v2439_v32 = vsel %vm19467_vm5, %v16469_v20, 0  ;;  %v1794_v14 = vshrl.u32 %v12425_v24, 16  ;;  %v1797_v26 = vshll.u32 %v12425_v24, 16  ;;  %v12441_v20 = vcombine.low %v15649_v31, %v2214_v50 }
 0x1bf   : > { %v1970_v13 = vsel %vm1854_vm8, %v1960_v5, %v16592_v45  ;;  %v2777_v41 = vsel %vm1854_vm8, %v2767_v63, %v16594_v51  ;;  %v2552_v40 = vshrl.u32 %v2439_v32, 16  ;;  %v2555_v10 = vshll.u32 %v2439_v32, 16 }
 0x1c0   : > { %4546 = vmatmul.mubr.bf16.gmra.mrb[76].mxu1 %v1970_v13  ;;  %4706 = vmatprep.mubr.bf16.mxu0 %v2777_v41  ;;  %v1796_v47 = vrot.slane %v1794_v14, 4  ;;  %v1799_v7 = vrot.slane %v1797_v26, 5  ;;  %v16612_v1 = vsel %vm1256_vm4, %v2098_v61, %v2100_v23  ;;  %v830_v55 = vand.u32 15, %v626_v3 }
 0x1c1   : > { %v2554_v48 = vrot.slane %v2552_v40, 4  ;;  %v2557_v5 = vrot.slane %v2555_v10, 5  ;;  %4553 = vmatprep.mubr.bf16.mxu1 %v2099_v56  ;;  %v627_v63 = vadd.s32 232, %v15609_v17  ;;  %v2384_v38 = vshrl.u32 %v12441_v20, 16 }
 0x1c2   : > { %v1800_v15 = vor.u32 %v1799_v7, %v1796_v47  ;;  %v2387_v58 = vshll.u32 %v12441_v20, 16  ;;  %v19473_v35 = vrot.slane %v16606_v34, 4  ;;  %vm1042_vm12 = vcmp.ge.s32.totalorder %v830_v55, 1 }
 0x1c3   : > { %v16616_v12 = vor.u32 %v2557_v5, %v2554_v48  ;;  %v837_v44 = vand.u32 15, %v627_v63  ;;  %v628_v24 = vadd.s32 240, %v15609_v17  ;;  %v2386_v32 = vrot.slane %v2384_v38, 3  ;;  %vm1592_vm7 = vmpackc.low %vm1042_vm12, %vm1042_vm12 }
 0x1c4   : > { %v16621_v61 = vsel %vm1676_vm0, %v16556_v29, %v1800_v15  ;;  %v2389_v56 = vrot.slane %v2387_v58, 4  ;;  %v16626_v3 = vsel %vm1256_vm4, %v2100_v23, %v19473_v35  ;;  %v1624_v26 = vsel %vm1592_vm7, 65537, %v16486_v33 }
 0x1c5   : > { %19667 = vst [vmem:[#allocation47_spill] sm:$0xff] %v16621_v61  ;;  %v2559_v14 = vsel %vm1676_vm0, %v2549_v52, %v16616_v12  ;;  %vm19469_vm5 = vcmp.ne.s16.totalorder %v16621_v61, 0  ;;  %vm1139_vm2 = vcmp.le.s32.totalorder %v837_v44, 14  ;;  %v12426_v23 = vcombine.low %v1624_v26, %v15649_v31 }
 0x1c6   : > { %4707 = vmatmul.mubr.bf16.gmra.mrb[44].mxu0 %v2559_v14  ;;  %v1850_v29 = vsel %vm19469_vm5, %v16490_v27, 0  ;;  %v2658_v50 = vsel %vm19469_vm5, %v16583_v28, 0  ;;  %v16638_v13 = vor.u32 %v2389_v56, %v2386_v32  ;;  %vm2184_vm12 = vmpackc.low %vm1139_vm2, %vm1139_vm2  ;;  %v844_v26 = vand.u32 15, %v628_v24 }
 0x1c7   : > { %v1972_v52 = vshrl.u32 %v1850_v29, 16  ;;  %v1975_v41 = vshll.u32 %v1850_v29, 16  ;;  %v2779_v40 = vshrl.u32 %v2658_v50, 16  ;;  %v2782_v10 = vshll.u32 %v2658_v50, 16 }
 0x1c8   : > { %v16644_v47 = vsel %vm1854_vm8, %v16580_v0, %v16638_v13  ;;  %v1803_v7 = vshrl.u32 %v12426_v23, 16  ;;  %v1806_v20 = vshll.u32 %v12426_v23, 16  ;;  %v2216_v48 = vsel %vm2184_vm12, 65537, %v16486_v33 }
 0x1c9   : > { %19668 = vst [vmem:[#allocation48_spill] sm:$0xff] %v16644_v47  ;;  %v1974_v5 = vrot.slane %v1972_v52, 3  ;;  %v1977_v55 = vrot.slane %v1975_v41, 4  ;;  %v2781_v63 = vrot.slane %v2779_v40, 3  ;;  %v2784_v38 = vrot.slane %v2782_v10, 4 }
 0x1ca   : > { %vm2423_vm7 = vcmp.ne.s16.totalorder %v16644_v47, 0  ;;  %v1805_v58 = vrot.slane %v1803_v7, 4  ;;  %v1808_v44 = vrot.slane %v1806_v20, 5  ;;  %v12442_v32 = vcombine.low %v15649_v31, %v2216_v48 }
 0x1cb   : > { %v1978_v56 = vor.u32 %v1977_v55, %v1974_v5  ;;  %v2785_v14 = vor.u32 %v2784_v38, %v2781_v63  ;;  %v2440_v0 = vsel %vm2423_vm7, %v16490_v27, 0  ;;  %vm1044_vm2 = vcmp.ge.s32.totalorder %v844_v26, 1  ;;  %v16670_v38 = vld [vmem:[#allocation2 + $0x80] sm:$0xf] }
 0x1cc   : > { %v2561_v29 = vshrl.u32 %v2440_v0, 16  ;;  %v2564_v50 = vshll.u32 %v2440_v0, 16  ;;  %v1809_v23 = vor.u32 %v1808_v44, %v1805_v58  ;;  %v2393_v52 = vshrl.u32 %v12442_v32, 16  ;;  %vm1594_vm12 = vmpackc.low %vm1044_vm2, %vm1044_vm2 }
 0x1cd   : > { %v1979_v41 = vsel %vm1854_vm8, %v16592_v45, %v1978_v56  ;;  %v2786_v40 = vsel %vm1854_vm8, %v16594_v51, %v2785_v14  ;;  %v2396_v10 = vshll.u32 %v12442_v32, 16  ;;  %v1626_v45 = vsel %vm1594_vm12, 65537, %v16486_v33 }
 0x1ce   : > { %4554 = vmatmul.mubr.bf16.gmra.mrb[80].mxu1 %v1979_v41  ;;  %4714 = vmatprep.mubr.bf16.mxu0 %v2786_v40  ;;  %v2563_v7 = vrot.slane %v2561_v29, 4  ;;  %v2566_v20 = vrot.slane %v2564_v50, 5  ;;  %v16657_v48 = vsel %vm1676_vm0, %v1800_v15, %v1809_v23  ;;  %v2395_v27 = vrot.slane %v2393_v52, 3 }
 0x1cf   : > { %19669 = vst [vmem:[#allocation49_spill] sm:$0xff] %v16657_v48  ;;  %4561 = vmatprep.mubr.bf16.mxu1 %v16612_v1  ;;  %vm19470_vm5 = vcmp.ne.s16.totalorder %v16657_v48, 0  ;;  %v2398_v24 = vrot.slane %v2396_v10, 4  ;;  %v629_v51 = vadd.s32 248, %v15609_v17  ;;  %v12427_v63 = vcombine.low %v1626_v45, %v15649_v31  ;;  %v2945_v10 = vld [vmem:[#allocation2 + $0x8] sm:$0xf0] }
 0x1d0   : > { %v2567_v5 = vor.u32 %v2566_v20, %v2563_v7  ;;  %v1851_v55 = vsel %vm19470_vm5, %v16583_v28, 0  ;;  %v2659_v15 = vsel %vm19470_vm5, %v16606_v34, 0 }
 0x1d1   : > { %v1981_v1 = vshrl.u32 %v1851_v55, 16  ;;  %v1984_v58 = vshll.u32 %v1851_v55, 16  ;;  %v2788_v44 = vshrl.u32 %v2659_v15, 16  ;;  %v2791_v32 = vshll.u32 %v2659_v15, 16 }
 0x1d2   : > { %v2568_v17 = vsel %vm1676_vm0, %v16616_v12, %v2567_v5  ;;  %v16674_v0 = vor.u32 %v2398_v24, %v2395_v27  ;;  %v1812_v26 = vshrl.u32 %v12427_v63, 16  ;;  %v1815_v29 = vshll.u32 %v12427_v63, 16  ;;  %v1563_v24 = vld [vmem:[#allocation2 + $0x80] sm:$0xf]  ;;  %v2644_v63 = vld [vmem:[#allocation2 + $0x88] sm:$0xf] }
 0x1d3   : > { %4715 = vmatmul.mubr.bf16.gmra.mrb[48].mxu0 %v2568_v17  ;;  %v1983_v50 = vrot.slane %v1981_v1, 3  ;;  %v1986_v52 = vrot.slane %v1984_v58, 4  ;;  %v2790_v41 = vrot.slane %v2788_v44, 3  ;;  %v2793_v40 = vrot.slane %v2791_v32, 4  ;;  %v2643_v44 = vld [vmem:[#allocation2 + $0x80] sm:$0xff] }
 0x1d4   : > { %v16679_v7 = vsel %vm1854_vm8, %v16638_v13, %v16674_v0  ;;  %v1814_v20 = vrot.slane %v1812_v26, 4  ;;  %v1817_v45 = vrot.slane %v1815_v29, 5  ;;  %v851_v55 = vand.u32 15, %v629_v51 }
 0x1d5   : > { %19670 = vst [vmem:[#allocation50_spill] sm:$0xff] %v16679_v7  ;;  %v1987_v15 = vor.u32 %v1986_v52, %v1983_v50  ;;  %v2794_v12 = vor.u32 %v2793_v40, %v2790_v41  ;;  %vm19471_vm2 = vcmp.ne.s16.totalorder %v16679_v7, 0  ;;  %v2104_v27 = vrot.slane %v16670_v38, 4 }
 0x1d6   : > { %v2441_v1 = vsel %vm19471_vm2, %v16583_v28, 0  ;;  %v16686_v58 = vor.u32 %v1817_v45, %v1814_v20  ;;  %vm1141_vm12 = vcmp.le.s32.totalorder %v851_v55, 14  ;;  %v16690_v13 = vsel %vm19472_vm13, %v2945_v10, 0 }
 0x1d7   : > { %v1988_v51 = vsel %vm1854_vm8, %v1978_v56, %v1987_v15  ;;  %v2795_v32 = vsel %vm1854_vm8, %v2785_v14, %v2794_v12  ;;  %v2570_v17 = vshrl.u32 %v2441_v1, 16  ;;  %v2573_v38 = vshll.u32 %v2441_v1, 16  ;;  %vm2186_vm5 = vmpackc.low %vm1141_vm12, %vm1141_vm12 }
 0x1d8   : > { %19671 = vst [vmem:[#allocation51_spill] sm:$0xff] %v16686_v58  ;;  %4562 = vmatmul.mubr.bf16.gmra.mrb[84].mxu1 %v1988_v51  ;;  %4722 = vmatprep.mubr.bf16.mxu0 %v2795_v32  ;;  %v16696_v28 = vsel %vm1676_vm0, %v1809_v23, %v16686_v58  ;;  %v2218_v26 = vsel %vm2186_vm5, 65537, %v16486_v33  ;;  %vm19526_vm2 = vcmp.ne.s16.totalorder %v16686_v58, 0 }
 0x1d9   : > { %19672 = vst [vmem:[#allocation52_spill] sm:$0xff] %v16696_v28  ;;  %v2572_v29 = vrot.slane %v2570_v17, 4  ;;  %v2575_v50 = vrot.slane %v2573_v38, 5  ;;  %4569 = vmatprep.mubr.bf16.mxu1 %v16626_v3  ;;  %vm19534_vm13 = vcmp.ne.s16.totalorder %v16696_v28, 0  ;;  %v12443_v56 = vcombine.low %v15649_v31, %v2218_v26  ;;  %v16716_v17 = vld [vmem:[#allocation2 + $0x10] sm:$0xff] }
 0x1da   : > { %v1852_v14 = vsel %vm19534_vm13, %v16606_v34, 0  ;;  %v2660_v23 = vsel %vm19534_vm13, %v2643_v44, 0  ;;  %v1853_v33 = vsel %vm19526_vm2, %v1563_v24, 0  ;;  %v2661_v52 = vsel %vm19526_vm2, %v2644_v63, 0  ;;  %v17028_v28 = vld [vmem:[#allocation2 + $0x88] sm:$0xf] }
 0x1db   : > { %v16712_v41 = vor.u32 %v2575_v50, %v2572_v29  ;;  %v1990_v3 = vshrl.u32 %v1852_v14, 16  ;;  %v1993_v40 = vshll.u32 %v1852_v14, 16  ;;  %v2797_v10 = vshrl.u32 %v2660_v23, 16  ;;  %v2154_v29 = vld [vmem:[#allocation2 + $0x80] sm:$0x1f] }
 0x1dc   : > { %v2800_v20 = vshll.u32 %v2660_v23, 16  ;;  %v2402_v31 = vshrl.u32 %v12443_v56, 16  ;;  %v2405_v45 = vshll.u32 %v12443_v56, 16  ;;  %v1999_v55 = vshrl.u32 %v1853_v33, 16 }
 0x1dd   : > { %v2577_v1 = vsel %vm1676_vm0, %v2567_v5, %v16712_v41  ;;  %v1992_v51 = vrot.slane %v1990_v3, 3  ;;  %v1995_v44 = vrot.slane %v1993_v40, 4  ;;  %v2799_v32 = vrot.slane %v2797_v10, 3 }
 0x1de   : > { %4723 = vmatmul.mubr.bf16.gmra.mrb[52].mxu0 %v2577_v1  ;;  %v2802_v24 = vrot.slane %v2800_v20, 4  ;;  %v2404_v63 = vrot.slane %v2402_v31, 3  ;;  %v2407_v38 = vrot.slane %v2405_v45, 4  ;;  %v2001_v26 = vrot.slane %v1999_v55, 3 }
 0x1df   : > { %v1996_v50 = vor.u32 %v1995_v44, %v1992_v51  ;;  %v2002_v14 = vshll.u32 %v1853_v33, 16  ;;  %v2806_v23 = vshrl.u32 %v2661_v52, 16  ;;  %v2809_v35 = vshll.u32 %v2661_v52, 16 }
 0x1e0   : > { %v2803_v56 = vor.u32 %v2802_v24, %v2799_v32  ;;  %v16718_v53 = vor.u32 %v2407_v38, %v2404_v63  ;;  %v19674_v5 = vrot.slane %v16606_v34, 4  ;;  %v2980_v40 = vshrl.u32 %v16690_v13, 16 }
 0x1e1   : > { %v1997_v10 = vsel %vm1854_vm8, %v1987_v15, %v1996_v50  ;;  %v2004_v20 = vrot.slane %v2002_v14, 4  ;;  %v2808_v31 = vrot.slane %v2806_v23, 3  ;;  %v2963_v45 = vsel %vm2411_vm1, %v16716_v17, 0  ;;  %v3163_v14 = vld [vmem:[#allocation2 + $0x10] sm:$0xf8] }
 0x1e2   : > { %19673 = vst [vmem:[#allocation53_spill] sm:$0xff] %v16718_v53  ;;  %v2105_v3 = vsel %vm1256_vm4, %v19674_v5, %v2104_v27  ;;  %4570 = vmatmul.mubr.bf16.gmra.mrb[88].mxu1 %v1997_v10  ;;  %v2804_v33 = vsel %vm1854_vm8, %v2794_v12, %v2803_v56  ;;  %v16732_v52 = vsel %vm1854_vm8, %v16674_v0, %v16718_v53  ;;  %v2811_v55 = vrot.slane %v2809_v35, 4 }
 0x1e3   : > { %19675 = vst [vmem:[#allocation54_spill] sm:$0xff] %v16732_v52  ;;  %vm19525_vm5 = vcmp.ne.s16.totalorder %v16718_v53, 0  ;;  %4730 = vmatprep.mubr.bf16.mxu0 %v2804_v33  ;;  %vm19533_vm12 = vcmp.ne.s16.totalorder %v16732_v52, 0  ;;  %4577 = vmatprep.mubr.bf16.mxu1 %v2105_v3  ;;  %v2005_v15 = vor.u32 %v2004_v20, %v2001_v26  ;;  %v2982_v1 = vrot.slane %v2980_v40, 4  ;;  %v3382_v3 = vld [vmem:[#allocation2 + $0x18] sm:$0xff]  ;;  %v14767_v52 = vld [vmem:[#allocation10 + $0x78] sm:$0xff]  }
 0x1e4   : > { %v2443_v27 = vsel %vm19525_vm5, %v2154_v29, 0  ;;  %v2442_v12 = vsel %vm19533_vm12, %v16606_v34, 0  ;;  %v2983_v0 = vshll.u32 %v16690_v13, 16  ;;  %v2812_v24 = vor.u32 %v2811_v55, %v2808_v31  ;;  %v2846_v20 = vld [vmem:[#allocation2 + $0x8] sm:$0xf0] }
 0x1e5   : > { %v2588_v51 = vshrl.u32 %v2443_v27, 16  ;;  %v2591_v44 = vshll.u32 %v2443_v27, 16  ;;  %v2579_v35 = vshrl.u32 %v2442_v12, 16  ;;  %v2582_v32 = vshll.u32 %v2442_v12, 16  ;;  %v3381_v13 = vld [vmem:[#allocation2 + $0x10] sm:$0xf0] }
 0x1e6   : > { %v2985_v63 = vrot.slane %v2983_v0, 5  ;;  %v2988_v38 = vshrl.u32 %v2963_v45, 16  ;;  %v2006_v5 = vsel %vm1854_vm8, %v1996_v50, %v2005_v15  ;;  %v2991_v29 = vshll.u32 %v2963_v45, 16 }
 0x1e7   : > { %v2581_v23 = vrot.slane %v2579_v35, 4  ;;  %v2584_v26 = vrot.slane %v2582_v32, 5  ;;  %v2590_v40 = vrot.slane %v2588_v51, 4  ;;  %v2593_v33 = vrot.slane %v2591_v44, 5 }
 0x1e8   : > { %v2990_v10 = vrot.slane %v2988_v38, 4  ;;  %v2986_v27 = vor.u32 %v2985_v63, %v2982_v1  ;;  %v2993_v11 = vrot.slane %v2991_v29, 5  ;;  %v2813_v31 = vsel %vm1854_vm8, %v2803_v56, %v2812_v24 }
 0x1e9   : > { %v2585_v34 = vor.u32 %v2584_v26, %v2581_v23  ;;  %v3180_v55 = vsel %vm1820_vm9, %v3163_v14, 0  ;;  %v3181_v12 = vsel %vm19478_vm11, %v3382_v3, 0  ;;  %v2964_v50 = vsel %vm2412_vm10, %v3382_v3, 0  ;;  %v16753_v44 = vpop.f32.mrb[0].mxu1  ;;  %v16760_v26 = vld [vmem:[#allocation2 + $0x20] sm:$0xff] }
 0x1ea   : > { %4578 = vmatmul.mubr.bf16.gmra.mrb[92].mxu1 %v2006_v5  ;;  %v2994_v15 = vor.u32 %v2993_v11, %v2990_v10  ;;  %v2880_v51 = vrot.slane %v2846_v20, 4  ;;  %v2881_v1 = vrot.slane %v16716_v17, 4  ;;  %19676 = vst [vmem:[#allocation55_spill] sm:$0xff] %v16753_v44  ;;  %v3198_v56 = vshrl.u32 %v3180_v55, 16  ;;  %v16755_v24 = vpop.f32.mrb[1].mxu1 }
 0x1eb   : > { %v2586_v45 = vsel %vm1676_vm0, %v16712_v41, %v2585_v34  ;;  %v3201_v0 = vshll.u32 %v3180_v55, 16  ;;  %v3206_v35 = vshrl.u32 %v3181_v12, 16  ;;  %v3209_v32 = vshll.u32 %v3181_v12, 16  ;;  %19677 = vst [vmem:[#allocation56_spill] sm:$0xff] %v16755_v24  ;;  %v16758_v41 = vpop.f32.mrb[2].mxu1 }
 0x1ec   : > { %4731 = vmatmul.mubr.bf16.gmra.mrb[56].mxu0 %v2586_v45  ;;  %v2594_v63 = vor.u32 %v2593_v33, %v2590_v40  ;;  %v2995_v38 = vsel %vm1676_vm0, %v2986_v27, %v2994_v15  ;;  %v2997_v14 = vshrl.u32 %v2964_v50, 16  ;;  %v3000_v23 = vshll.u32 %v2964_v50, 16  ;;  %19678 = vst [vmem:[#allocation57_spill] sm:$0xff] %v16758_v41  ;;  %v16762_v5 = vpop.f32.mrb[3].mxu1  ;;  %v14738_v50 = vld [vmem:[#allocation8 + $0x208] sm:$0xff]  }
 0x1ed   : > { %4738 = vmatprep.mubr.bf16.mxu0 %v2813_v31  ;;  %4779 = vmatprep.mubr.bf16.mxu1 %v2995_v38  ;;  %v3415_v11 = vrot.slane %v3381_v13, 4  ;;  %v3416_v17 = vrot.slane %v3382_v3, 4  ;;  %19679 = vst [vmem:[#allocation58_spill] sm:$0xff] %v16762_v5  ;;  %v2882_v29 = vsel %vm1256_vm4, %v2880_v51, %v2881_v1  ;;  %v3200_v55 = vrot.slane %v3198_v56, 3  ;;  %v14894_v56 = vld [vmem:[#allocation8 + $0x200] sm:$0xff]   ;;  %v16829_v41 = vld [vmem:[#allocation2 + $0x40] sm:$0xff] }
 0x1ee   : > { %v2999_v10 = vrot.slane %v2997_v14, 4  ;;  %v3002_v20 = vrot.slane %v3000_v23, 5  ;;  %v3203_v31 = vrot.slane %v3201_v0, 4  ;;  %v3208_v40 = vrot.slane %v3206_v35, 3  ;;  %v16776_v23 = vld [vmem:[#allocation2 + $0x28] sm:$0xff] }
 0x1ef   : > { %v3211_v33 = vrot.slane %v3209_v32, 4  ;;  %v2595_v27 = vsel %vm1676_vm0, %v2585_v34, %v2594_v63  ;;  %v3182_v13 = vsel %vm19479_vm3, %v16760_v26, 0  ;;  %vm19680_vm11 = vcmp.ne.s16.totalorder %v16089_v60, 0 }
 0x1f0   : > { %v3003_v12 = vor.u32 %v3002_v20, %v2999_v10  ;;  %v2965_v3 = vsel %vm19680_vm11, %v16760_v26, 0  ;;  %v3417_v45 = vsel %vm1256_vm4, %v3415_v11, %v3416_v17  ;;  %v3204_v32 = vor.u32 %v3203_v31, %v3200_v55 }
 0x1f1   : > { %v3006_v51 = vshrl.u32 %v2965_v3, 16  ;;  %v3009_v35 = vshll.u32 %v2965_v3, 16  ;;  %v16774_v34 = vpop.f32.mrb[4].mxu1  ;;  %v3212_v63 = vor.u32 %v3211_v33, %v3208_v40  ;;  %v3215_v38 = vshrl.u32 %v3182_v13, 16 }
 0x1f2   : > { %4780 = vmatmul.mubr.bf16.vlgmr.msra.gmra.mrb[96].mxu1 %v2882_v29  ;;  %v3004_v0 = vsel %vm1676_vm0, %v2994_v15, %v3003_v12  ;;  %19681 = vst [vmem:[#allocation59_spill] sm:$0xff] %v16774_v34  ;;  %v16778_v10 = vpop.f32.mrb[5].mxu1  ;;  %v14739_v29 = vld [vmem:[#allocation8 + $0x210] sm:$0xff]   ;;  %v3218_v11 = vshll.u32 %v3182_v13, 16  ;;  %vm19683_vm11 = vcmp.ne.s16.totalorder %v16146_v30, 0  ;;  %v3418_v55 = vrot.slane %v16760_v26, 4 }
 0x1f3   : > { %14318 = vmatpush3.bf16.msra.mxu1 %v14894_v56  ;;  %4787 = vmatprep.mubr.bf16.mxu1 %v3004_v0  ;;  %v3008_v14 = vrot.slane %v3006_v51, 4  ;;  %19682 = vst [vmem:[#allocation60_spill] sm:$0xff] %v16778_v10  ;;  %v3011_v20 = vrot.slane %v3009_v35, 5  ;;  %v2966_v15 = vsel %vm19683_vm11, %v16776_v23, 0  ;;  %v16783_v3 = vpop.f32.mrb[6].mxu1  ;;  %v2884_v33 = vsel %vm1256_vm4, %v2881_v1, %v3416_v17  ;;  %v14740_v26 = vld [vmem:[#allocation8 + $0x218] sm:$0xff]  }
 0x1f4   : > { %4739 = vmatmul.mubr.bf16.gmra.mrb[60].mxu0 %v2595_v27  ;;  %14319 = vmatprep.subr.bf16.mxu1 %v14738_v50  ;;  %19684 = vst [vmem:[#allocation61_spill] sm:$0xff] %v16783_v3  ;;  %v3015_v31 = vshrl.u32 %v2966_v15, 16  ;;  %v16786_v40 = vpop.f32.mrb[7].mxu1  ;;  %v3018_v51 = vshll.u32 %v2966_v15, 16  ;;  %v3213_v13 = vsel %vm1854_vm8, %v3204_v32, %v3212_v63  ;;  %v3217_v56 = vrot.slane %v3215_v38, 3 }
 0x1f5   : > { %4940 = vmatprep.mubr.bf16.mxu0 %v3417_v45  ;;  %19685 = vst [vmem:[#allocation62_spill] sm:$0xff] %v16786_v40  ;;  %v3012_v27 = vor.u32 %v3011_v20, %v3008_v14  ;;  %v16789_v45 = vld [vmem:[#allocation2 + $0x30] sm:$0xff]  ;;  %vm19686_vm11 = vcmp.ne.s16.totalorder %v16046_v22, 0  ;;  %v3220_v3 = vrot.slane %v3218_v11, 4  ;;  %vm19692_vm3 = vcmp.ne.s16.totalorder %v16315_v59, 0 }
 0x1f6   : > { %v3183_v0 = vsel %vm19686_vm11, %v16776_v23, 0  ;;  %v3017_v35 = vrot.slane %v3015_v31, 4  ;;  %v3020_v40 = vrot.slane %v3018_v51, 5  ;;  %v2967_v1 = vsel %vm2415_vm6, %v16789_v45, 0 }
 0x1f7   : > { %14320 = vmatpush3.bf16.msra.mxu1 %v14738_v50  ;;  %v3013_v34 = vsel %vm1676_vm0, %v3003_v12, %v3012_v27  ;;  %v3419_v50 = vsel %vm1256_vm4, %v3416_v17, %v3418_v55  ;;  %v3224_v32 = vshrl.u32 %v3183_v0, 16  ;;  %v3024_v20 = vshrl.u32 %v2967_v1, 16  ;;  %v14741_v12 = vld [vmem:[#allocation8 + $0x220] sm:$0xff]  }
 0x1f8   : > { %14321 = vmatprep.subr.bf16.mxu1 %v14739_v29  ;;  %v3021_v14 = vor.u32 %v3020_v40, %v3017_v35  ;;  %v3027_v15 = vshll.u32 %v2967_v1, 16  ;;  %v3221_v31 = vor.u32 %v3220_v3, %v3217_v56  ;;  %v3227_v51 = vshll.u32 %v3183_v0, 16 }
 0x1f9   : > { %v16800_v38 = vpop.f32.mrb[8].mxu1  ;;  %v3420_v17 = vrot.slane %v16776_v23, 4  ;;  %vm19691_vm11 = vcmp.ne.s16.totalorder %v16140_v4, 0  ;;  %v3026_v1 = vrot.slane %v3024_v20, 4 }
 0x1fa   : > { %4788 = vmatmul.mubr.bf16.gmra.mrb[100].mxu1 %v2884_v33  ;;  %19687 = vst [vmem:[#allocation63_spill] sm:$0xff] %v16800_v38  ;;  %v16802_v11 = vpop.f32.mrb[9].mxu1  ;;  %v3184_v40 = vsel %vm19691_vm11, %v16789_v45, 0  ;;  %v16812_v33 = vld [vmem:[#allocation2 + $0x38] sm:$0xff]  ;;  %v3022_v35 = vsel %vm1676_vm0, %v3012_v27, %v3021_v14  ;;  %v3029_v3 = vrot.slane %v3027_v15, 5  ;;  %v3222_v56 = vsel %vm1854_vm8, %v3212_v63, %v3221_v31 }
 0x1fb   : > { %4795 = vmatprep.mubr.bf16.mxu1 %v3013_v34  ;;  %14322 = vmatpush3.bf16.msra.mxu1 %v14739_v29  ;;  %19688 = vst [vmem:[#allocation64_spill] sm:$0xff] %v16802_v11  ;;  %v16804_v10 = vpop.f32.mrb[10].mxu1  ;;  %v3226_v29 = vrot.slane %v3224_v32, 3  ;;  %v3229_v0 = vrot.slane %v3227_v51, 4  ;;  %v2968_v23 = vsel %vm19692_vm3, %v16812_v33, 0  ;;  %v3421_v32 = vsel %vm1256_vm4, %v3418_v55, %v3420_v17 }
 0x1fc   : > { %4941 = vmatmul.mubr.bf16.vlgmr.msra.gmra.mrb[64].mxu0 %v3213_v13  ;;  %14323 = vmatprep.subr.bf16.mxu1 %v14740_v26  ;;  %19689 = vst [vmem:[#allocation65_spill] sm:$0xff] %v16804_v10  ;;  %v16807_v34 = vpop.f32.mrb[11].mxu1  ;;  %v14742_v13 = vld [vmem:[#allocation8 + $0x228] sm:$0xff]   ;;  %v14743_v10 = vld [vmem:[#allocation8 + $0x230] sm:$0xff]   ;;  %v3233_v38 = vshrl.u32 %v3184_v40, 16  ;;  %v3236_v27 = vshll.u32 %v3184_v40, 16  ;;  %v3030_v20 = vor.u32 %v3029_v3, %v3026_v1 }
 0x1fd   : > { %4948 = vmatprep.mubr.bf16.mxu0 %v3419_v50  ;;  %19690 = vst [vmem:[#allocation66_spill] sm:$0xff] %v16807_v34  ;;  %v3033_v15 = vshrl.u32 %v2968_v23, 16  ;;  %v3036_v34 = vshll.u32 %v2968_v23, 16  ;;  %v3230_v51 = vor.u32 %v3229_v0, %v3226_v29  ;;  %v3422_v55 = vrot.slane %v16789_v45, 4 }
 0x1fe   : > { %v3031_v40 = vsel %vm1676_vm0, %v3021_v14, %v3030_v20  ;;  %v2969_v29 = vsel %vm2417_vm14, %v16829_v41, 0  ;;  %vm19697_vm3 = vcmp.ne.s16.totalorder %v16209_v6, 0  ;;  %vm19702_vm11 = vcmp.ne.s16.totalorder %v16298_v18, 0  ;;  %v16988_v6 = vld [vmem:[#allocation2 + $0x88] sm:$0xff] }
 0x1ff   : > { %14324 = vmatpush3.bf16.msra.mxu1 %v14740_v26  ;;  %v3035_v1 = vrot.slane %v3033_v15, 4  ;;  %v3038_v3 = vrot.slane %v3036_v34, 5  ;;  %v3231_v23 = vsel %vm1854_vm8, %v3221_v31, %v3230_v51  ;;  %v3423_v45 = vsel %vm1256_vm4, %v3420_v17, %v3422_v55 }
 0x200   : > { %14325 = vmatprep.subr.bf16.mxu1 %v14741_v12  ;;  %v3042_v0 = vshrl.u32 %v2969_v29, 16  ;;  %v3045_v31 = vshll.u32 %v2969_v29, 16  ;;  %v3186_v29 = vsel %vm19702_vm11, %v16829_v41, 0  ;;  %vm19708_vm11 = vcmp.ne.s16.totalorder %v16353_v19, 0 }
 0x201   : > { %v16820_v26 = vpop.f32.mrb[12].mxu1  ;;  %v3039_v34 = vor.u32 %v3038_v3, %v3035_v1 }
 0x202   : > { %4796 = vmatmul.mubr.bf16.gmra.mrb[104].mxu1 %v3419_v50  ;;  %19693 = vst [vmem:[#allocation67_spill] sm:$0xff] %v16820_v26  ;;  %v16822_v63 = vpop.f32.mrb[13].mxu1  ;;  %v3047_v1 = vrot.slane %v3045_v31, 5 }
 0x203   : > { %4803 = vmatprep.mubr.bf16.mxu1 %v3022_v35  ;;  %14326 = vmatpush3.bf16.msra.mxu1 %v14741_v12  ;;  %19694 = vst [vmem:[#allocation68_spill] sm:$0xff] %v16822_v63  ;;  %v16824_v11 = vpop.f32.mrb[14].mxu1  ;;  %v3235_v35 = vrot.slane %v3233_v38, 3  ;;  %v3238_v12 = vrot.slane %v3236_v27, 4  ;;  %v3185_v38 = vsel %vm19697_vm3, %v16812_v33, 0  ;;  %vm19703_vm3 = vcmp.ne.s16.totalorder %v16413_v43, 0 }
 0x204   : > { %4949 = vmatmul.mubr.bf16.gmra.mrb[68].mxu0 %v3222_v56  ;;  %14327 = vmatprep.subr.bf16.mxu1 %v14742_v13  ;;  %19695 = vst [vmem:[#allocation69_spill] sm:$0xff] %v16824_v11  ;;  %v16827_v50 = vpop.f32.mrb[15].mxu1  ;;  %v14744_v56 = vld [vmem:[#allocation8 + $0x238] sm:$0xff]   ;;  %v3245_v15 = vshll.u32 %v3185_v38, 16  ;;  %v3424_v11 = vrot.slane %v16812_v33, 4 }
 0x205   : > { %4956 = vmatprep.mubr.bf16.mxu0 %v3421_v32  ;;  %19696 = vst [vmem:[#allocation70_spill] sm:$0xff] %v16827_v50  ;;  %v3239_v14 = vor.u32 %v3238_v12, %v3235_v35  ;;  %v3040_v35 = vsel %vm1676_vm0, %v3030_v20, %v3039_v34  ;;  %v3044_v12 = vrot.slane %v3042_v0, 4  ;;  %v3251_v20 = vshrl.u32 %v3186_v29, 16 }
 0x207   : > { %14328 = vmatpush3.bf16.msra.mxu1 %v14742_v13 }
 0x208   : > { %14329 = vmatprep.subr.bf16.mxu1 %v14743_v10 }
 0x209   : > { %v16840_v13 = vpop.f32.mrb[16].mxu1 }
 0x20a   : > { %4804 = vmatmul.mubr.bf16.gmra.mrb[108].mxu1 %v3421_v32  ;;  %19698 = vst [vmem:[#allocation71_spill] sm:$0xff] %v16840_v13  ;;  %v16842_v27 = vpop.f32.mrb[17].mxu1  ;;  %v3242_v32 = vshrl.u32 %v3185_v38, 16  ;;  %v3425_v38 = vsel %vm1256_vm4, %v3422_v55, %v3424_v11  ;;  %v16869_v55 = vld [vmem:[#allocation2 + $0x50] sm:$0xff] }
 0x20b   : > { %4811 = vmatprep.mubr.bf16.mxu1 %v3031_v40  ;;  %14330 = vmatpush3.bf16.msra.mxu1 %v14743_v10  ;;  %19699 = vst [vmem:[#allocation72_spill] sm:$0xff] %v16842_v27  ;;  %v16844_v17 = vpop.f32.mrb[18].mxu1  ;;  %v16849_v40 = vld [vmem:[#allocation2 + $0x48] sm:$0xff]  ;;  %v3240_v10 = vsel %vm1854_vm8, %v3230_v51, %v3239_v14  ;;  %v3048_v51 = vor.u32 %v3047_v1, %v3044_v12  ;;  %v3253_v1 = vrot.slane %v3251_v20, 3  ;;  %v16907_v27 = vld [vmem:[#allocation2 + $0x60] sm:$0xff] }
 0x20c   : > { %4957 = vmatmul.mubr.bf16.gmra.mrb[72].mxu0 %v3231_v23  ;;  %14331 = vmatprep.subr.bf16.mxu1 %v14744_v56  ;;  %19700 = vst [vmem:[#allocation73_spill] sm:$0xff] %v16844_v17  ;;  %v16847_v26 = vpop.f32.mrb[19].mxu1  ;;  %v3244_v3 = vrot.slane %v3242_v32, 3  ;;  %v3247_v23 = vrot.slane %v3245_v15, 4  ;;  %v2970_v33 = vsel %vm19703_vm3, %v16849_v40, 0  ;;  %v3254_v17 = vshll.u32 %v3186_v29, 16 }
 0x20d   : > { %4964 = vmatprep.mubr.bf16.mxu0 %v3423_v45  ;;  %19701 = vst [vmem:[#allocation74_spill] sm:$0xff] %v16847_v26  ;;  %v3051_v0 = vshrl.u32 %v2970_v33, 16  ;;  %v3054_v31 = vshll.u32 %v2970_v33, 16  ;;  %v3426_v26 = vrot.slane %v16829_v41, 4  ;;  %v3187_v41 = vsel %vm19708_vm11, %v16849_v40, 0 }
 0x20e   : > { %v3248_v15 = vor.u32 %v3247_v23, %v3244_v3  ;;  %v3256_v33 = vrot.slane %v3254_v17, 4  ;;  %v2971_v3 = vsel %vm2419_vm15, %v16869_v55, 0  ;;  %vm19713_vm3 = vcmp.ne.s16.totalorder %v16398_v8, 0 }
 0x20f   : > { %14332 = vmatpush3.bf16.msra.mxu1 %v14744_v56  ;;  %v3427_v23 = vsel %vm1256_vm4, %v3424_v11, %v3426_v26  ;;  %v3428_v11 = vrot.slane %v16849_v40, 4  ;;  %vm19714_vm11 = vcmp.ne.s16.totalorder %v16511_v25, 0 }
 0x210   : > { %v3249_v12 = vsel %vm1854_vm8, %v3239_v14, %v3248_v15  ;;  %v3063_v14 = vshll.u32 %v2971_v3, 16  ;;  %v3257_v17 = vor.u32 %v3256_v33, %v3253_v1 }
 0x211   : > { %v16860_v56 = vpop.f32.mrb[20].mxu1 }
 0x212   : > { %4812 = vmatmul.mubr.bf16.gmra.mrb[112].mxu1 %v3423_v45  ;;  %19704 = vst [vmem:[#allocation75_spill] sm:$0xff] %v16860_v56  ;;  %v16862_v32 = vpop.f32.mrb[21].mxu1  ;;  %v3056_v56 = vrot.slane %v3054_v31, 5  ;;  %v3260_v31 = vshrl.u32 %v3187_v41, 16  ;;  %v3258_v1 = vsel %vm1854_vm8, %v3248_v15, %v3257_v17 }
 0x213   : > { %4819 = vmatprep.mubr.bf16.mxu1 %v3040_v35  ;;  %19705 = vst [vmem:[#allocation76_spill] sm:$0xff] %v16862_v32  ;;  %v16864_v13 = vpop.f32.mrb[22].mxu1  ;;  %v3049_v35 = vsel %vm1676_vm0, %v3039_v34, %v3048_v51 }
 0x214   : > { %4965 = vmatmul.mubr.bf16.gmra.mrb[76].mxu0 %v3240_v10  ;;  %19706 = vst [vmem:[#allocation77_spill] sm:$0xff] %v16864_v13  ;;  %v16867_v45 = vpop.f32.mrb[23].mxu1  ;;  %v3053_v10 = vrot.slane %v3051_v0, 4  ;;  %v3060_v0 = vshrl.u32 %v2971_v3, 16  ;;  %v3263_v13 = vshll.u32 %v3187_v41, 16  ;;  %v3065_v3 = vrot.slane %v3063_v14, 5 }
 0x215   : > { %4972 = vmatprep.mubr.bf16.mxu0 %v3425_v38  ;;  %19707 = vst [vmem:[#allocation78_spill] sm:$0xff] %v16867_v45  ;;  %v3262_v33 = vrot.slane %v3260_v31, 3 }
 0x216   : > { %v3057_v34 = vor.u32 %v3056_v56, %v3053_v10  ;;  %v3062_v10 = vrot.slane %v3060_v0, 4  ;;  %v3265_v41 = vrot.slane %v3263_v13, 4 }
 0x218   : > { %v3058_v56 = vsel %vm1676_vm0, %v3048_v51, %v3057_v34  ;;  %v3066_v51 = vor.u32 %v3065_v3, %v3062_v10  ;;  %v3266_v13 = vor.u32 %v3265_v41, %v3262_v33 }
 0x219   : > { %v16880_v29 = vpop.f32.mrb[24].mxu1 }
 0x21a   : > { %4820 = vmatmul.mubr.bf16.gmra.mrb[116].mxu1 %v3425_v38  ;;  %19709 = vst [vmem:[#allocation79_spill] sm:$0xff] %v16880_v29  ;;  %v16882_v20 = vpop.f32.mrb[25].mxu1  ;;  %v3067_v33 = vsel %vm1676_vm0, %v3057_v34, %v3066_v51 }
 0x21b   : > { %4827 = vmatprep.mubr.bf16.mxu1 %v3049_v35  ;;  %19710 = vst [vmem:[#allocation80_spill] sm:$0xff] %v16882_v20  ;;  %v16884_v38 = vpop.f32.mrb[26].mxu1  ;;  %v3188_v35 = vsel %vm19713_vm3, %v16869_v55, 0  ;;  %vm19719_vm3 = vcmp.ne.s16.totalorder %v16428_v37, 0 }
 0x21c   : > { %4973 = vmatmul.mubr.bf16.gmra.mrb[80].mxu0 %v3249_v12  ;;  %19711 = vst [vmem:[#allocation81_spill] sm:$0xff] %v16884_v38  ;;  %v16887_v45 = vpop.f32.mrb[27].mxu1  ;;  %v16892_v12 = vld [vmem:[#allocation2 + $0x58] sm:$0xff]  ;;  %v3429_v38 = vsel %vm1256_vm4, %v3426_v26, %v3428_v11  ;;  %v3269_v29 = vshrl.u32 %v3188_v35, 16 }
 0x21d   : > { %4980 = vmatprep.mubr.bf16.mxu0 %v3427_v23  ;;  %19712 = vst [vmem:[#allocation82_spill] sm:$0xff] %v16887_v45  ;;  %v2972_v40 = vsel %vm19714_vm11, %v16892_v12, 0  ;;  %v3272_v45 = vshll.u32 %v3188_v35, 16  ;;  %v3189_v10 = vsel %vm19719_vm3, %v16892_v12, 0  ;;  %vm19720_vm11 = vcmp.ne.s16.totalorder %v16548_v46, 0 }
 0x21e   : > { %v3069_v0 = vshrl.u32 %v2972_v40, 16  ;;  %v3072_v14 = vshll.u32 %v2972_v40, 16  ;;  %v3281_v44 = vshll.u32 %v3189_v10, 16  ;;  %vm19721_vm3 = vcmp.ne.s16.totalorder %v16495_v57, 0 }
 0x220   : > { %v3071_v41 = vrot.slane %v3069_v0, 4  ;;  %v3074_v40 = vrot.slane %v3072_v14, 5  ;;  %v16920_v14 = vld [vmem:[#allocation13] ss:$0 sm:$0xff] }
 0x221   : > { %v16900_v20 = vpop.f32.mrb[28].mxu1 }
 0x222   : > { %4828 = vmatmul.mubr.bf16.gmra.mrb[120].mxu1 %v3427_v23  ;;  %19715 = vst [vmem:[#allocation83_spill] sm:$0xff] %v16900_v20  ;;  %v16902_v32 = vpop.f32.mrb[29].mxu1  ;;  %v12981_v31 = vpop.f32.mrb[0].mxu0  ;;  %v3430_v23 = vrot.slane %v16869_v55, 4  ;;  %v3274_v20 = vrot.slane %v3272_v45, 4  ;;  %v2973_v55 = vsel %vm19720_vm11, %v16907_v27, 0  ;;  %v3075_v34 = vor.u32 %v3074_v40, %v3071_v41 }
 0x223   : > { %4835 = vmatprep.mubr.bf16.mxu1 %v3058_v56  ;;  %19716 = vst [vmem:[#allocation84_spill] sm:$0xff] %v16902_v32  ;;  %v16904_v15 = vpop.f32.mrb[30].mxu1  ;;  %v12982_v35 = vpop.f32.mrb[1].mxu0  ;;  %v3271_v56 = vrot.slane %v3269_v29, 3  ;;  %v3278_v29 = vshrl.u32 %v3189_v10, 16  ;;  %v3078_v50 = vshrl.u32 %v2973_v55, 16 }
 0x224   : > { %4981 = vmatmul.mubr.bf16.gmra.mrb[84].mxu0 %v3258_v1  ;;  %19717 = vst [vmem:[#allocation85_spill] sm:$0xff] %v16904_v15  ;;  %v16909_v26 = vpop.f32.mrb[31].mxu1  ;;  %v12983_v3 = vadd.f32 %v12982_v35, %v12981_v31  ;;  %v12984_v1 = vpop.f32.mrb[2].mxu0  ;;  %v3431_v45 = vsel %vm1256_vm4, %v3428_v11, %v3430_v23  ;;  %v3081_v0 = vshll.u32 %v2973_v55, 16  ;;  %v3190_v11 = vsel %vm19721_vm3, %v16907_v27, 0 }
 0x225   : > { %4988 = vmatprep.mubr.bf16.mxu0 %v3429_v38  ;;  %19718 = vst [vmem:[#allocation86_spill] sm:$0xff] %v16909_v26  ;;  %v12985_v15 = vpop.f32.mrb[3].mxu0  ;;  %v3267_v26 = vsel %vm1854_vm8, %v3257_v17, %v3266_v13  ;;  %v3275_v35 = vor.u32 %v3274_v20, %v3271_v56  ;;  %v3432_v17 = vrot.slane %v16892_v12, 4  ;;  %v3080_v56 = vrot.slane %v3078_v50, 4 }
 0x226   : > { %v12986_v32 = vadd.f32 %v12985_v15, %v12984_v1  ;;  %v16926_v15 = vld [vmem:[#allocation2 + $0x68] sm:$0xff]  ;;  %v3083_v40 = vrot.slane %v3081_v0, 5  ;;  %vm19722_vm11 = vcmp.ne.s16.totalorder %v16588_v49, 0  ;;  %vm19723_vm3 = vcmp.ne.s16.totalorder %v16519_v36, 0  ;;  %v16947_v36 = vld [vmem:[#allocation2 + $0x78] sm:$0xff] }
 0x227   : > { %v3276_v10 = vsel %vm1854_vm8, %v3266_v13, %v3275_v35  ;;  %v2974_v50 = vsel %vm19722_vm11, %v16926_v15, 0  ;;  %v3290_v13 = vshll.u32 %v3190_v11, 16  ;;  %vm19725_vm11 = vcmp.ne.s16.totalorder %v16567_v16, 0 }
 0x229   : > { %v12869_v31 = vpop.f32.mrb[32].mxu1 }
 0x22a   : > { %4836 = vmatmul.mubr.bf16.gmra.mrb[124].mxu1 %v3429_v38  ;;  %v12870_v63 = vpop.f32.mrb[33].mxu1  ;;  %v3280_v38 = vrot.slane %v3278_v29, 3  ;;  %v3283_v29 = vrot.slane %v3281_v44, 4  ;;  %v3084_v44 = vor.u32 %v3083_v40, %v3080_v56 }
 0x22b   : > { %4843 = vmatprep.mubr.bf16.mxu1 %v3067_v33  ;;  %v12871_v5 = vadd.f32 %v12870_v63, %v12869_v31  ;;  %v12872_v24 = vpop.f32.mrb[34].mxu1  ;;  %v12987_v20 = vpop.f32.mrb[4].mxu0  ;;  %v3076_v63 = vsel %vm1676_vm0, %v3066_v51, %v3075_v34 }
 0x22c   : > { %4989 = vmatmul.mubr.bf16.gmra.mrb[88].mxu0 %v3267_v26  ;;  %v12873_v26 = vpop.f32.mrb[35].mxu1  ;;  %v12988_v41 = vpop.f32.mrb[5].mxu0 }
 0x22d   : > { %4996 = vmatprep.mubr.bf16.mxu0 %v3431_v45  ;;  %v4460_v1 = vadd.f32 %v12871_v5, %v16920_v14  ;;  %v12874_v33 = vadd.f32 %v12873_v26, %v12872_v24  ;;  %v12989_v12 = vadd.f32 %v12988_v41, %v12987_v20  ;;  %v12990_v55 = vpop.f32.mrb[6].mxu0  ;;  %v3433_v24 = vsel %vm1256_vm4, %v3430_v23, %v3432_v17 }
 0x22e   : > { %v12991_v37 = vpop.f32.mrb[7].mxu0  ;;  %v3287_v5 = vshrl.u32 %v3190_v11, 16  ;;  %v3087_v20 = vshrl.u32 %v2974_v50, 16  ;;  %v19488_v11 = vrot.slane %v16907_v27, 4 }
 0x22f   : > { %v4463_v31 = vadd.f32 %v12874_v33, %v16920_v14  ;;  %v16932_v57 = vadd.f32 %v12983_v3, %v4460_v1  ;;  %v12992_v26 = vadd.f32 %v12991_v37, %v12990_v55  ;;  %v3191_v3 = vsel %vm19723_vm3, %v16926_v15, 0 }
 0x230   : > { %v3090_v1 = vshll.u32 %v2974_v50, 16  ;;  %v3289_v37 = vrot.slane %v3287_v5, 3  ;;  %v3299_v56 = vshll.u32 %v3191_v3, 16  ;;  %v3085_v50 = vsel %vm1676_vm0, %v3075_v34, %v3084_v44 }
 0x231   : > { %v16938_v51 = vadd.f32 %v12986_v32, %v4463_v31  ;;  %v12875_v0 = vpop.f32.mrb[36].mxu1  ;;  %v16944_v32 = vld [vmem:[#allocation2 + $0x70] sm:$0xff]  ;;  %v3089_v8 = vrot.slane %v3087_v20, 4  ;;  %vm19727_vm3 = vcmp.ne.s16.totalorder %v16621_v61, 0 }
 0x232   : > { %4844 = vmatmul.mubr.bf16.gmra.mrb[128].mxu1 %v3431_v45  ;;  %v12876_v33 = vpop.f32.mrb[37].mxu1  ;;  %v3284_v45 = vor.u32 %v3283_v29, %v3280_v38  ;;  %v3092_v38 = vrot.slane %v3090_v1, 5  ;;  %v19735_v42 = vrot.slane %v16944_v32, 4 }
 0x233   : > { %4851 = vmatprep.mubr.bf16.mxu1 %v3076_v63  ;;  %v12877_v41 = vadd.f32 %v12876_v33, %v12875_v0  ;;  %v12878_v23 = vpop.f32.mrb[38].mxu1  ;;  %v3292_v63 = vrot.slane %v3290_v13, 4  ;;  %v2975_v13 = vsel %vm2423_vm7, %v16944_v32, 0  ;;  %v3435_v33 = vsel %vm1256_vm4, %v3432_v17, %v19488_v11 }
 0x234   : > { %4997 = vmatmul.mubr.bf16.gmra.mrb[92].mxu0 %v3276_v10  ;;  %v12879_v55 = vpop.f32.mrb[39].mxu1  ;;  %v3296_v10 = vshrl.u32 %v3191_v3, 16  ;;  %v3285_v29 = vsel %vm1854_vm8, %v3275_v35, %v3284_v45  ;;  %v3096_v17 = vshrl.u32 %v2975_v13, 16 }
 0x235   : > { %5004 = vmatprep.mubr.bf16.mxu0 %v3433_v24  ;;  %v4468_v40 = vadd.f32 %v12877_v41, %v16920_v14  ;;  %v12880_v31 = vadd.f32 %v12879_v55, %v12878_v23  ;;  %v16960_v41 = vor.u32 %v3292_v63, %v3289_v37  ;;  %v3099_v37 = vshll.u32 %v2975_v13, 16 }
 0x236   : > { %v12993_v3 = vpop.f32.mrb[8].mxu0  ;;  %v3298_v35 = vrot.slane %v3296_v10, 3  ;;  %v3193_v63 = vsel %vm19727_vm3, %v16947_v36, 0  ;;  %v3098_v11 = vrot.slane %v3096_v17, 4  ;;  %vm19733_vm3 = vcmp.ne.s16.totalorder %v16657_v48, 0 }
 0x237   : > { %v4471_v0 = vadd.f32 %v12880_v31, %v16920_v14  ;;  %v16952_v5 = vadd.f32 %v12989_v12, %v4468_v40  ;;  %v12994_v20 = vpop.f32.mrb[9].mxu0  ;;  %v3192_v12 = vsel %vm19725_vm11, %v16944_v32, 0  ;;  %v16968_v40 = vor.u32 %v3092_v38, %v3089_v8 }
 0x238   : > { %v12995_v55 = vadd.f32 %v12994_v20, %v12993_v3  ;;  %v3305_v3 = vshrl.u32 %v3192_v12, 16  ;;  %v3308_v20 = vshll.u32 %v3192_v12, 16  ;;  %vm19728_vm11 = vcmp.ne.s16.totalorder %v16679_v7, 0 }
 0x239   : > { %19724 = vst [vmem:[#allocation87_spill] sm:$0xff] %v16952_v5  ;;  %v16966_v1 = vadd.f32 %v12992_v26, %v4471_v0  ;;  %v12881_v23 = vpop.f32.mrb[40].mxu1  ;;  %v2976_v8 = vsel %vm19728_vm11, %v16947_v36, 0  ;;  %v3314_v13 = vshrl.u32 %v3193_v63, 16  ;;  %v3294_v12 = vsel %vm1854_vm8, %v3284_v45, %v16960_v41 }
 0x23a   : > { %4852 = vmatmul.mubr.bf16.gmra.mrb[132].mxu1 %v3433_v24  ;;  %v12996_v24 = vpop.f32.mrb[10].mxu0  ;;  %v12882_v31 = vpop.f32.mrb[41].mxu1  ;;  %v3105_v38 = vshrl.u32 %v2976_v8, 16 }
 0x23b   : > { %4859 = vmatprep.mubr.bf16.mxu1 %v3085_v50  ;;  %19726 = vst [vmem:[#allocation88_spill] sm:$0xff] %v16966_v1  ;;  %v12997_v10 = vpop.f32.mrb[11].mxu0  ;;  %v3301_v50 = vrot.slane %v3299_v56, 4  ;;  %v12883_v26 = vadd.f32 %v12882_v31, %v12881_v23  ;;  %v12884_v0 = vpop.f32.mrb[42].mxu1  ;;  %v3094_v56 = vsel %vm1676_vm0, %v3084_v44, %v16968_v40  ;;  %v3101_v23 = vrot.slane %v3099_v37, 5 }
 0x23c   : > { %5005 = vmatmul.mubr.bf16.gmra.mrb[96].mxu0 %v3285_v29  ;;  %v12998_v34 = vadd.f32 %v12997_v10, %v12996_v24  ;;  %v12885_v29 = vpop.f32.mrb[43].mxu1  ;;  %v3317_v31 = vshll.u32 %v3193_v63, 16  ;;  %v16981_v24 = vld [vmem:[#allocation2 + $0x80] sm:$0xff]  ;;  %v19731_v44 = vrot.slane %v16907_v27, 4  ;;  %v16995_v37 = vrot.slane %v3305_v3, 3 }
 0x23d   : > { %5012 = vmatprep.mubr.bf16.mxu0 %v3435_v33  ;;  %v4476_v61 = vadd.f32 %v12883_v26, %v16920_v14  ;;  %v12886_v16 = vadd.f32 %v12885_v29, %v12884_v0  ;;  %v19730_v26 = vrot.slane %v16926_v15, 4  ;;  %v3310_v63 = vrot.slane %v3308_v20, 4  ;;  %v2961_v29 = vld [vmem:[#allocation2 + $0x88] sm:$0x1f] }
 0x23e   : > { %v3108_v0 = vshll.u32 %v2976_v8, 16  ;;  %v17006_v3 = vor.u32 %v3101_v23, %v3098_v11  ;;  %v17008_v20 = vrot.slane %v3317_v31, 4  ;;  %v17011_v8 = vrot.slane %v16981_v24, 4 }
 0x23f   : > { %v4479_v10 = vadd.f32 %v12886_v16, %v16920_v14  ;;  %v16986_v19 = vadd.f32 %v12995_v55, %v4476_v61  ;;  %v12999_v18 = vpop.f32.mrb[12].mxu0  ;;  %v3437_v17 = vsel %vm1256_vm4, %v19731_v44, %v19730_v26  ;;  %v16997_v16 = vrot.slane %v3314_v13, 3 }
 0x240   : > { %v13000_v45 = vpop.f32.mrb[13].mxu0  ;;  %v17004_v26 = vor.u32 %v3301_v50, %v3298_v35  ;;  %v3110_v35 = vrot.slane %v3108_v0, 5  ;;  %v3195_v23 = vsel %vm19534_vm13, %v16988_v6, 0 }
 0x241   : > { %19729 = vst [vmem:[#allocation89_spill] sm:$0xff] %v16986_v19  ;;  %v16999_v61 = vadd.f32 %v12998_v34, %v4479_v10  ;;  %v12887_v55 = vpop.f32.mrb[44].mxu1  ;;  %v13001_v4 = vadd.f32 %v13000_v45, %v12999_v18  ;;  %v13002_v22 = vpop.f32.mrb[14].mxu0  ;;  %v2977_v18 = vsel %vm19533_vm12, %v16981_v24, 0 }
 0x242   : > { %4860 = vmatmul.mubr.bf16.gmra.mrb[136].mxu1 %v3435_v33  ;;  %v3194_v33 = vsel %vm19733_vm3, %v16981_v24, 0  ;;  %v12888_v13 = vpop.f32.mrb[45].mxu1  ;;  %v13003_v34 = vpop.f32.mrb[15].mxu0  ;;  %v3114_v0 = vshrl.u32 %v2977_v18, 16  ;;  %vm19743_vm3 = vcmp.ne.s16.totalorder %v16089_v60, 0 }
 0x243   : > { %4867 = vmatprep.mubr.bf16.mxu1 %v3094_v56  ;;  %19732 = vst [vmem:[#allocation90_spill] sm:$0xff] %v16999_v61  ;;  %v3107_v56 = vrot.slane %v3105_v38, 4  ;;  %v12889_v10 = vadd.f32 %v12888_v13, %v12887_v55  ;;  %v12890_v44 = vpop.f32.mrb[46].mxu1  ;;  %v3323_v50 = vshrl.u32 %v3194_v33, 16  ;;  %v3326_v31 = vshll.u32 %v3194_v33, 16 }
 0x244   : > { %5013 = vmatmul.mubr.bf16.gmra.mrb[100].mxu0 %v3294_v12  ;;  %v13004_v12 = vadd.f32 %v13003_v34, %v13002_v22  ;;  %v12891_v11 = vpop.f32.mrb[47].mxu1  ;;  %v2978_v38 = vsel %vm19525_vm5, %v2961_v29, 0  ;;  %v3179_v55 = vld [vmem:[#allocation2 + $0x90] sm:$0xf]  ;;  %v3303_v13 = vsel %vm1854_vm8, %v16960_v41, %v17004_v26  ;;  %v3103_v22 = vsel %vm1676_vm0, %v16968_v40, %v17006_v3 }
 0x245   : > { %5020 = vmatprep.mubr.bf16.mxu0 %v3437_v17  ;;  %v4484_v45 = vadd.f32 %v12889_v10, %v16920_v14  ;;  %v12892_v48 = vadd.f32 %v12891_v11, %v12890_v44  ;;  %v3117_v34 = vshll.u32 %v2977_v18, 16  ;;  %v3332_v44 = vshrl.u32 %v3195_v23, 16  ;;  %v17033_v29 = vld [vmem:[#allocation2 + $0x90] sm:$0xf] }
 0x246   : > { %v3335_v11 = vshll.u32 %v3195_v23, 16  ;;  %v19736_v41 = vrot.slane %v16926_v15, 4  ;;  %v3123_v40 = vshrl.u32 %v2978_v38, 16  ;;  %v3126_v2 = vshll.u32 %v2978_v38, 16 }
 0x247   : > { %v4487_v33 = vadd.f32 %v12892_v48, %v16920_v14  ;;  %v17031_v10 = vadd.f32 %v13001_v4, %v4484_v45  ;;  %v17040_v18 = vrot.slane %v3323_v50, 3  ;;  %v17042_v61 = vrot.slane %v3326_v31, 4  ;;  %v3480_v45 = vld [vmem:[#allocation2 + $0x10] sm:$0xf0] }
 0x248   : > { %v3439_v9 = vsel %vm1256_vm4, %v19736_v41, %v19735_v42  ;;  %v3116_v19 = vrot.slane %v3114_v0, 4  ;;  %v3119_v1 = vrot.slane %v3117_v34, 5  ;;  %v17049_v42 = vsel %vm19526_vm2, %v3179_v55, 0  ;;  %v19737_v48 = vld [vmem:[#allocation28_spill] sm:$0xff] }
 0x249   : > { %19734 = vst [vmem:[#allocation91_spill] sm:$0xff] %v17031_v10  ;;  %v17044_v4 = vadd.f32 %v13004_v12, %v4487_v33  ;;  %v12893_v23 = vpop.f32.mrb[48].mxu1  ;;  %v3111_v10 = vor.u32 %v3110_v35, %v3107_v56  ;;  %v3311_v50 = vor.u32 %v3310_v63, %v16995_v37  ;;  %v17052_v31 = vrot.slane %v3332_v44, 3 }
 0x24a   : > { %4868 = vmatmul.mubr.bf16.gmra.mrb[140].mxu1 %v3437_v17  ;;  %v3481_v17 = vld [vmem:[#allocation2 + $0x18] sm:$0xff]  ;;  %v12894_v5 = vpop.f32.mrb[49].mxu1  ;;  %v17055_v41 = vrot.slane %v3335_v11, 4  ;;  %v17059_v0 = vrot.slane %v3126_v2, 5  ;;  %vm19738_vm11 = vcmp.ne.s16.totalorder %v19737_v48, 0  ;;  %v3120_v55 = vor.u32 %v3119_v1, %v3116_v19 }
 0x24b   : > { %4875 = vmatprep.mubr.bf16.mxu1 %v3103_v22  ;;  %v12895_v12 = vadd.f32 %v12894_v5, %v12893_v23  ;;  %v12896_v38 = vpop.f32.mrb[50].mxu1  ;;  %v3112_v23 = vsel %vm1676_vm0, %v17006_v3, %v3111_v10  ;;  %v3498_v58 = vsel %vm2411_vm1, %v3481_v17, 0  ;;  %v19740_v3 = vrot.slane %v16947_v36, 4 }
 0x24c   : > { %5021 = vmatmul.mubr.bf16.gmra.mrb[104].mxu0 %v3303_v13  ;;  %v13005_v22 = vpop.f32.mrb[16].mxu0  ;;  %v12897_v56 = vpop.f32.mrb[51].mxu1  ;;  %v17057_v13 = vrot.slane %v3123_v40, 4  ;;  %v3497_v40 = vsel %vm19738_vm11, %v3480_v45, 0  ;;  %vm19746_vm11 = vcmp.ne.s16.totalorder %v16146_v30, 0 }
 0x24d   : > { %5028 = vmatprep.mubr.bf16.mxu0 %v3439_v9  ;;  %v13006_v35 = vpop.f32.mrb[17].mxu0  ;;  %v4492_v34 = vadd.f32 %v12895_v12, %v16920_v14  ;;  %v12898_v37 = vadd.f32 %v12897_v56, %v12896_v38  ;;  %v3312_v12 = vsel %vm1854_vm8, %v17004_v26, %v3311_v50  ;;  %v3515_v17 = vshrl.u32 %v3497_v40, 16 }
 0x24e   : > { %v13007_v63 = vadd.f32 %v13006_v35, %v13005_v22  ;;  %v13008_v44 = vpop.f32.mrb[18].mxu0  ;;  %v19741_v35 = vrot.slane %v16944_v32, 4  ;;  %v3518_v2 = vshll.u32 %v3497_v40, 16 }
 0x24f   : > { %v13009_v11 = vpop.f32.mrb[19].mxu0  ;;  %v4495_v38 = vadd.f32 %v12898_v37, %v16920_v14  ;;  %v3517_v40 = vrot.slane %v3515_v17, 4  ;;  %v3329_v17 = vor.u32 %v17042_v61, %v17040_v18  ;;  %v19744_v18 = vrot.slane %v16988_v6, 4 }
 0x250   : > { %v17074_v22 = vadd.f32 %v13007_v63, %v4492_v34  ;;  %v13010_v56 = vadd.f32 %v13009_v11, %v13008_v44  ;;  %v3441_v33 = vsel %vm1256_vm4, %v19741_v35, %v19740_v3  ;;  %v3320_v34 = vor.u32 %v17008_v20, %v16997_v16  ;;  %v3482_v35 = vld [vmem:[#allocation2 + $0x20] sm:$0xff] }
 0x251   : > { %v12899_v5 = vpop.f32.mrb[52].mxu1  ;;  %v3523_v63 = vshrl.u32 %v3498_v58, 16  ;;  %v3520_v20 = vrot.slane %v3518_v2, 5  ;;  %v3499_v2 = vsel %vm2412_vm10, %v3482_v35, 0 }
 0x252   : > { %4876 = vmatmul.mubr.bf16.gmra.mrb[144].mxu1 %v3439_v9  ;;  %v17081_v45 = vadd.f32 %v13010_v56, %v4495_v38  ;;  %v12900_v26 = vpop.f32.mrb[53].mxu1  ;;  %v3526_v56 = vshll.u32 %v3498_v58, 16  ;;  %v3321_v48 = vsel %vm1854_vm8, %v3311_v50, %v3320_v34 }
 0x253   : > { %4883 = vmatprep.mubr.bf16.mxu1 %v3112_v23  ;;  %v12901_v9 = vadd.f32 %v12900_v26, %v12899_v5  ;;  %v12902_v37 = vpop.f32.mrb[54].mxu1  ;;  %v19742_v26 = vrot.slane %v16947_v36, 4 }
 0x254   : > { %5029 = vmatmul.mubr.bf16.gmra.mrb[108].mxu0 %v3312_v12  ;;  %v12903_v11 = vpop.f32.mrb[55].mxu1  ;;  %v3121_v12 = vsel %vm1676_vm0, %v3111_v10, %v3120_v55  ;;  %v3129_v10 = vor.u32 %v17059_v0, %v17057_v13  ;;  %v3532_v0 = vshrl.u32 %v3499_v2, 16 }
 0x255   : > { %5036 = vmatprep.mubr.bf16.mxu0 %v3441_v33  ;;  %v4500_v3 = vadd.f32 %v12901_v9, %v16920_v14  ;;  %v12904_v23 = vadd.f32 %v12903_v11, %v12902_v37  ;;  %v3443_v9 = vsel %vm1256_vm4, %v19742_v26, %v17011_v8  ;;  %v3483_v11 = vld [vmem:[#allocation2 + $0x28] sm:$0xff]  ;;  %v3535_v26 = vshll.u32 %v3499_v2, 16 }
 0x256   : > { %v13011_v44 = vpop.f32.mrb[20].mxu0  ;;  %v3130_v13 = vsel %vm1676_vm0, %v3120_v55, %v3129_v10  ;;  %v3484_v10 = vld [vmem:[#allocation2 + $0x30] sm:$0xff] }
 0x257   : > { %v13012_v38 = vpop.f32.mrb[21].mxu0  ;;  %v4503_v16 = vadd.f32 %v12904_v23, %v16920_v14  ;;  %v3528_v23 = vrot.slane %v3526_v56, 5 }
 0x258   : > { %v13013_v19 = vadd.f32 %v13012_v38, %v13011_v44  ;;  %v13014_v1 = vpop.f32.mrb[22].mxu0  ;;  %v3525_v44 = vrot.slane %v3523_v63, 4  ;;  %v3445_v63 = vsel %vm1256_vm4, %v17011_v8, %v19744_v18 }
 0x259   : > { %v13015_v5 = vpop.f32.mrb[23].mxu0 }
 0x25a   : > { %4884 = vmatmul.mubr.bf16.gmra.mrb[148].mxu1 %v3441_v33  ;;  %v17093_v37 = vadd.f32 %v13013_v19, %v4500_v3  ;;  %v13016_v58 = vadd.f32 %v13015_v5, %v13014_v1  ;;  %v3330_v5 = vsel %vm1854_vm8, %v3320_v34, %v3329_v17  ;;  %v3485_v34 = vld [vmem:[#allocation2 + $0x38] sm:$0xff] }
 0x25b   : > { %4891 = vmatprep.mubr.bf16.mxu1 %v3121_v12 }
 0x25c   : > { %5037 = vmatmul.mubr.bf16.gmra.mrb[112].mxu0 %v3321_v48  ;;  %v17097_v50 = vadd.f32 %v13016_v58, %v4503_v16  ;;  %v12905_v33 = vpop.f32.mrb[56].mxu1  ;;  %v3500_v48 = vsel %vm19743_vm3, %v3483_v11, 0  ;;  %vm19751_vm3 = vcmp.ne.s16.totalorder %v16315_v59, 0 }
 0x25d   : > { %5044 = vmatprep.mubr.bf16.mxu0 %v3443_v9  ;;  %v12906_v3 = vpop.f32.mrb[57].mxu1  ;;  %v3541_v55 = vshrl.u32 %v3500_v48, 16 }
 0x25e   : > { %v12907_v38 = vadd.f32 %v12906_v3, %v12905_v33  ;;  %v12908_v19 = vpop.f32.mrb[58].mxu1  ;;  %v3521_v33 = vor.u32 %v3520_v20, %v3517_v40  ;;  %v3529_v3 = vor.u32 %v3528_v23, %v3525_v44  ;;  %v3534_v44 = vrot.slane %v3532_v0, 4 }
 0x25f   : > { %v12909_v12 = vpop.f32.mrb[59].mxu1  ;;  %v3537_v23 = vrot.slane %v3535_v26, 5  ;;  %v19749_v26 = vshrl.u32 %v17049_v42, 16 }
 0x260   : > { %v4508_v1 = vadd.f32 %v12907_v38, %v16920_v14  ;;  %v13017_v35 = vpop.f32.mrb[24].mxu0  ;;  %v12910_v16 = vadd.f32 %v12909_v12, %v12908_v19  ;;  %v3544_v38 = vshll.u32 %v3500_v48, 16  ;;  %v3338_v12 = vor.u32 %v17055_v41, %v17052_v31 }
 0x261   : > { %v13018_v61 = vpop.f32.mrb[25].mxu0  ;;  %v3530_v20 = vsel %vm1676_vm0, %v3521_v33, %v3529_v3  ;;  %v3501_v48 = vsel %vm19746_vm11, %v3484_v10, 0  ;;  %v19747_v41 = vrot.slane %v17033_v29, 4  ;;  %v3538_v29 = vor.u32 %v3537_v23, %v3534_v44 }
 0x262   : > { %4892 = vmatmul.mubr.bf16.gmra.mrb[152].mxu1 %v3443_v9  ;;  %v4511_v56 = vadd.f32 %v12910_v16, %v16920_v14  ;;  %v13019_v58 = vadd.f32 %v13018_v61, %v13017_v35  ;;  %v13020_v11 = vpop.f32.mrb[26].mxu0  ;;  %v19745_v16 = vrot.slane %v17028_v28, 4  ;;  %v3502_v28 = vsel %vm2415_vm6, %v3485_v34, 0 }
 0x263   : > { %4899 = vmatprep.mubr.bf16.mxu1 %v3130_v13  ;;  %v13021_v19 = vpop.f32.mrb[27].mxu0  ;;  %v3550_v10 = vshrl.u32 %v3501_v48, 16  ;;  %v3553_v33 = vshll.u32 %v3501_v48, 16  ;;  %v3539_v44 = vsel %vm1676_vm0, %v3529_v3, %v3538_v29  ;;  %vm19752_vm11 = vcmp.ne.s16.totalorder %v16413_v43, 0 }
 0x264   : > { %5045 = vmatmul.mubr.bf16.gmra.mrb[116].mxu0 %v3330_v5  ;;  %v17113_v2 = vadd.f32 %v13019_v58, %v4508_v1  ;;  %v13022_v9 = vadd.f32 %v13021_v19, %v13020_v11  ;;  %v2912_v35 = vsel %vm1256_vm4, %v17011_v8, %v19745_v16  ;;  %v3543_v1 = vrot.slane %v3541_v55, 4 }
 0x265   : > { %5052 = vmatprep.mubr.bf16.mxu0 %v3445_v63  ;;  %v3546_v5 = vrot.slane %v3544_v38, 5  ;;  %v3339_v8 = vsel %vm1854_vm8, %v3329_v17, %v3338_v12  ;;  %v19748_v63 = vrot.slane %v16988_v6, 4  ;;  %v19750_v58 = vshll.u32 %v17049_v42, 16 }
 0x266   : > { %v17121_v61 = vadd.f32 %v13022_v9, %v4511_v56  ;;  %v12911_v40 = vpop.f32.mrb[60].mxu1  ;;  %v3343_v56 = vrot.slane %v19749_v26, 3  ;;  %v3559_v9 = vshrl.u32 %v3502_v28, 16  ;;  %v3562_v16 = vshll.u32 %v3502_v28, 16 }
 0x267   : > { %v12912_v13 = vpop.f32.mrb[61].mxu1  ;;  %v3447_v0 = vsel %vm1256_vm4, %v19748_v63, %v19747_v41  ;;  %v3346_v11 = vrot.slane %v19750_v58, 4  ;;  %v3547_v41 = vor.u32 %v3546_v5, %v3543_v1  ;;  %v3555_v58 = vrot.slane %v3553_v33, 5 }
 0x268   : > { %v12913_v18 = vadd.f32 %v12912_v13, %v12911_v40  ;;  %v12914_v31 = vpop.f32.mrb[62].mxu1  ;;  %v14745_v40 = vld [vmem:[#allocation10 + $0x40] sm:$0xff]   ;;  %v3561_v23 = vrot.slane %v3559_v9, 4  ;;  %v3564_v28 = vrot.slane %v3562_v16, 5 }
 0x269   : > { %v12915_v55 = vpop.f32.mrb[63].mxu1  ;;  %v14746_v13 = vld [vmem:[#allocation10] sm:$0xff]   ;;  %13325 = vmatprep.subr.bf16.mxu0 %v14745_v40  ;;  %v3548_v1 = vsel %vm1676_vm0, %v3538_v29, %v3547_v41 }
 0x26a   : > { %4900 = vmatmul.mubr.bf16.gmra.mrb[156].mxu1 %v2912_v35  ;;  %v4516_v38 = vadd.f32 %v12913_v18, %v16920_v14  ;;  %v13023_v19 = vpop.f32.mrb[28].mxu0  ;;  %v12916_v17 = vadd.f32 %v12915_v55, %v12914_v31  ;;  %v3347_v35 = vor.u32 %v3346_v11, %v3343_v56  ;;  %v3552_v18 = vrot.slane %v3550_v10, 4  ;;  %13326 = vmatpush3.bf16.msra.mxu0 %v14746_v13  ;;  %v14896_v11 = vld [vmem:[#allocation2 + $0x48] sm:$0xff] }
 0x26b   : > { %14333 = vmatprep.mubr.bf16.mxu1 %v3530_v20  ;;  %v13024_v34 = vpop.f32.mrb[29].mxu0  ;;  %v3504_v55 = vsel %vm2417_vm14, %v14896_v11, 0 }
 0x26c   : > { %5053 = vmatmul.mubr.bf16.gmra.mrb[120].mxu0 %v3339_v8  ;;  %v4519_v42 = vadd.f32 %v12916_v17, %v16920_v14  ;;  %v13025_v63 = vadd.f32 %v13024_v34, %v13023_v19  ;;  %v13026_v26 = vpop.f32.mrb[30].mxu0  ;;  %v14895_v8 = vld [vmem:[#allocation2 + $0x40] sm:$0xff]  ;;  %v3348_v10 = vsel %vm1854_vm8, %v3338_v12, %v3347_v35  ;;  %v3556_v3 = vor.u32 %v3555_v58, %v3552_v18 }
 0x26d   : > { %5060 = vmatprep.mubr.bf16.mxu0 %v3447_v0  ;;  %v13027_v48 = vpop.f32.mrb[31].mxu0  ;;  %v3503_v0 = vsel %vm19751_vm3, %v14895_v8, 0  ;;  %v3565_v17 = vor.u32 %v3564_v28, %v3561_v23  ;;  %v3577_v16 = vshrl.u32 %v3504_v55, 16  ;;  %vm19753_vm3 = vcmp.ne.s16.totalorder %v16511_v25, 0 }
 0x26e   : > { %v17140_v31 = vadd.f32 %v13025_v63, %v4516_v38  ;;  %v13028_v20 = vadd.f32 %v13027_v48, %v13026_v26  ;;  %v3568_v29 = vshrl.u32 %v3503_v0, 16  ;;  %v3571_v34 = vshll.u32 %v3503_v0, 16 }
 0x26f   : > { %v3580_v63 = vshll.u32 %v3504_v55, 16  ;;  %v3557_v12 = vsel %vm1676_vm0, %v3547_v41, %v3556_v3  ;;  %v3566_v58 = vsel %vm1676_vm0, %v3556_v3, %v3565_v17  ;;  %v3579_v23 = vrot.slane %v3577_v16, 4  ;;  %v14898_v55 = vld [vmem:[#allocation2 + $0x58] sm:$0xff] }
 0x270   : > { %v17144_v5 = vadd.f32 %v13028_v20, %v4519_v42  ;;  %v12917_v56 = vpop.f32.mrb[64].mxu1  ;;  %v3570_v20 = vrot.slane %v3568_v29, 4  ;;  %v3506_v41 = vsel %vm2419_vm15, %v14898_v55, 0  ;;  %v14748_v29 = vld [vmem:[#allocation10 + $0x8] sm:$0xff]  }
 0x271   : > { %v12918_v33 = vpop.f32.mrb[65].mxu1  ;;  %v3582_v8 = vrot.slane %v3580_v63, 5  ;;  %v3598_v16 = vshll.u32 %v3506_v41, 16  ;;  %v3507_v63 = vsel %vm19753_vm3, %v16907_v27, 0  ;;  %vm19755_vm3 = vcmp.ne.s16.totalorder %v16588_v49, 0 }
 0x272   : > { %14334 = vmatmul.mubr.bf16.vlgmr.msra.gmra.mrb[160].mxu1 %v3539_v44  ;;  %v12919_v38 = vadd.f32 %v12918_v33, %v12917_v56  ;;  %v12920_v19 = vpop.f32.mrb[66].mxu1  ;;  %v3573_v44 = vrot.slane %v3571_v34, 5  ;;  %v14897_v56 = vld [vmem:[#allocation2 + $0x50] sm:$0xff] }
 0x273   : > { %14337 = vmatprep.mubr.bf16.mxu1 %v3548_v1  ;;  %v12921_v9 = vpop.f32.mrb[67].mxu1  ;;  %v3505_v11 = vsel %vm19752_vm11, %v14897_v56, 0  ;;  %v3583_v34 = vor.u32 %v3582_v8, %v3579_v23  ;;  %vm19754_vm11 = vcmp.ne.s16.totalorder %v16548_v46, 0  ;;  %v3607_v23 = vshll.u32 %v3507_v63, 16 }
 0x274   : > { %5061 = vmatmul.mubr.bf16.gmra.mrb[124].mxu0 %v3348_v10  ;;  %v4524_v40 = vadd.f32 %v12919_v38, %v16920_v14  ;;  %v13029_v13 = vpop.f32.mrb[32].mxu0  ;;  %v12922_v42 = vadd.f32 %v12921_v9, %v12920_v19  ;;  %v3574_v33 = vor.u32 %v3573_v44, %v3570_v20  ;;  %v3586_v3 = vshrl.u32 %v3505_v11, 16  ;;  %v14747_v19 = vld [vmem:[#allocation10 + $0x48] sm:$0xff]  }
 0x275   : > { %v13030_v26 = vpop.f32.mrb[33].mxu0  ;;  %v3589_v38 = vshll.u32 %v3505_v11, 16  ;;  %v3595_v9 = vshrl.u32 %v3506_v41, 16  ;;  %13327 = vmatprep.subr.bf16.mxu0 %v14747_v19 }
 0x276   : > { %v4527_v35 = vadd.f32 %v12922_v42, %v16920_v14  ;;  %v13031_v48 = vadd.f32 %v13030_v26, %v13029_v13  ;;  %v13032_v18 = vpop.f32.mrb[34].mxu0  ;;  %13328 = vmatpush3.bf16.msra.mxu0 %v14748_v29  ;;  %v3588_v13 = vrot.slane %v3586_v3, 4  ;;  %v3584_v26 = vsel %vm1676_vm0, %v3574_v33, %v3583_v34 }
 0x277   : > { %v13033_v28 = vpop.f32.mrb[35].mxu0  ;;  %v3591_v42 = vrot.slane %v3589_v38, 5  ;;  %v3609_v29 = vrot.slane %v3607_v23, 5 }
 0x278   : > { %v17155_v1 = vadd.f32 %v13031_v48, %v4524_v40  ;;  %v13034_v0 = vadd.f32 %v13033_v28, %v13032_v18  ;;  %v3575_v40 = vsel %vm1676_vm0, %v3565_v17, %v3574_v33  ;;  %v3600_v48 = vrot.slane %v3598_v16, 5 }
 0x279   : > { %v3508_v18 = vsel %vm19754_vm11, %v16926_v15, 0  ;;  %v3604_v17 = vshrl.u32 %v3507_v63, 16  ;;  %v3592_v28 = vor.u32 %v3591_v42, %v3588_v13  ;;  %vm19756_vm11 = vcmp.ne.s16.totalorder %v16679_v7, 0 }
 0x27a   : > { %14338 = vmatmul.mubr.bf16.gmra.mrb[164].mxu1 %v3557_v12  ;;  %v17161_v10 = vadd.f32 %v13034_v0, %v4527_v35  ;;  %v3597_v35 = vrot.slane %v3595_v9, 4  ;;  %v3613_v0 = vshrl.u32 %v3508_v18, 16  ;;  %v3616_v27 = vshll.u32 %v3508_v18, 16 }
 0x27b   : > { %14341 = vmatprep.mubr.bf16.mxu1 %v3566_v58  ;;  %v3606_v19 = vrot.slane %v3604_v17, 4  ;;  %v3593_v9 = vsel %vm1676_vm0, %v3583_v34, %v3592_v28 }
 0x27c   : > { %v3601_v41 = vor.u32 %v3600_v48, %v3597_v35  ;;  %v3618_v13 = vrot.slane %v3616_v27, 5 }
 0x27d   : > { %v3610_v34 = vor.u32 %v3609_v29, %v3606_v19 }
 0x27e   : > { %v3602_v63 = vsel %vm1676_vm0, %v3592_v28, %v3601_v41  ;;  %v14749_v28 = vld [vmem:[#allocation10 + $0x50] sm:$0xff]  }
 0x27f   : > { %13329 = vmatprep.subr.bf16.mxu0 %v14749_v28 }
 0x280   : > { %v12923_v12 = vpop.f32.mrb[68].mxu1 }
 0x281   : > { %v12924_v58 = vpop.f32.mrb[69].mxu1 }
 0x282   : > { %14342 = vmatmul.mubr.bf16.gmra.mrb[168].mxu1 %v3575_v40  ;;  %v12925_v20 = vadd.f32 %v12924_v58, %v12923_v12  ;;  %v12926_v44 = vpop.f32.mrb[70].mxu1  ;;  %v3615_v40 = vrot.slane %v3613_v0, 4  ;;  %v3509_v12 = vsel %vm19755_vm3, %v16944_v32, 0 }
 0x283   : > { %14345 = vmatprep.mubr.bf16.mxu1 %v3584_v26  ;;  %v12927_v8 = vpop.f32.mrb[71].mxu1  ;;  %v3622_v17 = vshrl.u32 %v3509_v12, 16  ;;  %v3625_v23 = vshll.u32 %v3509_v12, 16  ;;  %v3512_v12 = vsel %vm19533_vm12, %v16988_v6, 0 }
 0x284   : > { %v4532_v56 = vadd.f32 %v12925_v20, %v16920_v14  ;;  %v13035_v11 = vpop.f32.mrb[36].mxu0  ;;  %v12928_v55 = vadd.f32 %v12927_v8, %v12926_v44  ;;  %v3619_v44 = vor.u32 %v3618_v13, %v3615_v40  ;;  %v14750_v8 = vld [vmem:[#allocation10 + $0x10] sm:$0xff]   ;;  %v3652_v28 = vshll.u32 %v3512_v12, 16 }
 0x285   : > { %v13036_v33 = vpop.f32.mrb[37].mxu0  ;;  %13330 = vmatpush3.bf16.msra.mxu0 %v14750_v8  ;;  %v3624_v19 = vrot.slane %v3622_v17, 4  ;;  %v3627_v29 = vrot.slane %v3625_v23, 5  ;;  %v3649_v23 = vshrl.u32 %v3512_v12, 16  ;;  %v14751_v12 = vld [vmem:[#allocation10 + $0x58] sm:$0xff]  }
 0x286   : > { %v4535_v3 = vadd.f32 %v12928_v55, %v16920_v14  ;;  %v13037_v15 = vadd.f32 %v13036_v33, %v13035_v11  ;;  %v13038_v38 = vpop.f32.mrb[38].mxu0  ;;  %v3510_v14 = vsel %vm2423_vm7, %v16947_v36, 0  ;;  %v17185_v11 = vld [vmem:[#allocation13] ss:$0 sm:$0xff]  ;;  %v3511_v33 = vsel %vm19756_vm11, %v16981_v24, 0  ;;  %13331 = vmatprep.subr.bf16.mxu0 %v14751_v12 }
 0x287   : > { %v13039_v16 = vpop.f32.mrb[39].mxu0  ;;  %v3631_v32 = vshrl.u32 %v3510_v14, 16  ;;  %v3634_v27 = vshll.u32 %v3510_v14, 16  ;;  %v3643_v14 = vshll.u32 %v3511_v33, 16 }
 0x288   : > { %v17174_v42 = vadd.f32 %v13037_v15, %v4532_v56  ;;  %v13040_v26 = vadd.f32 %v13039_v16, %v13038_v38  ;;  %v3620_v38 = vsel %vm1676_vm0, %v3610_v34, %v3619_v44 }
 0x289   : > { %v12929_v35 = vpop.f32.mrb[72].mxu1  ;;  %v3633_v13 = vrot.slane %v3631_v32, 4  ;;  %v3496_v32 = vld [vmem:[#allocation2 + $0x90] sm:$0x1f] }
 0x28a   : > { %14346 = vmatmul.mubr.bf16.gmra.mrb[172].mxu1 %v3593_v9  ;;  %v17183_v48 = vadd.f32 %v13040_v26, %v4535_v3  ;;  %v12930_v18 = vpop.f32.mrb[73].mxu1  ;;  %v3611_v3 = vsel %vm1676_vm0, %v3601_v41, %v3610_v34  ;;  %v3628_v34 = vor.u32 %v3627_v29, %v3624_v19 }
 0x28b   : > { %14349 = vmatprep.mubr.bf16.mxu1 %v3602_v63  ;;  %v12931_v58 = vadd.f32 %v12930_v18, %v12929_v35  ;;  %v12932_v20 = vpop.f32.mrb[74].mxu1  ;;  %v3636_v63 = vrot.slane %v3634_v27, 5  ;;  %v3640_v35 = vshrl.u32 %v3511_v33, 16 }
 0x28c   : > { %v12933_v0 = vpop.f32.mrb[75].mxu1 }
 0x28d   : > { %v12934_v56 = vadd.f32 %v12933_v0, %v12932_v20  ;;  %v4540_v36 = vadd.f32 %v17185_v11, %v12931_v58  ;;  %v3637_v17 = vor.u32 %v3636_v63, %v3633_v13  ;;  %v3642_v6 = vrot.slane %v3640_v35, 4 }
 0x28e   : > { %v13041_v55 = vpop.f32.mrb[40].mxu0 }
 0x28f   : > { %v13042_v15 = vpop.f32.mrb[41].mxu0  ;;  %v4543_v9 = vadd.f32 %v17185_v11, %v12934_v56  ;;  %v3645_v56 = vrot.slane %v3643_v14, 5  ;;  %v3638_v33 = vsel %vm1676_vm0, %v3628_v34, %v3637_v17 }
 0x290   : > { %v13043_v16 = vadd.f32 %v13042_v15, %v13041_v55  ;;  %v13044_v40 = vpop.f32.mrb[42].mxu0  ;;  %v3654_v15 = vrot.slane %v3652_v28, 5 }
 0x291   : > { %v13045_v26 = vpop.f32.mrb[43].mxu0 }
 0x292   : > { %14350 = vmatmul.mubr.bf16.gmra.mrb[176].mxu1 %v3611_v3  ;;  %v17197_v24 = vadd.f32 %v13043_v16, %v4540_v36  ;;  %v13046_v41 = vadd.f32 %v13045_v26, %v13044_v40  ;;  %v3629_v36 = vsel %vm1676_vm0, %v3619_v44, %v3628_v34  ;;  %v3651_v3 = vrot.slane %v3649_v23, 4 }
 0x293   : > { %14353 = vmatprep.mubr.bf16.mxu1 %v3620_v38  ;;  %v12935_v18 = vpop.f32.mrb[76].mxu1  ;;  %v3513_v38 = vsel %vm19525_vm5, %v3496_v32, 0  ;;  %v3646_v16 = vor.u32 %v3645_v56, %v3642_v6 }
 0x294   : > { %v17199_v58 = vadd.f32 %v13046_v41, %v4543_v9  ;;  %v12936_v20 = vpop.f32.mrb[77].mxu1  ;;  %v3658_v44 = vshrl.u32 %v3513_v38, 16  ;;  %v3661_v26 = vshll.u32 %v3513_v38, 16  ;;  %v14752_v41 = vld [vmem:[#allocation10 + $0x18] sm:$0xff]   ;;  %v3655_v14 = vor.u32 %v3654_v15, %v3651_v3 }
 0x295   : > { %v12937_v8 = vadd.f32 %v12936_v20, %v12935_v18  ;;  %v12938_v0 = vpop.f32.mrb[78].mxu1  ;;  %13332 = vmatpush3.bf16.msra.mxu0 %v14752_v41  ;;  %v3647_v23 = vsel %vm1676_vm0, %v3637_v17, %v3646_v16 }
 0x296   : > { %v12939_v27 = vpop.f32.mrb[79].mxu1  ;;  %v3660_v28 = vrot.slane %v3658_v44, 4  ;;  %v14753_v44 = vld [vmem:[#allocation10 + $0x60] sm:$0xff]  }
 0x297   : > { %v12940_v55 = vadd.f32 %v12939_v27, %v12938_v0  ;;  %v4548_v19 = vadd.f32 %v17185_v11, %v12937_v8  ;;  %v3663_v8 = vrot.slane %v3661_v26, 5  ;;  %v3656_v0 = vsel %vm1676_vm0, %v3646_v16, %v3655_v14  ;;  %v14754_v26 = vld [vmem:[#allocation10 + $0x20] sm:$0xff]   ;;  %13333 = vmatprep.subr.bf16.mxu0 %v14753_v44 }
 0x299   : > { %v13047_v29 = vpop.f32.mrb[44].mxu0  ;;  %v4551_v40 = vadd.f32 %v17185_v11, %v12940_v55  ;;  %13334 = vmatpush3.bf16.msra.mxu0 %v14754_v26 }
 0x29a   : > { %14354 = vmatmul.mubr.bf16.gmra.mrb[180].mxu1 %v3629_v36  ;;  %v13048_v9 = vpop.f32.mrb[45].mxu0  ;;  %v3664_v36 = vor.u32 %v3663_v8, %v3660_v28 }
 0x29b   : > { %v13049_v13 = vadd.f32 %v13048_v9, %v13047_v29  ;;  %v13050_v63 = vpop.f32.mrb[46].mxu0  ;;  %14357 = vmatprep.mubr.bf16.mxu1 %v3638_v33 }
 0x29c   : > { %v13051_v35 = vpop.f32.mrb[47].mxu0 }
 0x29d   : > { %v17207_v34 = vadd.f32 %v13049_v13, %v4548_v19  ;;  %v13052_v18 = vadd.f32 %v13051_v35, %v13050_v63  ;;  %v3665_v19 = vsel %vm1676_vm0, %v3655_v14, %v3664_v36 }
 0x29f   : > { %v17209_v20 = vadd.f32 %v13052_v18, %v4551_v40 }
 0x2a1   : > { %v12941_v32 = vpop.f32.mrb[80].mxu1 }
 0x2a2   : > { %14358 = vmatmul.mubr.bf16.gmra.mrb[184].mxu1 %v3647_v23  ;;  %v12942_v27 = vpop.f32.mrb[81].mxu1 }
 0x2a3   : > { %v12943_v6 = vadd.f32 %v12942_v27, %v12941_v32  ;;  %v12944_v56 = vpop.f32.mrb[82].mxu1  ;;  %14361 = vmatprep.mubr.bf16.mxu1 %v3656_v0 }
 0x2a4   : > { %v12945_v55 = vpop.f32.mrb[83].mxu1 }
 0x2a5   : > { %v12946_v33 = vadd.f32 %v12945_v55, %v12944_v56  ;;  %v4556_v3 = vadd.f32 %v17185_v11, %v12943_v6 }
 0x2a6   : > { %v13053_v15 = vpop.f32.mrb[48].mxu0 }
 0x2a7   : > { %v13054_v38 = vpop.f32.mrb[49].mxu0  ;;  %v4559_v17 = vadd.f32 %v17185_v11, %v12946_v33 }
 0x2a8   : > { %v13055_v29 = vadd.f32 %v13054_v38, %v13053_v15  ;;  %v13056_v9 = vpop.f32.mrb[50].mxu0 }
 0x2a9   : > { %v13057_v16 = vpop.f32.mrb[51].mxu0 }
 0x2aa   : > { %v17216_v40 = vadd.f32 %v13055_v29, %v4556_v3  ;;  %v13058_v13 = vadd.f32 %v13057_v16, %v13056_v9  ;;  %14362 = vmatmul.mubr.bf16.gmra.mrb[188].mxu1 %v3665_v19  ;;  %v14755_v9 = vld [vmem:[#allocation10 + $0x68] sm:$0xff]  }
 0x2ab   : > { %v12947_v63 = vpop.f32.mrb[84].mxu1  ;;  %v14756_v16 = vld [vmem:[#allocation10 + $0x28] sm:$0xff]   ;;  %13335 = vmatprep.subr.bf16.mxu0 %v14755_v9 }
 0x2ac   : > { %v17218_v12 = vadd.f32 %v13058_v13, %v4559_v17  ;;  %v12948_v41 = vpop.f32.mrb[85].mxu1  ;;  %13336 = vmatpush3.bf16.msra.mxu0 %v14756_v16 }
 0x2ad   : > { %v12949_v35 = vadd.f32 %v12948_v41, %v12947_v63  ;;  %v12950_v18 = vpop.f32.mrb[86].mxu1 }
 0x2ae   : > { %v12951_v23 = vpop.f32.mrb[87].mxu1 }
 0x2af   : > { %v12952_v14 = vadd.f32 %v12951_v23, %v12950_v18  ;;  %v4564_v28 = vadd.f32 %v17185_v11, %v12949_v35 }
 0x2b1   : > { %v13059_v8 = vpop.f32.mrb[52].mxu0  ;;  %v4567_v32 = vadd.f32 %v17185_v11, %v12952_v14 }
 0x2b2   : > { %v13060_v0 = vpop.f32.mrb[53].mxu0 }
 0x2b3   : > { %v13061_v27 = vadd.f32 %v13060_v0, %v13059_v8  ;;  %v13062_v6 = vpop.f32.mrb[54].mxu0 }
 0x2b4   : > { %v13063_v56 = vpop.f32.mrb[55].mxu0 }
 0x2b5   : > { %v17222_v36 = vadd.f32 %v13061_v27, %v4564_v28  ;;  %v13064_v55 = vadd.f32 %v13063_v56, %v13062_v6  ;;  %v12953_v33 = vpop.f32.mrb[88].mxu1 }
 0x2b6   : > { %v12954_v3 = vpop.f32.mrb[89].mxu1 }
 0x2b7   : > { %v17224_v15 = vadd.f32 %v13064_v55, %v4567_v32  ;;  %v12955_v38 = vadd.f32 %v12954_v3, %v12953_v33  ;;  %v12956_v19 = vpop.f32.mrb[90].mxu1 }
 0x2b8   : > { %v12957_v17 = vpop.f32.mrb[91].mxu1 }
 0x2b9   : > { %v12958_v29 = vadd.f32 %v12957_v17, %v12956_v19  ;;  %v4572_v44 = vadd.f32 %v17185_v11, %v12955_v38 }
 0x2bb   : > { %v4575_v14 = vadd.f32 %v17185_v11, %v12958_v29 }
 0x2bd   : > { %v12959_v13 = vpop.f32.mrb[92].mxu1 }
 0x2be   : > { %v12960_v63 = vpop.f32.mrb[93].mxu1 }
 0x2bf   : > { %v13065_v26 = vpop.f32.mrb[56].mxu0  ;;  %v12961_v41 = vadd.f32 %v12960_v63, %v12959_v13  ;;  %v12962_v35 = vpop.f32.mrb[94].mxu1 }
 0x2c0   : > { %v13066_v18 = vpop.f32.mrb[57].mxu0  ;;  %v12963_v23 = vpop.f32.mrb[95].mxu1 }
 0x2c1   : > { %v13067_v28 = vadd.f32 %v13066_v18, %v13065_v26  ;;  %v13068_v8 = vpop.f32.mrb[58].mxu0  ;;  %v12964_v0 = vadd.f32 %v12963_v23, %v12962_v35  ;;  %v4580_v3 = vadd.f32 %v17185_v11, %v12961_v41  ;;  %v14759_v35 = vld [vmem:[#allocation10 + $0xc0] sm:$0xff]  }
 0x2c2   : > { %v13069_v32 = vpop.f32.mrb[59].mxu0  ;;  %v14760_v23 = vld [vmem:[#allocation10 + $0x80] sm:$0xff]   ;;  %13437 = vmatprep.subr.bf16.mxu1 %v14759_v35  ;;  %v14764_v35 = vld [vmem:[#allocation10 + $0x90] sm:$0xff]  }
 0x2c3   : > { %v17228_v27 = vadd.f32 %v13067_v28, %v4572_v44  ;;  %v13070_v6 = vadd.f32 %v13069_v32, %v13068_v8  ;;  %v4583_v29 = vadd.f32 %v17185_v11, %v12964_v0  ;;  %v14757_v8 = vld [vmem:[#allocation10 + $0x70] sm:$0xff]   ;;  %13438 = vmatpush3.bf16.msra.mxu1 %v14760_v23  ;;  %v14761_v0 = vld [vmem:[#allocation10 + $0xc8] sm:$0xff]  }
 0x2c4   : > { %v14758_v32 = vld [vmem:[#allocation10 + $0x30] sm:$0xff]   ;;  %13337 = vmatprep.subr.bf16.mxu0 %v14757_v8  ;;  %13439 = vmatprep.subr.bf16.mxu1 %v14761_v0  ;;  %v14765_v0 = vld [vmem:[#allocation10 + $0xd8] sm:$0xff]  }
 0x2c5   : > { %v17230_v56 = vadd.f32 %v13070_v6, %v4575_v14  ;;  %v13093_v55 = vpop.f32.mrb[96].mxu1  ;;  %13338 = vmatpush3.bf16.msra.mxu0 %v14758_v32  ;;  %v19758_v23 = vld [vmem:[#allocation88_spill] sm:$0xff] }
 0x2c6   : > { %v13094_v33 = vpop.f32.mrb[97].mxu1  ;;  %13339 = vmatprep.subr.bf16.mxu0 %v14767_v52 }
 0x2c7   : > { %v13071_v38 = vpop.f32.mrb[60].mxu0  ;;  %v13095_v19 = vadd.f32 %v13094_v33, %v13093_v55  ;;  %v13096_v17 = vpop.f32.mrb[98].mxu1 }
 0x2c8   : > { %v13072_v9 = vpop.f32.mrb[61].mxu0  ;;  %v13097_v16 = vpop.f32.mrb[99].mxu1 }
 0x2c9   : > { %v13073_v13 = vadd.f32 %v13072_v9, %v13071_v38  ;;  %v13074_v63 = vpop.f32.mrb[62].mxu0  ;;  %v4782_v26 = vadd.f32 %v13095_v19, %v16932_v57  ;;  %v13098_v44 = vadd.f32 %v13097_v16, %v13096_v17  ;;  %v14762_v57 = vld [vmem:[#allocation10 + $0x88] sm:$0xff]  }
 0x2ca   : > { %v13075_v18 = vpop.f32.mrb[63].mxu0  ;;  %13440 = vmatpush3.bf16.msra.mxu1 %v14762_v57  ;;  %v19757_v16 = vld [vmem:[#allocation87_spill] sm:$0xff]  ;;  %v14766_v57 = vld [vmem:[#allocation10 + $0x98] sm:$0xff]  }
 0x2cb   : > { %v17235_v14 = vadd.f32 %v13073_v13, %v4580_v3  ;;  %v13076_v28 = vadd.f32 %v13075_v18, %v13074_v63  ;;  %v4785_v41 = vadd.f32 %v13098_v44, %v16938_v51 }
 0x2cd   : > { %v17238_v6 = vadd.f32 %v13076_v28, %v4583_v29  ;;  %v13099_v11 = vpop.f32.mrb[100].mxu1  ;;  %v14763_v29 = vld [vmem:[#allocation10 + $0xd0] sm:$0xff]  }
 0x2ce   : > { %v13100_v55 = vpop.f32.mrb[101].mxu1  ;;  %13441 = vmatprep.subr.bf16.mxu1 %v14763_v29  ;;  %v14769_v29 = vld [vmem:[#allocation10 + $0xe0] sm:$0xff]  }
 0x2cf   : > { %v13205_v33 = vpop.f32.mrb[64].mxu0  ;;  %v13101_v38 = vadd.f32 %v13100_v55, %v13099_v11  ;;  %v13102_v19 = vpop.f32.mrb[102].mxu1  ;;  %13442 = vmatpush3.bf16.msra.mxu1 %v14764_v35  ;;  %v14770_v35 = vld [vmem:[#allocation10 + $0xa0] sm:$0xff]  }
 0x2d0   : > { %v13206_v3 = vpop.f32.mrb[65].mxu0  ;;  %v13103_v17 = vpop.f32.mrb[103].mxu1  ;;  %13443 = vmatprep.subr.bf16.mxu1 %v14765_v0 }
 0x2d1   : > { %v13207_v51 = vadd.f32 %v13206_v3, %v13205_v33  ;;  %v13208_v9 = vpop.f32.mrb[66].mxu0  ;;  %v4790_v13 = vadd.f32 %v13101_v38, %v19757_v16  ;;  %v13104_v63 = vadd.f32 %v13103_v17, %v13102_v19 }
 0x2d2   : > { %v13209_v44 = vpop.f32.mrb[67].mxu0 }
 0x2d3   : > { %v13210_v18 = vadd.f32 %v13209_v44, %v13208_v9  ;;  %v4793_v28 = vadd.f32 %v13104_v63, %v19758_v23  ;;  %v17242_v8 = vadd.f32 %v13207_v51, %v4782_v26  ;;  %13444 = vmatpush3.bf16.msra.mxu1 %v14766_v57  ;;  %v19759_v63 = vld [vmem:[#allocation89_spill] sm:$0xff]  ;;  %v14771_v57 = vld [vmem:[#allocation10 + $0xe8] sm:$0xff]  }
 0x2d4   : > { %13445 = vmatprep.subr.bf16.mxu1 %v14769_v29 }
 0x2d5   : > { %v13105_v32 = vpop.f32.mrb[104].mxu1  ;;  %v17244_v11 = vadd.f32 %v13210_v18, %v4785_v41  ;;  %v19760_v18 = vld [vmem:[#allocation90_spill] sm:$0xff] }
 0x2d6   : > { %v13106_v55 = vpop.f32.mrb[105].mxu1 }
 0x2d7   : > { %v13211_v33 = vpop.f32.mrb[68].mxu0  ;;  %v13107_v3 = vadd.f32 %v13106_v55, %v13105_v32  ;;  %v13108_v38 = vpop.f32.mrb[106].mxu1  ;;  %v14768_v32 = vld [vmem:[#allocation10 + $0x38] sm:$0xff]   ;;  %13446 = vmatpush3.bf16.msra.mxu1 %v14770_v35  ;;  %v14773_v35 = vld [vmem:[#allocation10 + $0xf0] sm:$0xff]  }
 0x2d8   : > { %v13212_v19 = vpop.f32.mrb[69].mxu0  ;;  %v13109_v17 = vpop.f32.mrb[107].mxu1  ;;  %13340 = vmatpush3.bf16.msra.mxu0 %v14768_v32  ;;  %13447 = vmatprep.subr.bf16.mxu1 %v14771_v57 }
 0x2d9   : > { %v13213_v9 = vadd.f32 %v13212_v19, %v13211_v33  ;;  %v13214_v16 = vpop.f32.mrb[70].mxu0  ;;  %v4798_v26 = vadd.f32 %v13107_v3, %v19759_v63  ;;  %v13110_v51 = vadd.f32 %v13109_v17, %v13108_v38  ;;  %v14772_v3 = vld [vmem:[#allocation10 + $0xa8] sm:$0xff]  }
 0x2da   : > { %v13215_v44 = vpop.f32.mrb[71].mxu0 }
 0x2db   : > { %v13216_v41 = vadd.f32 %v13215_v44, %v13214_v16  ;;  %v4801_v23 = vadd.f32 %v13110_v51, %v19760_v18  ;;  %v17248_v53 = vadd.f32 %v13213_v9, %v4790_v13  ;;  %13448 = vmatpush3.bf16.msra.mxu1 %v14772_v3  ;;  %v19761_v51 = vld [vmem:[#allocation91_spill] sm:$0xff] }
 0x2dc   : > { %13449 = vmatprep.subr.bf16.mxu1 %v14773_v35 }
 0x2dd   : > { %v13111_v0 = vpop.f32.mrb[108].mxu1  ;;  %v17250_v55 = vadd.f32 %v13216_v41, %v4793_v28  ;;  %v14774_v41 = vld [vmem:[#allocation10 + $0xb0] sm:$0xff]  }
 0x2de   : > { %v13112_v33 = vpop.f32.mrb[109].mxu1 }
 0x2df   : > { %v13217_v38 = vpop.f32.mrb[72].mxu0  ;;  %v13113_v19 = vadd.f32 %v13112_v33, %v13111_v0  ;;  %v13114_v17 = vpop.f32.mrb[110].mxu1  ;;  %13450 = vmatpush3.bf16.msra.mxu1 %v14774_v41  ;;  %v14775_v33 = vld [vmem:[#allocation10 + $0xf8] sm:$0xff]  }
 0x2e0   : > { %v13218_v16 = vpop.f32.mrb[73].mxu0  ;;  %v13115_v63 = vpop.f32.mrb[111].mxu1  ;;  %13451 = vmatprep.subr.bf16.mxu1 %v14775_v33 }
 0x2e1   : > { %v13219_v13 = vadd.f32 %v13218_v16, %v13217_v38  ;;  %v13220_v9 = vpop.f32.mrb[74].mxu0  ;;  %v4806_v29 = vadd.f32 %v13113_v19, %v19761_v51  ;;  %v13116_v44 = vadd.f32 %v13115_v63, %v13114_v17  ;;  %v14776_v38 = vld [vmem:[#allocation10 + $0xb8] sm:$0xff]  }
 0x2e2   : > { %v13221_v28 = vpop.f32.mrb[75].mxu0 }
 0x2e3   : > { %v13222_v52 = vadd.f32 %v13221_v28, %v13220_v9  ;;  %v4809_v18 = vadd.f32 %v13116_v44, %v17044_v4  ;;  %v17254_v32 = vadd.f32 %v13219_v13, %v4798_v26  ;;  %13452 = vmatpush3.bf16.msra.mxu1 %v14776_v38  ;;  %v14777_v28 = vld [vmem:[#allocation10 + $0x140] sm:$0xff]  }
 0x2e4   : > { %13549 = vmatprep.subr.bf16.mxu0 %v14777_v28 }
 0x2e5   : > { %v13117_v0 = vpop.f32.mrb[112].mxu1  ;;  %v17256_v57 = vadd.f32 %v13222_v52, %v4801_v23 }
 0x2e6   : > { %v13118_v3 = vpop.f32.mrb[113].mxu1 }
 0x2e7   : > { %v13223_v16 = vpop.f32.mrb[76].mxu0  ;;  %v13119_v7 = vadd.f32 %v13118_v3, %v13117_v0  ;;  %v13120_v19 = vpop.f32.mrb[114].mxu1 }
 0x2e8   : > { %v13224_v17 = vpop.f32.mrb[77].mxu0  ;;  %v13121_v63 = vpop.f32.mrb[115].mxu1 }
 0x2e9   : > { %v13225_v9 = vadd.f32 %v13224_v17, %v13223_v16  ;;  %v13226_v51 = vpop.f32.mrb[78].mxu0  ;;  %v4814_v4 = vadd.f32 %v13119_v7, %v17074_v22  ;;  %v13122_v26 = vadd.f32 %v13121_v63, %v13120_v19 }
 0x2ea   : > { %v13227_v13 = vpop.f32.mrb[79].mxu0 }
 0x2eb   : > { %v13228_v44 = vadd.f32 %v13227_v13, %v13226_v51  ;;  %v4817_v23 = vadd.f32 %v13122_v26, %v17081_v45  ;;  %v17260_v35 = vadd.f32 %v13225_v9, %v4806_v29 }
 0x2ed   : > { %v13123_v41 = vpop.f32.mrb[116].mxu1  ;;  %v17262_v52 = vadd.f32 %v13228_v44, %v4809_v18 }
 0x2ee   : > { %v13124_v0 = vpop.f32.mrb[117].mxu1 }
 0x2ef   : > { %v13229_v33 = vpop.f32.mrb[80].mxu0  ;;  %v13125_v3 = vadd.f32 %v13124_v0, %v13123_v41  ;;  %v13126_v38 = vpop.f32.mrb[118].mxu1 }
 0x2f0   : > { %v13230_v16 = vpop.f32.mrb[81].mxu0  ;;  %v13127_v17 = vpop.f32.mrb[119].mxu1 }
 0x2f1   : > { %v13231_v47 = vadd.f32 %v13230_v16, %v13229_v33  ;;  %v13232_v7 = vpop.f32.mrb[82].mxu0  ;;  %v4822_v22 = vadd.f32 %v13125_v3, %v17093_v37  ;;  %v13128_v19 = vadd.f32 %v13127_v17, %v13126_v38 }
 0x2f2   : > { %v13233_v63 = vpop.f32.mrb[83].mxu0 }
 0x2f3   : > { %v13234_v45 = vadd.f32 %v13233_v63, %v13232_v7  ;;  %v4825_v29 = vadd.f32 %v13128_v19, %v17097_v50  ;;  %v17266_v9 = vadd.f32 %v13231_v47, %v4814_v4 }
 0x2f5   : > { %v13129_v18 = vpop.f32.mrb[120].mxu1  ;;  %v17268_v51 = vadd.f32 %v13234_v45, %v4817_v23 }
 0x2f6   : > { %v13130_v26 = vpop.f32.mrb[121].mxu1 }
 0x2f7   : > { %v13235_v13 = vpop.f32.mrb[84].mxu0  ;;  %v13131_v44 = vadd.f32 %v13130_v26, %v13129_v18  ;;  %v13132_v28 = vpop.f32.mrb[122].mxu1 }
 0x2f8   : > { %v13236_v41 = vpop.f32.mrb[85].mxu0  ;;  %v13133_v0 = vpop.f32.mrb[123].mxu1 }
 0x2f9   : > { %v13237_v33 = vadd.f32 %v13236_v41, %v13235_v13  ;;  %v13238_v16 = vpop.f32.mrb[86].mxu0  ;;  %v4830_v37 = vadd.f32 %v13131_v44, %v17113_v2  ;;  %v13134_v3 = vadd.f32 %v13133_v0, %v13132_v28 }
 0x2fa   : > { %v13239_v38 = vpop.f32.mrb[87].mxu0 }
 0x2fb   : > { %v13240_v17 = vadd.f32 %v13239_v38, %v13238_v16  ;;  %v4833_v50 = vadd.f32 %v13134_v3, %v17121_v61  ;;  %v17272_v47 = vadd.f32 %v13237_v33, %v4822_v22 }
 0x2fd   : > { %v13135_v4 = vpop.f32.mrb[124].mxu1  ;;  %v17274_v23 = vadd.f32 %v13240_v17, %v4825_v29 }
 0x2fe   : > { %v13136_v7 = vpop.f32.mrb[125].mxu1 }
 0x2ff   : > { %v13241_v19 = vpop.f32.mrb[88].mxu0  ;;  %v13137_v63 = vadd.f32 %v13136_v7, %v13135_v4  ;;  %v13138_v45 = vpop.f32.mrb[126].mxu1 }
 0x300   : > { %v13242_v18 = vpop.f32.mrb[89].mxu0  ;;  %v13139_v26 = vpop.f32.mrb[127].mxu1 }
 0x301   : > { %v13243_v13 = vadd.f32 %v13242_v18, %v13241_v19  ;;  %v13244_v41 = vpop.f32.mrb[90].mxu0  ;;  %v4838_v2 = vadd.f32 %v13137_v63, %v17140_v31  ;;  %v13140_v44 = vadd.f32 %v13139_v26, %v13138_v45 }
 0x302   : > { %v13245_v28 = vpop.f32.mrb[91].mxu0 }
 0x303   : > { %v13246_v0 = vadd.f32 %v13245_v28, %v13244_v41  ;;  %v4841_v61 = vadd.f32 %v13140_v44, %v17144_v5  ;;  %v17278_v22 = vadd.f32 %v13243_v13, %v4830_v37 }
 0x305   : > { %v13141_v33 = vpop.f32.mrb[128].mxu1  ;;  %v17280_v29 = vadd.f32 %v13246_v0, %v4833_v50 }
 0x306   : > { %v13142_v16 = vpop.f32.mrb[129].mxu1 }
 0x307   : > { %v13247_v3 = vpop.f32.mrb[92].mxu0  ;;  %v13143_v38 = vadd.f32 %v13142_v16, %v13141_v33  ;;  %v13144_v17 = vpop.f32.mrb[130].mxu1 }
 0x308   : > { %v13248_v4 = vpop.f32.mrb[93].mxu0  ;;  %v13145_v7 = vpop.f32.mrb[131].mxu1 }
 0x309   : > { %v13249_v19 = vadd.f32 %v13248_v4, %v13247_v3  ;;  %v13250_v18 = vpop.f32.mrb[94].mxu0  ;;  %v4846_v31 = vadd.f32 %v13143_v38, %v17155_v1  ;;  %v13146_v63 = vadd.f32 %v13145_v7, %v13144_v17 }
 0x30a   : > { %v13251_v45 = vpop.f32.mrb[95].mxu0 }
 0x30b   : > { %v13252_v26 = vadd.f32 %v13251_v45, %v13250_v18  ;;  %v4849_v5 = vadd.f32 %v13146_v63, %v17161_v10  ;;  %v17284_v37 = vadd.f32 %v13249_v19, %v4838_v2 }
 0x30d   : > { %v13147_v13 = vpop.f32.mrb[132].mxu1  ;;  %v17286_v50 = vadd.f32 %v13252_v26, %v4841_v61 }
 0x30e   : > { %v13148_v41 = vpop.f32.mrb[133].mxu1 }
 0x30f   : > { %v13253_v44 = vpop.f32.mrb[96].mxu0  ;;  %v13149_v28 = vadd.f32 %v13148_v41, %v13147_v13  ;;  %v13150_v0 = vpop.f32.mrb[134].mxu1 }
 0x310   : > { %v13254_v33 = vpop.f32.mrb[97].mxu0  ;;  %v13151_v16 = vpop.f32.mrb[135].mxu1 }
 0x311   : > { %v13255_v3 = vadd.f32 %v13254_v33, %v13253_v44  ;;  %v13256_v4 = vpop.f32.mrb[98].mxu0  ;;  %v4854_v1 = vadd.f32 %v13149_v28, %v17174_v42  ;;  %v13152_v38 = vadd.f32 %v13151_v16, %v13150_v0 }
 0x312   : > { %v13257_v17 = vpop.f32.mrb[99].mxu0 }
 0x313   : > { %v13258_v7 = vadd.f32 %v13257_v17, %v13256_v4  ;;  %v4857_v10 = vadd.f32 %v13152_v38, %v17183_v48  ;;  %v17290_v2 = vadd.f32 %v13255_v3, %v4846_v31 }
 0x315   : > { %v13153_v19 = vpop.f32.mrb[136].mxu1  ;;  %v17292_v61 = vadd.f32 %v13258_v7, %v4849_v5 }
 0x316   : > { %v13154_v18 = vpop.f32.mrb[137].mxu1 }
 0x317   : > { %v13259_v63 = vpop.f32.mrb[100].mxu0  ;;  %v13155_v45 = vadd.f32 %v13154_v18, %v13153_v19  ;;  %v13156_v26 = vpop.f32.mrb[138].mxu1 }
 0x318   : > { %v13260_v13 = vpop.f32.mrb[101].mxu0  ;;  %v13157_v41 = vpop.f32.mrb[139].mxu1 }
 0x319   : > { %v13261_v44 = vadd.f32 %v13260_v13, %v13259_v63  ;;  %v13262_v33 = vpop.f32.mrb[102].mxu0  ;;  %v4862_v42 = vadd.f32 %v13155_v45, %v17197_v24  ;;  %v13158_v28 = vadd.f32 %v13157_v41, %v13156_v26 }
 0x31a   : > { %v13263_v0 = vpop.f32.mrb[103].mxu0 }
 0x31b   : > { %v13264_v16 = vadd.f32 %v13263_v0, %v13262_v33  ;;  %v4865_v48 = vadd.f32 %v13158_v28, %v17199_v58  ;;  %v17296_v31 = vadd.f32 %v13261_v44, %v4854_v1 }
 0x31d   : > { %v13159_v3 = vpop.f32.mrb[140].mxu1  ;;  %v17298_v5 = vadd.f32 %v13264_v16, %v4857_v10 }
 0x31e   : > { %v13160_v4 = vpop.f32.mrb[141].mxu1 }
 0x31f   : > { %v13265_v38 = vpop.f32.mrb[104].mxu0  ;;  %v13161_v17 = vadd.f32 %v13160_v4, %v13159_v3  ;;  %v13162_v7 = vpop.f32.mrb[142].mxu1 }
 0x320   : > { %v13266_v19 = vpop.f32.mrb[105].mxu0  ;;  %v13163_v18 = vpop.f32.mrb[143].mxu1 }
 0x321   : > { %v13267_v63 = vadd.f32 %v13266_v19, %v13265_v38  ;;  %v13268_v13 = vpop.f32.mrb[106].mxu0  ;;  %v4870_v24 = vadd.f32 %v13161_v17, %v17207_v34  ;;  %v13164_v45 = vadd.f32 %v13163_v18, %v13162_v7 }
 0x322   : > { %v13269_v26 = vpop.f32.mrb[107].mxu0 }
 0x323   : > { %v13270_v41 = vadd.f32 %v13269_v26, %v13268_v13  ;;  %v4873_v58 = vadd.f32 %v13164_v45, %v17209_v20  ;;  %v17302_v1 = vadd.f32 %v13267_v63, %v4862_v42 }
 0x325   : > { %v13165_v44 = vpop.f32.mrb[144].mxu1  ;;  %v17304_v10 = vadd.f32 %v13270_v41, %v4865_v48 }
 0x326   : > { %v13166_v33 = vpop.f32.mrb[145].mxu1 }
 0x327   : > { %v13271_v28 = vpop.f32.mrb[108].mxu0  ;;  %v13167_v0 = vadd.f32 %v13166_v33, %v13165_v44  ;;  %v13168_v16 = vpop.f32.mrb[146].mxu1 }
 0x328   : > { %v13272_v3 = vpop.f32.mrb[109].mxu0  ;;  %v13169_v4 = vpop.f32.mrb[147].mxu1 }
 0x329   : > { %v13273_v38 = vadd.f32 %v13272_v3, %v13271_v28  ;;  %v13274_v19 = vpop.f32.mrb[110].mxu0  ;;  %v4878_v34 = vadd.f32 %v13167_v0, %v17216_v40  ;;  %v13170_v17 = vadd.f32 %v13169_v4, %v13168_v16 }
 0x32a   : > { %v13275_v7 = vpop.f32.mrb[111].mxu0 }
 0x32b   : > { %v13276_v18 = vadd.f32 %v13275_v7, %v13274_v19  ;;  %v4881_v20 = vadd.f32 %v13170_v17, %v17218_v12  ;;  %v17308_v42 = vadd.f32 %v13273_v38, %v4870_v24 }
 0x32d   : > { %v13171_v63 = vpop.f32.mrb[148].mxu1  ;;  %v17310_v48 = vadd.f32 %v13276_v18, %v4873_v58 }
 0x32e   : > { %v13172_v13 = vpop.f32.mrb[149].mxu1 }
 0x32f   : > { %v13277_v45 = vpop.f32.mrb[112].mxu0  ;;  %v13173_v26 = vadd.f32 %v13172_v13, %v13171_v63  ;;  %v13174_v41 = vpop.f32.mrb[150].mxu1 }
 0x330   : > { %v13278_v44 = vpop.f32.mrb[113].mxu0  ;;  %v13175_v33 = vpop.f32.mrb[151].mxu1 }
 0x331   : > { %v13279_v28 = vadd.f32 %v13278_v44, %v13277_v45  ;;  %v13280_v3 = vpop.f32.mrb[114].mxu0  ;;  %v4886_v40 = vadd.f32 %v13173_v26, %v17222_v36  ;;  %v13176_v0 = vadd.f32 %v13175_v33, %v13174_v41 }
 0x332   : > { %v13281_v16 = vpop.f32.mrb[115].mxu0 }
 0x333   : > { %v13282_v4 = vadd.f32 %v13281_v16, %v13280_v3  ;;  %v4889_v12 = vadd.f32 %v13176_v0, %v17224_v15  ;;  %v17314_v24 = vadd.f32 %v13279_v28, %v4878_v34  ;;  %v5423_v0 = vld [vmem:[#allocation2] sm:$0xf8] }
 0x335   : > { %v13177_v38 = vpop.f32.mrb[152].mxu1  ;;  %v17316_v58 = vadd.f32 %v13282_v4, %v4881_v20 }
 0x336   : > { %v13178_v19 = vpop.f32.mrb[153].mxu1 }
 0x337   : > { %v13283_v17 = vpop.f32.mrb[116].mxu0  ;;  %v13179_v7 = vadd.f32 %v13178_v19, %v13177_v38  ;;  %v13180_v18 = vpop.f32.mrb[154].mxu1 }
 0x338   : > { %v13284_v63 = vpop.f32.mrb[117].mxu0  ;;  %v13181_v13 = vpop.f32.mrb[155].mxu1 }
 0x339   : > { %v13285_v45 = vadd.f32 %v13284_v63, %v13283_v17  ;;  %v13286_v44 = vpop.f32.mrb[118].mxu0  ;;  %v4894_v36 = vadd.f32 %v13179_v7, %v17228_v27  ;;  %v13182_v26 = vadd.f32 %v13181_v13, %v13180_v18 }
 0x33a   : > { %v13287_v41 = vpop.f32.mrb[119].mxu0 }
 0x33b   : > { %v13288_v33 = vadd.f32 %v13287_v41, %v13286_v44  ;;  %v4897_v15 = vadd.f32 %v13182_v26, %v17230_v56  ;;  %v17320_v34 = vadd.f32 %v13285_v45, %v4886_v40  ;;  %v5440_v56 = vsel %vm1820_vm9, %v5423_v0, 0  ;;  %v5740_v40 = vld [vmem:[#allocation2] sm:$0xf0]  ;;  %v19763_v41 = vld [vmem:[#allocation28_spill] sm:$0xff] }
 0x33c   : > { %v5458_v26 = vshrl.u32 %v5440_v56, 16  ;;  %vm19764_vm3 = vcmp.ne.s16.totalorder %v19763_v41, 0 }
 0x33d   : > { %v13183_v28 = vpop.f32.mrb[156].mxu1  ;;  %v17322_v20 = vadd.f32 %v13288_v33, %v4889_v12  ;;  %v5757_v33 = vsel %vm19764_vm3, %v5740_v40, 0 }
 0x33e   : > { %v13184_v3 = vpop.f32.mrb[157].mxu1  ;;  %v5778_v40 = vshll.u32 %v5757_v33, 16 }
 0x33f   : > { %v13289_v16 = vpop.f32.mrb[120].mxu0  ;;  %v13185_v4 = vadd.f32 %v13184_v3, %v13183_v28  ;;  %v13186_v38 = vpop.f32.mrb[158].mxu1 }
 0x340   : > { %v13290_v19 = vpop.f32.mrb[121].mxu0  ;;  %v13187_v17 = vpop.f32.mrb[159].mxu1 }
 0x341   : > { %v13291_v63 = vadd.f32 %v13290_v19, %v13289_v16  ;;  %v13292_v49 = vpop.f32.mrb[122].mxu0  ;;  %v4902_v27 = vadd.f32 %v13185_v4, %v17235_v14  ;;  %v13188_v7 = vadd.f32 %v13187_v17, %v13186_v38  ;;  %v5461_v4 = vshll.u32 %v5440_v56, 16 }
 0x342   : > { %v13293_v13 = vpop.f32.mrb[123].mxu0 }
 0x343   : > { %v13294_v45 = vadd.f32 %v13293_v13, %v13292_v49  ;;  %v4905_v12 = vadd.f32 %v13188_v7, %v17238_v6  ;;  %v17328_v44 = vadd.f32 %v13291_v63, %v4894_v36  ;;  %v5775_v49 = vshrl.u32 %v5757_v33, 16  ;;  %v17344_v33 = vld [vmem:[#allocation2] sm:$0xf0] }
 0x344   : > { %v17337_v7 = vrot.slane %v5458_v26, 3 }
 0x345   : > { %v14335_v28 = vpop.f32.mrb[160].mxu1  ;;  %v17332_v3 = vadd.f32 %v13294_v45, %v4897_v15 }
 0x346   : > { %v5112_v14 = vadd.f32 %v14335_v28, %v17248_v53  ;;  %v5103_v16 = vpop.f32.mrb[161].mxu1  ;;  %v17340_v28 = vrot.slane %v5461_v4, 4 }
 0x347   : > { %v13295_v38 = vpop.f32.mrb[124].mxu0  ;;  %v5104_v0 = vadd.f32 %v5103_v16, %v17242_v8  ;;  %v14336_v19 = vpop.f32.mrb[162].mxu1 }
 0x348   : > { %v13296_v17 = vpop.f32.mrb[125].mxu0  ;;  %v5264_v6 = vmul.f32 0.01, %v5112_v14  ;;  %v5115_v36 = vadd.f32 %v14336_v19, %v17250_v55  ;;  %v5106_v63 = vpop.f32.mrb[163].mxu1  ;;  %vm5232_vm11 = vcmp.ge.f32.partialorder %v5112_v14, 0.0  ;;  %v17342_v55 = vrot.slane %v5775_v49, 4 }
 0x349   : > { %v13297_v13 = vadd.f32 %v13296_v17, %v13295_v38  ;;  %v13298_v15 = vpop.f32.mrb[126].mxu0  ;;  %v5262_v45 = vmul.f32 0.01, %v5104_v0  ;;  %v5107_v53 = vadd.f32 %v5106_v63, %v17244_v11  ;;  %vm5230_vm3 = vcmp.ge.f32.partialorder %v5104_v0, 0.0 }
 0x34a   : > { %v13299_v56 = vpop.f32.mrb[127].mxu0  ;;  %vm5233_vm5 = vcmp.ge.f32.partialorder %v5115_v36, 0.0  ;;  %v5265_v8 = vmul.f32 0.01, %v5115_v36  ;;  %v5296_v26 = vsel %vm5232_vm11, %v5112_v14, %v5264_v6  ;;  %v17346_v38 = vrot.slane %v5778_v40, 5 }
 0x34b   : > { %v13300_v16 = vadd.f32 %v13299_v56, %v13298_v15  ;;  %vm5231_vm2 = vcmp.ge.f32.partialorder %v5107_v53, 0.0  ;;  %v5263_v41 = vmul.f32 0.01, %v5107_v53  ;;  %v17348_v17 = vadd.f32 %v13297_v13, %v4902_v27 }
 0x34c   : > { %v5297_v19 = vsel %vm5233_vm5, %v5115_v36, %v5265_v8  ;;  %v5294_v11 = vsel %vm5230_vm3, %v5104_v0, %v5262_v45 }
 0x34d   : > { %v5327_v63 = vpack.c.bf16 %v5297_v19, %v5296_v26  ;;  %v5295_v46 = vsel %vm5231_vm2, %v5107_v53, %v5263_v41  ;;  %v14339_v25 = vpop.f32.mrb[164].mxu1  ;;  %v17350_v39 = vadd.f32 %v13300_v16, %v4905_v12  ;;  %v19767_v19 = vld [vmem:[#allocation30_spill] sm:$0xff] }
 0x34e   : > { %v5326_v4 = vpack.c.bf16 %v5295_v46, %v5294_v11  ;;  %v5128_v15 = vadd.f32 %v14339_v25, %v17260_v35  ;;  %v5119_v56 = vpop.f32.mrb[165].mxu1  ;;  %vm19768_vm13 = vcmp.ne.s16.totalorder %v19767_v19, 0 }
 0x34f   : > { %v5359_v49 = vrot.slane %v5327_v63, 4  ;;  %v5120_v14 = vadd.f32 %v5119_v56, %v17254_v32  ;;  %v14340_v6 = vpop.f32.mrb[166].mxu1 }
 0x350   : > { %v5358_v40 = vrot.slane %v5326_v4, 4  ;;  %vm5236_vm5 = vcmp.ge.f32.partialorder %v5128_v15, 0.0  ;;  %v5268_v0 = vmul.f32 0.01, %v5128_v15  ;;  %v5131_v41 = vadd.f32 %v14340_v6, %v17262_v52  ;;  %v5122_v12 = vpop.f32.mrb[167].mxu1 }
 0x351   : > { %vm5234_vm2 = vcmp.ge.f32.partialorder %v5120_v14, 0.0  ;;  %v5266_v46 = vmul.f32 0.01, %v5120_v14  ;;  %v5123_v25 = vadd.f32 %v5122_v12, %v17256_v57  ;;  %v19765_v57 = vld [vmem:[#allocation27_spill] sm:$0xff]  ;;  %v19771_v12 = vrot.slane %v17344_v33, 4 }
 0x352   : > { %v17362_v32 = vsel %vm1256_vm4, %v5358_v40, %v5359_v49  ;;  %5406 = vst [vmem:[#allocation2 + $0x8] sm:$0xf0] %v5358_v40  ;;  %v5300_v13 = vsel %vm5236_vm5, %v5128_v15, %v5268_v0  ;;  %vm5237_vm11 = vcmp.ge.f32.partialorder %v5131_v41, 0.0  ;;  %v5269_v45 = vmul.f32 0.01, %v5131_v41 }
 0x353   : > { %5407 = vst [vmem:[#allocation2 + $0x10] sm:$0xff] %v17362_v32  ;;  %v5298_v53 = vsel %vm5234_vm2, %v5120_v14, %v5266_v46  ;;  %vm5235_vm3 = vcmp.ge.f32.partialorder %v5123_v25, 0.0  ;;  %v5267_v52 = vmul.f32 0.01, %v5123_v25  ;;  %vm19766_vm12 = vcmp.ne.s16.totalorder %v19765_v57, 0 }
 0x354   : > { %v5301_v16 = vsel %vm5237_vm11, %v5131_v41, %v5269_v45  ;;  %v5976_v26 = vsel %vm19766_vm12, %v17362_v32, 0  ;;  %v17372_v11 = vsel %vm19768_vm13, %v17362_v32, 0  ;;  %v17377_v63 = vsel %vm2412_vm10, %v17362_v32, 0 }
 0x355   : > { %v5329_v4 = vpack.c.bf16 %v5301_v16, %v5300_v13  ;;  %v5299_v15 = vsel %vm5235_vm3, %v5123_v25, %v5267_v52  ;;  %v14343_v56 = vpop.f32.mrb[168].mxu1  ;;  %v6001_v14 = vshrl.u32 %v5976_v26, 16  ;;  %v6004_v6 = vshll.u32 %v5976_v26, 16 }
 0x356   : > { %v5328_v40 = vpack.c.bf16 %v5299_v15, %v5298_v53  ;;  %v5144_v0 = vadd.f32 %v14343_v56, %v17272_v47  ;;  %v5135_v41 = vpop.f32.mrb[169].mxu1  ;;  %vm19769_vm11 = vcmp.ne.s16.totalorder %v19765_v57, 0 }
 0x357   : > { %v5363_v45 = vrot.slane %v5329_v4, 4  ;;  %v5136_v35 = vadd.f32 %v5135_v41, %v17266_v9  ;;  %v14344_v27 = vpop.f32.mrb[170].mxu1  ;;  %v6003_v8 = vrot.slane %v6001_v14, 3  ;;  %v6006_v36 = vrot.slane %v6004_v6, 4  ;;  %v14791_v14 = vld [vmem:[#allocation10 + $0x1c0] sm:$0xff]  }
 0x358   : > { %v5361_v54 = vrot.slane %v5328_v40, 4  ;;  %vm5240_vm13 = vcmp.ge.f32.partialorder %v5144_v0, 0.0  ;;  %v5272_v25 = vmul.f32 0.01, %v5144_v0  ;;  %v5147_v13 = vadd.f32 %v14344_v27, %v17274_v23  ;;  %v5138_v52 = vpop.f32.mrb[171].mxu1  ;;  %13661 = vmatprep.subr.bf16.mxu1 %v14791_v14 }
 0x359   : > { %vm5238_vm12 = vcmp.ge.f32.partialorder %v5136_v35, 0.0  ;;  %v5270_v53 = vmul.f32 0.01, %v5136_v35  ;;  %v5139_v47 = vadd.f32 %v5138_v52, %v17268_v51  ;;  %v5642_v16 = vld [vmem:[#allocation2 + $0x8] sm:$0xff]  ;;  %v17385_v15 = vor.u32 %v6006_v36, %v6003_v8 }
 0x35a   : > { %v5958_v26 = vld [vmem:[#allocation2 + $0x8] sm:$0xf8]  ;;  %v17388_v4 = vsel %vm1256_vm4, %v5359_v49, %v5361_v54  ;;  %v17391_v9 = vsel %vm1256_vm4, %v5361_v54, %v5363_v45  ;;  %v5304_v56 = vsel %vm5240_vm13, %v5144_v0, %v5272_v25  ;;  %vm5241_vm5 = vcmp.ge.f32.partialorder %v5147_v13, 0.0 }
 0x35b   : > { %5408 = vst [vmem:[#allocation2 + $0x18] sm:$0xff] %v17388_v4  ;;  %5409 = vst [vmem:[#allocation2 + $0x20] sm:$0xff] %v17391_v9  ;;  %v5302_v23 = vsel %vm5238_vm12, %v5136_v35, %v5270_v53  ;;  %v5273_v27 = vmul.f32 0.01, %v5147_v13  ;;  %vm5239_vm2 = vcmp.ge.f32.partialorder %v5139_v47, 0.0  ;;  %v5676_v6 = vrot.slane %v5642_v16, 4 }
 0x35c   : > { %v5271_v51 = vmul.f32 0.01, %v5139_v47  ;;  %v5441_v36 = vsel %vm19769_vm11, %v5642_v16, 0  ;;  %v5975_v49 = vsel %vm1820_vm9, %v5958_v26, 0  ;;  %v5758_v8 = vsel %vm2411_vm1, %v5642_v16, 0 }
 0x35d   : > { %v5305_v40 = vsel %vm5241_vm5, %v5147_v13, %v5273_v27  ;;  %v14347_v41 = vpop.f32.mrb[172].mxu1  ;;  %v5466_v25 = vshrl.u32 %v5441_v36, 16  ;;  %v5469_v52 = vshll.u32 %v5441_v36, 16  ;;  %v5677_v57 = vsel %vm1256_vm4, %v19771_v12, %v5676_v6  ;;  %v14778_v36 = vld [vmem:[#allocation10 + $0x100] sm:$0xff]  }
 0x35e   : > { %v5303_v0 = vsel %vm5239_vm2, %v5139_v47, %v5271_v51  ;;  %v5331_v35 = vpack.c.bf16 %v5305_v40, %v5304_v56  ;;  %v5160_v46 = vadd.f32 %v14347_v41, %v17284_v37  ;;  %v5151_v43 = vpop.f32.mrb[173].mxu1  ;;  %7787 = vmatprep.mubr.bf16.mxu0 %v5677_v57  ;;  %v19772_v13 = vrot.slane %v17362_v32, 4 }
 0x35f   : > { %v5330_v53 = vpack.c.bf16 %v5303_v0, %v5302_v23  ;;  %v5152_v26 = vadd.f32 %v5151_v43, %v17278_v22  ;;  %v14348_v18 = vpop.f32.mrb[174].mxu1  ;;  %v5468_v16 = vrot.slane %v5466_v25, 3  ;;  %v5471_v14 = vrot.slane %v5469_v52, 4 }
 0x360   : > { %v5679_v47 = vsel %vm1256_vm4, %v5676_v6, %v19772_v13  ;;  %v17409_v27 = vrot.slane %v5331_v35, 4  ;;  %vm5244_vm3 = vcmp.ge.f32.partialorder %v5160_v46, 0.0  ;;  %v5276_v37 = vmul.f32 0.01, %v5160_v46  ;;  %v5154_v23 = vpop.f32.mrb[175].mxu1 }
 0x361   : > { %v5365_v56 = vrot.slane %v5330_v53, 4  ;;  %vm5242_vm13 = vcmp.ge.f32.partialorder %v5152_v26, 0.0  ;;  %v5274_v33 = vmul.f32 0.01, %v5152_v26  ;;  %v5163_v12 = vadd.f32 %v14348_v18, %v17286_v50 }
 0x362   : > { %v5155_v57 = vadd.f32 %v5154_v23, %v17280_v29  ;;  %v5308_v51 = vsel %vm5244_vm3, %v5160_v46, %v5276_v37  ;;  %v17420_v6 = vor.u32 %v5471_v14, %v5468_v16  ;;  %v14779_v29 = vld [vmem:[#allocation10 + $0x148] sm:$0xff]   ;;  %v5993_v46 = vshrl.u32 %v5975_v49, 16 }
 0x363   : > { %v17414_v43 = vsel %vm1256_vm4, %v5363_v45, %v5365_v56  ;;  %v17418_v22 = vsel %vm1256_vm4, %v5365_v56, %v17409_v27  ;;  %v5306_v40 = vsel %vm5242_vm13, %v5152_v26, %v5274_v33  ;;  %vm5245_vm12 = vcmp.ge.f32.partialorder %v5163_v12, 0.0 }
 0x364   : > { %5410 = vst [vmem:[#allocation2 + $0x28] sm:$0xff] %v17414_v43  ;;  %5411 = vst [vmem:[#allocation2 + $0x30] sm:$0xff] %v17418_v22  ;;  %v5277_v50 = vmul.f32 0.01, %v5163_v12  ;;  %vm5243_vm5 = vcmp.ge.f32.partialorder %v5155_v57, 0.0  ;;  %v19773_v45 = vor.u32 %v17340_v28, %v17337_v7  ;;  %v5996_v41 = vshll.u32 %v5975_v49, 16 }
 0x365   : > { %v5275_v18 = vmul.f32 0.01, %v5155_v57  ;;  %v5783_v52 = vshrl.u32 %v5758_v8, 16  ;;  %v5786_v35 = vshll.u32 %v5758_v8, 16  ;;  %v14351_v53 = vpop.f32.mrb[176].mxu1  ;;  %v19774_v26 = vshrl.u32 %v17372_v11, 16 }
 0x366   : > { %v5473_v0 = vsel %vm1854_vm8, %v19773_v45, %v17420_v6  ;;  %v5309_v25 = vsel %vm5245_vm12, %v5163_v12, %v5277_v50  ;;  %v5995_v56 = vrot.slane %v5993_v46, 3  ;;  %v5998_v37 = vrot.slane %v5996_v41, 4  ;;  %v5167_v23 = vpop.f32.mrb[177].mxu1  ;;  %v14780_v7 = vld [vmem:[#allocation10 + $0x108] sm:$0xff]   ;;  %v14792_v46 = vld [vmem:[#allocation10 + $0x180] sm:$0xff]   ;;  %v14782_v41 = vld [vmem:[#allocation10 + $0x110] sm:$0xff]  }
 0x367   : > { %7788 = vmatmul.mubr.bf16.vlgmr.msra.gmra.mrb[128].mxu0 %v5473_v0  ;;  %v5477_v16 = vrot.slane %v19774_v26, 3  ;;  %v5333_v14 = vpack.c.bf16 %v5309_v25, %v5308_v51  ;;  %v5307_v13 = vsel %vm5243_vm5, %v5155_v57, %v5275_v18  ;;  %v5785_v33 = vrot.slane %v5783_v52, 4  ;;  %v14352_v12 = vpop.f32.mrb[178].mxu1  ;;  %v14781_v51 = vld [vmem:[#allocation10 + $0x150] sm:$0xff]   ;;  %v14793_v25 = vld [vmem:[#allocation10 + $0x1c8] sm:$0xff]   ;;  %v14783_v26 = vld [vmem:[#allocation10 + $0x158] sm:$0xff]  }
 0x368   : > { %7795 = vmatprep.mubr.bf16.mxu0 %v5679_v47  ;;  %13550 = vmatpush3.bf16.msra.mxu0 %v14778_v36  ;;  %v5332_v28 = vpack.c.bf16 %v5307_v13, %v5306_v40  ;;  %v5788_v45 = vrot.slane %v5786_v35, 5  ;;  %v5176_v49 = vadd.f32 %v14351_v53, %v17296_v31  ;;  %v5999_v50 = vor.u32 %v5998_v37, %v5995_v56  ;;  %v5170_v47 = vpop.f32.mrb[179].mxu1 }
 0x369   : > { %13551 = vmatprep.subr.bf16.mxu0 %v14779_v29  ;;  %v17432_v8 = vrot.slane %v5333_v14, 4  ;;  %v5168_v0 = vadd.f32 %v5167_v23, %v17290_v2  ;;  %v5179_v57 = vadd.f32 %v14352_v12, %v17298_v5  ;;  %v19775_v52 = vor.u32 %v17346_v38, %v17342_v55  ;;  %v14784_v12 = vld [vmem:[#allocation10 + $0x118] sm:$0xff]  }
 0x36a   : > { %v5369_v18 = vrot.slane %v5332_v28, 4  ;;  %v17436_v36 = vor.u32 %v5788_v45, %v5785_v33  ;;  %vm5248_vm2 = vcmp.ge.f32.partialorder %v5176_v49, 0.0  ;;  %v5280_v40 = vmul.f32 0.01, %v5176_v49  ;;  %v14794_v33 = vld [vmem:[#allocation10 + $0x188] sm:$0xff]  }
 0x36b   : > { %v6008_v31 = vsel %vm1854_vm8, %v5999_v50, %v17385_v15  ;;  %vm5246_vm11 = vcmp.ge.f32.partialorder %v5168_v0, 0.0  ;;  %v5278_v29 = vmul.f32 0.01, %v5168_v0  ;;  %vm5249_vm3 = vcmp.ge.f32.partialorder %v5179_v57, 0.0 }
 0x36c   : > { %13552 = vmatpush3.bf16.msra.mxu0 %v14780_v7  ;;  %v17442_v2 = vsel %vm1256_vm4, %v17409_v27, %v5369_v18  ;;  %v17446_v5 = vsel %vm1256_vm4, %v5369_v18, %v17432_v8  ;;  %7948 = vmatprep.mubr.bf16.mxu1 %v6008_v31  ;;  %v5790_v35 = vsel %vm1676_vm0, %v19775_v52, %v17436_v36  ;;  %v5281_v14 = vmul.f32 0.01, %v5179_v57 }
 0x36d   : > { %v5312_v53 = vsel %vm5248_vm2, %v5176_v49, %v5280_v40  ;;  %5412 = vst [vmem:[#allocation2 + $0x38] sm:$0xff] %v17442_v2  ;;  %5413 = vst [vmem:[#allocation2 + $0x40] sm:$0xff] %v17446_v5  ;;  %7949 = vmatmul.mubr.bf16.vlgmr.msra.gmra.mrb[192].mxu1 %v5790_v35  ;;  %v5310_v27 = vsel %vm5246_vm11, %v5168_v0, %v5278_v29  ;;  %v5171_v13 = vadd.f32 %v5170_v47, %v17292_v61  ;;  %v14355_v28 = vpop.f32.mrb[180].mxu1  ;;  %v14795_v40 = vld [vmem:[#allocation10 + $0x1d0] sm:$0xff]  }
 0x36e   : > { %v19776_v56 = vshll.u32 %v17372_v11, 16  ;;  %13553 = vmatprep.subr.bf16.mxu0 %v14781_v51  ;;  %v5680_v23 = vrot.slane %v17388_v4, 4  ;;  %vm19777_vm13 = vcmp.ne.s16.totalorder %v19767_v19, 0  ;;  %v5792_v38 = vshrl.u32 %v17377_v63, 16  ;;  %13662 = vmatpush3.bf16.msra.mxu1 %v14792_v46  ;;  %v5183_v49 = vpop.f32.mrb[181].mxu1 }
 0x36f   : > { %v5977_v55 = vsel %vm19777_vm13, %v17388_v4, 0  ;;  %v5795_v7 = vshll.u32 %v17377_v63, 16  ;;  %v5313_v45 = vsel %vm5249_vm3, %v5179_v57, %v5281_v14  ;;  %vm5247_vm12 = vcmp.ge.f32.partialorder %v5171_v13, 0.0  ;;  %13663 = vmatprep.subr.bf16.mxu1 %v14793_v25  ;;  %v14356_v18 = vpop.f32.mrb[182].mxu1  ;;  %v14785_v57 = vld [vmem:[#allocation10 + $0x160] sm:$0xff]  }
 0x370   : > { %v5480_v37 = vrot.slane %v19776_v56, 4  ;;  %v5279_v61 = vmul.f32 0.01, %v5171_v13  ;;  %13554 = vmatpush3.bf16.msra.mxu0 %v14782_v41  ;;  %v5335_v50 = vpack.c.bf16 %v5313_v45, %v5312_v53  ;;  %v19778_v0 = vrot.slane %v17362_v32, 4  ;;  %v5186_v41 = vpop.f32.mrb[183].mxu1  ;;  %v14796_v53 = vld [vmem:[#allocation10 + $0x190] sm:$0xff]  }
 0x371   : > { %v6010_v47 = vshrl.u32 %v5977_v55, 16  ;;  %v6013_v51 = vshll.u32 %v5977_v55, 16  ;;  %13555 = vmatprep.subr.bf16.mxu0 %v14783_v26  ;;  %v5794_v31 = vrot.slane %v5792_v38, 4  ;;  %v5797_v29 = vrot.slane %v5795_v7, 5 }
 0x372   : > { %v17465_v11 = vor.u32 %v5480_v37, %v5477_v16  ;;  %v5681_v63 = vsel %vm1256_vm4, %v19778_v0, %v5680_v23  ;;  %v5311_v46 = vsel %vm5247_vm12, %v5171_v13, %v5279_v61  ;;  %v17475_v25 = vrot.slane %v5335_v50, 4  ;;  %13664 = vmatpush3.bf16.msra.mxu1 %v14794_v33  ;;  %v19779_v13 = vld [vmem:[#allocation32_spill] sm:$0xff]  ;;  %v14786_v37 = vld [vmem:[#allocation10 + $0x120] sm:$0xff]   ;;  %v14787_v33 = vld [vmem:[#allocation10 + $0x168] sm:$0xff]  }
 0x373   : > { %v5334_v52 = vpack.c.bf16 %v5311_v46, %v5310_v27  ;;  %v6012_v32 = vrot.slane %v6010_v47, 3  ;;  %v6015_v35 = vrot.slane %v6013_v51, 4  ;;  %v17477_v26 = vor.u32 %v5797_v29, %v5794_v31  ;;  %13665 = vmatprep.subr.bf16.mxu1 %v14795_v40  ;;  %v14798_v0 = vld [vmem:[#allocation10 + $0x198] sm:$0xff]   ;;  %v14801_v40 = vld [vmem:[#allocation10 + $0x1e0] sm:$0xff]  }
 0x374   : > { %v5482_v16 = vsel %vm1854_vm8, %v17420_v6, %v17465_v11  ;;  %v5192_v14 = vadd.f32 %v14355_v28, %v17308_v42  ;;  %vm19780_vm5 = vcmp.ne.s16.totalorder %v19779_v13, 0  ;;  %v5184_v56 = vadd.f32 %v5183_v49, %v17302_v1  ;;  %13556 = vmatpush3.bf16.msra.mxu0 %v14784_v12  ;;  %v14797_v28 = vld [vmem:[#allocation10 + $0x1d8] sm:$0xff]  }
 0x375   : > { %7796 = vmatmul.mubr.bf16.gmra.mrb[132].mxu0 %v5482_v16  ;;  %v5978_v6 = vsel %vm19780_vm5, %v17391_v9, 0  ;;  %v5373_v55 = vrot.slane %v5334_v52, 4  ;;  %v6016_v27 = vor.u32 %v6015_v35, %v6012_v32  ;;  %13557 = vmatprep.subr.bf16.mxu0 %v14785_v57  ;;  %v5799_v45 = vsel %vm1676_vm0, %v17436_v36, %v17477_v26  ;;  %v14359_v50 = vpop.f32.mrb[184].mxu1  ;;  %v14788_v57 = vld [vmem:[#allocation10 + $0x128] sm:$0xff]   ;;  %vm19781_vm3 = vmmov %vm19780_vm5 }
 0x376   : > { %7803 = vmatprep.mubr.bf16.mxu0 %v5681_v63  ;;  %v6019_v38 = vshrl.u32 %v5978_v6, 16  ;;  %v6022_v7 = vshll.u32 %v5978_v6, 16  ;;  %vm5252_vm2 = vcmp.ge.f32.partialorder %v5192_v14, 0.0  ;;  %v5284_v42 = vmul.f32 0.01, %v5192_v14  ;;  %13666 = vmatpush3.bf16.msra.mxu1 %v14796_v53  ;;  %v5199_v51 = vpop.f32.mrb[185].mxu1 }
 0x377   : > { %vm5250_vm11 = vcmp.ge.f32.partialorder %v5184_v56, 0.0  ;;  %v17489_v1 = vsel %vm1256_vm4, %v17432_v8, %v5373_v55  ;;  %v17493_v61 = vsel %vm1256_vm4, %v5373_v55, %v17475_v25  ;;  %v6017_v49 = vsel %vm1854_vm8, %v17385_v15, %v6016_v27  ;;  %v17508_v29 = vpop.f32.mrb[186].mxu1  ;;  %13667 = vmatprep.subr.bf16.mxu1 %v14797_v28 }
 0x378   : > { %v6021_v12 = vrot.slane %v6019_v38, 3  ;;  %5414 = vst [vmem:[#allocation2 + $0x48] sm:$0xff] %v17489_v1  ;;  %5415 = vst [vmem:[#allocation2 + $0x50] sm:$0xff] %v17493_v61  ;;  %7956 = vmatprep.mubr.bf16.mxu1 %v6017_v49  ;;  %v5316_v36 = vsel %vm5252_vm2, %v5192_v14, %v5284_v42  ;;  %v6024_v63 = vrot.slane %v6022_v7, 4  ;;  %v5282_v8 = vmul.f32 0.01, %v5184_v56  ;;  %13558 = vmatpush3.bf16.msra.mxu0 %v14786_v37 }
 0x379   : > { %v5195_v47 = vadd.f32 %v14356_v18, %v17310_v48  ;;  %7957 = vmatmul.mubr.bf16.gmra.mrb[196].mxu1 %v5799_v45  ;;  %v5187_v15 = vadd.f32 %v5186_v41, %v17304_v10  ;;  %v5443_v46 = vsel %vm19781_vm3, %v17388_v4, 0  ;;  %v5682_v16 = vrot.slane %v17391_v9, 4  ;;  %13559 = vmatprep.subr.bf16.mxu0 %v14787_v33  ;;  %v14789_v48 = vld [vmem:[#allocation10 + $0x170] sm:$0xff]   ;;  %v17513_v41 = vpop.f32.mrb[187].mxu1  ;;  %v14802_v14 = vld [vmem:[#allocation10 + $0x1a0] sm:$0xff]   ;;  %v14803_v7 = vld [vmem:[#allocation10 + $0x1e8] sm:$0xff]  }
 0x37a   : > { %vm19782_vm13 = vcmp.ne.s16.totalorder %v16089_v60, 0  ;;  %v17510_v18 = vor.u32 %v6024_v63, %v6021_v12  ;;  %v5314_v52 = vsel %vm5250_vm11, %v5184_v56, %v5282_v8  ;;  %v5484_v35 = vshrl.u32 %v5443_v46, 16  ;;  %13668 = vmatpush3.bf16.msra.mxu1 %v14798_v0  ;;  %v14790_v38 = vld [vmem:[#allocation10 + $0x130] sm:$0xff]   ;;  %v19783_v8 = vld [vmem:[#allocation33_spill] sm:$0xff] }
 0x37b   : > { %v5760_v31 = vsel %vm19782_vm13, %v17388_v4, 0  ;;  %vm5253_vm12 = vcmp.ge.f32.partialorder %v5195_v47, 0.0  ;;  %v5285_v10 = vmul.f32 0.01, %v5195_v47  ;;  %vm5251_vm5 = vcmp.ge.f32.partialorder %v5187_v15, 0.0  ;;  %13669 = vmatprep.subr.bf16.mxu1 %v14801_v40  ;;  %v14800_v40 = vld [vmem:[#allocation10 + $0x138] sm:$0xff]  }
 0x37c   : > { %v5283_v32 = vmul.f32 0.01, %v5187_v15  ;;  %v5487_v53 = vshll.u32 %v5443_v46, 16  ;;  %v6026_v6 = vsel %vm1854_vm8, %v6016_v27, %v17510_v18  ;;  %v5683_v56 = vsel %vm1256_vm4, %v5680_v23, %v5682_v16  ;;  %13560 = vmatpush3.bf16.msra.mxu0 %v14788_v57  ;;  %v14799_v27 = vld [vmem:[#allocation10 + $0x178] sm:$0xff]   ;;  %v14805_v46 = vld [vmem:[#allocation10 + $0x1f0] sm:$0xff]  }
 0x37d   : > { %v5317_v37 = vsel %vm5253_vm12, %v5195_v47, %v5285_v10  ;;  %v5801_v55 = vshrl.u32 %v5760_v31, 16  ;;  %7964 = vmatprep.mubr.bf16.mxu1 %v6026_v6  ;;  %v5486_v42 = vrot.slane %v5484_v35, 3  ;;  %13561 = vmatprep.subr.bf16.mxu0 %v14789_v48  ;;  %v5804_v0 = vshll.u32 %v5760_v31, 16  ;;  %v17532_v57 = vpop.f32.mrb[188].mxu1 }
 0x37e   : > { %v5337_v33 = vpack.c.bf16 %v5317_v37, %v5316_v36  ;;  %v5315_v45 = vsel %vm5251_vm5, %v5187_v15, %v5283_v32  ;;  %v5489_v28 = vrot.slane %v5487_v53, 4  ;;  %v5208_v4 = vadd.f32 %v14359_v50, %v17320_v34  ;;  %13670 = vmatpush3.bf16.msra.mxu1 %v14802_v14  ;;  %v14804_v15 = vld [vmem:[#allocation10 + $0x1a8] sm:$0xff]   ;;  %v5215_v50 = vpop.f32.mrb[189].mxu1 }
 0x37f   : > { %v5336_v49 = vpack.c.bf16 %v5315_v45, %v5314_v52  ;;  %v5803_v12 = vrot.slane %v5801_v55, 4  ;;  %vm19784_vm2 = vcmp.ne.s16.totalorder %v19783_v8, 0  ;;  %v5200_v36 = vadd.f32 %v5199_v51, %v17314_v24  ;;  %13671 = vmatprep.subr.bf16.mxu1 %v14803_v7  ;;  %v17537_v24 = vpop.f32.mrb[190].mxu1  ;;  %v17539_v51 = vld [vmem:[#allocation10 + $0x200] sm:$0xff]   ;;  %v14806_v7 = vld [vmem:[#allocation10 + $0x1b0] sm:$0xff]  }
 0x380   : > { %v17524_v63 = vrot.slane %v5337_v33, 4  ;;  %v17526_v23 = vor.u32 %v5489_v28, %v5486_v42  ;;  %v5979_v47 = vsel %vm19784_vm2, %v17414_v43, 0  ;;  %v5806_v31 = vrot.slane %v5804_v0, 5  ;;  %13562 = vmatpush3.bf16.msra.mxu0 %v14790_v38  ;;  %v17552_v6 = vpop.f32.mrb[191].mxu1  ;;  %vm19785_vm13 = vmmov %vm19784_vm2  ;;  %v14807_v28 = vld [vmem:[#allocation10 + $0x1f8] sm:$0xff]  }
 0x381   : > { %v5377_v48 = vrot.slane %v5336_v49, 4  ;;  %vm5256_vm11 = vcmp.ge.f32.partialorder %v5208_v4, 0.0  ;;  %v5288_v34 = vmul.f32 0.01, %v5208_v4  ;;  %v6028_v10 = vshrl.u32 %v5979_v47, 16  ;;  %13563 = vmatprep.subr.bf16.mxu0 %v14799_v27 }
 0x382   : > { %v5491_v52 = vsel %vm1854_vm8, %v17465_v11, %v17526_v23  ;;  %v6031_v32 = vshll.u32 %v5979_v47, 16  ;;  %vm5254_vm3 = vcmp.ge.f32.partialorder %v5200_v36, 0.0  ;;  %v17549_v14 = vor.u32 %v5806_v31, %v5803_v12  ;;  %13672 = vmatpush3.bf16.msra.mxu1 %v14804_v15  ;;  %v14808_v47 = vld [vmem:[#allocation10 + $0x1b8] sm:$0xff]  }
 0x383   : > { %v17543_v35 = vsel %vm1256_vm4, %v17475_v25, %v5377_v48  ;;  %v17547_v53 = vsel %vm1256_vm4, %v5377_v48, %v17524_v63  ;;  %7804 = vmatmul.mubr.bf16.gmra.mrb[136].mxu0 %v5491_v52  ;;  %v5320_v11 = vsel %vm5256_vm11, %v5208_v4, %v5288_v34  ;;  %v6030_v37 = vrot.slane %v6028_v10, 3  ;;  %13673 = vmatprep.subr.bf16.mxu1 %v14805_v46  ;;  %v19787_v10 = vld [vmem:[#allocation34_spill] sm:$0xff] }
 0x384   : > { %5416 = vst [vmem:[#allocation2 + $0x58] sm:$0xff] %v17543_v35  ;;  %5417 = vst [vmem:[#allocation2 + $0x60] sm:$0xff] %v17547_v53  ;;  %7811 = vmatprep.mubr.bf16.mxu0 %v5683_v56  ;;  %v6033_v55 = vrot.slane %v6031_v32, 4  ;;  %v5286_v25 = vmul.f32 0.01, %v5200_v36  ;;  %v5211_v38 = vadd.f32 %v17508_v29, %v17322_v20  ;;  %v5808_v33 = vsel %vm1676_vm0, %v17477_v26, %v17549_v14 }
 0x385   : > { %v5203_v45 = vadd.f32 %v17513_v41, %v17316_v58  ;;  %v5444_v42 = vsel %vm19785_vm13, %v17391_v9, 0  ;;  %v5684_v56 = vrot.slane %v17414_v43, 4  ;;  %13564 = vmatpush3.bf16.msra.mxu0 %v14800_v40  ;;  %7965 = vmatmul.mubr.bf16.gmra.mrb[200].mxu1 %v5808_v33  ;;  %vm19786_vm2 = vcmp.ne.s16.totalorder %v16146_v30, 0 }
 0x386   : > { %v17567_v20 = vor.u32 %v6033_v55, %v6030_v37  ;;  %v5318_v29 = vsel %vm5254_vm3, %v5200_v36, %v5286_v25  ;;  %vm5257_vm12 = vcmp.ge.f32.partialorder %v5211_v38, 0.0  ;;  %v5289_v27 = vmul.f32 0.01, %v5211_v38  ;;  %14365 = vmatprep.subr.bf16.mxu0 %v17539_v51  ;;  %13674 = vmatpush3.bf16.msra.mxu1 %v14806_v7 }
 0x387   : > { %vm5255_vm5 = vcmp.ge.f32.partialorder %v5203_v45, 0.0  ;;  %v5287_v58 = vmul.f32 0.01, %v5203_v45  ;;  %v5493_v26 = vshrl.u32 %v5444_v42, 16  ;;  %v5496_v41 = vshll.u32 %v5444_v42, 16  ;;  %13675 = vmatprep.subr.bf16.mxu1 %v14807_v28 }
 0x388   : > { %v6035_v49 = vsel %vm1854_vm8, %v17510_v18, %v17567_v20  ;;  %v5321_v12 = vsel %vm5257_vm12, %v5211_v38, %v5289_v27  ;;  %v5685_v0 = vsel %vm1256_vm4, %v5682_v16, %v5684_v56  ;;  %v5761_v4 = vsel %vm19786_vm2, %v17391_v9, 0 }
 0x389   : > { %7972 = vmatprep.mubr.bf16.mxu1 %v6035_v49  ;;  %v5339_v36 = vpack.c.bf16 %v5321_v12, %v5320_v11  ;;  %v5319_v40 = vsel %vm5255_vm5, %v5203_v45, %v5287_v58  ;;  %v5495_v15 = vrot.slane %v5493_v26, 3  ;;  %v5498_v46 = vrot.slane %v5496_v41, 4 }
 0x38a   : > { %v5338_v18 = vpack.c.bf16 %v5319_v40, %v5318_v29  ;;  %v5810_v48 = vshrl.u32 %v5761_v4, 16  ;;  %v5813_v31 = vshll.u32 %v5761_v4, 16  ;;  %v5224_v34 = vadd.f32 %v17532_v57, %v17348_v17  ;;  %13676 = vmatpush3.bf16.msra.mxu1 %v14808_v47 }
 0x38b   : > { %v17584_v52 = vrot.slane %v5339_v36, 4  ;;  %v5499_v16 = vor.u32 %v5498_v46, %v5495_v15  ;;  %vm19788_vm11 = vcmp.ne.s16.totalorder %v19787_v10, 0  ;;  %v5216_v32 = vadd.f32 %v5215_v50, %v17328_v44  ;;  %v19790_v36 = vld [vmem:[#allocation35_spill] sm:$0xff] }
 0x38c   : > { %v5980_v9 = vsel %vm19788_vm11, %v17418_v22, 0  ;;  %v5381_v11 = vrot.slane %v5338_v18, 4  ;;  %v5812_v37 = vrot.slane %v5810_v48, 4  ;;  %v5815_v55 = vrot.slane %v5813_v31, 5  ;;  %vm19789_vm12 = vmmov %vm19788_vm11 }
 0x38d   : > { %vm5260_vm3 = vcmp.ge.f32.partialorder %v5224_v34, 0.0  ;;  %v5500_v25 = vsel %vm1854_vm8, %v17526_v23, %v5499_v16  ;;  %v5292_v38 = vmul.f32 0.01, %v5224_v34  ;;  %v6037_v7 = vshrl.u32 %v5980_v9, 16 }
 0x38e   : > { %v6040_v17 = vshll.u32 %v5980_v9, 16  ;;  %v17594_v57 = vsel %vm1256_vm4, %v17524_v63, %v5381_v11  ;;  %v17598_v33 = vsel %vm1256_vm4, %v5381_v11, %v17584_v52  ;;  %7812 = vmatmul.mubr.bf16.gmra.mrb[140].mxu0 %v5500_v25  ;;  %v17600_v44 = vor.u32 %v5815_v55, %v5812_v37 }
 0x38f   : > { %vm5258_vm13 = vcmp.ge.f32.partialorder %v5216_v32, 0.0  ;;  %5418 = vst [vmem:[#allocation2 + $0x68] sm:$0xff] %v17594_v57  ;;  %5419 = vst [vmem:[#allocation2 + $0x70] sm:$0xff] %v17598_v33  ;;  %7819 = vmatprep.mubr.bf16.mxu0 %v5685_v0  ;;  %v5324_v23 = vsel %vm5260_vm3, %v5224_v34, %v5292_v38  ;;  %v6039_v50 = vrot.slane %v6037_v7, 3  ;;  %v5290_v42 = vmul.f32 0.01, %v5216_v32 }
 0x390   : > { %v6042_v45 = vrot.slane %v6040_v17, 4  ;;  %v5817_v63 = vsel %vm1676_vm0, %v17549_v14, %v17600_v44  ;;  %v5227_v28 = vadd.f32 %v17537_v24, %v17350_v39  ;;  %v5219_v29 = vadd.f32 %v17552_v6, %v17332_v3 }
 0x391   : > { %v5445_v27 = vsel %vm19789_vm12, %v17414_v43, 0  ;;  %7973 = vmatmul.mubr.bf16.gmra.mrb[204].mxu1 %v5817_v63  ;;  %v5322_v26 = vsel %vm5258_vm13, %v5216_v32, %v5290_v42  ;;  %v5686_v3 = vrot.slane %v17418_v22, 4  ;;  %v5762_v47 = vsel %vm2415_vm6, %v17414_v43, 0 }
 0x392   : > { %v6043_v58 = vor.u32 %v6042_v45, %v6039_v50  ;;  %v5502_v41 = vshrl.u32 %v5445_v27, 16  ;;  %v5505_v49 = vshll.u32 %v5445_v27, 16  ;;  %vm5261_vm5 = vcmp.ge.f32.partialorder %v5227_v28, 0.0 }
 0x393   : > { %v5293_v12 = vmul.f32 0.01, %v5227_v28  ;;  %vm5259_vm2 = vcmp.ge.f32.partialorder %v5219_v29, 0.0  ;;  %v5291_v0 = vmul.f32 0.01, %v5219_v29  ;;  %vm19791_vm11 = vcmp.ne.s16.totalorder %v19790_v36, 0 }
 0x394   : > { %v6044_v14 = vsel %vm1854_vm8, %v17567_v20, %v6043_v58  ;;  %v5504_v39 = vrot.slane %v5502_v41, 3  ;;  %v5507_v24 = vrot.slane %v5505_v49, 4  ;;  %v5981_v40 = vsel %vm19791_vm11, %v17442_v2, 0  ;;  %vm19792_vm3 = vmmov %vm19791_vm11 }
 0x395   : > { %7980 = vmatprep.mubr.bf16.mxu1 %v6044_v14  ;;  %v5325_v6 = vsel %vm5261_vm5, %v5227_v28, %v5293_v12  ;;  %v5323_v4 = vsel %vm5259_vm2, %v5219_v29, %v5291_v0  ;;  %v5687_v20 = vsel %vm1256_vm4, %v5684_v56, %v5686_v3  ;;  %v5819_v48 = vshrl.u32 %v5762_v47, 16  ;;  %v19794_v12 = vld [vmem:[#allocation36_spill] sm:$0xff] }
 0x396   : > { %v5341_v15 = vpack.c.bf16 %v5325_v6, %v5324_v23  ;;  %v5340_v46 = vpack.c.bf16 %v5323_v4, %v5322_v26  ;;  %v5508_v18 = vor.u32 %v5507_v24, %v5504_v39  ;;  %v5822_v31 = vshll.u32 %v5762_v47, 16 }
 0x397   : > { %v6046_v34 = vshrl.u32 %v5981_v40, 16  ;;  %v6049_v9 = vshll.u32 %v5981_v40, 16  ;;  %v5446_v55 = vsel %vm19792_vm3, %v17418_v22, 0  ;;  %v5821_v25 = vrot.slane %v5819_v48, 4 }
 0x398   : > { %v5387_v32 = vrot.slane %v5341_v15, 4  ;;  %v5385_v11 = vrot.slane %v5340_v46, 4  ;;  %v5509_v37 = vsel %vm1854_vm8, %v5499_v16, %v5508_v18  ;;  %v5824_v38 = vrot.slane %v5822_v31, 5 }
 0x399   : > { %7820 = vmatmul.mubr.bf16.gmra.mrb[144].mxu0 %v5509_v37  ;;  %v6048_v7 = vrot.slane %v6046_v34, 3  ;;  %v6051_v17 = vrot.slane %v6049_v9, 4  ;;  %v5511_v23 = vshrl.u32 %v5446_v55, 16  ;;  %v5514_v16 = vshll.u32 %v5446_v55, 16 }
 0x39a   : > { %5422 = vst [vmem:[#allocation2 + $0x88] sm:$0xf] %v5387_v32  ;;  %v17632_v43 = vsel %vm1256_vm4, %v17584_v52, %v5385_v11  ;;  %v17635_v56 = vsel %vm1256_vm4, %v5385_v11, %v5387_v32  ;;  %7827 = vmatprep.mubr.bf16.mxu0 %v5687_v20  ;;  %v5825_v50 = vor.u32 %v5824_v38, %v5821_v25  ;;  %v5688_v42 = vrot.slane %v17442_v2, 4  ;;  %v19797_v11 = vld [vmem:[#allocation37_spill] sm:$0xff] }
 0x39b   : > { %5420 = vst [vmem:[#allocation2 + $0x78] sm:$0xff] %v17632_v43  ;;  %5421 = vst [vmem:[#allocation2 + $0x80] sm:$0xff] %v17635_v56  ;;  %v6052_v45 = vor.u32 %v6051_v17, %v6048_v7  ;;  %vm19793_vm13 = vcmp.ne.s16.totalorder %v16315_v59, 0  ;;  %v5513_v52 = vrot.slane %v5511_v23, 3  ;;  %v5516_v28 = vrot.slane %v5514_v16, 4 }
 0x39c   : > { %v5763_v63 = vsel %vm19793_vm13, %v17418_v22, 0  ;;  %v5826_v26 = vsel %vm1676_vm0, %v17600_v44, %v5825_v50  ;;  %v5689_v49 = vsel %vm1256_vm4, %v5686_v3, %v5688_v42  ;;  %vm19795_vm12 = vcmp.ne.s16.totalorder %v19794_v12, 0 }
 0x39d   : > { %v5828_v29 = vshrl.u32 %v5763_v63, 16  ;;  %v5831_v27 = vshll.u32 %v5763_v63, 16  ;;  %v6053_v41 = vsel %vm1854_vm8, %v6043_v58, %v6052_v45  ;;  %v5982_v0 = vsel %vm19795_vm12, %v17446_v5, 0  ;;  %7981 = vmatmul.mubr.bf16.gmra.mrb[208].mxu1 %v5826_v26  ;;  %vm19796_vm5 = vmmov %vm19795_vm12 }
 0x39e   : > { %v5517_v14 = vor.u32 %v5516_v28, %v5513_v52  ;;  %v6055_v22 = vshrl.u32 %v5982_v0, 16  ;;  %7988 = vmatprep.mubr.bf16.mxu1 %v6053_v41  ;;  %v6058_v6 = vshll.u32 %v5982_v0, 16  ;;  %v5447_v4 = vsel %vm19796_vm5, %v17442_v2, 0 }
 0x39f   : > { %v5830_v39 = vrot.slane %v5828_v29, 4  ;;  %v5833_v24 = vrot.slane %v5831_v27, 5  ;;  %v5690_v44 = vrot.slane %v17446_v5, 4  ;;  %v5764_v58 = vsel %vm2417_vm14, %v17442_v2, 0 }
 0x3a0   : > { %v5518_v3 = vsel %vm1854_vm8, %v5508_v18, %v5517_v14  ;;  %v6057_v40 = vrot.slane %v6055_v22, 3  ;;  %v5520_v15 = vshrl.u32 %v5447_v4, 16  ;;  %v6060_v46 = vrot.slane %v6058_v6, 4 }
 0x3a1   : > { %v5834_v47 = vor.u32 %v5833_v24, %v5830_v39  ;;  %7828 = vmatmul.mubr.bf16.gmra.mrb[148].mxu0 %v5518_v3  ;;  %v5523_v20 = vshll.u32 %v5447_v4, 16  ;;  %v5691_v48 = vsel %vm1256_vm4, %v5688_v42, %v5690_v44  ;;  %v5837_v31 = vshrl.u32 %v5764_v58, 16  ;;  %v19802_v39 = vld [vmem:[#allocation39_spill] sm:$0xff] }
 0x3a2   : > { %7835 = vmatprep.mubr.bf16.mxu0 %v5689_v49  ;;  %v5522_v9 = vrot.slane %v5520_v15, 3  ;;  %v5840_v32 = vshll.u32 %v5764_v58, 16  ;;  %vm19798_vm2 = vcmp.ne.s16.totalorder %v19797_v11, 0  ;;  %v6061_v37 = vor.u32 %v6060_v46, %v6057_v40  ;;  %v19800_v49 = vld [vmem:[#allocation38_spill] sm:$0xff] }
 0x3a3   : > { %v5835_v34 = vsel %vm1676_vm0, %v5825_v50, %v5834_v47  ;;  %v5983_v2 = vsel %vm19798_vm2, %v17489_v1, 0  ;;  %v5525_v18 = vrot.slane %v5523_v20, 4  ;;  %v5839_v55 = vrot.slane %v5837_v31, 4  ;;  %vm19799_vm11 = vmmov %vm19798_vm2 }
 0x3a4   : > { %v6064_v25 = vshrl.u32 %v5983_v2, 16  ;;  %v5842_v38 = vrot.slane %v5840_v32, 5  ;;  %v6067_v7 = vshll.u32 %v5983_v2, 16  ;;  %v5448_v17 = vsel %vm19799_vm11, %v17446_v5, 0 }
 0x3a5   : > { %v5692_v23 = vrot.slane %v17489_v1, 4  ;;  %v6062_v16 = vsel %vm1854_vm8, %v6052_v45, %v6061_v37  ;;  %v5526_v50 = vor.u32 %v5525_v18, %v5522_v9  ;;  %v5529_v63 = vshrl.u32 %v5448_v17, 16  ;;  %7989 = vmatmul.mubr.bf16.gmra.mrb[212].mxu1 %v5835_v34 }
 0x3a6   : > { %v6066_v42 = vrot.slane %v6064_v25, 3  ;;  %v5843_v52 = vor.u32 %v5842_v38, %v5839_v55  ;;  %v6069_v28 = vrot.slane %v6067_v7, 4  ;;  %v5532_v29 = vshll.u32 %v5448_v17, 16  ;;  %7996 = vmatprep.mubr.bf16.mxu1 %v6062_v16  ;;  %v19806_v16 = vld [vmem:[#allocation41_spill] sm:$0xff] }
 0x3a7   : > { %v5693_v27 = vsel %vm1256_vm4, %v5690_v44, %v5692_v23  ;;  %v5527_v26 = vsel %vm1854_vm8, %v5517_v14, %v5526_v50  ;;  %v5531_v41 = vrot.slane %v5529_v63, 3  ;;  %vm19801_vm3 = vcmp.ne.s16.totalorder %v19800_v49, 0 }
 0x3a8   : > { %v5765_v0 = vsel %vm19801_vm3, %v17446_v5, 0  ;;  %vm19803_vm13 = vcmp.ne.s16.totalorder %v19802_v39, 0  ;;  %v5844_v24 = vsel %vm1676_vm0, %v5834_v47, %v5843_v52  ;;  %v6070_v22 = vor.u32 %v6069_v28, %v6066_v42 }
 0x3a9   : > { %v5984_v45 = vsel %vm19803_vm13, %v17493_v61, 0  ;;  %v5534_v6 = vrot.slane %v5532_v29, 4  ;;  %v5846_v4 = vshrl.u32 %v5765_v0, 16  ;;  %7836 = vmatmul.mubr.bf16.gmra.mrb[152].mxu0 %v5527_v26  ;;  %v5849_v58 = vshll.u32 %v5765_v0, 16  ;;  %vm19804_vm12 = vmmov %vm19803_vm13 }
 0x3aa   : > { %v6073_v44 = vshrl.u32 %v5984_v45, 16  ;;  %v6076_v3 = vshll.u32 %v5984_v45, 16  ;;  %v5449_v14 = vsel %vm19804_vm12, %v17489_v1, 0  ;;  %7843 = vmatprep.mubr.bf16.mxu0 %v5691_v48  ;;  %v6071_v5 = vsel %vm1854_vm8, %v6061_v37, %v6070_v22 }
 0x3ab   : > { %v5535_v40 = vor.u32 %v5534_v6, %v5531_v41  ;;  %v5848_v15 = vrot.slane %v5846_v4, 4  ;;  %v5538_v46 = vshrl.u32 %v5449_v14, 16  ;;  %v5851_v20 = vrot.slane %v5849_v58, 5  ;;  %v19809_v4 = vld [vmem:[#allocation42_spill] sm:$0xff] }
 0x3ac   : > { %v6075_v31 = vrot.slane %v6073_v44, 3  ;;  %v6078_v47 = vrot.slane %v6076_v3, 4  ;;  %v5541_v34 = vshll.u32 %v5449_v14, 16  ;;  %v5694_v2 = vrot.slane %v17493_v61, 4 }
 0x3ad   : > { %v5536_v9 = vsel %vm1854_vm8, %v5526_v50, %v5535_v40  ;;  %v5540_v32 = vrot.slane %v5538_v46, 3  ;;  %v5766_v55 = vsel %vm2419_vm15, %v17489_v1, 0  ;;  %v5852_v25 = vor.u32 %v5851_v20, %v5848_v15  ;;  %7997 = vmatmul.mubr.bf16.gmra.mrb[216].mxu1 %v5844_v24 }
 0x3ae   : > { %v6079_v48 = vor.u32 %v6078_v47, %v6075_v31  ;;  %v5543_v38 = vrot.slane %v5541_v34, 4  ;;  %v5855_v37 = vshrl.u32 %v5766_v55, 16  ;;  %v5695_v7 = vsel %vm1256_vm4, %v5692_v23, %v5694_v2  ;;  %8004 = vmatprep.mubr.bf16.mxu1 %v6071_v5  ;;  %v19811_v31 = vld [vmem:[#allocation43_spill] sm:$0xff] }
 0x3af   : > { %v5858_v17 = vshll.u32 %v5766_v55, 16  ;;  %vm19807_vm5 = vcmp.ne.s16.totalorder %v19806_v16, 0  ;;  %v5853_v63 = vsel %vm1676_vm0, %v5843_v52, %v5852_v25  ;;  %v5696_v6 = vrot.slane %v17543_v35, 4 }
 0x3b0   : > { %v5985_v42 = vsel %vm19807_vm5, %v17543_v35, 0  ;;  %vm19808_vm2 = vmmov %vm19807_vm5  ;;  %v6080_v1 = vsel %vm1854_vm8, %v6070_v22, %v6079_v48  ;;  %v5544_v28 = vor.u32 %v5543_v38, %v5540_v32  ;;  %v5857_v29 = vrot.slane %v5855_v37, 4 }
 0x3b1   : > { %v5450_v50 = vsel %vm19808_vm2, %v17493_v61, 0  ;;  %v5860_v26 = vrot.slane %v5858_v17, 5  ;;  %v6082_v41 = vshrl.u32 %v5985_v42, 16  ;;  %v6085_v0 = vshll.u32 %v5985_v42, 16  ;;  %7844 = vmatmul.mubr.bf16.gmra.mrb[156].mxu0 %v5536_v9 }
 0x3b2   : > { %v5547_v23 = vshrl.u32 %v5450_v50, 16  ;;  %v5545_v45 = vsel %vm1854_vm8, %v5535_v40, %v5544_v28  ;;  %v5550_v24 = vshll.u32 %v5450_v50, 16  ;;  %vm19810_vm11 = vcmp.ne.s16.totalorder %v19809_v4, 0  ;;  %7851 = vmatprep.mubr.bf16.mxu0 %v5693_v27 }
 0x3b3   : > { %v5767_v58 = vsel %vm19810_vm11, %v17493_v61, 0  ;;  %v5861_v52 = vor.u32 %v5860_v26, %v5857_v29  ;;  %v6084_v44 = vrot.slane %v6082_v41, 3  ;;  %v6087_v22 = vrot.slane %v6085_v0, 4  ;;  %v19814_v0 = vld [vmem:[#allocation44_spill] sm:$0xff] }
 0x3b4   : > { %v5549_v3 = vrot.slane %v5547_v23, 3  ;;  %v5552_v14 = vrot.slane %v5550_v24, 4  ;;  %v17701_v5 = vsel %vm1256_vm4, %v5694_v2, %v5696_v6  ;;  %v5864_v15 = vshrl.u32 %v5767_v58, 16 }
 0x3b5   : > { %v5867_v46 = vshll.u32 %v5767_v58, 16  ;;  %v5862_v40 = vsel %vm1676_vm0, %v5852_v25, %v5861_v52  ;;  %v6088_v20 = vor.u32 %v6087_v22, %v6084_v44  ;;  %vm19812_vm3 = vcmp.ne.s16.totalorder %v19811_v31, 0  ;;  %8005 = vmatmul.mubr.bf16.gmra.mrb[220].mxu1 %v5853_v63  ;;  %v19816_v44 = vld [vmem:[#allocation45_spill] sm:$0xff] }
 0x3b6   : > { %v5986_v47 = vsel %vm19812_vm3, %v17547_v53, 0  ;;  %vm19813_vm13 = vmmov %vm19812_vm3  ;;  %v5553_v27 = vor.u32 %v5552_v14, %v5549_v3  ;;  %v5866_v34 = vrot.slane %v5864_v15, 4  ;;  %8012 = vmatprep.mubr.bf16.mxu1 %v6080_v1  ;;  %v5698_v50 = vrot.slane %v17547_v53, 4 }
 0x3b7   : > { %v5451_v61 = vsel %vm19813_vm13, %v17543_v35, 0  ;;  %v5869_v9 = vrot.slane %v5867_v46, 5  ;;  %v6091_v32 = vshrl.u32 %v5986_v47, 16  ;;  %v6089_v2 = vsel %vm1854_vm8, %v6079_v48, %v6088_v20 }
 0x3b8   : > { %v6094_v55 = vshll.u32 %v5986_v47, 16  ;;  %v5556_v38 = vshrl.u32 %v5451_v61, 16  ;;  %v5559_v37 = vshll.u32 %v5451_v61, 16  ;;  %v5554_v25 = vsel %vm1854_vm8, %v5544_v28, %v5553_v27 }
 0x3b9   : > { %v5870_v17 = vor.u32 %v5869_v9, %v5866_v34  ;;  %v6093_v42 = vrot.slane %v6091_v32, 3  ;;  %vm19815_vm12 = vcmp.ne.s16.totalorder %v19814_v0, 0  ;;  %7852 = vmatmul.mubr.bf16.gmra.mrb[160].mxu0 %v5545_v45  ;;  %v17718_v63 = vsel %vm1256_vm4, %v5696_v6, %v5698_v50 }
 0x3ba   : > { %v6096_v29 = vrot.slane %v6094_v55, 4  ;;  %v5558_v26 = vrot.slane %v5556_v38, 3  ;;  %v5561_v41 = vrot.slane %v5559_v37, 4  ;;  %v5768_v23 = vsel %vm19815_vm12, %v17543_v35, 0  ;;  %7859 = vmatprep.mubr.bf16.mxu0 %v5695_v7  ;;  %v19819_v38 = vld [vmem:[#allocation46_spill] sm:$0xff] }
 0x3bb   : > { %v5871_v48 = vsel %vm1676_vm0, %v5861_v52, %v5870_v17  ;;  %v5873_v1 = vshrl.u32 %v5768_v23, 16  ;;  %v5876_v24 = vshll.u32 %v5768_v23, 16  ;;  %vm19817_vm5 = vcmp.ne.s16.totalorder %v19816_v44, 0 }
 0x3bc   : > { %v6097_v28 = vor.u32 %v6096_v29, %v6093_v42  ;;  %v5562_v58 = vor.u32 %v5561_v41, %v5558_v26  ;;  %v5987_v22 = vsel %vm19817_vm5, %v17594_v57, 0  ;;  %vm19818_vm2 = vmmov %vm19817_vm5  ;;  %v5700_v9 = vrot.slane %v17594_v57, 4  ;;  %v19821_v42 = vld [vmem:[#allocation47_spill] sm:$0xff] }
 0x3bd   : > { %v5452_v3 = vsel %vm19818_vm2, %v17547_v53, 0  ;;  %v5875_v35 = vrot.slane %v5873_v1, 4  ;;  %v5878_v45 = vrot.slane %v5876_v24, 5  ;;  %v6100_v14 = vshrl.u32 %v5987_v22, 16  ;;  %8013 = vmatmul.mubr.bf16.gmra.mrb[224].mxu1 %v5862_v40 }
 0x3be   : > { %v6103_v52 = vshll.u32 %v5987_v22, 16  ;;  %v6098_v6 = vsel %vm1854_vm8, %v6088_v20, %v6097_v28  ;;  %v5563_v15 = vsel %vm1854_vm8, %v5553_v27, %v5562_v58  ;;  %v5565_v46 = vshrl.u32 %v5452_v3, 16  ;;  %8020 = vmatprep.mubr.bf16.mxu1 %v6089_v2 }
 0x3bf   : > { %v5568_v7 = vshll.u32 %v5452_v3, 16  ;;  %v5879_v47 = vor.u32 %v5878_v45, %v5875_v35  ;;  %v6102_v61 = vrot.slane %v6100_v14, 3  ;;  %vm19820_vm11 = vcmp.ne.s16.totalorder %v19819_v38, 0 }
 0x3c0   : > { %v6105_v34 = vrot.slane %v6103_v52, 4  ;;  %v5567_v32 = vrot.slane %v5565_v46, 3  ;;  %v5769_v37 = vsel %vm19820_vm11, %v17547_v53, 0  ;;  %vm19822_vm3 = vcmp.ne.s16.totalorder %v19821_v42, 0 }
 0x3c1   : > { %v5570_v55 = vrot.slane %v5568_v7, 4  ;;  %v5988_v20 = vsel %vm19822_vm3, %v17598_v33, 0  ;;  %v17736_v27 = vsel %vm1676_vm0, %v5870_v17, %v5879_v47  ;;  %v17739_v26 = vsel %vm1256_vm4, %v5698_v50, %v5700_v9  ;;  %7860 = vmatmul.mubr.bf16.gmra.mrb[164].mxu0 %v5554_v25  ;;  %vm19823_vm13 = vmmov %vm19822_vm3 }
 0x3c2   : > { %v6106_v29 = vor.u32 %v6105_v34, %v6102_v61  ;;  %v5882_v41 = vshrl.u32 %v5769_v37, 16  ;;  %v5885_v23 = vshll.u32 %v5769_v37, 16  ;;  %v6109_v1 = vshrl.u32 %v5988_v20, 16  ;;  %7867 = vmatprep.mubr.bf16.mxu0 %v17701_v5 }
 0x3c3   : > { %v5571_v40 = vor.u32 %v5570_v55, %v5567_v32  ;;  %v6112_v24 = vshll.u32 %v5988_v20, 16  ;;  %v5453_v2 = vsel %vm19823_vm13, %v17594_v57, 0  ;;  %v5702_v17 = vrot.slane %v17598_v33, 4 }
 0x3c4   : > { %v6107_v53 = vsel %vm1854_vm8, %v6097_v28, %v6106_v29  ;;  %v5884_v22 = vrot.slane %v5882_v41, 4  ;;  %v5887_v3 = vrot.slane %v5885_v23, 5  ;;  %v6111_v35 = vrot.slane %v6109_v1, 3 }
 0x3c5   : > { %v17748_v50 = vsel %vm1854_vm8, %v5562_v58, %v5571_v40  ;;  %v6114_v45 = vrot.slane %v6112_v24, 4  ;;  %v5574_v14 = vshrl.u32 %v5453_v2, 16  ;;  %v5577_v52 = vshll.u32 %v5453_v2, 16  ;;  %v19825_v58 = vld [vmem:[#allocation49_spill] sm:$0xff]  ;;  %8021 = vmatmul.mubr.bf16.gmra.mrb[228].mxu1 %v5871_v48 }
 0x3c6   : > { %v17751_v25 = vsel %vm1256_vm4, %v5700_v9, %v5702_v17  ;;  %v5770_v46 = vsel %vm2423_vm7, %v17594_v57, 0  ;;  %v5888_v7 = vor.u32 %v5887_v3, %v5884_v22  ;;  %vm19826_vm12 = vcmp.ne.s16.totalorder %v19825_v58, 0  ;;  %8028 = vmatprep.mubr.bf16.mxu1 %v6098_v6 }
 0x3c7   : > { %v6115_v61 = vor.u32 %v6114_v45, %v6111_v35  ;;  %v5891_v34 = vshrl.u32 %v5770_v46, 16  ;;  %v5894_v32 = vshll.u32 %v5770_v46, 16  ;;  %v5576_v5 = vrot.slane %v5574_v14, 3  ;;  %vm19827_vm5 = vmmov %vm19826_vm12  ;;  %v19828_v14 = vld [vmem:[#allocation50_spill] sm:$0xff] }
 0x3c8   : > { %v5579_v55 = vrot.slane %v5577_v52, 4  ;;  %v5989_v37 = vsel %vm19826_vm12, %v17632_v43, 0  ;;  %v5454_v20 = vsel %vm19827_vm5, %v17598_v33, 0  ;;  %v5889_v9 = vsel %vm1676_vm0, %v5879_v47, %v5888_v7 }
 0x3c9   : > { %v6116_v41 = vsel %vm1854_vm8, %v6106_v29, %v6115_v61  ;;  %v5893_v57 = vrot.slane %v5891_v34, 4  ;;  %v5896_v23 = vrot.slane %v5894_v32, 5  ;;  %v6118_v24 = vshrl.u32 %v5989_v37, 16  ;;  %7868 = vmatmul.mubr.bf16.gmra.mrb[168].mxu0 %v5563_v15 }
 0x3ca   : > { %v5580_v1 = vor.u32 %v5579_v55, %v5576_v5  ;;  %v6121_v22 = vshll.u32 %v5989_v37, 16  ;;  %v5583_v2 = vshrl.u32 %v5454_v20, 16  ;;  %v5586_v35 = vshll.u32 %v5454_v20, 16  ;;  %7875 = vmatprep.mubr.bf16.mxu0 %v17718_v63 }
 0x3cb   : > { %v5897_v3 = vor.u32 %v5896_v23, %v5893_v57  ;;  %v5704_v45 = vrot.slane %v17632_v43, 4  ;;  %vm19829_vm2 = vcmp.ne.s16.totalorder %v19828_v14, 0  ;;  %v6120_v47 = vrot.slane %v6118_v24, 3 }
 0x3cc   : > { %v5771_v52 = vsel %vm19829_vm2, %v17598_v33, 0  ;;  %v5581_v48 = vsel %vm1854_vm8, %v5571_v40, %v5580_v1  ;;  %v6123_v29 = vrot.slane %v6121_v22, 4  ;;  %v5585_v46 = vrot.slane %v5583_v2, 3  ;;  %v19830_v33 = vld [vmem:[#allocation52_spill] sm:$0xff] }
 0x3cd   : > { %v5898_v6 = vsel %vm1676_vm0, %v5888_v7, %v5897_v3  ;;  %v5588_v34 = vrot.slane %v5586_v35, 4  ;;  %v5705_v32 = vsel %vm1256_vm4, %v5702_v17, %v5704_v45  ;;  %v5900_v5 = vshrl.u32 %v5771_v52, 16  ;;  %8029 = vmatmul.mubr.bf16.gmra.mrb[232].mxu1 %v17736_v27 }
 0x3ce   : > { %v6124_v55 = vor.u32 %v6123_v29, %v6120_v47  ;;  %v5903_v37 = vshll.u32 %v5771_v52, 16  ;;  %vm19831_vm11 = vcmp.ne.s16.totalorder %v19830_v33, 0  ;;  %8036 = vmatprep.mubr.bf16.mxu1 %v6107_v53 }
 0x3cf   : > { %v5990_v15 = vsel %vm19831_vm11, %v17635_v56, 0  ;;  %vm19832_vm3 = vmmov %vm19831_vm11  ;;  %v5589_v20 = vor.u32 %v5588_v34, %v5585_v46  ;;  %v5902_v63 = vrot.slane %v5900_v5, 4  ;;  %v19833_v46 = vld [vmem:[#allocation54_spill] sm:$0xff] }
 0x3d0   : > { %v5455_v40 = vsel %vm19832_vm3, %v17632_v43, 0  ;;  %v6127_v57 = vshrl.u32 %v5990_v15, 16  ;;  %v6130_v7 = vshll.u32 %v5990_v15, 16  ;;  %v6125_v23 = vsel %vm1854_vm8, %v6115_v61, %v6124_v55 }
 0x3d1   : > { %v5905_v24 = vrot.slane %v5903_v37, 5  ;;  %v5592_v22 = vshrl.u32 %v5455_v40, 16  ;;  %v5595_v17 = vshll.u32 %v5455_v40, 16  ;;  %v5590_v2 = vsel %vm1854_vm8, %v5580_v1, %v5589_v20  ;;  %7876 = vmatmul.mubr.bf16.gmra.mrb[172].mxu0 %v17748_v50 }
 0x3d2   : > { %v6129_v35 = vrot.slane %v6127_v57, 3  ;;  %v6132_v52 = vrot.slane %v6130_v7, 4  ;;  %vm19834_vm13 = vcmp.ne.s16.totalorder %v19833_v46, 0  ;;  %7883 = vmatprep.mubr.bf16.mxu0 %v17739_v26  ;;  %v5439_v26 = vld [vmem:[#allocation2 + $0x80] sm:$0xf] }
 0x3d3   : > { %v5906_v56 = vor.u32 %v5905_v24, %v5902_v63  ;;  %v5594_v47 = vrot.slane %v5592_v22, 3  ;;  %v5597_v29 = vrot.slane %v5595_v17, 4  ;;  %v5772_v34 = vsel %vm19834_vm13, %v17632_v43, 0  ;;  %v6275_v7 = vld [vmem:[#allocation2 + $0x8] sm:$0xf0] }
 0x3d4   : > { %v17786_v5 = vor.u32 %v6132_v52, %v6129_v35  ;;  %v5909_v61 = vshrl.u32 %v5772_v34, 16  ;;  %v5912_v37 = vshll.u32 %v5772_v34, 16  ;;  %v19835_v24 = vld [vmem:[#allocation51_spill] sm:$0xff]  ;;  %v5657_v22 = vld [vmem:[#allocation2 + $0x80] sm:$0xf]  ;;  %v19838_v17 = vld [vmem:[#allocation28_spill] sm:$0xff] }
 0x3d5   : > { %v5907_v27 = vsel %vm1676_vm0, %v5897_v3, %v5906_v56  ;;  %v17790_v15 = vor.u32 %v5597_v29, %v5594_v47  ;;  %8037 = vmatmul.mubr.bf16.gmra.mrb[236].mxu1 %v5889_v9  ;;  %v5974_v3 = vld [vmem:[#allocation2 + $0x88] sm:$0xf]  ;;  %vm19836_vm12 = vcmp.ne.s16.totalorder %v19835_v24, 0  ;;  %vm19839_vm2 = vcmp.ne.s16.totalorder %v19838_v17, 0  ;;  %v5756_v52 = vld [vmem:[#allocation2 + $0x80] sm:$0x1f] }
 0x3d6   : > { %v6134_v53 = vsel %vm1854_vm8, %v6124_v55, %v17786_v5  ;;  %v5911_v1 = vrot.slane %v5909_v61, 4  ;;  %v5914_v40 = vrot.slane %v5912_v37, 5  ;;  %8044 = vmatprep.mubr.bf16.mxu1 %v6116_v41  ;;  %v17802_v55 = vld [vmem:[#allocation2 + $0x10] sm:$0xff]  ;;  %vm19837_vm5 = vmmov %vm19836_vm12  ;;  %v6292_v41 = vsel %vm19839_vm2, %v6275_v7, 0 }
 0x3d7   : > { %v5599_v63 = vsel %vm1854_vm8, %v5589_v20, %v17790_v15  ;;  %v5991_v20 = vsel %vm19836_vm12, %v5974_v3, 0  ;;  %v5456_v9 = vsel %vm19837_vm5, %v5439_v26, 0  ;;  %v6310_v47 = vshrl.u32 %v6292_v41, 16  ;;  %v6712_v3 = vld [vmem:[#allocation2 + $0x18] sm:$0xff]  ;;  %v6493_v17 = vld [vmem:[#allocation2 + $0x10] sm:$0xf8] }
 0x3d8   : > { %v17797_v57 = vor.u32 %v5914_v40, %v5911_v1  ;;  %v5601_v35 = vshrl.u32 %v5456_v9, 16  ;;  %v6313_v29 = vshll.u32 %v6292_v41, 16  ;;  %v19840_v1 = vld [vmem:[#allocation53_spill] sm:$0xff]  ;;  %vm19846_vm13 = vcmp.ne.s16.totalorder %v16089_v60, 0 }
 0x3d9   : > { %7884 = vmatmul.mubr.bf16.gmra.mrb[176].mxu0 %v5581_v48  ;;  %v6136_v48 = vshrl.u32 %v5991_v20, 16  ;;  %vm19841_vm11 = vcmp.ne.s16.totalorder %v19840_v1, 0  ;;  %vm19847_vm12 = vcmp.ne.s16.totalorder %v19767_v19, 0  ;;  %vm19848_vm5 = vcmp.ne.s16.totalorder %v16146_v30, 0 }
 0x3da   : > { %v5916_v50 = vsel %vm1676_vm0, %v5906_v56, %v17797_v57  ;;  %7891 = vmatprep.mubr.bf16.mxu0 %v17751_v25  ;;  %v6293_v25 = vsel %vm2411_vm1, %v17802_v55, 0  ;;  %v5706_v56 = vrot.slane %v5657_v22, 4  ;;  %v5773_v40 = vsel %vm19841_vm11, %v5756_v52, 0 }
 0x3db   : > { %v6318_v34 = vshrl.u32 %v6293_v25, 16  ;;  %v6321_v61 = vshll.u32 %v6293_v25, 16  ;;  %v5603_v26 = vrot.slane %v5601_v35, 3  ;;  %v5918_v25 = vshrl.u32 %v5773_v40, 16 }
 0x3dc   : > { %v5707_v7 = vsel %vm1256_vm4, %v5704_v45, %v5706_v56  ;;  %v19843_v56 = vld [vmem:[#allocation27_spill] sm:$0xff]  ;;  %vm19849_vm2 = vcmp.ne.s16.totalorder %v19779_v13, 0  ;;  %vm19850_vm11 = vcmp.ne.s16.totalorder %v19783_v8, 0 }
 0x3dd   : > { %8045 = vmatmul.mubr.bf16.gmra.mrb[240].mxu1 %v5898_v6  ;;  %v6139_v6 = vshll.u32 %v5991_v20, 16  ;;  %v6312_v20 = vrot.slane %v6310_v47, 4  ;;  %v6320_v22 = vrot.slane %v6318_v34, 4  ;;  %v6323_v41 = vrot.slane %v6321_v61, 5  ;;  %v6711_v34 = vld [vmem:[#allocation2 + $0x10] sm:$0xf0] }
 0x3de   : > { %8052 = vmatprep.mubr.bf16.mxu1 %v6125_v23  ;;  %v5604_v23 = vshll.u32 %v5456_v9, 16  ;;  %v6315_v9 = vrot.slane %v6313_v29, 5  ;;  %v5920_v54 = vrot.slane %v5918_v25, 4  ;;  %vm19844_vm3 = vcmp.ne.s16.totalorder %v19843_v56, 0  ;;  %v6811_v61 = vld [vmem:[#allocation2 + $0x18] sm:$0xff] }
 0x3df   : > { %v6141_v37 = vrot.slane %v6139_v6, 4  ;;  %v6294_v6 = vsel %vm2412_vm10, %v6712_v3, 0  ;;  %v6324_v43 = vor.u32 %v6323_v41, %v6320_v22  ;;  %v6511_v47 = vsel %vm19844_vm3, %v6712_v3, 0 }
 0x3e0   : > { %v6327_v35 = vshrl.u32 %v6294_v6, 16  ;;  %v6211_v25 = vrot.slane %v17802_v55, 4  ;;  %v14810_v55 = vld [vmem:[#allocation10 + $0x208] sm:$0xff]   ;;  %vm19851_vm3 = vcmp.ne.s16.totalorder %v16315_v59, 0 }
 0x3e1   : > { %7892 = vmatmul.mubr.bf16.gmra.mrb[180].mxu0 %v5590_v2  ;;  %v6138_v2 = vrot.slane %v6136_v48, 3 }
 0x3e2   : > { %7899 = vmatprep.mubr.bf16.mxu0 %v5705_v32  ;;  %v5606_v32 = vrot.slane %v5604_v23, 4  ;;  %v6330_v23 = vshll.u32 %v6294_v6, 16 }
 0x3e3   : > { %v6142_v52 = vor.u32 %v6141_v37, %v6138_v2  ;;  %v6510_v2 = vsel %vm1820_vm9, %v6493_v17, 0  ;;  %v17828_v37 = vld [vmem:[#allocation2 + $0x20] sm:$0xff] }
 0x3e4   : > { %v5607_v24 = vor.u32 %v5606_v32, %v5603_v26  ;;  %v6329_v26 = vrot.slane %v6327_v35, 4  ;;  %v6332_v32 = vrot.slane %v6330_v23, 5  ;;  %v6528_v22 = vshrl.u32 %v6510_v2, 16  ;;  %v17837_v23 = vld [vmem:[#allocation2 + $0x28] sm:$0xff] }
 0x3e5   : > { %8053 = vmatmul.mubr.bf16.gmra.mrb[244].mxu1 %v5907_v27  ;;  %v5921_v27 = vshll.u32 %v5773_v40, 16  ;;  %v6176_v40 = vld [vmem:[#allocation2 + $0x8] sm:$0xf0]  ;;  %v6531_v41 = vshll.u32 %v6510_v2, 16  ;;  %v6296_v2 = vsel %vm19848_vm5, %v17837_v23, 0  ;;  %vm19854_vm5 = vcmp.ne.s16.totalorder %v19800_v49, 0 }
 0x3e6   : > { %8060 = vmatprep.mubr.bf16.mxu1 %v6134_v53  ;;  %v6316_v53 = vor.u32 %v6315_v9, %v6312_v20  ;;  %v5608_v29 = vsel %vm1854_vm8, %v17790_v15, %v5607_v24  ;;  %v6539_v20 = vshll.u32 %v6511_v47, 16  ;;  %v6295_v15 = vsel %vm19846_vm13, %v17828_v37, 0 }
 0x3e7   : > { %v5923_v45 = vrot.slane %v5921_v27, 5  ;;  %v6745_v24 = vrot.slane %v6711_v34, 4  ;;  %v6210_v17 = vrot.slane %v6176_v40, 4  ;;  %v6333_v27 = vor.u32 %v6332_v32, %v6329_v26 }
 0x3e8   : > { %vm19852_vm13 = vcmp.ne.s16.totalorder %v19787_v10, 0 }
 0x3e9   : > { %7900 = vmatmul.mubr.bf16.gmra.mrb[184].mxu0 %v5599_v63  ;;  %v6143_v63 = vsel %vm1854_vm8, %v17786_v5, %v6142_v52  ;;  %v5924_v9 = vor.u32 %v5923_v45, %v5920_v54  ;;  %v6746_v5 = vrot.slane %v6712_v3, 4  ;;  %v6541_v52 = vrot.slane %v6539_v20, 4 }
 0x3ea   : > { %7907 = vmatprep.mubr.bf16.mxu0 %v5707_v7  ;;  %v6536_v7 = vshrl.u32 %v6511_v47, 16  ;;  %v6339_v54 = vshll.u32 %v6295_v15, 16  ;;  %v6530_v45 = vrot.slane %v6528_v22, 3  ;;  %v6533_v47 = vrot.slane %v6531_v41, 4 }
 0x3eb   : > { %v5925_v35 = vsel %vm1676_vm0, %v17797_v57, %v5924_v9  ;;  %v6747_v3 = vsel %vm1256_vm4, %v6745_v24, %v6746_v5  ;;  %v6334_v34 = vsel %vm1676_vm0, %v6324_v43, %v6333_v27  ;;  %v14811_v9 = vld [vmem:[#allocation10 + $0x210] sm:$0xff]   ;;  %v6345_v22 = vshrl.u32 %v6296_v2, 16 }
 0x3ec   : > { %v6538_v6 = vrot.slane %v6536_v7, 3  ;;  %v6341_v26 = vrot.slane %v6339_v54, 5  ;;  %v6534_v20 = vor.u32 %v6533_v47, %v6530_v45  ;;  %v6348_v41 = vshll.u32 %v6296_v2, 16 }
 0x3ed   : > { %8061 = vmatmul.mubr.bf16.gmra.mrb[248].mxu1 %v5916_v50  ;;  %v6325_v50 = vsel %vm1676_vm0, %v6316_v53, %v6324_v43  ;;  %v6336_v53 = vshrl.u32 %v6295_v15, 16  ;;  %v6347_v54 = vrot.slane %v6345_v22, 4 }
 0x3ee   : > { %8068 = vmatprep.mubr.bf16.mxu1 %v6143_v63  ;;  %v6512_v63 = vsel %vm19847_vm12, %v17828_v37, 0  ;;  %v6542_v57 = vor.u32 %v6541_v52, %v6538_v6  ;;  %v6513_v6 = vsel %vm19849_vm2, %v17837_v23, 0  ;;  %vm19853_vm12 = vcmp.ne.s16.totalorder %v19790_v36, 0 }
 0x3ef   : > { %v6338_v40 = vrot.slane %v6336_v53, 4  ;;  %v6545_v32 = vshrl.u32 %v6512_v63, 16  ;;  %v6548_v7 = vshll.u32 %v6512_v63, 16  ;;  %v14812_v53 = vld [vmem:[#allocation10 + $0x218] sm:$0xff]   ;;  %v6554_v45 = vshrl.u32 %v6513_v6, 16 }
 0x3f0   : > { %v6543_v43 = vsel %vm1854_vm8, %v6534_v20, %v6542_v57  ;;  %v6557_v47 = vshll.u32 %v6513_v6, 16  ;;  %vm19855_vm2 = vcmp.ne.s16.totalorder %v19794_v12, 0 }
 0x3f1   : > { %7908 = vmatmul.mubr.bf16.gmra.mrb[188].mxu0 %v5608_v29  ;;  %v6212_v29 = vsel %vm1256_vm4, %v6210_v17, %v6211_v25  ;;  %v6342_v15 = vor.u32 %v6341_v26, %v6338_v40  ;;  %v6547_v24 = vrot.slane %v6545_v32, 3  ;;  %v6550_v17 = vrot.slane %v6548_v7, 4 }
 0x3f2   : > { %8109 = vmatprep.mubr.bf16.mxu0 %v6325_v50  ;;  %v6748_v50 = vrot.slane %v17828_v37, 4  ;;  %v6556_v2 = vrot.slane %v6554_v45, 3  ;;  %v6559_v40 = vrot.slane %v6557_v47, 4 }
 0x3f3   : > { %v6343_v63 = vsel %vm1676_vm0, %v6333_v27, %v6342_v15 }
 0x3f4   : > { %v6749_v52 = vsel %vm1256_vm4, %v6746_v5, %v6748_v50 }
 0x3f5   : > { %8069 = vmatmul.mubr.bf16.gmra.mrb[252].mxu1 %v5925_v35  ;;  %v6214_v35 = vsel %vm1256_vm4, %v6211_v25, %v6746_v5  ;;  %v14813_v5 = vld [vmem:[#allocation10 + $0x220] sm:$0xff]  }
 0x3f6   : > { %8270 = vmatprep.mubr.bf16.mxu1 %v6747_v3  ;;  %v6350_v3 = vrot.slane %v6348_v41, 5  ;;  %v6560_v41 = vor.u32 %v6559_v40, %v6556_v2  ;;  %v17880_v2 = vld [vmem:[#allocation2 + $0x40] sm:$0xff] }
 0x3f8   : > { %v6351_v25 = vor.u32 %v6350_v3, %v6347_v54 }
 0x3f9   : > { %8110 = vmatmul.mubr.bf16.vlgmr.msra.gmra.mrb[192].mxu0 %v6212_v29  ;;  %v6551_v29 = vor.u32 %v6550_v17, %v6547_v24 }
 0x3fa   : > { %8117 = vmatprep.mubr.bf16.mxu0 %v6334_v34  ;;  %14366 = vmatpush3.bf16.msra.mxu0 %v17539_v51  ;;  %v17855_v51 = vld [vmem:[#allocation2 + $0x30] sm:$0xff]  ;;  %v6352_v22 = vsel %vm1676_vm0, %v6342_v15, %v6351_v25 }
 0x3fb   : > { %14367 = vmatprep.subr.bf16.mxu0 %v14810_v55  ;;  %v6297_v34 = vsel %vm2415_vm6, %v17855_v51, 0  ;;  %v6552_v32 = vsel %vm1854_vm8, %v6542_v57, %v6551_v29  ;;  %v6514_v20 = vsel %vm19850_vm11, %v17855_v51, 0  ;;  %v6561_v54 = vsel %vm1854_vm8, %v6551_v29, %v6560_v41 }
 0x3fc   : > { %v6354_v26 = vshrl.u32 %v6297_v34, 16  ;;  %v6357_v7 = vshll.u32 %v6297_v34, 16  ;;  %v6563_v17 = vshrl.u32 %v6514_v20, 16  ;;  %v6566_v6 = vshll.u32 %v6514_v20, 16 }
 0x3fd   : > { %8271 = vmatmul.mubr.bf16.vlgmr.msra.gmra.mrb[32].mxu1 %v6543_v43  ;;  %v17868_v43 = vld [vmem:[#allocation2 + $0x38] sm:$0xff]  ;;  %vm19856_vm11 = vcmp.ne.s16.totalorder %v19797_v11, 0 }
 0x3fe   : > { %14368 = vmatpush3.bf16.msra.mxu0 %v14810_v55  ;;  %8278 = vmatprep.mubr.bf16.mxu1 %v6749_v52  ;;  %v6750_v55 = vrot.slane %v17837_v23, 4  ;;  %v6356_v24 = vrot.slane %v6354_v26, 4  ;;  %v6359_v57 = vrot.slane %v6357_v7, 5  ;;  %v6565_v47 = vrot.slane %v6563_v17, 3 }
 0x3ff   : > { %14369 = vmatprep.subr.bf16.mxu0 %v14811_v9 }
 0x400   : > { %v6751_v27 = vsel %vm1256_vm4, %v6748_v50, %v6750_v55  ;;  %v6298_v50 = vsel %vm19851_vm3, %v17868_v43, 0  ;;  %v6360_v45 = vor.u32 %v6359_v57, %v6356_v24  ;;  %vm19857_vm3 = vcmp.ne.s16.totalorder %v19809_v4, 0 }
 0x401   : > { %8118 = vmatmul.mubr.bf16.gmra.mrb[196].mxu0 %v6214_v35  ;;  %v6752_v35 = vrot.slane %v17855_v51, 4  ;;  %v6363_v3 = vshrl.u32 %v6298_v50, 16  ;;  %v6366_v15 = vshll.u32 %v6298_v50, 16 }
 0x402   : > { %8125 = vmatprep.mubr.bf16.mxu0 %v6343_v63  ;;  %14370 = vmatpush3.bf16.msra.mxu0 %v14811_v9  ;;  %v14814_v9 = vld [vmem:[#allocation10 + $0x228] sm:$0xff]   ;;  %v6515_v63 = vsel %vm19852_vm13, %v17868_v43, 0  ;;  %v6361_v7 = vsel %vm1676_vm0, %v6351_v25, %v6360_v45  ;;  %vm19858_vm13 = vcmp.ne.s16.totalorder %v19802_v39, 0 }
 0x403   : > { %14371 = vmatprep.subr.bf16.mxu0 %v14812_v53  ;;  %v6753_v34 = vsel %vm1256_vm4, %v6750_v55, %v6752_v35  ;;  %v6365_v40 = vrot.slane %v6363_v3, 4  ;;  %v6368_v29 = vrot.slane %v6366_v15, 5  ;;  %v6572_v26 = vshrl.u32 %v6515_v63, 16 }
 0x404   : > { %v6754_v55 = vrot.slane %v17868_v43, 4 }
 0x405   : > { %8279 = vmatmul.mubr.bf16.gmra.mrb[36].mxu1 %v6552_v32  ;;  %v6575_v32 = vshll.u32 %v6515_v63, 16  ;;  %v6574_v24 = vrot.slane %v6572_v26, 3  ;;  %v6756_v63 = vrot.slane %v17880_v2, 4 }
 0x406   : > { %14372 = vmatpush3.bf16.msra.mxu0 %v14812_v53  ;;  %8286 = vmatprep.mubr.bf16.mxu1 %v6751_v27  ;;  %v14815_v53 = vld [vmem:[#allocation10 + $0x230] sm:$0xff]   ;;  %v6755_v25 = vsel %vm1256_vm4, %v6752_v35, %v6754_v55 }
 0x407   : > { %14373 = vmatprep.subr.bf16.mxu0 %v14813_v5  ;;  %v6577_v57 = vrot.slane %v6575_v32, 4 }
 0x409   : > { %8126 = vmatmul.mubr.bf16.gmra.mrb[200].mxu0 %v6749_v52  ;;  %v6568_v52 = vrot.slane %v6566_v6, 4  ;;  %v6578_v3 = vor.u32 %v6577_v57, %v6574_v24 }
 0x40a   : > { %8133 = vmatprep.mubr.bf16.mxu0 %v6352_v22  ;;  %14374 = vmatpush3.bf16.msra.mxu0 %v14813_v5  ;;  %v14816_v5 = vld [vmem:[#allocation10 + $0x238] sm:$0xff]   ;;  %v6299_v22 = vsel %vm2417_vm14, %v17880_v2, 0 }
 0x40b   : > { %14375 = vmatprep.subr.bf16.mxu0 %v14814_v9  ;;  %v6569_v20 = vor.u32 %v6568_v52, %v6565_v47  ;;  %v6372_v17 = vshrl.u32 %v6299_v22, 16  ;;  %v6375_v50 = vshll.u32 %v6299_v22, 16  ;;  %v17904_v22 = vld [vmem:[#allocation2 + $0x50] sm:$0xff] }
 0x40d   : > { %8287 = vmatmul.mubr.bf16.gmra.mrb[40].mxu1 %v6561_v54  ;;  %v6570_v6 = vsel %vm1854_vm8, %v6560_v41, %v6569_v20  ;;  %v17892_v54 = vld [vmem:[#allocation2 + $0x48] sm:$0xff]  ;;  %v6374_v15 = vrot.slane %v6372_v17, 4  ;;  %v6377_v47 = vrot.slane %v6375_v50, 5 }
 0x40e   : > { %14376 = vmatpush3.bf16.msra.mxu0 %v14814_v9  ;;  %8294 = vmatprep.mubr.bf16.mxu1 %v6753_v34  ;;  %v6369_v9 = vor.u32 %v6368_v29, %v6365_v40  ;;  %v6300_v35 = vsel %vm19854_vm5, %v17892_v54, 0  ;;  %v6579_v40 = vsel %vm1854_vm8, %v6569_v20, %v6578_v3  ;;  %vm19860_vm5 = vcmp.ne.s16.totalorder %v19806_v16, 0 }
 0x40f   : > { %14377 = vmatprep.subr.bf16.mxu0 %v14815_v53  ;;  %v6381_v29 = vshrl.u32 %v6300_v35, 16  ;;  %v6378_v26 = vor.u32 %v6377_v47, %v6374_v15 }
 0x411   : > { %8134 = vmatmul.mubr.bf16.gmra.mrb[204].mxu0 %v6751_v27  ;;  %v6516_v27 = vsel %vm19853_vm12, %v17880_v2, 0  ;;  %v6383_v24 = vrot.slane %v6381_v29, 4  ;;  %v6379_v20 = vsel %vm1676_vm0, %v6369_v9, %v6378_v26  ;;  %vm19859_vm12 = vcmp.ne.s16.totalorder %v19814_v0, 0 }
 0x412   : > { %8141 = vmatprep.mubr.bf16.mxu0 %v6361_v7  ;;  %14378 = vmatpush3.bf16.msra.mxu0 %v14815_v53  ;;  %v6370_v53 = vsel %vm1676_vm0, %v6360_v45, %v6369_v9  ;;  %v6581_v52 = vshrl.u32 %v6516_v27, 16  ;;  %v6584_v41 = vshll.u32 %v6516_v27, 16  ;;  %v6757_v7 = vsel %vm1256_vm4, %v6754_v55, %v6756_v63 }
 0x413   : > { %14379 = vmatprep.subr.bf16.mxu0 %v14816_v5  ;;  %v6301_v27 = vsel %vm2419_vm15, %v17904_v22, 0  ;;  %v6518_v9 = vsel %vm19856_vm11, %v17904_v22, 0  ;;  %vm19862_vm11 = vcmp.ne.s16.totalorder %v19811_v31, 0 }
 0x414   : > { %v6583_v32 = vrot.slane %v6581_v52, 3  ;;  %v6586_v45 = vrot.slane %v6584_v41, 4  ;;  %v6390_v52 = vshrl.u32 %v6301_v27, 16 }
 0x415   : > { %8295 = vmatmul.mubr.bf16.gmra.mrb[44].mxu1 %v6570_v6 }
 0x416   : > { %14380 = vmatpush3.bf16.msra.mxu0 %v14816_v5  ;;  %8302 = vmatprep.mubr.bf16.mxu1 %v6755_v25  ;;  %v6384_v5 = vshll.u32 %v6300_v35, 16  ;;  %v6587_v50 = vor.u32 %v6586_v45, %v6583_v32  ;;  %v6393_v35 = vshll.u32 %v6301_v27, 16  ;;  %v6392_v32 = vrot.slane %v6390_v52, 4 }
 0x418   : > { %v6386_v57 = vrot.slane %v6384_v5, 5  ;;  %v6588_v41 = vsel %vm1854_vm8, %v6578_v3, %v6587_v50  ;;  %v6395_v45 = vrot.slane %v6393_v35, 5 }
 0x419   : > { %8142 = vmatmul.mubr.bf16.gmra.mrb[208].mxu0 %v6753_v34  ;;  %v6517_v34 = vsel %vm19855_vm2, %v17892_v54, 0  ;;  %vm19861_vm2 = vcmp.ne.s16.totalorder %v19819_v38, 0 }
 0x41a   : > { %8149 = vmatprep.mubr.bf16.mxu0 %v6370_v53  ;;  %v6590_v17 = vshrl.u32 %v6517_v34, 16  ;;  %v6593_v6 = vshll.u32 %v6517_v34, 16  ;;  %v6758_v53 = vrot.slane %v17892_v54, 4  ;;  %v6387_v15 = vor.u32 %v6386_v57, %v6383_v24 }
 0x41b   : > { %v6599_v34 = vshrl.u32 %v6518_v9, 16  ;;  %v6602_v24 = vshll.u32 %v6518_v9, 16 }
 0x41c   : > { %v6592_v55 = vrot.slane %v6590_v17, 3  ;;  %v6595_v47 = vrot.slane %v6593_v6, 4  ;;  %v6388_v29 = vsel %vm1676_vm0, %v6378_v26, %v6387_v15 }
 0x41d   : > { %8303 = vmatmul.mubr.bf16.gmra.mrb[48].mxu1 %v6579_v40  ;;  %v17916_v40 = vld [vmem:[#allocation2 + $0x58] sm:$0xff]  ;;  %v6601_v27 = vrot.slane %v6599_v34, 3  ;;  %v6604_v26 = vrot.slane %v6602_v24, 4 }
 0x41e   : > { %8310 = vmatprep.mubr.bf16.mxu1 %v6757_v7  ;;  %v6596_v5 = vor.u32 %v6595_v47, %v6592_v55  ;;  %v6302_v3 = vsel %vm19857_vm3, %v17916_v40, 0  ;;  %v17928_v47 = vld [vmem:[#allocation2 + $0x60] sm:$0xff]  ;;  %vm19863_vm3 = vcmp.ne.s16.totalorder %v19816_v44, 0 }
 0x41f   : > { %v6399_v17 = vshrl.u32 %v6302_v3, 16  ;;  %v6402_v6 = vshll.u32 %v6302_v3, 16 }
 0x420   : > { %v6597_v57 = vsel %vm1854_vm8, %v6587_v50, %v6596_v5 }
 0x421   : > { %8150 = vmatmul.mubr.bf16.gmra.mrb[212].mxu0 %v6755_v25  ;;  %v6759_v25 = vsel %vm1256_vm4, %v6756_v63, %v6758_v53  ;;  %v6760_v63 = vrot.slane %v17904_v22, 4  ;;  %v6401_v52 = vrot.slane %v6399_v17, 4 }
 0x422   : > { %8157 = vmatprep.mubr.bf16.mxu0 %v6379_v20  ;;  %v6396_v20 = vor.u32 %v6395_v45, %v6392_v32  ;;  %v6762_v32 = vrot.slane %v17916_v40, 4  ;;  %v6303_v45 = vsel %vm19859_vm12, %v17928_v47, 0  ;;  %vm19865_vm12 = vcmp.ne.s16.totalorder %v19821_v42, 0 }
 0x423   : > { %v6761_v55 = vsel %vm1256_vm4, %v6758_v53, %v6760_v63  ;;  %v6411_v17 = vshll.u32 %v6303_v45, 16 }
 0x424   : > { %v6397_v50 = vsel %vm1676_vm0, %v6387_v15, %v6396_v20  ;;  %v6763_v15 = vsel %vm1256_vm4, %v6760_v63, %v6762_v32 }
 0x425   : > { %8311 = vmatmul.mubr.bf16.gmra.mrb[52].mxu1 %v6588_v41  ;;  %v6404_v41 = vrot.slane %v6402_v6, 5  ;;  %v17940_v6 = vld [vmem:[#allocation2 + $0x68] sm:$0xff] }
 0x426   : > { %8318 = vmatprep.mubr.bf16.mxu1 %v6759_v25 }
 0x427   : > { %v6405_v34 = vor.u32 %v6404_v41, %v6401_v52  ;;  %v6413_v41 = vrot.slane %v6411_v17, 5  ;;  %v17952_v17 = vld [vmem:[#allocation2 + $0x70] sm:$0xff] }
 0x428   : > { %v6768_v44 = vrot.slane %v17952_v17, 4 }
 0x429   : > { %8158 = vmatmul.mubr.bf16.gmra.mrb[216].mxu0 %v6757_v7  ;;  %v6519_v7 = vsel %vm19858_vm13, %v17916_v40, 0  ;;  %vm19864_vm13 = vcmp.ne.s16.totalorder %v19828_v14, 0 }
 0x42a   : > { %8165 = vmatprep.mubr.bf16.mxu0 %v6388_v29  ;;  %v6608_v35 = vshrl.u32 %v6519_v7, 16  ;;  %v6611_v9 = vshll.u32 %v6519_v7, 16  ;;  %v6605_v29 = vor.u32 %v6604_v26, %v6601_v27  ;;  %v6406_v27 = vsel %vm1676_vm0, %v6396_v20, %v6405_v34 }
 0x42c   : > { %v6610_v53 = vrot.slane %v6608_v35, 3  ;;  %v6613_v24 = vrot.slane %v6611_v9, 4  ;;  %v6606_v3 = vsel %vm1854_vm8, %v6596_v5, %v6605_v29  ;;  %v6304_v35 = vsel %vm19861_vm2, %v17940_v6, 0 }
 0x42d   : > { %8319 = vmatmul.mubr.bf16.gmra.mrb[56].mxu1 %v6597_v57  ;;  %v6408_v57 = vshrl.u32 %v6303_v45, 16  ;;  %v6764_v9 = vrot.slane %v17928_v47, 4  ;;  %v6417_v45 = vshrl.u32 %v6304_v35, 16  ;;  %vm19868_vm2 = vcmp.ne.s16.totalorder %v19825_v58, 0 }
 0x42e   : > { %8326 = vmatprep.mubr.bf16.mxu1 %v6761_v55  ;;  %v6614_v26 = vor.u32 %v6613_v24, %v6610_v53  ;;  %v6420_v53 = vshll.u32 %v6304_v35, 16 }
 0x42f   : > { %v6410_v52 = vrot.slane %v6408_v57, 4  ;;  %v6765_v57 = vsel %vm1256_vm4, %v6762_v32, %v6764_v9  ;;  %v6766_v32 = vrot.slane %v17940_v6, 4 }
 0x430   : > { %v6615_v63 = vsel %vm1854_vm8, %v6605_v29, %v6614_v26  ;;  %v6422_v35 = vrot.slane %v6420_v53, 5 }
 0x431   : > { %8166 = vmatmul.mubr.bf16.gmra.mrb[220].mxu0 %v6759_v25  ;;  %v6520_v25 = vsel %vm19860_vm5, %v17928_v47, 0  ;;  %v6414_v16 = vor.u32 %v6413_v41, %v6410_v52  ;;  %vm19866_vm5 = vcmp.ne.s16.totalorder %v19833_v46, 0 }
 0x432   : > { %8173 = vmatprep.mubr.bf16.mxu0 %v6397_v50  ;;  %v6617_v7 = vshrl.u32 %v6520_v25, 16  ;;  %v6620_v5 = vshll.u32 %v6520_v25, 16 }
 0x433   : > { %v6415_v41 = vsel %vm1676_vm0, %v6405_v34, %v6414_v16 }
 0x434   : > { %v6619_v50 = vrot.slane %v6617_v7, 3  ;;  %v6622_v20 = vrot.slane %v6620_v5, 4  ;;  %v6419_v7 = vrot.slane %v6417_v45, 4 }
 0x435   : > { %8327 = vmatmul.mubr.bf16.gmra.mrb[60].mxu1 %v6606_v3 }
 0x436   : > { %8334 = vmatprep.mubr.bf16.mxu1 %v6763_v15  ;;  %v6623_v5 = vor.u32 %v6622_v20, %v6619_v50  ;;  %v17960_v50 = vld [vmem:[#allocation2 + $0x78] sm:$0xff]  ;;  %v6767_v20 = vsel %vm1256_vm4, %v6764_v9, %v6766_v32 }
 0x439   : > { %8174 = vmatmul.mubr.bf16.gmra.mrb[224].mxu0 %v6761_v55  ;;  %v6521_v55 = vsel %vm19862_vm11, %v17940_v6, 0  ;;  %vm19870_vm11 = vcmp.ne.s16.totalorder %v19840_v1, 0 }
 0x43a   : > { %8181 = vmatprep.mubr.bf16.mxu0 %v6406_v27  ;;  %v13341_v3 = vpop.f32.mrb[128].mxu0  ;;  %v6626_v39 = vshrl.u32 %v6521_v55, 16  ;;  %v6629_v11 = vshll.u32 %v6521_v55, 16  ;;  %v6624_v55 = vsel %vm1854_vm8, %v6614_v26, %v6623_v5 }
 0x43b   : > { %v13342_v24 = vpop.f32.mrb[129].mxu0 }
 0x43c   : > { %v13343_v25 = vadd.f32 %v13342_v24, %v13341_v3  ;;  %v13344_v27 = vpop.f32.mrb[130].mxu0  ;;  %v6628_v24 = vrot.slane %v6626_v39, 3  ;;  %v6631_v31 = vrot.slane %v6629_v11, 4 }
 0x43d   : > { %8335 = vmatmul.mubr.bf16.gmra.mrb[64].mxu1 %v6615_v63  ;;  %v13345_v29 = vpop.f32.mrb[131].mxu0  ;;  %v6305_v63 = vsel %vm2423_vm7, %v17952_v17, 0 }
 0x43e   : > { %8342 = vmatprep.mubr.bf16.mxu1 %v6765_v57  ;;  %v13346_v52 = vadd.f32 %v13345_v29, %v13344_v27  ;;  %v6426_v45 = vshrl.u32 %v6305_v63, 16  ;;  %v6429_v36 = vshll.u32 %v6305_v63, 16  ;;  %v6522_v29 = vsel %vm19863_vm3, %v17952_v17, 0 }
 0x43f   : > { %v6632_v39 = vor.u32 %v6631_v31, %v6628_v24  ;;  %vm19872_vm3 = vcmp.ne.s16.totalorder %v19830_v33, 0 }
 0x440   : > { %v13453_v3 = vpop.f32.mrb[192].mxu1  ;;  %v6428_v63 = vrot.slane %v6426_v45, 4  ;;  %v6431_v26 = vrot.slane %v6429_v36, 5 }
 0x441   : > { %8182 = vmatmul.mubr.bf16.gmra.mrb[228].mxu0 %v6763_v15  ;;  %v13454_v12 = vpop.f32.mrb[193].mxu1  ;;  %v6423_v15 = vor.u32 %v6422_v35, %v6419_v7  ;;  %v6635_v35 = vshrl.u32 %v6522_v29, 16  ;;  %v6633_v10 = vsel %vm1854_vm8, %v6623_v5, %v6632_v39 }
 0x442   : > { %8189 = vmatprep.mubr.bf16.mxu0 %v6415_v41  ;;  %v13455_v27 = vadd.f32 %v13454_v12, %v13453_v3  ;;  %v13456_v34 = vpop.f32.mrb[194].mxu1  ;;  %v17966_v41 = vld [vmem:[#allocation14] ss:$0 sm:$0xff]  ;;  %v6306_v12 = vsel %vm19864_vm13, %v17960_v50, 0  ;;  %v6638_v3 = vshll.u32 %v6522_v29, 16  ;;  %v6432_v8 = vor.u32 %v6431_v26, %v6428_v63 }
 0x443   : > { %v13457_v53 = vpop.f32.mrb[195].mxu1  ;;  %v6424_v9 = vsel %vm1676_vm0, %v6414_v16, %v6423_v15  ;;  %v7790_v24 = vadd.f32 %v13343_v25, %v17966_v41  ;;  %v6435_v36 = vshrl.u32 %v6306_v12, 16  ;;  %v6637_v16 = vrot.slane %v6635_v35, 3  ;;  %v17980_v25 = vld [vmem:[#allocation2 + $0x80] sm:$0xff] }
 0x444   : > { %v13458_v11 = vadd.f32 %v13457_v53, %v13456_v34  ;;  %v6438_v53 = vshll.u32 %v6306_v12, 16  ;;  %v6640_v19 = vrot.slane %v6638_v3, 4  ;;  %v6523_v29 = vsel %vm19865_vm12, %v17960_v50, 0 }
 0x445   : > { %8343 = vmatmul.mubr.bf16.gmra.mrb[68].mxu1 %v6624_v55  ;;  %v17982_v63 = vadd.f32 %v13455_v27, %v7790_v24  ;;  %v6644_v3 = vshrl.u32 %v6523_v29, 16  ;;  %v6307_v42 = vsel %vm19866_vm5, %v17980_v25, 0  ;;  %v6770_v27 = vrot.slane %v17960_v50, 4 }
 0x446   : > { %8350 = vmatprep.mubr.bf16.mxu1 %v6767_v20  ;;  %v6440_v5 = vrot.slane %v6438_v53, 5  ;;  %vm19880_vm5 = vcmp.ne.s16.totalorder %v16089_v60, 0 }
 0x448   : > { %v13347_v7 = vpop.f32.mrb[132].mxu0 }
 0x449   : > { %8190 = vmatmul.mubr.bf16.gmra.mrb[232].mxu0 %v6765_v57  ;;  %v13348_v55 = vpop.f32.mrb[133].mxu0  ;;  %v7793_v57 = vadd.f32 %v13346_v52, %v17966_v41  ;;  %v6433_v52 = vsel %vm1676_vm0, %v6423_v15, %v6432_v8 }
 0x44a   : > { %8197 = vmatprep.mubr.bf16.mxu0 %v6424_v9  ;;  %v13349_v34 = vadd.f32 %v13348_v55, %v13347_v7  ;;  %v13350_v31 = vpop.f32.mrb[134].mxu0  ;;  %v6769_v7 = vsel %vm1256_vm4, %v6766_v32, %v6768_v44  ;;  %v6437_v55 = vrot.slane %v6435_v36, 4  ;;  %v6646_v36 = vrot.slane %v6644_v3, 3 }
 0x44b   : > { %v13351_v45 = vpop.f32.mrb[135].mxu0  ;;  %v17989_v56 = vadd.f32 %v13458_v11, %v7793_v57  ;;  %v6771_v11 = vsel %vm1256_vm4, %v6768_v44, %v6770_v27  ;;  %v6291_v57 = vld [vmem:[#allocation2 + $0x88] sm:$0x1f]  ;;  %v18006_v44 = vrot.slane %v17980_v25, 4 }
 0x44c   : > { %v13352_v13 = vadd.f32 %v13351_v45, %v13350_v31  ;;  %v13459_v9 = vpop.f32.mrb[196].mxu1  ;;  %v6647_v31 = vshll.u32 %v6523_v29, 16  ;;  %v6641_v45 = vor.u32 %v6640_v19, %v6637_v16  ;;  %v6441_v15 = vor.u32 %v6440_v5, %v6437_v55 }
 0x44d   : > { %8351 = vmatmul.mubr.bf16.gmra.mrb[72].mxu1 %v6633_v10  ;;  %v13460_v12 = vpop.f32.mrb[197].mxu1  ;;  %v7798_v10 = vadd.f32 %v13349_v34, %v17966_v41  ;;  %19867 = vst [vmem:[#allocation87_spill] sm:$0xff] %v17989_v56  ;;  %v6447_v29 = vshll.u32 %v6307_v42, 16  ;;  %v6524_v34 = vsel %vm19868_vm2, %v17980_v25, 0  ;;  %v6727_v56 = vld [vmem:[#allocation2 + $0x90] sm:$0xf] }
 0x44e   : > { %8358 = vmatprep.mubr.bf16.mxu1 %v6769_v7  ;;  %v13461_v26 = vadd.f32 %v13460_v12, %v13459_v9  ;;  %v13462_v35 = vpop.f32.mrb[198].mxu1  ;;  %v6649_v53 = vrot.slane %v6647_v31, 4  ;;  %v6444_v9 = vshrl.u32 %v6307_v42, 16  ;;  %v6642_v19 = vsel %vm1854_vm8, %v6632_v39, %v6641_v45 }
 0x44f   : > { %v13463_v32 = vpop.f32.mrb[199].mxu1  ;;  %v6442_v12 = vsel %vm1676_vm0, %v6432_v8, %v6441_v15  ;;  %v6449_v39 = vrot.slane %v6447_v29, 5  ;;  %v6656_v31 = vshll.u32 %v6524_v34, 16  ;;  %v18009_v29 = vld [vmem:[#allocation2 + $0x88] sm:$0xff]  ;;  %vm19881_vm2 = vcmp.ne.s16.totalorder %v16146_v30, 0 }
 0x450   : > { %v13464_v24 = vadd.f32 %v13463_v32, %v13462_v35  ;;  %v17997_v16 = vadd.f32 %v13461_v26, %v7798_v10  ;;  %v6650_v5 = vor.u32 %v6649_v53, %v6646_v36  ;;  %v6653_v35 = vshrl.u32 %v6524_v34, 16 }
 0x451   : > { %8198 = vmatmul.mubr.bf16.gmra.mrb[236].mxu0 %v6767_v20  ;;  %v7801_v20 = vadd.f32 %v13352_v13, %v17966_v41  ;;  %v6308_v26 = vsel %vm19870_vm11, %v6291_v57, 0  ;;  %v6658_v58 = vrot.slane %v6656_v31, 4  ;;  %vm19882_vm11 = vcmp.ne.s16.totalorder %v16315_v59, 0 }
 0x452   : > { %8205 = vmatprep.mubr.bf16.mxu0 %v6433_v52  ;;  %19869 = vst [vmem:[#allocation88_spill] sm:$0xff] %v17997_v16  ;;  %v6446_v52 = vrot.slane %v6444_v9, 4  ;;  %v6456_v57 = vshll.u32 %v6308_v26, 16 }
 0x453   : > { %v18003_v10 = vadd.f32 %v13464_v24, %v7801_v20 }
 0x455   : > { %8359 = vmatmul.mubr.bf16.gmra.mrb[76].mxu1 %v6642_v19  ;;  %19871 = vst [vmem:[#allocation89_spill] sm:$0xff] %v18003_v10 }
 0x456   : > { %8366 = vmatprep.mubr.bf16.mxu1 %v6771_v11  ;;  %v13353_v55 = vpop.f32.mrb[136].mxu0 }
 0x457   : > { %v13354_v42 = vpop.f32.mrb[137].mxu0 }
 0x458   : > { %v13355_v13 = vadd.f32 %v13354_v42, %v13353_v55  ;;  %v13356_v3 = vpop.f32.mrb[138].mxu0  ;;  %v13465_v8 = vpop.f32.mrb[200].mxu1  ;;  %v6453_v55 = vshrl.u32 %v6308_v26, 16  ;;  %v6655_v42 = vrot.slane %v6653_v35, 3 }
 0x459   : > { %8206 = vmatmul.mubr.bf16.gmra.mrb[240].mxu0 %v6769_v7  ;;  %v13357_v32 = vpop.f32.mrb[139].mxu0  ;;  %v13466_v9 = vpop.f32.mrb[201].mxu1  ;;  %v6651_v7 = vsel %vm1854_vm8, %v6641_v45, %v6650_v5  ;;  %v6525_v45 = vsel %vm19872_vm3, %v18009_v29, 0  ;;  %vm19883_vm3 = vcmp.ne.s16.totalorder %v19800_v49, 0 }
 0x45a   : > { %8213 = vmatprep.mubr.bf16.mxu0 %v6442_v12  ;;  %v7806_v36 = vadd.f32 %v13355_v13, %v17966_v41  ;;  %v13358_v53 = vadd.f32 %v13357_v32, %v13356_v3  ;;  %v13467_v19 = vadd.f32 %v13466_v9, %v13465_v8  ;;  %v13468_v34 = vpop.f32.mrb[202].mxu1  ;;  %v6450_v12 = vor.u32 %v6449_v39, %v6446_v52 }
 0x45b   : > { %v13469_v20 = vpop.f32.mrb[203].mxu1  ;;  %v6773_v13 = vsel %vm1256_vm4, %v6770_v27, %v18006_v44  ;;  %v6455_v26 = vrot.slane %v6453_v55, 4  ;;  %v6458_v32 = vrot.slane %v6456_v57, 5  ;;  %v6828_v52 = vsel %vm2411_vm1, %v6811_v61, 0  ;;  %v19876_v55 = vld [vmem:[#allocation28_spill] sm:$0xff] }
 0x45c   : > { %v7809_v24 = vadd.f32 %v13358_v53, %v17966_v41  ;;  %v13470_v3 = vadd.f32 %v13469_v20, %v13468_v34  ;;  %v18018_v8 = vadd.f32 %v13467_v19, %v7806_v36  ;;  %v6810_v53 = vld [vmem:[#allocation2 + $0x10] sm:$0xf0]  ;;  %v6451_v39 = vsel %vm1676_vm0, %v6441_v15, %v6450_v12  ;;  %v6509_v36 = vld [vmem:[#allocation2 + $0x90] sm:$0xf] }
 0x45d   : > { %8367 = vmatmul.mubr.bf16.gmra.mrb[80].mxu1 %v6651_v7  ;;  %v6659_v35 = vor.u32 %v6658_v58, %v6655_v42  ;;  %v6662_v31 = vshrl.u32 %v6525_v45, 16  ;;  %v6774_v34 = vrot.slane %v18009_v29, 4  ;;  %v6665_v20 = vshll.u32 %v6525_v45, 16 }
 0x45e   : > { %19873 = vst [vmem:[#allocation90_spill] sm:$0xff] %v18018_v8  ;;  %8374 = vmatprep.mubr.bf16.mxu1 %v6773_v13  ;;  %v18023_v27 = vadd.f32 %v13470_v3, %v7809_v24  ;;  %vm19877_vm13 = vcmp.ne.s16.totalorder %v19876_v55, 0  ;;  %v6853_v33 = vshrl.u32 %v6828_v52, 16  ;;  %v6856_v58 = vshll.u32 %v6828_v52, 16 }
 0x45f   : > { %v6827_v57 = vsel %vm19877_vm13, %v6810_v53, 0  ;;  %v6775_v61 = vsel %vm1256_vm4, %v18006_v44, %v6774_v34  ;;  %v6660_v24 = vsel %vm1854_vm8, %v6650_v5, %v6659_v35  ;;  %v6664_v9 = vrot.slane %v6662_v31, 3 }
 0x460   : > { %19875 = vst [vmem:[#allocation91_spill] sm:$0xff] %v18023_v27  ;;  %v19878_v27 = vld [vmem:[#allocation51_spill] sm:$0xff]  ;;  %v6845_v10 = vshrl.u32 %v6827_v57, 16  ;;  %v6848_v16 = vshll.u32 %v6827_v57, 16  ;;  %v6667_v52 = vrot.slane %v6665_v20, 4  ;;  %v6829_v5 = vsel %vm2412_vm10, %v17828_v37, 0 }
 0x461   : > { %8214 = vmatmul.mubr.bf16.gmra.mrb[244].mxu0 %v6771_v11  ;;  %v13359_v7 = vpop.f32.mrb[140].mxu0  ;;  %vm19879_vm12 = vcmp.ne.s16.totalorder %v19878_v27, 0  ;;  %v6776_v20 = vrot.slane %v6727_v56, 4  ;;  %vm19884_vm13 = vcmp.ne.s16.totalorder %v19809_v4, 0 }
 0x462   : > { %8221 = vmatprep.mubr.bf16.mxu0 %v6451_v39  ;;  %v13360_v19 = vpop.f32.mrb[141].mxu0  ;;  %v6459_v39 = vor.u32 %v6458_v32, %v6455_v26  ;;  %v6526_v8 = vsel %vm19879_vm12, %v6509_v36, 0  ;;  %v6855_v26 = vrot.slane %v6853_v33, 4  ;;  %v6858_v36 = vrot.slane %v6856_v58, 5 }
 0x463   : > { %v13361_v11 = vadd.f32 %v13360_v19, %v13359_v7  ;;  %v13362_v15 = vpop.f32.mrb[142].mxu0  ;;  %v6830_v33 = vsel %vm19880_vm5, %v17837_v23, 0  ;;  %v6668_v37 = vor.u32 %v6667_v52, %v6664_v9  ;;  %v6865_v58 = vshll.u32 %v6829_v5, 16 }
 0x464   : > { %v13471_v42 = vpop.f32.mrb[204].mxu1  ;;  %v13363_v3 = vpop.f32.mrb[143].mxu0  ;;  %v6460_v57 = vsel %vm1676_vm0, %v6450_v12, %v6459_v39  ;;  %vm19885_vm12 = vcmp.ne.s16.totalorder %v19814_v0, 0  ;;  %vm19886_vm5 = vcmp.ne.s16.totalorder %v19819_v38, 0 }
 0x465   : > { %8375 = vmatmul.mubr.bf16.gmra.mrb[84].mxu1 %v6660_v24  ;;  %v7814_v45 = vadd.f32 %v13361_v11, %v17966_v41  ;;  %v13364_v53 = vadd.f32 %v13363_v3, %v13362_v15  ;;  %v13472_v55 = vpop.f32.mrb[205].mxu1  ;;  %v6671_v24 = vshrl.u32 %v6526_v8, 16  ;;  %v6674_v11 = vshll.u32 %v6526_v8, 16 }
 0x466   : > { %8382 = vmatprep.mubr.bf16.mxu1 %v6775_v61  ;;  %v13473_v7 = vadd.f32 %v13472_v55, %v13471_v42  ;;  %v13474_v19 = vpop.f32.mrb[206].mxu1  ;;  %v6192_v55 = vld [vmem:[#allocation2 + $0x88] sm:$0xf]  ;;  %v6847_v42 = vrot.slane %v6845_v10, 4  ;;  %v6850_v3 = vrot.slane %v6848_v16, 5  ;;  %v6669_v39 = vsel %vm1854_vm8, %v6659_v35, %v6668_v37 }
 0x467   : > { %v7817_v32 = vadd.f32 %v13364_v53, %v17966_v41  ;;  %v13475_v31 = vpop.f32.mrb[207].mxu1  ;;  %v6862_v53 = vshrl.u32 %v6829_v5, 16  ;;  %v6676_v12 = vrot.slane %v6674_v11, 4  ;;  %v6241_v56 = vrot.slane %v6192_v55, 4 }
 0x468   : > { %v13476_v15 = vadd.f32 %v13475_v31, %v13474_v19  ;;  %v18039_v61 = vadd.f32 %v13473_v7, %v7814_v45  ;;  %v6673_v19 = vrot.slane %v6671_v24, 3  ;;  %v6871_v7 = vshrl.u32 %v6830_v33, 16 }
 0x469   : > { %8222 = vmatmul.mubr.bf16.gmra.mrb[248].mxu0 %v6773_v13  ;;  %v6859_v13 = vor.u32 %v6858_v36, %v6855_v26  ;;  %v6874_v10 = vshll.u32 %v6830_v33, 16  ;;  %v6777_v16 = vsel %vm1256_vm4, %v6774_v34, %v6776_v20  ;;  %v6851_v9 = vor.u32 %v6850_v3, %v6847_v42 }
 0x46a   : > { %8229 = vmatprep.mubr.bf16.mxu0 %v6460_v57  ;;  %v18044_v27 = vadd.f32 %v13476_v15, %v7817_v32  ;;  %v6242_v5 = vsel %vm1256_vm4, %v18006_v44, %v6241_v56  ;;  %v6864_v26 = vrot.slane %v6862_v53, 4  ;;  %v6867_v32 = vrot.slane %v6865_v58, 5 }
 0x46b   : > { %v6860_v35 = vsel %vm1676_vm0, %v6851_v9, %v6859_v13  ;;  %v6677_v24 = vor.u32 %v6676_v12, %v6673_v19  ;;  %v6831_v11 = vsel %vm19881_vm2, %v17855_v51, 0  ;;  %v6873_v57 = vrot.slane %v6871_v7, 4 }
 0x46c   : > { %v13365_v8 = vpop.f32.mrb[144].mxu0  ;;  %v6876_v20 = vrot.slane %v6874_v10, 5  ;;  %v6832_v44 = vsel %vm2415_vm6, %v17868_v43, 0  ;;  %v6868_v53 = vor.u32 %v6867_v32, %v6864_v26  ;;  %v6880_v58 = vshrl.u32 %v6831_v11, 16 }
 0x46d   : > { %v13366_v45 = vpop.f32.mrb[145].mxu0  ;;  %8383 = vmatmul.mubr.bf16.gmra.mrb[88].mxu1 %v6669_v39  ;;  %v6678_v51 = vsel %vm1854_vm8, %v6668_v37, %v6677_v24  ;;  %v6883_v12 = vshll.u32 %v6831_v11, 16  ;;  %v6889_v39 = vshrl.u32 %v6832_v44, 16  ;;  %v6892_v10 = vshll.u32 %v6832_v44, 16 }
 0x46e   : > { %v13367_v31 = vadd.f32 %v13366_v45, %v13365_v8  ;;  %v13368_v23 = vpop.f32.mrb[146].mxu0  ;;  %8390 = vmatprep.mubr.bf16.mxu1 %v6777_v16  ;;  %v6877_v7 = vor.u32 %v6876_v20, %v6873_v57  ;;  %v6833_v32 = vsel %vm19882_vm11, %v17880_v2, 0  ;;  %vm19887_vm2 = vcmp.ne.s16.totalorder %v19828_v14, 0 }
 0x46f   : > { %v13369_v52 = vpop.f32.mrb[147].mxu0  ;;  %v6885_v37 = vrot.slane %v6883_v12, 5  ;;  %vm19888_vm11 = vcmp.ne.s16.totalorder %v19833_v46, 0 }
 0x470   : > { %v13370_v36 = vadd.f32 %v13369_v52, %v13368_v23  ;;  %v7822_v34 = vadd.f32 %v13367_v31, %v17966_v41  ;;  %v13477_v15 = vpop.f32.mrb[208].mxu1  ;;  %v6869_v23 = vsel %vm1676_vm0, %v6859_v13, %v6868_v53  ;;  %v6882_v52 = vrot.slane %v6880_v58, 4 }
 0x471   : > { %8230 = vmatmul.mubr.bf16.gmra.mrb[252].mxu0 %v6242_v5  ;;  %v13478_v55 = vpop.f32.mrb[209].mxu1  ;;  %v6878_v11 = vsel %vm1676_vm0, %v6868_v53, %v6877_v7  ;;  %v6834_v13 = vsel %vm2417_vm14, %v17892_v54, 0 }
 0x472   : > { %14381 = vmatprep.mubr.bf16.mxu0 %v6860_v35  ;;  %v7825_v42 = vadd.f32 %v13370_v36, %v17966_v41  ;;  %v13479_v3 = vadd.f32 %v13478_v55, %v13477_v15  ;;  %v13480_v33 = vpop.f32.mrb[210].mxu1  ;;  %v6891_v36 = vrot.slane %v6889_v39, 4  ;;  %v6898_v55 = vshrl.u32 %v6833_v32, 16 }
 0x473   : > { %v13481_v8 = vpop.f32.mrb[211].mxu1  ;;  %v6907_v58 = vshrl.u32 %v6834_v13, 16 }
 0x474   : > { %v13371_v19 = vpop.f32.mrb[148].mxu0  ;;  %v13482_v45 = vadd.f32 %v13481_v8, %v13480_v33  ;;  %v18060_v16 = vadd.f32 %v13479_v3, %v7822_v34  ;;  %v6894_v34 = vrot.slane %v6892_v10, 5  ;;  %v6901_v33 = vshll.u32 %v6833_v32, 16 }
 0x475   : > { %v13372_v56 = vpop.f32.mrb[149].mxu0  ;;  %8391 = vmatmul.mubr.bf16.gmra.mrb[92].mxu1 %v6678_v51  ;;  %v6835_v10 = vsel %vm19883_vm3, %v17904_v22, 0  ;;  %vm19889_vm3 = vcmp.ne.s16.totalorder %v19840_v1, 0 }
 0x476   : > { %v13373_v43 = vadd.f32 %v13372_v56, %v13371_v19  ;;  %v13374_v31 = vpop.f32.mrb[150].mxu0  ;;  %v18063_v5 = vadd.f32 %v13482_v45, %v7825_v42  ;;  %v6886_v42 = vor.u32 %v6885_v37, %v6882_v52  ;;  %v6895_v53 = vor.u32 %v6894_v34, %v6891_v36 }
 0x477   : > { %v13375_v9 = vpop.f32.mrb[151].mxu0  ;;  %v6910_v19 = vshll.u32 %v6834_v13, 16  ;;  %v6900_v56 = vrot.slane %v6898_v55, 4  ;;  %v6836_v52 = vsel %vm2419_vm15, %v17916_v40, 0  ;;  %v6909_v36 = vrot.slane %v6907_v58, 4 }
 0x478   : > { %v13376_v26 = vadd.f32 %v13375_v9, %v13374_v31  ;;  %v7830_v35 = vadd.f32 %v13373_v43, %v17966_v41  ;;  %v13483_v24 = vpop.f32.mrb[212].mxu1  ;;  %v6887_v31 = vsel %vm1676_vm0, %v6877_v7, %v6886_v42  ;;  %v6903_v9 = vrot.slane %v6901_v33, 5 }
 0x479   : > { %14382 = vmatmul.mubr.bf16.vlgmr.msra.gmra.mrb[0].mxu0 %v6869_v23  ;;  %v13484_v15 = vpop.f32.mrb[213].mxu1  ;;  %v6896_v32 = vsel %vm1676_vm0, %v6886_v42, %v6895_v53  ;;  %v6916_v34 = vshrl.u32 %v6835_v10, 16  ;;  %v6925_v40 = vshrl.u32 %v6836_v52, 16 }
 0x47a   : > { %14385 = vmatprep.mubr.bf16.mxu0 %v6878_v11  ;;  %v7833_v57 = vadd.f32 %v13376_v26, %v17966_v41  ;;  %v13485_v20 = vadd.f32 %v13484_v15, %v13483_v24  ;;  %v13486_v44 = vpop.f32.mrb[214].mxu1  ;;  %v6904_v15 = vor.u32 %v6903_v9, %v6900_v56 }
 0x47b   : > { %v13487_v2 = vpop.f32.mrb[215].mxu1 }
 0x47c   : > { %v13377_v3 = vpop.f32.mrb[152].mxu0  ;;  %v13488_v8 = vadd.f32 %v13487_v2, %v13486_v44  ;;  %v18074_v12 = vadd.f32 %v13485_v20, %v7830_v35  ;;  %v6912_v35 = vrot.slane %v6910_v19, 5  ;;  %v6919_v20 = vshll.u32 %v6835_v10, 16 }
 0x47d   : > { %v13378_v51 = vpop.f32.mrb[153].mxu0  ;;  %v6837_v19 = vsel %vm19884_vm13, %v17928_v47, 0  ;;  %v6927_v10 = vrot.slane %v6925_v40, 4 }
 0x47e   : > { %v13379_v39 = vadd.f32 %v13378_v51, %v13377_v3  ;;  %v13380_v54 = vpop.f32.mrb[154].mxu0  ;;  %v18079_v43 = vadd.f32 %v13488_v8, %v7833_v57  ;;  %v6913_v2 = vor.u32 %v6912_v35, %v6909_v36  ;;  %v6928_v3 = vshll.u32 %v6836_v52, 16 }
 0x47f   : > { %v13381_v45 = vpop.f32.mrb[155].mxu0  ;;  %v6918_v51 = vrot.slane %v6916_v34, 4  ;;  %v6921_v56 = vrot.slane %v6919_v20, 5  ;;  %v6934_v36 = vshrl.u32 %v6837_v19, 16 }
 0x480   : > { %v13382_v23 = vadd.f32 %v13381_v45, %v13380_v54  ;;  %v7838_v26 = vadd.f32 %v13379_v39, %v17966_v41  ;;  %v13489_v37 = vpop.f32.mrb[216].mxu1  ;;  %v6905_v54 = vsel %vm1676_vm0, %v6895_v53, %v6904_v15  ;;  %v6914_v9 = vsel %vm1676_vm0, %v6904_v15, %v6913_v2 }
 0x481   : > { %14386 = vmatmul.mubr.bf16.gmra.mrb[4].mxu0 %v6887_v31  ;;  %v13490_v24 = vpop.f32.mrb[217].mxu1  ;;  %v6930_v52 = vrot.slane %v6928_v3, 5  ;;  %v6839_v3 = vsel %vm19886_vm5, %v17952_v17, 0 }
 0x482   : > { %14389 = vmatprep.mubr.bf16.mxu0 %v6896_v32  ;;  %v7841_v22 = vadd.f32 %v13382_v23, %v17966_v41  ;;  %v13491_v11 = vadd.f32 %v13490_v24, %v13489_v37  ;;  %v13492_v7 = vpop.f32.mrb[218].mxu1  ;;  %v6922_v24 = vor.u32 %v6921_v56, %v6918_v51 }
 0x483   : > { %v13493_v13 = vpop.f32.mrb[219].mxu1  ;;  %v6931_v15 = vor.u32 %v6930_v52, %v6927_v10 }
 0x484   : > { %v13383_v57 = vpop.f32.mrb[156].mxu0  ;;  %v13494_v44 = vadd.f32 %v13493_v13, %v13492_v7  ;;  %v18088_v33 = vadd.f32 %v13491_v11, %v7838_v26  ;;  %v6838_v26 = vsel %vm19885_vm12, %v17940_v6, 0  ;;  %v6937_v11 = vshll.u32 %v6837_v19, 16 }
 0x485   : > { %v13384_v55 = vpop.f32.mrb[157].mxu0  ;;  %v6943_v7 = vshrl.u32 %v6838_v26, 16  ;;  %v6840_v19 = vsel %vm2423_vm7, %v17960_v50, 0  ;;  %v6932_v56 = vsel %vm1676_vm0, %v6922_v24, %v6931_v15 }
 0x486   : > { %v13385_v42 = vadd.f32 %v13384_v55, %v13383_v57  ;;  %v13386_v58 = vpop.f32.mrb[158].mxu0  ;;  %v18093_v39 = vadd.f32 %v13494_v44, %v7841_v22  ;;  %v6946_v57 = vshll.u32 %v6838_v26, 16  ;;  %v6936_v55 = vrot.slane %v6934_v36, 4 }
 0x487   : > { %v13387_v8 = vpop.f32.mrb[159].mxu0  ;;  %v6939_v51 = vrot.slane %v6937_v11, 5  ;;  %v6945_v10 = vrot.slane %v6943_v7, 4  ;;  %v6961_v50 = vshrl.u32 %v6840_v19, 16 }
 0x488   : > { %v13388_v45 = vadd.f32 %v13387_v8, %v13386_v58  ;;  %v7846_v31 = vadd.f32 %v13385_v42, %v17966_v41  ;;  %v13495_v23 = vpop.f32.mrb[220].mxu1  ;;  %v6923_v58 = vsel %vm1676_vm0, %v6913_v2, %v6922_v24  ;;  %v6964_v24 = vshll.u32 %v6840_v19, 16 }
 0x489   : > { %14390 = vmatmul.mubr.bf16.gmra.mrb[8].mxu0 %v6905_v54  ;;  %v13496_v37 = vpop.f32.mrb[221].mxu1  ;;  %v6940_v26 = vor.u32 %v6939_v51, %v6936_v55  ;;  %v6963_v51 = vrot.slane %v6961_v50, 4  ;;  %v6826_v50 = vld [vmem:[#allocation2 + $0x90] sm:$0x1f] }
 0x48a   : > { %14393 = vmatprep.mubr.bf16.mxu0 %v6914_v9  ;;  %v7849_v47 = vadd.f32 %v13388_v45, %v17966_v41  ;;  %v13497_v32 = vadd.f32 %v13496_v37, %v13495_v23  ;;  %v13498_v53 = vpop.f32.mrb[222].mxu1  ;;  %v6966_v19 = vrot.slane %v6964_v24, 5 }
 0x48b   : > { %v13499_v35 = vpop.f32.mrb[223].mxu1 }
 0x48c   : > { %v13389_v22 = vpop.f32.mrb[160].mxu0  ;;  %v13500_v34 = vadd.f32 %v13499_v35, %v13498_v53  ;;  %v18102_v20 = vadd.f32 %v13497_v32, %v7846_v31  ;;  %v6948_v31 = vrot.slane %v6946_v57, 5  ;;  %v6955_v32 = vshll.u32 %v6839_v3, 16 }
 0x48d   : > { %v13390_v13 = vpop.f32.mrb[161].mxu0  ;;  %v6841_v57 = vsel %vm19887_vm2, %v17980_v25, 0 }
 0x48e   : > { %v13391_v40 = vadd.f32 %v13390_v13, %v13389_v22  ;;  %v13392_v6 = vpop.f32.mrb[162].mxu0  ;;  %v18107_v42 = vadd.f32 %v13500_v34, %v7849_v47  ;;  %v6952_v47 = vshrl.u32 %v6839_v3, 16  ;;  %v6949_v22 = vor.u32 %v6948_v31, %v6945_v10 }
 0x48f   : > { %v13393_v44 = vpop.f32.mrb[163].mxu0  ;;  %v6957_v55 = vrot.slane %v6955_v32, 5 }
 0x490   : > { %v13394_v8 = vadd.f32 %v13393_v44, %v13392_v6  ;;  %v13501_v54 = vpop.f32.mrb[224].mxu1  ;;  %v7854_v45 = vadd.f32 %v13391_v40, %v17966_v41  ;;  %v6941_v40 = vsel %vm1676_vm0, %v6931_v15, %v6940_v26  ;;  %v6954_v44 = vrot.slane %v6952_v47, 4 }
 0x491   : > { %14394 = vmatmul.mubr.bf16.gmra.mrb[12].mxu0 %v6923_v58  ;;  %v13502_v23 = vpop.f32.mrb[225].mxu1 }
 0x492   : > { %14397 = vmatprep.mubr.bf16.mxu0 %v6932_v56  ;;  %v13503_v17 = vadd.f32 %v13502_v23, %v13501_v54  ;;  %v13504_v9 = vpop.f32.mrb[226].mxu1  ;;  %v7857_v2 = vadd.f32 %v13394_v8, %v17966_v41  ;;  %v6950_v8 = vsel %vm1676_vm0, %v6940_v26, %v6949_v22  ;;  %v6958_v31 = vor.u32 %v6957_v55, %v6954_v44 }
 0x493   : > { %v13505_v52 = vpop.f32.mrb[227].mxu1  ;;  %v6970_v23 = vshrl.u32 %v6841_v57, 16  ;;  %v6843_v55 = vsel %vm19889_vm3, %v6826_v50, 0 }
 0x494   : > { %v13395_v37 = vpop.f32.mrb[164].mxu0  ;;  %v18116_v53 = vadd.f32 %v13503_v17, %v7854_v45  ;;  %v13506_v36 = vadd.f32 %v13505_v52, %v13504_v9  ;;  %v6973_v17 = vshll.u32 %v6841_v57, 16  ;;  %v6842_v9 = vsel %vm19888_vm11, %v18009_v29, 0 }
 0x495   : > { %v13396_v35 = vpop.f32.mrb[165].mxu0  ;;  %v6979_v24 = vshrl.u32 %v6842_v9, 16  ;;  %v6972_v57 = vrot.slane %v6970_v23, 4 }
 0x496   : > { %v13397_v11 = vadd.f32 %v13396_v35, %v13395_v37  ;;  %v13398_v7 = vpop.f32.mrb[166].mxu0  ;;  %v18118_v34 = vadd.f32 %v13506_v36, %v7857_v2  ;;  %v6967_v37 = vor.u32 %v6966_v19, %v6963_v51 }
 0x497   : > { %v13399_v13 = vpop.f32.mrb[167].mxu0  ;;  %v6981_v19 = vrot.slane %v6979_v24, 4 }
 0x498   : > { %v13400_v6 = vadd.f32 %v13399_v13, %v13398_v7  ;;  %v13507_v3 = vpop.f32.mrb[228].mxu1  ;;  %v7862_v58 = vadd.f32 %v13397_v11, %v17966_v41  ;;  %v6982_v11 = vshll.u32 %v6842_v9, 16  ;;  %v6959_v7 = vsel %vm1676_vm0, %v6949_v22, %v6958_v31  ;;  %v14818_v9 = vld [vmem:[#allocation11] sm:$0xff]  }
 0x499   : > { %14398 = vmatmul.mubr.bf16.gmra.mrb[16].mxu0 %v6941_v40  ;;  %v13508_v54 = vpop.f32.mrb[229].mxu1  ;;  %v6975_v40 = vrot.slane %v6973_v17, 5  ;;  %v6968_v44 = vsel %vm1676_vm0, %v6958_v31, %v6967_v37  ;;  %v14817_v17 = vld [vmem:[#allocation11 + $0x40] sm:$0xff]  }
 0x49a   : > { %14401 = vmatprep.mubr.bf16.mxu0 %v6950_v8  ;;  %v13509_v45 = vadd.f32 %v13508_v54, %v13507_v3  ;;  %v13510_v56 = vpop.f32.mrb[230].mxu1  ;;  %v7865_v10 = vadd.f32 %v13400_v6, %v17966_v41  ;;  %v6984_v22 = vrot.slane %v6982_v11, 5  ;;  %13797 = vmatprep.subr.bf16.mxu1 %v14817_v17 }
 0x49b   : > { %v13511_v25 = vpop.f32.mrb[231].mxu1  ;;  %13798 = vmatpush3.bf16.msra.mxu1 %v14818_v9 }
 0x49c   : > { %v13401_v15 = vpop.f32.mrb[168].mxu0  ;;  %v18130_v2 = vadd.f32 %v13509_v45, %v7862_v58  ;;  %v13512_v52 = vadd.f32 %v13511_v25, %v13510_v56  ;;  %v6976_v45 = vor.u32 %v6975_v40, %v6972_v57  ;;  %v6991_v25 = vshll.u32 %v6843_v55, 16 }
 0x49d   : > { %v13402_v26 = vpop.f32.mrb[169].mxu0  ;;  %v6985_v50 = vor.u32 %v6984_v22, %v6981_v19  ;;  %v14819_v22 = vld [vmem:[#allocation11 + $0xc0] sm:$0xff]  }
 0x49e   : > { %v13403_v47 = vadd.f32 %v13402_v26, %v13401_v15  ;;  %v13404_v32 = vpop.f32.mrb[170].mxu0  ;;  %v18132_v36 = vadd.f32 %v13512_v52, %v7865_v10  ;;  %v6988_v10 = vshrl.u32 %v6843_v55, 16  ;;  %13909 = vmatprep.subr.bf16.mxu0 %v14819_v22 }
 0x49f   : > { %v13405_v35 = vpop.f32.mrb[171].mxu0  ;;  %v6986_v40 = vsel %vm1676_vm0, %v6976_v45, %v6985_v50 }
 0x4a0   : > { %v13406_v13 = vadd.f32 %v13405_v35, %v13404_v32  ;;  %v13513_v6 = vpop.f32.mrb[232].mxu1  ;;  %v7870_v29 = vadd.f32 %v13403_v47, %v17966_v41  ;;  %v6977_v35 = vsel %vm1676_vm0, %v6967_v37, %v6976_v45  ;;  %v6990_v11 = vrot.slane %v6988_v10, 4 }
 0x4a1   : > { %14402 = vmatmul.mubr.bf16.gmra.mrb[20].mxu0 %v6959_v7  ;;  %v13514_v3 = vpop.f32.mrb[233].mxu1  ;;  %v6993_v7 = vrot.slane %v6991_v25, 5 }
 0x4a2   : > { %14405 = vmatprep.mubr.bf16.mxu0 %v6968_v44  ;;  %v13515_v58 = vadd.f32 %v13514_v3, %v13513_v6  ;;  %v13516_v8 = vpop.f32.mrb[234].mxu1  ;;  %v7873_v51 = vadd.f32 %v13406_v13, %v17966_v41 }
 0x4a3   : > { %v13517_v54 = vpop.f32.mrb[235].mxu1 }
 0x4a4   : > { %v13407_v56 = vpop.f32.mrb[172].mxu0  ;;  %v18140_v15 = vadd.f32 %v13515_v58, %v7870_v29  ;;  %v13518_v23 = vadd.f32 %v13517_v54, %v13516_v8  ;;  %v6994_v58 = vor.u32 %v6993_v7, %v6990_v11  ;;  %v14820_v54 = vld [vmem:[#allocation11 + $0x80] sm:$0xff]  }
 0x4a5   : > { %v13408_v31 = vpop.f32.mrb[173].mxu0  ;;  %13910 = vmatpush3.bf16.msra.mxu0 %v14820_v54 }
 0x4a6   : > { %v13409_v52 = vadd.f32 %v13408_v31, %v13407_v56  ;;  %v13410_v26 = vpop.f32.mrb[174].mxu0  ;;  %v18142_v47 = vadd.f32 %v13518_v23, %v7873_v51  ;;  %v6995_v23 = vsel %vm1676_vm0, %v6985_v50, %v6994_v58  ;;  %v14823_v50 = vld [vmem:[#allocation11 + $0x8] sm:$0xff]  }
 0x4a7   : > { %v13411_v32 = vpop.f32.mrb[175].mxu0 }
 0x4a8   : > { %v13412_v24 = vadd.f32 %v13411_v32, %v13410_v26  ;;  %v13519_v13 = vpop.f32.mrb[236].mxu1  ;;  %v7878_v57 = vadd.f32 %v13409_v52, %v17966_v41 }
 0x4a9   : > { %14406 = vmatmul.mubr.bf16.gmra.mrb[24].mxu0 %v6977_v35  ;;  %v13520_v6 = vpop.f32.mrb[237].mxu1 }
 0x4aa   : > { %14409 = vmatprep.mubr.bf16.mxu0 %v6986_v40  ;;  %v13521_v29 = vadd.f32 %v13520_v6, %v13519_v13  ;;  %v13522_v44 = vpop.f32.mrb[238].mxu1  ;;  %v7881_v55 = vadd.f32 %v13412_v24, %v17966_v41  ;;  %v14821_v40 = vld [vmem:[#allocation11 + $0x48] sm:$0xff]  }
 0x4ab   : > { %v13523_v3 = vpop.f32.mrb[239].mxu1  ;;  %v14822_v6 = vld [vmem:[#allocation11 + $0xc8] sm:$0xff]   ;;  %13799 = vmatprep.subr.bf16.mxu1 %v14821_v40 }
 0x4ac   : > { %v13413_v8 = vpop.f32.mrb[176].mxu0  ;;  %v18148_v37 = vadd.f32 %v13521_v29, %v7878_v57  ;;  %v13524_v51 = vadd.f32 %v13523_v3, %v13522_v44  ;;  %13911 = vmatprep.subr.bf16.mxu0 %v14822_v6  ;;  %13800 = vmatpush3.bf16.msra.mxu1 %v14823_v50 }
 0x4ad   : > { %v13414_v19 = vpop.f32.mrb[177].mxu0 }
 0x4ae   : > { %v13415_v56 = vadd.f32 %v13414_v19, %v13413_v8  ;;  %v13416_v10 = vpop.f32.mrb[178].mxu0  ;;  %v18150_v25 = vadd.f32 %v13524_v51, %v7881_v55  ;;  %v14824_v55 = vld [vmem:[#allocation11 + $0x88] sm:$0xff]  }
 0x4af   : > { %v13417_v45 = vpop.f32.mrb[179].mxu0  ;;  %13912 = vmatpush3.bf16.msra.mxu0 %v14824_v55 }
 0x4b0   : > { %v13418_v31 = vadd.f32 %v13417_v45, %v13416_v10  ;;  %v13525_v17 = vpop.f32.mrb[240].mxu1  ;;  %v7886_v9 = vadd.f32 %v13415_v56, %v17966_v41 }
 0x4b1   : > { %14410 = vmatmul.mubr.bf16.gmra.mrb[28].mxu0 %v6995_v23  ;;  %v13526_v52 = vpop.f32.mrb[241].mxu1 }
 0x4b2   : > { %v13527_v26 = vadd.f32 %v13526_v52, %v13525_v17  ;;  %v13528_v32 = vpop.f32.mrb[242].mxu1  ;;  %v7889_v35 = vadd.f32 %v13418_v31, %v17966_v41  ;;  %v14825_v52 = vld [vmem:[#allocation11 + $0xd0] sm:$0xff]  }
 0x4b3   : > { %v13529_v24 = vpop.f32.mrb[243].mxu1  ;;  %13913 = vmatprep.subr.bf16.mxu0 %v14825_v52 }
 0x4b4   : > { %v13419_v11 = vpop.f32.mrb[180].mxu0  ;;  %v18155_v7 = vadd.f32 %v13527_v26, %v7886_v9  ;;  %v13530_v13 = vadd.f32 %v13529_v24, %v13528_v32  ;;  %v14826_v26 = vld [vmem:[#allocation11 + $0x90] sm:$0xff]  }
 0x4b5   : > { %v13420_v57 = vpop.f32.mrb[181].mxu0  ;;  %13914 = vmatpush3.bf16.msra.mxu0 %v14826_v26 }
 0x4b6   : > { %v13421_v29 = vadd.f32 %v13420_v57, %v13419_v11  ;;  %v13422_v44 = vpop.f32.mrb[182].mxu0  ;;  %v18157_v3 = vadd.f32 %v13530_v13, %v7889_v35 }
 0x4b7   : > { %v13423_v58 = vpop.f32.mrb[183].mxu0 }
 0x4b8   : > { %v13424_v8 = vadd.f32 %v13423_v58, %v13422_v44  ;;  %v13531_v51 = vpop.f32.mrb[244].mxu1  ;;  %v7894_v19 = vadd.f32 %v13421_v29, %v17966_v41 }
 0x4b9   : > { %v13532_v22 = vpop.f32.mrb[245].mxu1 }
 0x4ba   : > { %v13533_v54 = vadd.f32 %v13532_v22, %v13531_v51  ;;  %v13534_v56 = vpop.f32.mrb[246].mxu1  ;;  %v7897_v10 = vadd.f32 %v13424_v8, %v17966_v41  ;;  %v14827_v22 = vld [vmem:[#allocation11 + $0x50] sm:$0xff]  }
 0x4bb   : > { %v13535_v45 = vpop.f32.mrb[247].mxu1  ;;  %13801 = vmatprep.subr.bf16.mxu1 %v14827_v22 }
 0x4bc   : > { %v13425_v23 = vpop.f32.mrb[184].mxu0  ;;  %v18161_v31 = vadd.f32 %v13533_v54, %v7894_v19  ;;  %v13536_v17 = vadd.f32 %v13535_v45, %v13534_v56  ;;  %v14828_v54 = vld [vmem:[#allocation11 + $0xd8] sm:$0xff]   ;;  %v14829_v56 = vld [vmem:[#allocation11 + $0x10] sm:$0xff]  }
 0x4bd   : > { %v13426_v9 = vpop.f32.mrb[185].mxu0  ;;  %13915 = vmatprep.subr.bf16.mxu0 %v14828_v54  ;;  %13802 = vmatpush3.bf16.msra.mxu1 %v14829_v56 }
 0x4be   : > { %v13427_v32 = vadd.f32 %v13426_v9, %v13425_v23  ;;  %v13428_v35 = vpop.f32.mrb[186].mxu0  ;;  %v18163_v24 = vadd.f32 %v13536_v17, %v7897_v10  ;;  %v14830_v23 = vld [vmem:[#allocation11 + $0x98] sm:$0xff]  }
 0x4bf   : > { %v13429_v11 = vpop.f32.mrb[187].mxu0  ;;  %13916 = vmatpush3.bf16.msra.mxu0 %v14830_v23  ;;  %v19890_v23 = vld [vmem:[#allocation87_spill] sm:$0xff] }
 0x4c0   : > { %v13430_v13 = vadd.f32 %v13429_v11, %v13428_v35  ;;  %v13537_v57 = vpop.f32.mrb[248].mxu1  ;;  %v7902_v40 = vadd.f32 %v13427_v32, %v17966_v41 }
 0x4c1   : > { %v13538_v6 = vpop.f32.mrb[249].mxu1 }
 0x4c2   : > { %v13539_v50 = vadd.f32 %v13538_v6, %v13537_v57  ;;  %v13540_v29 = vpop.f32.mrb[250].mxu1  ;;  %v7905_v44 = vadd.f32 %v13430_v13, %v17966_v41 }
 0x4c3   : > { %v13541_v55 = vpop.f32.mrb[251].mxu1 }
 0x4c4   : > { %v13431_v58 = vpop.f32.mrb[188].mxu0  ;;  %v18167_v8 = vadd.f32 %v13539_v50, %v7902_v40  ;;  %v13542_v51 = vadd.f32 %v13541_v55, %v13540_v29  ;;  %v14831_v55 = vld [vmem:[#allocation11 + $0xe0] sm:$0xff]  }
 0x4c5   : > { %v13432_v19 = vpop.f32.mrb[189].mxu0  ;;  %13917 = vmatprep.subr.bf16.mxu0 %v14831_v55 }
 0x4c6   : > { %v13433_v10 = vadd.f32 %v13432_v19, %v13431_v58  ;;  %v13434_v45 = vpop.f32.mrb[190].mxu0  ;;  %v18169_v17 = vadd.f32 %v13542_v51, %v7905_v44 }
 0x4c7   : > { %v13435_v9 = vpop.f32.mrb[191].mxu0 }
 0x4c8   : > { %v13436_v52 = vadd.f32 %v13435_v9, %v13434_v45  ;;  %v13543_v26 = vpop.f32.mrb[252].mxu1  ;;  %v7910_v32 = vadd.f32 %v13433_v10, %v17966_v41  ;;  %v14832_v45 = vld [vmem:[#allocation11 + $0xa0] sm:$0xff]  }
 0x4c9   : > { %v13544_v35 = vpop.f32.mrb[253].mxu1  ;;  %13918 = vmatpush3.bf16.msra.mxu0 %v14832_v45  ;;  %v14834_v45 = vld [vmem:[#allocation11 + $0xe8] sm:$0xff]  }
 0x4ca   : > { %v13545_v11 = vadd.f32 %v13544_v35, %v13543_v26  ;;  %v13546_v13 = vpop.f32.mrb[254].mxu1  ;;  %v7913_v57 = vadd.f32 %v13436_v52, %v17966_v41  ;;  %13919 = vmatprep.subr.bf16.mxu0 %v14834_v45  ;;  %v14838_v45 = vld [vmem:[#allocation11 + $0x20] sm:$0xff]  }
 0x4cb   : > { %v13547_v40 = vpop.f32.mrb[255].mxu1 }
 0x4cc   : > { %v13565_v6 = vpop.f32.mrb[192].mxu0  ;;  %v18173_v50 = vadd.f32 %v13545_v11, %v7910_v32  ;;  %v13548_v29 = vadd.f32 %v13547_v40, %v13546_v13 }
 0x4cd   : > { %v13566_v44 = vpop.f32.mrb[193].mxu0 }
 0x4ce   : > { %v13567_v58 = vadd.f32 %v13566_v44, %v13565_v6  ;;  %v13568_v51 = vpop.f32.mrb[194].mxu0  ;;  %v18175_v19 = vadd.f32 %v13548_v29, %v7913_v57 }
 0x4cf   : > { %v13569_v22 = vpop.f32.mrb[195].mxu0 }
 0x4d0   : > { %v8112_v54 = vadd.f32 %v13567_v58, %v17982_v63  ;;  %v13570_v56 = vadd.f32 %v13569_v22, %v13568_v51  ;;  %v13677_v10 = vpop.f32.mrb[32].mxu1  ;;  %v19891_v63 = vld [vmem:[#allocation88_spill] sm:$0xff]  ;;  %v19892_v22 = vld [vmem:[#allocation89_spill] sm:$0xff] }
 0x4d1   : > { %v13678_v9 = vpop.f32.mrb[33].mxu1 }
 0x4d2   : > { %v8115_v41 = vadd.f32 %v13570_v56, %v19890_v23  ;;  %v13679_v52 = vadd.f32 %v13678_v9, %v13677_v10  ;;  %v13680_v26 = vpop.f32.mrb[34].mxu1  ;;  %v14833_v23 = vld [vmem:[#allocation11 + $0x58] sm:$0xff]  }
 0x4d3   : > { %v13681_v32 = vpop.f32.mrb[35].mxu1  ;;  %v14835_v9 = vld [vmem:[#allocation11 + $0x18] sm:$0xff]   ;;  %13803 = vmatprep.subr.bf16.mxu1 %v14833_v23  ;;  %v14837_v23 = vld [vmem:[#allocation11 + $0x60] sm:$0xff]  }
 0x4d4   : > { %v13571_v35 = vpop.f32.mrb[196].mxu0  ;;  %v13682_v11 = vadd.f32 %v13681_v32, %v13680_v26  ;;  %v18179_v40 = vadd.f32 %v13679_v52, %v8112_v54  ;;  %v14836_v32 = vld [vmem:[#allocation11 + $0xa8] sm:$0xff]   ;;  %13804 = vmatpush3.bf16.msra.mxu1 %v14835_v9 }
 0x4d5   : > { %v13572_v13 = vpop.f32.mrb[197].mxu0  ;;  %13920 = vmatpush3.bf16.msra.mxu0 %v14836_v32  ;;  %v14841_v9 = vld [vmem:[#allocation11 + $0x68] sm:$0xff]   ;;  %13805 = vmatprep.subr.bf16.mxu1 %v14837_v23 }
 0x4d6   : > { %v13573_v57 = vadd.f32 %v13572_v13, %v13571_v35  ;;  %v13574_v6 = vpop.f32.mrb[198].mxu0  ;;  %v18181_v44 = vadd.f32 %v13682_v11, %v8115_v41 }
 0x4d7   : > { %v13575_v29 = vpop.f32.mrb[199].mxu0 }
 0x4d8   : > { %v8120_v55 = vadd.f32 %v13573_v57, %v19891_v63  ;;  %v13576_v58 = vadd.f32 %v13575_v29, %v13574_v6  ;;  %v13683_v51 = vpop.f32.mrb[36].mxu1  ;;  %v19893_v63 = vld [vmem:[#allocation90_spill] sm:$0xff]  ;;  %13806 = vmatpush3.bf16.msra.mxu1 %v14838_v45 }
 0x4d9   : > { %v13684_v10 = vpop.f32.mrb[37].mxu1  ;;  %13807 = vmatprep.subr.bf16.mxu1 %v14841_v9 }
 0x4da   : > { %v8123_v56 = vadd.f32 %v13576_v58, %v19892_v22  ;;  %v13685_v1 = vadd.f32 %v13684_v10, %v13683_v51  ;;  %v13686_v26 = vpop.f32.mrb[38].mxu1  ;;  %v19894_v10 = vld [vmem:[#allocation91_spill] sm:$0xff] }
 0x4db   : > { %v13687_v54 = vpop.f32.mrb[39].mxu1 }
 0x4dc   : > { %v13577_v52 = vpop.f32.mrb[200].mxu0  ;;  %v13688_v35 = vadd.f32 %v13687_v54, %v13686_v26  ;;  %v18185_v11 = vadd.f32 %v13685_v1, %v8120_v55  ;;  %v14839_v26 = vld [vmem:[#allocation11 + $0xf0] sm:$0xff]  }
 0x4dd   : > { %v13578_v41 = vpop.f32.mrb[201].mxu0  ;;  %v14840_v55 = vld [vmem:[#allocation11 + $0xb0] sm:$0xff]   ;;  %13921 = vmatprep.subr.bf16.mxu0 %v14839_v26 }
 0x4de   : > { %v13579_v13 = vadd.f32 %v13578_v41, %v13577_v52  ;;  %v13580_v57 = vpop.f32.mrb[202].mxu0  ;;  %v18187_v29 = vadd.f32 %v13688_v35, %v8123_v56  ;;  %13922 = vmatpush3.bf16.msra.mxu0 %v14840_v55 }
 0x4df   : > { %v13581_v6 = vpop.f32.mrb[203].mxu0 }
 0x4e0   : > { %v8128_v58 = vadd.f32 %v13579_v13, %v19893_v63  ;;  %v13582_v51 = vadd.f32 %v13581_v6, %v13580_v57  ;;  %v13689_v22 = vpop.f32.mrb[40].mxu1 }
 0x4e1   : > { %v13690_v14 = vpop.f32.mrb[41].mxu1 }
 0x4e2   : > { %v8131_v46 = vadd.f32 %v13582_v51, %v19894_v10  ;;  %v13691_v54 = vadd.f32 %v13690_v14, %v13689_v22  ;;  %v13692_v1 = vpop.f32.mrb[42].mxu1  ;;  %v14842_v14 = vld [vmem:[#allocation11 + $0x28] sm:$0xff]  }
 0x4e3   : > { %v13693_v32 = vpop.f32.mrb[43].mxu1  ;;  %13808 = vmatpush3.bf16.msra.mxu1 %v14842_v14  ;;  %v14848_v14 = vld [vmem:[#allocation11 + $0x38] sm:$0xff]  }
 0x4e4   : > { %v13583_v52 = vpop.f32.mrb[204].mxu0  ;;  %v13694_v56 = vadd.f32 %v13693_v32, %v13692_v1  ;;  %v18191_v41 = vadd.f32 %v13691_v54, %v8128_v58  ;;  %v14843_v1 = vld [vmem:[#allocation11 + $0x70] sm:$0xff]   ;;  %v14845_v54 = vld [vmem:[#allocation11 + $0xf8] sm:$0xff]  }
 0x4e5   : > { %v13584_v35 = vpop.f32.mrb[205].mxu0  ;;  %v14844_v58 = vld [vmem:[#allocation11 + $0x30] sm:$0xff]   ;;  %v14846_v32 = vld [vmem:[#allocation11 + $0xb8] sm:$0xff]   ;;  %13809 = vmatprep.subr.bf16.mxu1 %v14843_v1  ;;  %13923 = vmatprep.subr.bf16.mxu0 %v14845_v54 }
 0x4e6   : > { %v13585_v13 = vadd.f32 %v13584_v35, %v13583_v52  ;;  %v13586_v57 = vpop.f32.mrb[206].mxu0  ;;  %v18193_v63 = vadd.f32 %v13694_v56, %v8131_v46  ;;  %v14847_v52 = vld [vmem:[#allocation11 + $0x78] sm:$0xff]   ;;  %13924 = vmatpush3.bf16.msra.mxu0 %v14846_v32 }
 0x4e7   : > { %v13587_v6 = vpop.f32.mrb[207].mxu0  ;;  %13810 = vmatpush3.bf16.msra.mxu1 %v14844_v58 }
 0x4e8   : > { %v8136_v51 = vadd.f32 %v13585_v13, %v18039_v61  ;;  %v13588_v22 = vadd.f32 %v13587_v6, %v13586_v57  ;;  %v13695_v10 = vpop.f32.mrb[44].mxu1  ;;  %13811 = vmatprep.subr.bf16.mxu1 %v14847_v52 }
 0x4e9   : > { %v13696_v26 = vpop.f32.mrb[45].mxu1 }
 0x4ea   : > { %v8139_v23 = vadd.f32 %v13588_v22, %v18044_v27  ;;  %v13697_v45 = vadd.f32 %v13696_v26, %v13695_v10  ;;  %v13698_v55 = vpop.f32.mrb[46].mxu1 }
 0x4eb   : > { %v13699_v9 = vpop.f32.mrb[47].mxu1  ;;  %13812 = vmatpush3.bf16.msra.mxu1 %v14848_v14 }
 0x4ec   : > { %v13589_v35 = vpop.f32.mrb[208].mxu0  ;;  %v13700_v46 = vadd.f32 %v13699_v9, %v13698_v55  ;;  %v18197_v61 = vadd.f32 %v13697_v45, %v8136_v51  ;;  %v14849_v45 = vld [vmem:[#allocation11 + $0x1c0] sm:$0xff]  }
 0x4ed   : > { %v13590_v56 = vpop.f32.mrb[209].mxu0  ;;  %14133 = vmatprep.subr.bf16.mxu0 %v14849_v45 }
 0x4ee   : > { %v13591_v13 = vadd.f32 %v13590_v56, %v13589_v35  ;;  %v13592_v27 = vpop.f32.mrb[210].mxu0  ;;  %v18199_v6 = vadd.f32 %v13700_v46, %v8139_v23 }
 0x4ef   : > { %v13593_v57 = vpop.f32.mrb[211].mxu0 }
 0x4f0   : > { %v8144_v22 = vadd.f32 %v13591_v13, %v18060_v16  ;;  %v13594_v10 = vadd.f32 %v13593_v57, %v13592_v27  ;;  %v13701_v26 = vpop.f32.mrb[48].mxu1 }
 0x4f1   : > { %v13702_v54 = vpop.f32.mrb[49].mxu1 }
 0x4f2   : > { %v8147_v1 = vadd.f32 %v13594_v10, %v18063_v5  ;;  %v13703_v55 = vadd.f32 %v13702_v54, %v13701_v26  ;;  %v13704_v51 = vpop.f32.mrb[50].mxu1 }
 0x4f3   : > { %v13705_v58 = vpop.f32.mrb[51].mxu1 }
 0x4f4   : > { %v13595_v32 = vpop.f32.mrb[212].mxu0  ;;  %v13706_v9 = vadd.f32 %v13705_v58, %v13704_v51  ;;  %v18203_v52 = vadd.f32 %v13703_v55, %v8144_v22 }
 0x4f5   : > { %v13596_v35 = vpop.f32.mrb[213].mxu0 }
 0x4f6   : > { %v13597_v23 = vadd.f32 %v13596_v35, %v13595_v32  ;;  %v13598_v46 = vpop.f32.mrb[214].mxu0  ;;  %v18205_v16 = vadd.f32 %v13706_v9, %v8147_v1 }
 0x4f7   : > { %v13599_v56 = vpop.f32.mrb[215].mxu0 }
 0x4f8   : > { %v8152_v13 = vadd.f32 %v13597_v23, %v18074_v12  ;;  %v13600_v27 = vadd.f32 %v13599_v56, %v13598_v46  ;;  %v13707_v5 = vpop.f32.mrb[52].mxu1 }
 0x4f9   : > { %v13708_v14 = vpop.f32.mrb[53].mxu1 }
 0x4fa   : > { %v8155_v57 = vadd.f32 %v13600_v27, %v18079_v43  ;;  %v13709_v10 = vadd.f32 %v13708_v14, %v13707_v5  ;;  %v13710_v26 = vpop.f32.mrb[54].mxu1 }
 0x4fb   : > { %v13711_v54 = vpop.f32.mrb[55].mxu1 }
 0x4fc   : > { %v13601_v51 = vpop.f32.mrb[216].mxu0  ;;  %v13712_v58 = vadd.f32 %v13711_v54, %v13710_v26  ;;  %v18209_v55 = vadd.f32 %v13709_v10, %v8152_v13 }
 0x4fd   : > { %v13602_v22 = vpop.f32.mrb[217].mxu0 }
 0x4fe   : > { %v13603_v45 = vadd.f32 %v13602_v22, %v13601_v51  ;;  %v13604_v32 = vpop.f32.mrb[218].mxu0  ;;  %v18211_v1 = vadd.f32 %v13712_v58, %v8155_v57 }
 0x4ff   : > { %v13605_v35 = vpop.f32.mrb[219].mxu0 }
 0x500   : > { %v8160_v12 = vadd.f32 %v13603_v45, %v18088_v33  ;;  %v13606_v9 = vadd.f32 %v13605_v35, %v13604_v32  ;;  %v13713_v23 = vpop.f32.mrb[56].mxu1 }
 0x501   : > { %v13714_v46 = vpop.f32.mrb[57].mxu1 }
 0x502   : > { %v8163_v43 = vadd.f32 %v13606_v9, %v18093_v39  ;;  %v13715_v56 = vadd.f32 %v13714_v46, %v13713_v23  ;;  %v13716_v27 = vpop.f32.mrb[58].mxu1 }
 0x503   : > { %v13717_v5 = vpop.f32.mrb[59].mxu1 }
 0x504   : > { %v13607_v14 = vpop.f32.mrb[220].mxu0  ;;  %v13718_v26 = vadd.f32 %v13717_v5, %v13716_v27  ;;  %v18215_v13 = vadd.f32 %v13715_v56, %v8160_v12 }
 0x505   : > { %v13608_v54 = vpop.f32.mrb[221].mxu0 }
 0x506   : > { %v13609_v10 = vadd.f32 %v13608_v54, %v13607_v14  ;;  %v13610_v51 = vpop.f32.mrb[222].mxu0  ;;  %v18217_v57 = vadd.f32 %v13718_v26, %v8163_v43 }
 0x507   : > { %v13611_v22 = vpop.f32.mrb[223].mxu0 }
 0x508   : > { %v8168_v33 = vadd.f32 %v13609_v10, %v18102_v20  ;;  %v13612_v58 = vadd.f32 %v13611_v22, %v13610_v51  ;;  %v13719_v45 = vpop.f32.mrb[60].mxu1 }
 0x509   : > { %v13720_v32 = vpop.f32.mrb[61].mxu1 }
 0x50a   : > { %v8171_v39 = vadd.f32 %v13612_v58, %v18107_v42  ;;  %v13721_v35 = vadd.f32 %v13720_v32, %v13719_v45  ;;  %v13722_v9 = vpop.f32.mrb[62].mxu1 }
 0x50b   : > { %v13723_v23 = vpop.f32.mrb[63].mxu1 }
 0x50c   : > { %v13613_v46 = vpop.f32.mrb[224].mxu0  ;;  %v13724_v27 = vadd.f32 %v13723_v23, %v13722_v9  ;;  %v18221_v12 = vadd.f32 %v13721_v35, %v8168_v33 }
 0x50d   : > { %v13614_v5 = vpop.f32.mrb[225].mxu0 }
 0x50e   : > { %v13615_v56 = vadd.f32 %v13614_v5, %v13613_v46  ;;  %v13616_v14 = vpop.f32.mrb[226].mxu0  ;;  %v18223_v43 = vadd.f32 %v13724_v27, %v8171_v39 }
 0x50f   : > { %v13617_v54 = vpop.f32.mrb[227].mxu0 }
 0x510   : > { %v8176_v20 = vadd.f32 %v13615_v56, %v18116_v53  ;;  %v13618_v26 = vadd.f32 %v13617_v54, %v13616_v14  ;;  %v13725_v10 = vpop.f32.mrb[64].mxu1 }
 0x511   : > { %v13726_v51 = vpop.f32.mrb[65].mxu1 }
 0x512   : > { %v8179_v42 = vadd.f32 %v13618_v26, %v18118_v34  ;;  %v13727_v22 = vadd.f32 %v13726_v51, %v13725_v10  ;;  %v13728_v58 = vpop.f32.mrb[66].mxu1 }
 0x513   : > { %v13729_v45 = vpop.f32.mrb[67].mxu1 }
 0x514   : > { %v13619_v32 = vpop.f32.mrb[228].mxu0  ;;  %v13730_v9 = vadd.f32 %v13729_v45, %v13728_v58  ;;  %v18227_v33 = vadd.f32 %v13727_v22, %v8176_v20 }
 0x515   : > { %v13620_v23 = vpop.f32.mrb[229].mxu0 }
 0x516   : > { %v13621_v35 = vadd.f32 %v13620_v23, %v13619_v32  ;;  %v13622_v46 = vpop.f32.mrb[230].mxu0  ;;  %v18229_v39 = vadd.f32 %v13730_v9, %v8179_v42 }
 0x517   : > { %v13623_v5 = vpop.f32.mrb[231].mxu0 }
 0x518   : > { %v8184_v53 = vadd.f32 %v13621_v35, %v18130_v2  ;;  %v13624_v27 = vadd.f32 %v13623_v5, %v13622_v46  ;;  %v13731_v56 = vpop.f32.mrb[68].mxu1 }
 0x519   : > { %v13732_v14 = vpop.f32.mrb[69].mxu1 }
 0x51a   : > { %v8187_v34 = vadd.f32 %v13624_v27, %v18132_v36  ;;  %v13733_v54 = vadd.f32 %v13732_v14, %v13731_v56  ;;  %v13734_v26 = vpop.f32.mrb[70].mxu1 }
 0x51b   : > { %v13735_v10 = vpop.f32.mrb[71].mxu1 }
 0x51c   : > { %v13625_v51 = vpop.f32.mrb[232].mxu0  ;;  %v13736_v58 = vadd.f32 %v13735_v10, %v13734_v26  ;;  %v18233_v20 = vadd.f32 %v13733_v54, %v8184_v53 }
 0x51d   : > { %v13626_v45 = vpop.f32.mrb[233].mxu0 }
 0x51e   : > { %v13627_v22 = vadd.f32 %v13626_v45, %v13625_v51  ;;  %v13628_v32 = vpop.f32.mrb[234].mxu0  ;;  %v18235_v42 = vadd.f32 %v13736_v58, %v8187_v34 }
 0x51f   : > { %v13629_v23 = vpop.f32.mrb[235].mxu0 }
 0x520   : > { %v8192_v2 = vadd.f32 %v13627_v22, %v18140_v15  ;;  %v13630_v9 = vadd.f32 %v13629_v23, %v13628_v32  ;;  %v13737_v35 = vpop.f32.mrb[72].mxu1 }
 0x521   : > { %v13738_v46 = vpop.f32.mrb[73].mxu1 }
 0x522   : > { %v8195_v36 = vadd.f32 %v13630_v9, %v18142_v47  ;;  %v13739_v5 = vadd.f32 %v13738_v46, %v13737_v35  ;;  %v13740_v27 = vpop.f32.mrb[74].mxu1 }
 0x523   : > { %v13741_v56 = vpop.f32.mrb[75].mxu1 }
 0x524   : > { %v13631_v14 = vpop.f32.mrb[236].mxu0  ;;  %v13742_v26 = vadd.f32 %v13741_v56, %v13740_v27  ;;  %v18239_v53 = vadd.f32 %v13739_v5, %v8192_v2 }
 0x525   : > { %v13632_v10 = vpop.f32.mrb[237].mxu0 }
 0x526   : > { %v13633_v54 = vadd.f32 %v13632_v10, %v13631_v14  ;;  %v13634_v51 = vpop.f32.mrb[238].mxu0  ;;  %v18241_v34 = vadd.f32 %v13742_v26, %v8195_v36 }
 0x527   : > { %v13635_v45 = vpop.f32.mrb[239].mxu0 }
 0x528   : > { %v8200_v15 = vadd.f32 %v13633_v54, %v18148_v37  ;;  %v13636_v58 = vadd.f32 %v13635_v45, %v13634_v51  ;;  %v13743_v22 = vpop.f32.mrb[76].mxu1 }
 0x529   : > { %v13744_v32 = vpop.f32.mrb[77].mxu1 }
 0x52a   : > { %v8203_v47 = vadd.f32 %v13636_v58, %v18150_v25  ;;  %v13745_v23 = vadd.f32 %v13744_v32, %v13743_v22  ;;  %v13746_v9 = vpop.f32.mrb[78].mxu1 }
 0x52b   : > { %v13747_v35 = vpop.f32.mrb[79].mxu1 }
 0x52c   : > { %v13637_v46 = vpop.f32.mrb[240].mxu0  ;;  %v13748_v27 = vadd.f32 %v13747_v35, %v13746_v9  ;;  %v18245_v2 = vadd.f32 %v13745_v23, %v8200_v15 }
 0x52d   : > { %v13638_v56 = vpop.f32.mrb[241].mxu0 }
 0x52e   : > { %v13639_v5 = vadd.f32 %v13638_v56, %v13637_v46  ;;  %v13640_v14 = vpop.f32.mrb[242].mxu0  ;;  %v18247_v36 = vadd.f32 %v13748_v27, %v8203_v47 }
 0x52f   : > { %v13641_v10 = vpop.f32.mrb[243].mxu0 }
 0x530   : > { %v8208_v37 = vadd.f32 %v13639_v5, %v18155_v7  ;;  %v13642_v26 = vadd.f32 %v13641_v10, %v13640_v14  ;;  %v13749_v54 = vpop.f32.mrb[80].mxu1  ;;  %v14857_v14 = vld [vmem:[#allocation11 + $0x140] sm:$0xff]  }
 0x531   : > { %v13750_v51 = vpop.f32.mrb[81].mxu1  ;;  %14021 = vmatprep.subr.bf16.mxu1 %v14857_v14 }
 0x532   : > { %v8211_v25 = vadd.f32 %v13642_v26, %v18157_v3  ;;  %v13751_v45 = vadd.f32 %v13750_v51, %v13749_v54  ;;  %v13752_v58 = vpop.f32.mrb[82].mxu1 }
 0x533   : > { %v13753_v22 = vpop.f32.mrb[83].mxu1 }
 0x534   : > { %v13643_v32 = vpop.f32.mrb[244].mxu0  ;;  %v13754_v9 = vadd.f32 %v13753_v22, %v13752_v58  ;;  %v18251_v15 = vadd.f32 %v13751_v45, %v8208_v37 }
 0x535   : > { %v13644_v35 = vpop.f32.mrb[245].mxu0 }
 0x536   : > { %v13645_v23 = vadd.f32 %v13644_v35, %v13643_v32  ;;  %v13646_v46 = vpop.f32.mrb[246].mxu0  ;;  %v18253_v47 = vadd.f32 %v13754_v9, %v8211_v25 }
 0x537   : > { %v13647_v56 = vpop.f32.mrb[247].mxu0 }
 0x538   : > { %v8216_v7 = vadd.f32 %v13645_v23, %v18161_v31  ;;  %v13648_v27 = vadd.f32 %v13647_v56, %v13646_v46  ;;  %v13755_v5 = vpop.f32.mrb[84].mxu1 }
 0x539   : > { %v13756_v10 = vpop.f32.mrb[85].mxu1 }
 0x53a   : > { %v8219_v3 = vadd.f32 %v13648_v27, %v18163_v24  ;;  %v13757_v26 = vadd.f32 %v13756_v10, %v13755_v5  ;;  %v13758_v54 = vpop.f32.mrb[86].mxu1 }
 0x53b   : > { %v13759_v51 = vpop.f32.mrb[87].mxu1 }
 0x53c   : > { %v13649_v58 = vpop.f32.mrb[248].mxu0  ;;  %v13760_v37 = vadd.f32 %v13759_v51, %v13758_v54  ;;  %v18257_v22 = vadd.f32 %v13757_v26, %v8216_v7 }
 0x53d   : > { %v13650_v45 = vpop.f32.mrb[249].mxu0 }
 0x53e   : > { %v13651_v32 = vadd.f32 %v13650_v45, %v13649_v58  ;;  %v13652_v25 = vpop.f32.mrb[250].mxu0  ;;  %v18259_v35 = vadd.f32 %v13760_v37, %v8219_v3 }
 0x53f   : > { %v13653_v9 = vpop.f32.mrb[251].mxu0 }
 0x540   : > { %v8224_v31 = vadd.f32 %v13651_v32, %v18167_v8  ;;  %v13654_v23 = vadd.f32 %v13653_v9, %v13652_v25  ;;  %v13761_v46 = vpop.f32.mrb[88].mxu1  ;;  %v8753_v32 = vld [vmem:[#allocation2] sm:$0xf8] }
 0x541   : > { %v13762_v56 = vpop.f32.mrb[89].mxu1 }
 0x542   : > { %v8227_v24 = vadd.f32 %v13654_v23, %v18169_v17  ;;  %v13763_v27 = vadd.f32 %v13762_v56, %v13761_v46  ;;  %v13764_v5 = vpop.f32.mrb[90].mxu1  ;;  %v9070_v17 = vld [vmem:[#allocation2] sm:$0xf0] }
 0x543   : > { %v13765_v14 = vpop.f32.mrb[91].mxu1 }
 0x544   : > { %v13655_v10 = vpop.f32.mrb[252].mxu0  ;;  %v13766_v54 = vadd.f32 %v13765_v14, %v13764_v5  ;;  %v18263_v7 = vadd.f32 %v13763_v27, %v8224_v31  ;;  %v8770_v31 = vsel %vm1820_vm9, %v8753_v32, 0 }
 0x545   : > { %v13656_v51 = vpop.f32.mrb[253].mxu0 }
 0x546   : > { %v13657_v26 = vadd.f32 %v13656_v51, %v13655_v10  ;;  %v13658_v58 = vpop.f32.mrb[254].mxu0  ;;  %v18265_v3 = vadd.f32 %v13766_v54, %v8227_v24  ;;  %v19896_v10 = vld [vmem:[#allocation28_spill] sm:$0xff] }
 0x547   : > { %v13659_v45 = vpop.f32.mrb[255].mxu0  ;;  %vm19897_vm13 = vcmp.ne.s16.totalorder %v19896_v10, 0 }
 0x548   : > { %v8232_v8 = vadd.f32 %v13657_v26, %v18173_v50  ;;  %v13660_v37 = vadd.f32 %v13659_v45, %v13658_v58  ;;  %v13767_v25 = vpop.f32.mrb[92].mxu1  ;;  %v9087_v24 = vsel %vm19897_vm13, %v9070_v17, 0  ;;  %v8788_v45 = vshrl.u32 %v8770_v31, 16 }
 0x549   : > { %v13768_v23 = vpop.f32.mrb[93].mxu1  ;;  %v9105_v28 = vshrl.u32 %v9087_v24, 16 }
 0x54a   : > { %v8235_v9 = vadd.f32 %v13660_v37, %v18175_v19  ;;  %v13769_v46 = vadd.f32 %v13768_v23, %v13767_v25  ;;  %v13770_v56 = vpop.f32.mrb[94].mxu1  ;;  %v8791_v37 = vshll.u32 %v8770_v31, 16 }
 0x54b   : > { %v13771_v27 = vpop.f32.mrb[95].mxu1 }
 0x54c   : > { %v14383_v14 = vpop.f32.mrb[0].mxu0  ;;  %v13772_v54 = vadd.f32 %v13771_v27, %v13770_v56  ;;  %v18274_v26 = vadd.f32 %v13769_v46, %v8232_v8  ;;  %v18281_v46 = vrot.slane %v8788_v45, 3  ;;  %v18283_v31 = vrot.slane %v8791_v37, 4 }
 0x54d   : > { %v8442_v50 = vadd.f32 %v14383_v14, %v18185_v11  ;;  %v8433_v51 = vpop.f32.mrb[1].mxu0  ;;  %v9108_v11 = vshll.u32 %v9087_v24, 16  ;;  %v18285_v14 = vld [vmem:[#allocation2] sm:$0xf0] }
 0x54e   : > { %v8434_v58 = vadd.f32 %v8433_v51, %v18179_v40  ;;  %v14384_v19 = vpop.f32.mrb[2].mxu0  ;;  %v18278_v38 = vadd.f32 %v13772_v54, %v8235_v9  ;;  %v18287_v9 = vrot.slane %v9105_v28, 4 }
 0x54f   : > { %v8594_v25 = vmul.f32 0.01, %v8442_v50  ;;  %v8445_v23 = vadd.f32 %v14384_v19, %v18187_v29  ;;  %v8436_v32 = vpop.f32.mrb[3].mxu0  ;;  %vm8562_vm12 = vcmp.ge.f32.partialorder %v8442_v50, 0.0  ;;  %v18289_v24 = vrot.slane %v9108_v11, 5 }
 0x550   : > { %v8592_v17 = vmul.f32 0.01, %v8434_v58  ;;  %v8437_v56 = vadd.f32 %v8436_v32, %v18181_v44  ;;  %vm8560_vm5 = vcmp.ge.f32.partialorder %v8434_v58, 0.0 }
 0x551   : > { %vm8563_vm2 = vcmp.ge.f32.partialorder %v8445_v23, 0.0  ;;  %v8595_v8 = vmul.f32 0.01, %v8445_v23  ;;  %v8626_v27 = vsel %vm8562_vm12, %v8442_v50, %v8594_v25 }
 0x552   : > { %vm8561_vm11 = vcmp.ge.f32.partialorder %v8437_v56, 0.0  ;;  %v8593_v40 = vmul.f32 0.01, %v8437_v56  ;;  %v8624_v54 = vsel %vm8560_vm5, %v8434_v58, %v8592_v17 }
 0x553   : > { %v8627_v29 = vsel %vm8563_vm2, %v8445_v23, %v8595_v8 }
 0x554   : > { %v8657_v51 = vpack.c.bf16 %v8627_v29, %v8626_v27  ;;  %v8625_v19 = vsel %vm8561_vm11, %v8437_v56, %v8593_v40  ;;  %v14387_v44 = vpop.f32.mrb[4].mxu0 }
 0x555   : > { %v8656_v32 = vpack.c.bf16 %v8625_v19, %v8624_v54  ;;  %v8458_v10 = vadd.f32 %v14387_v44, %v18197_v61  ;;  %v8449_v0 = vpop.f32.mrb[5].mxu0  ;;  %v19900_v54 = vld [vmem:[#allocation30_spill] sm:$0xff] }
 0x556   : > { %v8689_v45 = vrot.slane %v8657_v51, 4  ;;  %v8450_v37 = vadd.f32 %v8449_v0, %v18191_v41  ;;  %v14388_v4 = vpop.f32.mrb[6].mxu0  ;;  %vm19901_vm11 = vcmp.ne.s16.totalorder %v19900_v54, 0 }
 0x557   : > { %v8688_v25 = vrot.slane %v8656_v32, 4  ;;  %vm8566_vm3 = vcmp.ge.f32.partialorder %v8458_v10, 0.0  ;;  %v8598_v58 = vmul.f32 0.01, %v8458_v10  ;;  %v8461_v23 = vadd.f32 %v14388_v4, %v18199_v6  ;;  %v8452_v17 = vpop.f32.mrb[7].mxu0 }
 0x558   : > { %vm8564_vm13 = vcmp.ge.f32.partialorder %v8450_v37, 0.0  ;;  %v8596_v56 = vmul.f32 0.01, %v8450_v37  ;;  %v8453_v61 = vadd.f32 %v8452_v17, %v18193_v63  ;;  %v19898_v63 = vld [vmem:[#allocation27_spill] sm:$0xff] }
 0x559   : > { %v18301_v0 = vsel %vm1256_vm4, %v8688_v25, %v8689_v45  ;;  %8736 = vst [vmem:[#allocation2 + $0x8] sm:$0xf0] %v8688_v25  ;;  %v8630_v41 = vsel %vm8566_vm3, %v8458_v10, %v8598_v58  ;;  %vm8567_vm12 = vcmp.ge.f32.partialorder %v8461_v23, 0.0  ;;  %v8599_v8 = vmul.f32 0.01, %v8461_v23 }
 0x55a   : > { %8737 = vst [vmem:[#allocation2 + $0x10] sm:$0xff] %v18301_v0  ;;  %v8628_v40 = vsel %vm8564_vm13, %v8450_v37, %v8596_v56  ;;  %vm8565_vm5 = vcmp.ge.f32.partialorder %v8453_v61, 0.0  ;;  %v8597_v4 = vmul.f32 0.01, %v8453_v61  ;;  %vm19899_vm2 = vcmp.ne.s16.totalorder %v19898_v63, 0 }
 0x55b   : > { %v8631_v27 = vsel %vm8567_vm12, %v8461_v23, %v8599_v8  ;;  %v9306_v29 = vsel %vm19899_vm2, %v18301_v0, 0  ;;  %v18311_v51 = vsel %vm19901_vm11, %v18301_v0, 0  ;;  %v18316_v10 = vsel %vm2412_vm10, %v18301_v0, 0 }
 0x55c   : > { %v8659_v19 = vpack.c.bf16 %v8631_v27, %v8630_v41  ;;  %v8629_v44 = vsel %vm8565_vm5, %v8453_v61, %v8597_v4  ;;  %v14391_v32 = vpop.f32.mrb[8].mxu0  ;;  %v9331_v37 = vshrl.u32 %v9306_v29, 16  ;;  %v9334_v25 = vshll.u32 %v9306_v29, 16 }
 0x55d   : > { %v8658_v58 = vpack.c.bf16 %v8629_v44, %v8628_v40  ;;  %v8474_v23 = vadd.f32 %v14391_v32, %v18209_v55  ;;  %v8465_v17 = vpop.f32.mrb[9].mxu0  ;;  %v19903_v8 = vrot.slane %v18285_v14, 4 }
 0x55e   : > { %v8693_v11 = vrot.slane %v8659_v19, 4  ;;  %v8466_v28 = vadd.f32 %v8465_v17, %v18203_v52  ;;  %v14392_v6 = vpop.f32.mrb[10].mxu0  ;;  %v9333_v50 = vrot.slane %v9331_v37, 3  ;;  %v9336_v48 = vrot.slane %v9334_v25, 4 }
 0x55f   : > { %v8691_v18 = vrot.slane %v8658_v58, 4  ;;  %vm8570_vm3 = vcmp.ge.f32.partialorder %v8474_v23, 0.0  ;;  %v8602_v61 = vmul.f32 0.01, %v8474_v23  ;;  %v8477_v41 = vadd.f32 %v14392_v6, %v18211_v1  ;;  %v8468_v4 = vpop.f32.mrb[11].mxu0 }
 0x560   : > { %vm8568_vm13 = vcmp.ge.f32.partialorder %v8466_v28, 0.0  ;;  %v8600_v40 = vmul.f32 0.01, %v8466_v28  ;;  %v8469_v55 = vadd.f32 %v8468_v4, %v18205_v16  ;;  %v8972_v27 = vld [vmem:[#allocation2 + $0x8] sm:$0xff]  ;;  %v18324_v44 = vor.u32 %v9336_v48, %v9333_v50 }
 0x561   : > { %v9288_v29 = vld [vmem:[#allocation2 + $0x8] sm:$0xf8]  ;;  %v18327_v19 = vsel %vm1256_vm4, %v8689_v45, %v8691_v18  ;;  %v18330_v52 = vsel %vm1256_vm4, %v8691_v18, %v8693_v11  ;;  %v8634_v32 = vsel %vm8570_vm3, %v8474_v23, %v8602_v61  ;;  %vm8571_vm12 = vcmp.ge.f32.partialorder %v8477_v41, 0.0 }
 0x562   : > { %8738 = vst [vmem:[#allocation2 + $0x18] sm:$0xff] %v18327_v19  ;;  %8739 = vst [vmem:[#allocation2 + $0x20] sm:$0xff] %v18330_v52  ;;  %v8632_v1 = vsel %vm8568_vm13, %v8466_v28, %v8600_v40  ;;  %v8603_v6 = vmul.f32 0.01, %v8477_v41  ;;  %vm8569_vm5 = vcmp.ge.f32.partialorder %v8469_v55, 0.0  ;;  %v9006_v37 = vrot.slane %v8972_v27, 4 }
 0x563   : > { %v8601_v16 = vmul.f32 0.01, %v8469_v55  ;;  %v8771_v48 = vsel %vm19899_vm2, %v8972_v27, 0  ;;  %v9305_v45 = vsel %vm1820_vm9, %v9288_v29, 0  ;;  %v9088_v18 = vsel %vm2411_vm1, %v8972_v27, 0 }
 0x564   : > { %v8635_v25 = vsel %vm8571_vm12, %v8477_v41, %v8603_v6  ;;  %v14395_v23 = vpop.f32.mrb[12].mxu0  ;;  %v8796_v17 = vshrl.u32 %v8771_v48, 16  ;;  %v8799_v61 = vshll.u32 %v8771_v48, 16  ;;  %v9007_v56 = vsel %vm1256_vm4, %v19903_v8, %v9006_v37  ;;  %v14858_v48 = vld [vmem:[#allocation11 + $0x100] sm:$0xff]  }
 0x565   : > { %v8633_v58 = vsel %vm8569_vm5, %v8469_v55, %v8601_v16  ;;  %v8661_v4 = vpack.c.bf16 %v8635_v25, %v8634_v32  ;;  %v8490_v40 = vadd.f32 %v14395_v23, %v18221_v12  ;;  %v8481_v63 = vpop.f32.mrb[13].mxu0  ;;  %11117 = vmatprep.mubr.bf16.mxu1 %v9007_v56  ;;  %v19904_v41 = vrot.slane %v18301_v0, 4 }
 0x566   : > { %v8660_v28 = vpack.c.bf16 %v8633_v58, %v8632_v1  ;;  %v8482_v29 = vadd.f32 %v8481_v63, %v18215_v13  ;;  %v14396_v5 = vpop.f32.mrb[14].mxu0  ;;  %v8798_v50 = vrot.slane %v8796_v17, 3  ;;  %v8801_v27 = vrot.slane %v8799_v61, 4 }
 0x567   : > { %v9009_v55 = vsel %vm1256_vm4, %v9006_v37, %v19904_v41  ;;  %v18348_v6 = vrot.slane %v8661_v4, 4  ;;  %vm8574_vm11 = vcmp.ge.f32.partialorder %v8490_v40, 0.0  ;;  %v8606_v12 = vmul.f32 0.01, %v8490_v40  ;;  %v8484_v1 = vpop.f32.mrb[15].mxu0 }
 0x568   : > { %v8695_v32 = vrot.slane %v8660_v28, 4  ;;  %vm8572_vm3 = vcmp.ge.f32.partialorder %v8482_v29, 0.0  ;;  %v8604_v14 = vmul.f32 0.01, %v8482_v29  ;;  %v8493_v8 = vadd.f32 %v14396_v5, %v18223_v43 }
 0x569   : > { %v8485_v56 = vadd.f32 %v8484_v1, %v18217_v57  ;;  %v8638_v16 = vsel %vm8574_vm11, %v8490_v40, %v8606_v12  ;;  %v18359_v37 = vor.u32 %v8801_v27, %v8798_v50  ;;  %v14861_v57 = vld [vmem:[#allocation11 + $0x148] sm:$0xff]   ;;  %v9323_v23 = vshrl.u32 %v9305_v45, 16 }
 0x56a   : > { %v18353_v13 = vsel %vm1256_vm4, %v8693_v11, %v8695_v32  ;;  %v18357_v63 = vsel %vm1256_vm4, %v8695_v32, %v18348_v6  ;;  %v8636_v25 = vsel %vm8572_vm3, %v8482_v29, %v8604_v14  ;;  %vm8575_vm13 = vcmp.ge.f32.partialorder %v8493_v8, 0.0 }
 0x56b   : > { %8740 = vst [vmem:[#allocation2 + $0x28] sm:$0xff] %v18353_v13  ;;  %8741 = vst [vmem:[#allocation2 + $0x30] sm:$0xff] %v18357_v63  ;;  %v8607_v43 = vmul.f32 0.01, %v8493_v8  ;;  %vm8573_vm12 = vcmp.ge.f32.partialorder %v8485_v56, 0.0  ;;  %v19905_v11 = vor.u32 %v18283_v31, %v18281_v46  ;;  %v9326_v50 = vshll.u32 %v9305_v45, 16 }
 0x56c   : > { %v8605_v5 = vmul.f32 0.01, %v8485_v56  ;;  %v9113_v61 = vshrl.u32 %v9088_v18, 16  ;;  %v9116_v4 = vshll.u32 %v9088_v18, 16  ;;  %v14399_v28 = vpop.f32.mrb[16].mxu0  ;;  %v19906_v40 = vshrl.u32 %v18311_v51, 16 }
 0x56d   : > { %v8803_v58 = vsel %vm1854_vm8, %v19905_v11, %v18359_v37  ;;  %v8639_v17 = vsel %vm8575_vm13, %v8493_v8, %v8607_v43  ;;  %v9325_v32 = vrot.slane %v9323_v23, 3  ;;  %v9328_v12 = vrot.slane %v9326_v50, 4  ;;  %v8497_v1 = vpop.f32.mrb[17].mxu0  ;;  %v14862_v46 = vld [vmem:[#allocation11 + $0x108] sm:$0xff]  }
 0x56e   : > { %11118 = vmatmul.mubr.bf16.vlgmr.msra.gmra.mrb[96].mxu1 %v8803_v58  ;;  %v8807_v29 = vrot.slane %v19906_v40, 3  ;;  %v8663_v27 = vpack.c.bf16 %v8639_v17, %v8638_v16  ;;  %v8637_v41 = vsel %vm8573_vm12, %v8485_v56, %v8605_v5  ;;  %v9115_v14 = vrot.slane %v9113_v61, 4  ;;  %v14400_v8 = vpop.f32.mrb[18].mxu0  ;;  %v14865_v16 = vld [vmem:[#allocation11 + $0x150] sm:$0xff]   ;;  %v14851_v50 = vld [vmem:[#allocation11 + $0x1c8] sm:$0xff]   ;;  %v14869_v40 = vld [vmem:[#allocation11 + $0x158] sm:$0xff]  }
 0x56f   : > { %11125 = vmatprep.mubr.bf16.mxu1 %v9009_v55  ;;  %14022 = vmatpush3.bf16.msra.mxu1 %v14858_v48  ;;  %v8662_v31 = vpack.c.bf16 %v8637_v41, %v8636_v25  ;;  %v9118_v11 = vrot.slane %v9116_v4, 5  ;;  %v8506_v45 = vadd.f32 %v14399_v28, %v18233_v20  ;;  %v9329_v43 = vor.u32 %v9328_v12, %v9325_v32  ;;  %v8500_v55 = vpop.f32.mrb[19].mxu0  ;;  %v14850_v25 = vld [vmem:[#allocation11 + $0x180] sm:$0xff]   ;;  %v14866_v17 = vld [vmem:[#allocation11 + $0x110] sm:$0xff]  }
 0x570   : > { %14023 = vmatprep.subr.bf16.mxu1 %v14861_v57  ;;  %v18371_v18 = vrot.slane %v8663_v27, 4  ;;  %v8498_v58 = vadd.f32 %v8497_v1, %v18227_v33  ;;  %v8509_v56 = vadd.f32 %v14400_v8, %v18235_v42  ;;  %v19907_v61 = vor.u32 %v18289_v24, %v18287_v9  ;;  %v14853_v8 = vld [vmem:[#allocation11 + $0x1d0] sm:$0xff]  }
 0x571   : > { %v8699_v5 = vrot.slane %v8662_v31, 4  ;;  %v18375_v23 = vor.u32 %v9118_v11, %v9115_v14  ;;  %vm8578_vm5 = vcmp.ge.f32.partialorder %v8506_v45, 0.0  ;;  %v8610_v48 = vmul.f32 0.01, %v8506_v45  ;;  %v14852_v14 = vld [vmem:[#allocation11 + $0x188] sm:$0xff]  }
 0x572   : > { %v9338_v20 = vsel %vm1854_vm8, %v9329_v43, %v18324_v44  ;;  %vm8576_vm2 = vcmp.ge.f32.partialorder %v8498_v58, 0.0  ;;  %v8608_v57 = vmul.f32 0.01, %v8498_v58  ;;  %vm8579_vm11 = vcmp.ge.f32.partialorder %v8509_v56, 0.0 }
 0x573   : > { %14024 = vmatpush3.bf16.msra.mxu1 %v14862_v46  ;;  %v18381_v33 = vsel %vm1256_vm4, %v18348_v6, %v8699_v5  ;;  %v18385_v42 = vsel %vm1256_vm4, %v8699_v5, %v18371_v18  ;;  %11278 = vmatprep.mubr.bf16.mxu0 %v9338_v20  ;;  %v9120_v4 = vsel %vm1676_vm0, %v19907_v61, %v18375_v23  ;;  %v8611_v27 = vmul.f32 0.01, %v8509_v56 }
 0x574   : > { %v8642_v28 = vsel %vm8578_vm5, %v8506_v45, %v8610_v48  ;;  %8742 = vst [vmem:[#allocation2 + $0x38] sm:$0xff] %v18381_v33  ;;  %8743 = vst [vmem:[#allocation2 + $0x40] sm:$0xff] %v18385_v42  ;;  %11279 = vmatmul.mubr.bf16.vlgmr.msra.gmra.mrb[32].mxu0 %v9120_v4  ;;  %v8640_v6 = vsel %vm8576_vm2, %v8498_v58, %v8608_v57  ;;  %v8501_v41 = vadd.f32 %v8500_v55, %v18229_v39  ;;  %v14403_v31 = vpop.f32.mrb[20].mxu0 }
 0x575   : > { %v19908_v32 = vshll.u32 %v18311_v51, 16  ;;  %14025 = vmatprep.subr.bf16.mxu1 %v14865_v16  ;;  %14134 = vmatpush3.bf16.msra.mxu0 %v14850_v25  ;;  %v9010_v9 = vrot.slane %v18327_v19, 4  ;;  %vm19909_vm3 = vcmp.ne.s16.totalorder %v19900_v54, 0  ;;  %v9122_v1 = vshrl.u32 %v18316_v10, 16  ;;  %v8513_v45 = vpop.f32.mrb[21].mxu0 }
 0x576   : > { %v9307_v24 = vsel %vm19909_vm3, %v18327_v19, 0  ;;  %v9125_v46 = vshll.u32 %v18316_v10, 16  ;;  %v8643_v11 = vsel %vm8579_vm11, %v8509_v56, %v8611_v27  ;;  %vm8577_vm13 = vcmp.ge.f32.partialorder %v8501_v41, 0.0  ;;  %14135 = vmatprep.subr.bf16.mxu0 %v14851_v50  ;;  %v14404_v5 = vpop.f32.mrb[22].mxu0  ;;  %v14870_v56 = vld [vmem:[#allocation11 + $0x118] sm:$0xff]   ;;  %v14871_v50 = vld [vmem:[#allocation11 + $0x160] sm:$0xff]  }
 0x577   : > { %v8810_v12 = vrot.slane %v19908_v32, 4  ;;  %v8609_v39 = vmul.f32 0.01, %v8501_v41  ;;  %14026 = vmatpush3.bf16.msra.mxu1 %v14866_v17  ;;  %v8665_v43 = vpack.c.bf16 %v8643_v11, %v8642_v28  ;;  %v19910_v58 = vrot.slane %v18301_v0, 4  ;;  %v8516_v57 = vpop.f32.mrb[23].mxu0  ;;  %v14854_v28 = vld [vmem:[#allocation11 + $0x190] sm:$0xff]  }
 0x578   : > { %v9340_v10 = vshrl.u32 %v9307_v24, 16  ;;  %v9343_v16 = vshll.u32 %v9307_v24, 16  ;;  %14027 = vmatprep.subr.bf16.mxu1 %v14869_v40  ;;  %v9124_v25 = vrot.slane %v9122_v1, 4  ;;  %v9127_v20 = vrot.slane %v9125_v46, 5 }
 0x579   : > { %v18404_v51 = vor.u32 %v8810_v12, %v8807_v29  ;;  %v9011_v55 = vsel %vm1256_vm4, %v19910_v58, %v9010_v9  ;;  %v8641_v48 = vsel %vm8577_vm13, %v8501_v41, %v8609_v39  ;;  %v18414_v17 = vrot.slane %v8665_v43, 4  ;;  %14136 = vmatpush3.bf16.msra.mxu0 %v14852_v14  ;;  %v19911_v41 = vld [vmem:[#allocation32_spill] sm:$0xff]  ;;  %v14872_v14 = vld [vmem:[#allocation11 + $0x120] sm:$0xff]  }
 0x57a   : > { %v8664_v61 = vpack.c.bf16 %v8641_v48, %v8640_v6  ;;  %v9342_v0 = vrot.slane %v9340_v10, 3  ;;  %v9345_v4 = vrot.slane %v9343_v16, 4  ;;  %v18416_v40 = vor.u32 %v9127_v20, %v9124_v25  ;;  %14137 = vmatprep.subr.bf16.mxu0 %v14853_v8  ;;  %v14855_v12 = vld [vmem:[#allocation11 + $0x1d8] sm:$0xff]  }
 0x57b   : > { %v8812_v29 = vsel %vm1854_vm8, %v18359_v37, %v18404_v51  ;;  %v8522_v27 = vadd.f32 %v14403_v31, %v18245_v2  ;;  %vm19912_vm12 = vcmp.ne.s16.totalorder %v19911_v41, 0  ;;  %v8514_v32 = vadd.f32 %v8513_v45, %v18239_v53  ;;  %14028 = vmatpush3.bf16.msra.mxu1 %v14870_v56  ;;  %v14875_v31 = vld [vmem:[#allocation11 + $0x168] sm:$0xff]   ;;  %v14859_v56 = vld [vmem:[#allocation11 + $0x1e0] sm:$0xff]  }
 0x57c   : > { %11126 = vmatmul.mubr.bf16.gmra.mrb[100].mxu1 %v8812_v29  ;;  %v9308_v37 = vsel %vm19912_vm12, %v18330_v52, 0  ;;  %v8703_v24 = vrot.slane %v8664_v61, 4  ;;  %v9346_v6 = vor.u32 %v9345_v4, %v9342_v0  ;;  %v9129_v11 = vsel %vm1676_vm0, %v18375_v23, %v18416_v40  ;;  %14029 = vmatprep.subr.bf16.mxu1 %v14871_v50  ;;  %v14407_v43 = vpop.f32.mrb[24].mxu0  ;;  %v14856_v23 = vld [vmem:[#allocation11 + $0x198] sm:$0xff]   ;;  %vm19913_vm11 = vmmov %vm19912_vm12  ;;  %v14877_v61 = vld [vmem:[#allocation11 + $0x170] sm:$0xff]  }
 0x57d   : > { %11133 = vmatprep.mubr.bf16.mxu1 %v9011_v55  ;;  %v9349_v1 = vshrl.u32 %v9308_v37, 16  ;;  %v9352_v46 = vshll.u32 %v9308_v37, 16  ;;  %vm8582_vm5 = vcmp.ge.f32.partialorder %v8522_v27, 0.0  ;;  %v8614_v2 = vmul.f32 0.01, %v8522_v27  ;;  %14138 = vmatpush3.bf16.msra.mxu0 %v14854_v28  ;;  %v8529_v16 = vpop.f32.mrb[25].mxu0 }
 0x57e   : > { %vm8580_vm2 = vcmp.ge.f32.partialorder %v8514_v32, 0.0  ;;  %v18428_v53 = vsel %vm1256_vm4, %v18371_v18, %v8703_v24  ;;  %v18432_v39 = vsel %vm1256_vm4, %v8703_v24, %v18414_v17  ;;  %v9347_v45 = vsel %vm1854_vm8, %v18324_v44, %v9346_v6  ;;  %14139 = vmatprep.subr.bf16.mxu0 %v14855_v12  ;;  %v18447_v20 = vpop.f32.mrb[26].mxu0 }
 0x57f   : > { %v9351_v8 = vrot.slane %v9349_v1, 3  ;;  %8744 = vst [vmem:[#allocation2 + $0x48] sm:$0xff] %v18428_v53  ;;  %8745 = vst [vmem:[#allocation2 + $0x50] sm:$0xff] %v18432_v39  ;;  %11286 = vmatprep.mubr.bf16.mxu0 %v9347_v45  ;;  %v8646_v58 = vsel %vm8582_vm5, %v8522_v27, %v8614_v2  ;;  %v9354_v55 = vrot.slane %v9352_v46, 4  ;;  %v8612_v18 = vmul.f32 0.01, %v8514_v32  ;;  %14030 = vmatpush3.bf16.msra.mxu1 %v14872_v14 }
 0x580   : > { %v8525_v10 = vadd.f32 %v14404_v5, %v18247_v36  ;;  %11287 = vmatmul.mubr.bf16.gmra.mrb[36].mxu0 %v9129_v11  ;;  %v8517_v44 = vadd.f32 %v8516_v57, %v18241_v34  ;;  %v8773_v48 = vsel %vm19913_vm11, %v18327_v19, 0  ;;  %v9012_v29 = vrot.slane %v18330_v52, 4  ;;  %v14876_v36 = vld [vmem:[#allocation11 + $0x128] sm:$0xff]   ;;  %v18452_v57 = vpop.f32.mrb[27].mxu0  ;;  %14031 = vmatprep.subr.bf16.mxu1 %v14875_v31  ;;  %v14860_v27 = vld [vmem:[#allocation11 + $0x1a0] sm:$0xff]   ;;  %v14878_v31 = vld [vmem:[#allocation11 + $0x130] sm:$0xff]  }
 0x581   : > { %vm19914_vm3 = vcmp.ne.s16.totalorder %v16089_v60, 0  ;;  %v18449_v5 = vor.u32 %v9354_v55, %v9351_v8  ;;  %v8644_v50 = vsel %vm8580_vm2, %v8514_v32, %v8612_v18  ;;  %v8814_v4 = vshrl.u32 %v8773_v48, 16  ;;  %14140 = vmatpush3.bf16.msra.mxu0 %v14856_v23  ;;  %v14863_v1 = vld [vmem:[#allocation11 + $0x1e8] sm:$0xff]  }
 0x582   : > { %v9090_v25 = vsel %vm19914_vm3, %v18327_v19, 0  ;;  %vm8583_vm13 = vcmp.ge.f32.partialorder %v8525_v10, 0.0  ;;  %v8615_v34 = vmul.f32 0.01, %v8525_v10  ;;  %vm8581_vm12 = vcmp.ge.f32.partialorder %v8517_v44, 0.0  ;;  %14141 = vmatprep.subr.bf16.mxu0 %v14859_v56  ;;  %v14864_v56 = vld [vmem:[#allocation11 + $0x1a8] sm:$0xff]  }
 0x583   : > { %v8613_v0 = vmul.f32 0.01, %v8517_v44  ;;  %v8817_v28 = vshll.u32 %v8773_v48, 16  ;;  %v9356_v37 = vsel %vm1854_vm8, %v9346_v6, %v18449_v5  ;;  %v9013_v32 = vsel %vm1256_vm4, %v9010_v9, %v9012_v29  ;;  %14032 = vmatpush3.bf16.msra.mxu1 %v14876_v36  ;;  %v19915_v9 = vld [vmem:[#allocation33_spill] sm:$0xff] }
 0x584   : > { %v8647_v12 = vsel %vm8583_vm13, %v8525_v10, %v8615_v34  ;;  %v9131_v24 = vshrl.u32 %v9090_v25, 16  ;;  %11294 = vmatprep.mubr.bf16.mxu0 %v9356_v37  ;;  %v8816_v11 = vrot.slane %v8814_v4, 3  ;;  %v9134_v6 = vshll.u32 %v9090_v25, 16  ;;  %14033 = vmatprep.subr.bf16.mxu1 %v14877_v61  ;;  %v18470_v10 = vpop.f32.mrb[28].mxu0  ;;  %v14879_v48 = vld [vmem:[#allocation11 + $0x178] sm:$0xff]  }
 0x585   : > { %v8667_v46 = vpack.c.bf16 %v8647_v12, %v8646_v58  ;;  %v8645_v14 = vsel %vm8581_vm12, %v8517_v44, %v8613_v0  ;;  %v8819_v2 = vrot.slane %v8817_v28, 4  ;;  %v8538_v23 = vadd.f32 %v14407_v43, %v18257_v22  ;;  %14142 = vmatpush3.bf16.msra.mxu0 %v14860_v27  ;;  %v14867_v44 = vld [vmem:[#allocation11 + $0x1f0] sm:$0xff]   ;;  %v8545_v43 = vpop.f32.mrb[29].mxu0 }
 0x586   : > { %v8666_v45 = vpack.c.bf16 %v8645_v14, %v8644_v50  ;;  %v9133_v8 = vrot.slane %v9131_v24, 4  ;;  %vm19916_vm5 = vcmp.ne.s16.totalorder %v19915_v9, 0  ;;  %v8530_v58 = vadd.f32 %v8529_v16, %v18251_v15  ;;  %14143 = vmatprep.subr.bf16.mxu0 %v14863_v1  ;;  %v18475_v15 = vpop.f32.mrb[30].mxu0  ;;  %v14880_v16 = vld [vmem:[#allocation11 + $0x138] sm:$0xff]   ;;  %v14868_v1 = vld [vmem:[#allocation11 + $0x1b0] sm:$0xff]  }
 0x587   : > { %v18462_v55 = vrot.slane %v8667_v46, 4  ;;  %v18464_v19 = vor.u32 %v8819_v2, %v8816_v11  ;;  %v9309_v18 = vsel %vm19916_vm5, %v18353_v13, 0  ;;  %v9136_v36 = vrot.slane %v9134_v6, 5  ;;  %14034 = vmatpush3.bf16.msra.mxu1 %v14878_v31  ;;  %vm19917_vm3 = vmmov %vm19916_vm5  ;;  %v14873_v2 = vld [vmem:[#allocation11 + $0x1f8] sm:$0xff]  }
 0x588   : > { %v8707_v25 = vrot.slane %v8666_v45, 4  ;;  %vm8586_vm2 = vcmp.ge.f32.partialorder %v8538_v23, 0.0  ;;  %v8618_v22 = vmul.f32 0.01, %v8538_v23  ;;  %v9358_v34 = vshrl.u32 %v9309_v18, 16  ;;  %14035 = vmatprep.subr.bf16.mxu1 %v14879_v48 }
 0x589   : > { %v8821_v50 = vsel %vm1854_vm8, %v18404_v51, %v18464_v19  ;;  %v9361_v61 = vshll.u32 %v9309_v18, 16  ;;  %vm8584_vm11 = vcmp.ge.f32.partialorder %v8530_v58, 0.0  ;;  %v18485_v28 = vor.u32 %v9136_v36, %v9133_v8  ;;  %v18487_v51 = vpop.f32.mrb[31].mxu0  ;;  %14144 = vmatpush3.bf16.msra.mxu0 %v14864_v56  ;;  %v14874_v18 = vld [vmem:[#allocation11 + $0x1b8] sm:$0xff]  }
 0x58a   : > { %v18479_v0 = vsel %vm1256_vm4, %v18414_v17, %v8707_v25  ;;  %v18483_v4 = vsel %vm1256_vm4, %v8707_v25, %v18462_v55  ;;  %11134 = vmatmul.mubr.bf16.gmra.mrb[104].mxu1 %v8821_v50  ;;  %v8650_v27 = vsel %vm8586_vm2, %v8538_v23, %v8618_v22  ;;  %v9360_v37 = vrot.slane %v9358_v34, 3  ;;  %14145 = vmatprep.subr.bf16.mxu0 %v14867_v44 }
 0x58b   : > { %8746 = vst [vmem:[#allocation2 + $0x58] sm:$0xff] %v18479_v0  ;;  %8747 = vst [vmem:[#allocation2 + $0x60] sm:$0xff] %v18483_v4  ;;  %11141 = vmatprep.mubr.bf16.mxu1 %v9013_v32  ;;  %v9363_v12 = vrot.slane %v9361_v61, 4  ;;  %v8616_v24 = vmul.f32 0.01, %v8530_v58  ;;  %v8541_v17 = vadd.f32 %v18447_v20, %v18259_v35  ;;  %v9138_v46 = vsel %vm1676_vm0, %v18416_v40, %v18485_v28 }
 0x58c   : > { %v8533_v14 = vadd.f32 %v18452_v57, %v18253_v47  ;;  %v8774_v11 = vsel %vm19917_vm3, %v18330_v52, 0  ;;  %v9014_v32 = vrot.slane %v18353_v13, 4  ;;  %11295 = vmatmul.mubr.bf16.gmra.mrb[40].mxu0 %v9138_v46  ;;  %14036 = vmatpush3.bf16.msra.mxu1 %v14880_v16  ;;  %vm19918_vm5 = vcmp.ne.s16.totalorder %v16146_v30, 0 }
 0x58d   : > { %v18502_v35 = vor.u32 %v9363_v12, %v9360_v37  ;;  %v8648_v20 = vsel %vm8584_vm11, %v8530_v58, %v8616_v24  ;;  %vm8587_vm13 = vcmp.ge.f32.partialorder %v8541_v17, 0.0  ;;  %v8619_v31 = vmul.f32 0.01, %v8541_v17  ;;  %14146 = vmatpush3.bf16.msra.mxu0 %v14868_v1 }
 0x58e   : > { %vm8585_vm12 = vcmp.ge.f32.partialorder %v8533_v14, 0.0  ;;  %v8617_v40 = vmul.f32 0.01, %v8533_v14  ;;  %v8823_v47 = vshrl.u32 %v8774_v11, 16  ;;  %v8826_v57 = vshll.u32 %v8774_v11, 16  ;;  %14147 = vmatprep.subr.bf16.mxu0 %v14873_v2 }
 0x58f   : > { %v9365_v45 = vsel %vm1854_vm8, %v18449_v5, %v18502_v35  ;;  %v8651_v8 = vsel %vm8587_vm13, %v8541_v17, %v8619_v31  ;;  %v9015_v6 = vsel %vm1256_vm4, %v9012_v29, %v9014_v32  ;;  %v9091_v23 = vsel %vm19918_vm5, %v18330_v52, 0  ;;  %v18516_v5 = vld [vmem:[#allocation11 + $0x200] sm:$0xff]  }
 0x590   : > { %11302 = vmatprep.mubr.bf16.mxu0 %v9365_v45  ;;  %v8669_v58 = vpack.c.bf16 %v8651_v8, %v8650_v27  ;;  %v8649_v56 = vsel %vm8585_vm12, %v8533_v14, %v8617_v40  ;;  %v8825_v44 = vrot.slane %v8823_v47, 3  ;;  %v8828_v48 = vrot.slane %v8826_v57, 4  ;;  %v19919_v52 = vld [vmem:[#allocation34_spill] sm:$0xff] }
 0x591   : > { %v8668_v25 = vpack.c.bf16 %v8649_v56, %v8648_v20  ;;  %v9140_v36 = vshrl.u32 %v9091_v23, 16  ;;  %v9143_v22 = vshll.u32 %v9091_v23, 16  ;;  %v8554_v29 = vadd.f32 %v18470_v10, %v18274_v26  ;;  %14148 = vmatpush3.bf16.msra.mxu0 %v14874_v18 }
 0x592   : > { %v18520_v50 = vrot.slane %v8669_v58, 4  ;;  %v8829_v34 = vor.u32 %v8828_v48, %v8825_v44  ;;  %vm19920_vm2 = vcmp.ne.s16.totalorder %v19919_v52, 0  ;;  %v8546_v16 = vadd.f32 %v8545_v43, %v18263_v7  ;;  %14413 = vmatprep.subr.bf16.mxu0 %v18516_v5  ;;  %v19922_v58 = vld [vmem:[#allocation35_spill] sm:$0xff] }
 0x593   : > { %v9310_v61 = vsel %vm19920_vm2, %v18357_v63, 0  ;;  %v8711_v27 = vrot.slane %v8668_v25, 4  ;;  %v9142_v37 = vrot.slane %v9140_v36, 4  ;;  %v9145_v12 = vrot.slane %v9143_v22, 5  ;;  %vm19921_vm13 = vmmov %vm19920_vm2 }
 0x594   : > { %vm8590_vm11 = vcmp.ge.f32.partialorder %v8554_v29, 0.0  ;;  %v8830_v24 = vsel %vm1854_vm8, %v18464_v19, %v8829_v34  ;;  %v8622_v17 = vmul.f32 0.01, %v8554_v29  ;;  %v9367_v1 = vshrl.u32 %v9310_v61, 16 }
 0x595   : > { %v9370_v26 = vshll.u32 %v9310_v61, 16  ;;  %v18531_v10 = vsel %vm1256_vm4, %v18462_v55, %v8711_v27  ;;  %v18535_v7 = vsel %vm1256_vm4, %v8711_v27, %v18520_v50  ;;  %11142 = vmatmul.mubr.bf16.gmra.mrb[108].mxu1 %v8830_v24  ;;  %v18537_v43 = vor.u32 %v9145_v12, %v9142_v37 }
 0x596   : > { %vm8588_vm3 = vcmp.ge.f32.partialorder %v8546_v16, 0.0  ;;  %8748 = vst [vmem:[#allocation2 + $0x68] sm:$0xff] %v18531_v10  ;;  %8749 = vst [vmem:[#allocation2 + $0x70] sm:$0xff] %v18535_v7  ;;  %11149 = vmatprep.mubr.bf16.mxu1 %v9015_v6  ;;  %v8654_v19 = vsel %vm8590_vm11, %v8554_v29, %v8622_v17  ;;  %v9369_v46 = vrot.slane %v9367_v1, 3  ;;  %v8620_v11 = vmul.f32 0.01, %v8546_v16 }
 0x597   : > { %v9372_v14 = vrot.slane %v9370_v26, 4  ;;  %v9147_v55 = vsel %vm1676_vm0, %v18485_v28, %v18537_v43  ;;  %v8557_v2 = vadd.f32 %v18475_v15, %v18278_v38  ;;  %v8549_v20 = vadd.f32 %v18487_v51, %v18265_v3 }
 0x598   : > { %v8775_v31 = vsel %vm19921_vm13, %v18353_v13, 0  ;;  %11303 = vmatmul.mubr.bf16.gmra.mrb[44].mxu0 %v9147_v55  ;;  %v8652_v47 = vsel %vm8588_vm3, %v8546_v16, %v8620_v11  ;;  %v9016_v3 = vrot.slane %v18357_v63, 4  ;;  %v9092_v18 = vsel %vm2415_vm6, %v18353_v13, 0 }
 0x599   : > { %v9373_v40 = vor.u32 %v9372_v14, %v9369_v46  ;;  %v8832_v57 = vshrl.u32 %v8775_v31, 16  ;;  %v8835_v45 = vshll.u32 %v8775_v31, 16  ;;  %vm8591_vm12 = vcmp.ge.f32.partialorder %v8557_v2, 0.0 }
 0x59a   : > { %v8623_v8 = vmul.f32 0.01, %v8557_v2  ;;  %vm8589_vm5 = vcmp.ge.f32.partialorder %v8549_v20, 0.0  ;;  %v8621_v6 = vmul.f32 0.01, %v8549_v20  ;;  %vm19923_vm2 = vcmp.ne.s16.totalorder %v19922_v58, 0 }
 0x59b   : > { %v9374_v28 = vsel %vm1854_vm8, %v18502_v35, %v9373_v40  ;;  %v8834_v38 = vrot.slane %v8832_v57, 3  ;;  %v8837_v15 = vrot.slane %v8835_v45, 4  ;;  %v9311_v56 = vsel %vm19923_vm2, %v18381_v33, 0  ;;  %vm19924_vm11 = vmmov %vm19923_vm2 }
 0x59c   : > { %11310 = vmatprep.mubr.bf16.mxu0 %v9374_v28  ;;  %v8655_v51 = vsel %vm8591_vm12, %v8557_v2, %v8623_v8  ;;  %v8653_v23 = vsel %vm8589_vm5, %v8549_v20, %v8621_v6  ;;  %v9017_v35 = vsel %vm1256_vm4, %v9014_v32, %v9016_v3  ;;  %v9149_v36 = vshrl.u32 %v9092_v18, 16  ;;  %v19926_v8 = vld [vmem:[#allocation36_spill] sm:$0xff] }
 0x59d   : > { %v8671_v44 = vpack.c.bf16 %v8655_v51, %v8654_v19  ;;  %v8670_v48 = vpack.c.bf16 %v8653_v23, %v8652_v47  ;;  %v8838_v25 = vor.u32 %v8837_v15, %v8834_v38  ;;  %v9152_v22 = vshll.u32 %v9092_v18, 16 }
 0x59e   : > { %v9376_v29 = vshrl.u32 %v9311_v56, 16  ;;  %v9379_v61 = vshll.u32 %v9311_v56, 16  ;;  %v8776_v12 = vsel %vm19924_vm11, %v18357_v63, 0  ;;  %v9151_v24 = vrot.slane %v9149_v36, 4 }
 0x59f   : > { %v8717_v16 = vrot.slane %v8671_v44, 4  ;;  %v8715_v27 = vrot.slane %v8670_v48, 4  ;;  %v8839_v37 = vsel %vm1854_vm8, %v8829_v34, %v8838_v25  ;;  %v9154_v17 = vrot.slane %v9152_v22, 5 }
 0x5a0   : > { %11150 = vmatmul.mubr.bf16.gmra.mrb[112].mxu1 %v8839_v37  ;;  %v9378_v1 = vrot.slane %v9376_v29, 3  ;;  %v9381_v26 = vrot.slane %v9379_v61, 4  ;;  %v8841_v19 = vshrl.u32 %v8776_v12, 16  ;;  %v8844_v34 = vshll.u32 %v8776_v12, 16 }
 0x5a1   : > { %8752 = vst [vmem:[#allocation2 + $0x88] sm:$0xf] %v8717_v16  ;;  %v18569_v13 = vsel %vm1256_vm4, %v18520_v50, %v8715_v27  ;;  %v18572_v32 = vsel %vm1256_vm4, %v8715_v27, %v8717_v16  ;;  %11157 = vmatprep.mubr.bf16.mxu1 %v9017_v35  ;;  %v9155_v46 = vor.u32 %v9154_v17, %v9151_v24  ;;  %v9018_v11 = vrot.slane %v18381_v33, 4  ;;  %v19929_v27 = vld [vmem:[#allocation37_spill] sm:$0xff] }
 0x5a2   : > { %8750 = vst [vmem:[#allocation2 + $0x78] sm:$0xff] %v18569_v13  ;;  %8751 = vst [vmem:[#allocation2 + $0x80] sm:$0xff] %v18572_v32  ;;  %v9382_v14 = vor.u32 %v9381_v26, %v9378_v1  ;;  %vm19925_vm3 = vcmp.ne.s16.totalorder %v16315_v59, 0  ;;  %v8843_v50 = vrot.slane %v8841_v19, 3  ;;  %v8846_v2 = vrot.slane %v8844_v34, 4 }
 0x5a3   : > { %v9093_v55 = vsel %vm19925_vm3, %v18357_v63, 0  ;;  %v9156_v47 = vsel %vm1676_vm0, %v18537_v43, %v9155_v46  ;;  %v9019_v45 = vsel %vm1256_vm4, %v9016_v3, %v9018_v11  ;;  %vm19927_vm13 = vcmp.ne.s16.totalorder %v19926_v8, 0 }
 0x5a4   : > { %v9158_v20 = vshrl.u32 %v9093_v55, 16  ;;  %v9161_v31 = vshll.u32 %v9093_v55, 16  ;;  %v9383_v57 = vsel %vm1854_vm8, %v9373_v40, %v9382_v14  ;;  %v9312_v6 = vsel %vm19927_vm13, %v18385_v42, 0  ;;  %11311 = vmatmul.mubr.bf16.gmra.mrb[48].mxu0 %v9156_v47  ;;  %vm19928_vm12 = vmmov %vm19927_vm13 }
 0x5a5   : > { %v8847_v28 = vor.u32 %v8846_v2, %v8843_v50  ;;  %v9385_v63 = vshrl.u32 %v9312_v6, 16  ;;  %11318 = vmatprep.mubr.bf16.mxu0 %v9383_v57  ;;  %v9388_v51 = vshll.u32 %v9312_v6, 16  ;;  %v8777_v23 = vsel %vm19928_vm12, %v18381_v33, 0  ;;  %v19933_v6 = vld [vmem:[#allocation39_spill] sm:$0xff] }
 0x5a6   : > { %v9160_v38 = vrot.slane %v9158_v20, 4  ;;  %v9163_v15 = vrot.slane %v9161_v31, 5  ;;  %v9020_v43 = vrot.slane %v18385_v42, 4  ;;  %v9094_v40 = vsel %vm2417_vm14, %v18381_v33, 0 }
 0x5a7   : > { %v8848_v3 = vsel %vm1854_vm8, %v8838_v25, %v8847_v28  ;;  %v9387_v56 = vrot.slane %v9385_v63, 3  ;;  %v8850_v44 = vshrl.u32 %v8777_v23, 16  ;;  %v9390_v48 = vrot.slane %v9388_v51, 4 }
 0x5a8   : > { %v9164_v18 = vor.u32 %v9163_v15, %v9160_v38  ;;  %11158 = vmatmul.mubr.bf16.gmra.mrb[116].mxu1 %v8848_v3  ;;  %v8853_v35 = vshll.u32 %v8777_v23, 16  ;;  %v9021_v36 = vsel %vm1256_vm4, %v9018_v11, %v9020_v43  ;;  %v9167_v22 = vshrl.u32 %v9094_v40, 16 }
 0x5a9   : > { %11165 = vmatprep.mubr.bf16.mxu1 %v9019_v45  ;;  %v8852_v61 = vrot.slane %v8850_v44, 3  ;;  %v9170_v16 = vshll.u32 %v9094_v40, 16  ;;  %vm19930_vm5 = vcmp.ne.s16.totalorder %v19929_v27, 0  ;;  %v9391_v37 = vor.u32 %v9390_v48, %v9387_v56 }
 0x5aa   : > { %v9165_v29 = vsel %vm1676_vm0, %v9155_v46, %v9164_v18  ;;  %v9313_v33 = vsel %vm19930_vm5, %v18428_v53, 0  ;;  %v8855_v25 = vrot.slane %v8853_v35, 4  ;;  %v9169_v12 = vrot.slane %v9167_v22, 4  ;;  %vm19931_vm2 = vmmov %vm19930_vm5 }
 0x5ab   : > { %v9394_v24 = vshrl.u32 %v9313_v33, 16  ;;  %v9172_v17 = vrot.slane %v9170_v16, 5  ;;  %v9397_v1 = vshll.u32 %v9313_v33, 16  ;;  %v8778_v26 = vsel %vm19931_vm2, %v18385_v42, 0 }
 0x5ac   : > { %v9022_v19 = vrot.slane %v18428_v53, 4  ;;  %v9392_v34 = vsel %vm1854_vm8, %v9382_v14, %v9391_v37  ;;  %v8856_v46 = vor.u32 %v8855_v25, %v8852_v61  ;;  %v8859_v55 = vshrl.u32 %v8778_v26, 16  ;;  %11319 = vmatmul.mubr.bf16.gmra.mrb[52].mxu0 %v9165_v29 }
 0x5ad   : > { %v9396_v11 = vrot.slane %v9394_v24, 3  ;;  %v9173_v50 = vor.u32 %v9172_v17, %v9169_v12  ;;  %v9399_v2 = vrot.slane %v9397_v1, 4  ;;  %v8862_v20 = vshll.u32 %v8778_v26, 16  ;;  %11326 = vmatprep.mubr.bf16.mxu0 %v9392_v34  ;;  %v19937_v26 = vld [vmem:[#allocation41_spill] sm:$0xff] }
 0x5ae   : > { %v9023_v31 = vsel %vm1256_vm4, %v9020_v43, %v9022_v19  ;;  %v8857_v47 = vsel %vm1854_vm8, %v8847_v28, %v8856_v46  ;;  %v8861_v57 = vrot.slane %v8859_v55, 3  ;;  %vm19932_vm11 = vcmp.ne.s16.totalorder %v19800_v49, 0 }
 0x5af   : > { %v9095_v45 = vsel %vm19932_vm11, %v18385_v42, 0  ;;  %vm19934_vm3 = vcmp.ne.s16.totalorder %v19933_v6, 0  ;;  %v9174_v38 = vsel %vm1676_vm0, %v9164_v18, %v9173_v50  ;;  %v9400_v15 = vor.u32 %v9399_v2, %v9396_v11 }
 0x5b0   : > { %v9314_v14 = vsel %vm19934_vm3, %v18432_v39, 0  ;;  %v8864_v63 = vrot.slane %v8862_v20, 4  ;;  %v9176_v51 = vshrl.u32 %v9095_v45, 16  ;;  %11166 = vmatmul.mubr.bf16.gmra.mrb[120].mxu1 %v8857_v47  ;;  %v9179_v23 = vshll.u32 %v9095_v45, 16  ;;  %vm19935_vm13 = vmmov %vm19934_vm3 }
 0x5b1   : > { %v9403_v43 = vshrl.u32 %v9314_v14, 16  ;;  %v9406_v40 = vshll.u32 %v9314_v14, 16  ;;  %v8779_v28 = vsel %vm19935_vm13, %v18428_v53, 0  ;;  %11173 = vmatprep.mubr.bf16.mxu1 %v9021_v36  ;;  %v9401_v42 = vsel %vm1854_vm8, %v9391_v37, %v9400_v15 }
 0x5b2   : > { %v8865_v3 = vor.u32 %v8864_v63, %v8861_v57  ;;  %v9178_v56 = vrot.slane %v9176_v51, 4  ;;  %v8868_v44 = vshrl.u32 %v8779_v28, 16  ;;  %v9181_v48 = vrot.slane %v9179_v23, 5  ;;  %v19940_v63 = vld [vmem:[#allocation42_spill] sm:$0xff] }
 0x5b3   : > { %v9405_v35 = vrot.slane %v9403_v43, 3  ;;  %v9408_v18 = vrot.slane %v9406_v40, 4  ;;  %v8871_v22 = vshll.u32 %v8779_v28, 16  ;;  %v9024_v16 = vrot.slane %v18432_v39, 4 }
 0x5b4   : > { %v8866_v29 = vsel %vm1854_vm8, %v8856_v46, %v8865_v3  ;;  %v8870_v61 = vrot.slane %v8868_v44, 3  ;;  %v9096_v25 = vsel %vm2419_vm15, %v18428_v53, 0  ;;  %v9182_v12 = vor.u32 %v9181_v48, %v9178_v56  ;;  %11327 = vmatmul.mubr.bf16.gmra.mrb[56].mxu0 %v9174_v38  ;;  %v19942_v48 = vld [vmem:[#allocation43_spill] sm:$0xff] }
 0x5b5   : > { %v9409_v36 = vor.u32 %v9408_v18, %v9405_v35  ;;  %v8873_v24 = vrot.slane %v8871_v22, 4  ;;  %v9185_v37 = vshrl.u32 %v9096_v25, 16  ;;  %v9025_v17 = vsel %vm1256_vm4, %v9022_v19, %v9024_v16  ;;  %11334 = vmatprep.mubr.bf16.mxu0 %v9401_v42 }
 0x5b6   : > { %v9188_v1 = vshll.u32 %v9096_v25, 16  ;;  %vm19938_vm12 = vcmp.ne.s16.totalorder %v19937_v26, 0  ;;  %v9183_v11 = vsel %vm1676_vm0, %v9173_v50, %v9182_v12  ;;  %v9026_v38 = vrot.slane %v18479_v0, 4 }
 0x5b7   : > { %v9315_v34 = vsel %vm19938_vm12, %v18479_v0, 0  ;;  %vm19939_vm5 = vmmov %vm19938_vm12  ;;  %v9410_v53 = vsel %vm1854_vm8, %v9400_v15, %v9409_v36  ;;  %v8874_v55 = vor.u32 %v8873_v24, %v8870_v61  ;;  %v9187_v2 = vrot.slane %v9185_v37, 4 }
 0x5b8   : > { %v8780_v46 = vsel %vm19939_vm5, %v18432_v39, 0  ;;  %v9190_v20 = vrot.slane %v9188_v1, 5  ;;  %v9412_v47 = vshrl.u32 %v9315_v34, 16  ;;  %v9415_v57 = vshll.u32 %v9315_v34, 16  ;;  %11174 = vmatmul.mubr.bf16.gmra.mrb[124].mxu1 %v8866_v29 }
 0x5b9   : > { %v8877_v19 = vshrl.u32 %v8780_v46, 16  ;;  %v8875_v45 = vsel %vm1854_vm8, %v8865_v3, %v8874_v55  ;;  %v8880_v14 = vshll.u32 %v8780_v46, 16  ;;  %vm19941_vm2 = vcmp.ne.s16.totalorder %v19940_v63, 0  ;;  %11181 = vmatprep.mubr.bf16.mxu1 %v9023_v31 }
 0x5ba   : > { %v9097_v51 = vsel %vm19941_vm2, %v18432_v39, 0  ;;  %v9191_v50 = vor.u32 %v9190_v20, %v9187_v2  ;;  %v9414_v23 = vrot.slane %v9412_v47, 3  ;;  %v9417_v15 = vrot.slane %v9415_v57, 4  ;;  %v19945_v47 = vld [vmem:[#allocation44_spill] sm:$0xff] }
 0x5bb   : > { %v8879_v43 = vrot.slane %v8877_v19, 3  ;;  %v8882_v40 = vrot.slane %v8880_v14, 4  ;;  %v18638_v28 = vsel %vm1256_vm4, %v9024_v16, %v9026_v38  ;;  %v9194_v42 = vshrl.u32 %v9097_v51, 16 }
 0x5bc   : > { %v9197_v56 = vshll.u32 %v9097_v51, 16  ;;  %v9192_v3 = vsel %vm1676_vm0, %v9182_v12, %v9191_v50  ;;  %v9418_v44 = vor.u32 %v9417_v15, %v9414_v23  ;;  %vm19943_vm11 = vcmp.ne.s16.totalorder %v19942_v48, 0  ;;  %11335 = vmatmul.mubr.bf16.gmra.mrb[60].mxu0 %v9183_v11  ;;  %v19947_v51 = vld [vmem:[#allocation45_spill] sm:$0xff] }
 0x5bd   : > { %v9316_v35 = vsel %vm19943_vm11, %v18483_v4, 0  ;;  %vm19944_vm3 = vmmov %vm19943_vm11  ;;  %v8883_v31 = vor.u32 %v8882_v40, %v8879_v43  ;;  %v9196_v18 = vrot.slane %v9194_v42, 4  ;;  %11342 = vmatprep.mubr.bf16.mxu0 %v9410_v53  ;;  %v9028_v34 = vrot.slane %v18483_v4, 4 }
 0x5be   : > { %v8781_v39 = vsel %vm19944_vm3, %v18479_v0, 0  ;;  %v9199_v22 = vrot.slane %v9197_v56, 5  ;;  %v9421_v29 = vshrl.u32 %v9316_v35, 16  ;;  %v9419_v61 = vsel %vm1854_vm8, %v9409_v36, %v9418_v44 }
 0x5bf   : > { %v9424_v16 = vshll.u32 %v9316_v35, 16  ;;  %v8886_v25 = vshrl.u32 %v8781_v39, 16  ;;  %v8889_v24 = vshll.u32 %v8781_v39, 16  ;;  %v8884_v12 = vsel %vm1854_vm8, %v8874_v55, %v8883_v31 }
 0x5c0   : > { %v9200_v37 = vor.u32 %v9199_v22, %v9196_v18  ;;  %v9423_v1 = vrot.slane %v9421_v29, 3  ;;  %vm19946_vm13 = vcmp.ne.s16.totalorder %v19945_v47, 0  ;;  %11182 = vmatmul.mubr.bf16.gmra.mrb[128].mxu1 %v8875_v45  ;;  %v18655_v11 = vsel %vm1256_vm4, %v9026_v38, %v9028_v34 }
 0x5c1   : > { %v9426_v46 = vrot.slane %v9424_v16, 4  ;;  %v8888_v2 = vrot.slane %v8886_v25, 3  ;;  %v8891_v20 = vrot.slane %v8889_v24, 4  ;;  %v9098_v57 = vsel %vm19946_vm13, %v18479_v0, 0  ;;  %11189 = vmatprep.mubr.bf16.mxu1 %v9025_v17  ;;  %v19950_v16 = vld [vmem:[#allocation46_spill] sm:$0xff]  ;;  %v19952_v24 = vld [vmem:[#allocation47_spill] sm:$0xff] }
 0x5c2   : > { %v9201_v36 = vsel %vm1676_vm0, %v9191_v50, %v9200_v37  ;;  %v9203_v53 = vshrl.u32 %v9098_v57, 16  ;;  %v9206_v19 = vshll.u32 %v9098_v57, 16  ;;  %vm19948_vm12 = vcmp.ne.s16.totalorder %v19947_v51, 0 }
 0x5c3   : > { %v9427_v55 = vor.u32 %v9426_v46, %v9423_v1  ;;  %v8892_v14 = vor.u32 %v8891_v20, %v8888_v2  ;;  %v9317_v23 = vsel %vm19948_vm12, %v18531_v10, 0  ;;  %vm19949_vm5 = vmmov %vm19948_vm12  ;;  %v9030_v18 = vrot.slane %v18531_v10, 4 }
 0x5c4   : > { %v8782_v15 = vsel %vm19949_vm5, %v18483_v4, 0  ;;  %v9205_v0 = vrot.slane %v9203_v53, 4  ;;  %v9208_v45 = vrot.slane %v9206_v19, 5  ;;  %v9430_v43 = vshrl.u32 %v9317_v23, 16  ;;  %11343 = vmatmul.mubr.bf16.gmra.mrb[64].mxu0 %v9192_v3 }
 0x5c5   : > { %v9433_v50 = vshll.u32 %v9317_v23, 16  ;;  %v9428_v38 = vsel %vm1854_vm8, %v9418_v44, %v9427_v55  ;;  %v8893_v40 = vsel %vm1854_vm8, %v8883_v31, %v8892_v14  ;;  %v8895_v42 = vshrl.u32 %v8782_v15, 16  ;;  %11350 = vmatprep.mubr.bf16.mxu0 %v9419_v61 }
 0x5c6   : > { %v8898_v17 = vshll.u32 %v8782_v15, 16  ;;  %v9209_v56 = vor.u32 %v9208_v45, %v9205_v0  ;;  %v9432_v35 = vrot.slane %v9430_v43, 3  ;;  %vm19951_vm2 = vcmp.ne.s16.totalorder %v19950_v16, 0 }
 0x5c7   : > { %v9435_v39 = vrot.slane %v9433_v50, 4  ;;  %v8897_v22 = vrot.slane %v8895_v42, 3  ;;  %v9099_v25 = vsel %vm19951_vm2, %v18483_v4, 0  ;;  %vm19953_vm11 = vcmp.ne.s16.totalorder %v19952_v24, 0 }
 0x5c8   : > { %v8900_v29 = vrot.slane %v8898_v17, 4  ;;  %v9318_v44 = vsel %vm19953_vm11, %v18535_v7, 0  ;;  %v18673_v31 = vsel %vm1676_vm0, %v9200_v37, %v9209_v56  ;;  %v18676_v46 = vsel %vm1256_vm4, %v9028_v34, %v9030_v18  ;;  %11190 = vmatmul.mubr.bf16.gmra.mrb[132].mxu1 %v8884_v12  ;;  %vm19954_vm3 = vmmov %vm19953_vm11 }
 0x5c9   : > { %v9436_v1 = vor.u32 %v9435_v39, %v9432_v35  ;;  %v9212_v2 = vshrl.u32 %v9099_v25, 16  ;;  %v9215_v20 = vshll.u32 %v9099_v25, 16  ;;  %v9439_v57 = vshrl.u32 %v9318_v44, 16  ;;  %11197 = vmatprep.mubr.bf16.mxu1 %v18638_v28 }
 0x5ca   : > { %v8901_v3 = vor.u32 %v8900_v29, %v8897_v22  ;;  %v9442_v53 = vshll.u32 %v9318_v44, 16  ;;  %v8783_v61 = vsel %vm19954_vm3, %v18531_v10, 0  ;;  %v9032_v37 = vrot.slane %v18535_v7, 4 }
 0x5cb   : > { %v9437_v4 = vsel %vm1854_vm8, %v9427_v55, %v9436_v1  ;;  %v9214_v19 = vrot.slane %v9212_v2, 4  ;;  %v9217_v23 = vrot.slane %v9215_v20, 5  ;;  %v9441_v15 = vrot.slane %v9439_v57, 3 }
 0x5cc   : > { %v18685_v34 = vsel %vm1854_vm8, %v8892_v14, %v8901_v3  ;;  %v9444_v0 = vrot.slane %v9442_v53, 4  ;;  %v8904_v45 = vshrl.u32 %v8783_v61, 16  ;;  %v8907_v43 = vshll.u32 %v8783_v61, 16  ;;  %v19956_v14 = vld [vmem:[#allocation49_spill] sm:$0xff]  ;;  %11351 = vmatmul.mubr.bf16.gmra.mrb[68].mxu0 %v9201_v36 }
 0x5cd   : > { %v18688_v12 = vsel %vm1256_vm4, %v9030_v18, %v9032_v37  ;;  %v9100_v50 = vsel %vm2423_vm7, %v18531_v10, 0  ;;  %v9218_v42 = vor.u32 %v9217_v23, %v9214_v19  ;;  %vm19957_vm13 = vcmp.ne.s16.totalorder %v19956_v14, 0  ;;  %11358 = vmatprep.mubr.bf16.mxu0 %v9428_v38 }
 0x5ce   : > { %v9445_v17 = vor.u32 %v9444_v0, %v9441_v15  ;;  %v9221_v35 = vshrl.u32 %v9100_v50, 16  ;;  %v9224_v39 = vshll.u32 %v9100_v50, 16  ;;  %v8906_v28 = vrot.slane %v8904_v45, 3  ;;  %vm19958_vm12 = vmmov %vm19957_vm13  ;;  %v19959_v0 = vld [vmem:[#allocation50_spill] sm:$0xff] }
 0x5cf   : > { %v8909_v22 = vrot.slane %v8907_v43, 4  ;;  %v9319_v29 = vsel %vm19957_vm13, %v18569_v13, 0  ;;  %v8784_v25 = vsel %vm19958_vm12, %v18535_v7, 0  ;;  %v9219_v18 = vsel %vm1676_vm0, %v9209_v56, %v9218_v42 }
 0x5d0   : > { %v9446_v44 = vsel %vm1854_vm8, %v9436_v1, %v9445_v17  ;;  %v9223_v10 = vrot.slane %v9221_v35, 4  ;;  %v9226_v2 = vrot.slane %v9224_v39, 5  ;;  %v9448_v57 = vshrl.u32 %v9319_v29, 16  ;;  %11198 = vmatmul.mubr.bf16.gmra.mrb[136].mxu1 %v8893_v40 }
 0x5d1   : > { %v8910_v20 = vor.u32 %v8909_v22, %v8906_v28  ;;  %v9451_v53 = vshll.u32 %v9319_v29, 16  ;;  %v8913_v19 = vshrl.u32 %v8784_v25, 16  ;;  %v8916_v23 = vshll.u32 %v8784_v25, 16  ;;  %11205 = vmatprep.mubr.bf16.mxu1 %v18655_v11 }
 0x5d2   : > { %v9227_v61 = vor.u32 %v9226_v2, %v9223_v10  ;;  %v9034_v15 = vrot.slane %v18569_v13, 4  ;;  %vm19960_vm5 = vcmp.ne.s16.totalorder %v19959_v0, 0  ;;  %v9450_v56 = vrot.slane %v9448_v57, 3 }
 0x5d3   : > { %v9101_v45 = vsel %vm19960_vm5, %v18535_v7, 0  ;;  %v8911_v36 = vsel %vm1854_vm8, %v8901_v3, %v8910_v20  ;;  %v9453_v1 = vrot.slane %v9451_v53, 4  ;;  %v8915_v43 = vrot.slane %v8913_v19, 3  ;;  %v19961_v7 = vld [vmem:[#allocation52_spill] sm:$0xff] }
 0x5d4   : > { %v9228_v38 = vsel %vm1676_vm0, %v9218_v42, %v9227_v61  ;;  %v8918_v50 = vrot.slane %v8916_v23, 4  ;;  %v9035_v35 = vsel %vm1256_vm4, %v9032_v37, %v9034_v15  ;;  %v9230_v39 = vshrl.u32 %v9101_v45, 16  ;;  %11359 = vmatmul.mubr.bf16.gmra.mrb[72].mxu0 %v18673_v31 }
 0x5d5   : > { %v9454_v28 = vor.u32 %v9453_v1, %v9450_v56  ;;  %v9233_v22 = vshll.u32 %v9101_v45, 16  ;;  %vm19962_vm2 = vcmp.ne.s16.totalorder %v19961_v7, 0  ;;  %11366 = vmatprep.mubr.bf16.mxu0 %v9437_v4  ;;  %v19964_v1 = vld [vmem:[#allocation54_spill] sm:$0xff] }
 0x5d6   : > { %v9320_v40 = vsel %vm19962_vm2, %v18572_v32, 0  ;;  %vm19963_vm11 = vmmov %vm19962_vm2  ;;  %v8919_v29 = vor.u32 %v8918_v50, %v8915_v43  ;;  %v9232_v11 = vrot.slane %v9230_v39, 4  ;;  %vm19965_vm3 = vcmp.ne.s16.totalorder %v19964_v1, 0 }
 0x5d7   : > { %v8785_v3 = vsel %vm19963_vm11, %v18569_v13, 0  ;;  %v9457_v25 = vshrl.u32 %v9320_v40, 16  ;;  %v9460_v42 = vshll.u32 %v9320_v40, 16  ;;  %v9455_v10 = vsel %vm1854_vm8, %v9445_v17, %v9454_v28 }
 0x5d8   : > { %v9235_v2 = vrot.slane %v9233_v22, 5  ;;  %v8922_v57 = vshrl.u32 %v8785_v3, 16  ;;  %v8925_v37 = vshll.u32 %v8785_v3, 16  ;;  %v8920_v53 = vsel %vm1854_vm8, %v8910_v20, %v8919_v29  ;;  %11206 = vmatmul.mubr.bf16.gmra.mrb[140].mxu1 %v18685_v34 }
 0x5d9   : > { %v9459_v19 = vrot.slane %v9457_v25, 3  ;;  %v9462_v23 = vrot.slane %v9460_v42, 4  ;;  %v9102_v43 = vsel %vm19965_vm3, %v18569_v13, 0  ;;  %11213 = vmatprep.mubr.bf16.mxu1 %v18676_v46  ;;  %v8769_v46 = vld [vmem:[#allocation2 + $0x80] sm:$0xf]  ;;  %v19966_v42 = vld [vmem:[#allocation51_spill] sm:$0xff] }
 0x5da   : > { %v9236_v32 = vor.u32 %v9235_v2, %v9232_v11  ;;  %v8924_v45 = vrot.slane %v8922_v57, 3  ;;  %v8927_v56 = vrot.slane %v8925_v37, 4  ;;  %v9239_v17 = vshrl.u32 %v9102_v43, 16  ;;  %v9605_v25 = vld [vmem:[#allocation2 + $0x8] sm:$0xf0] }
 0x5db   : > { %v18723_v50 = vor.u32 %v9462_v23, %v9459_v19  ;;  %v9242_v39 = vshll.u32 %v9102_v43, 16  ;;  %vm19967_vm13 = vcmp.ne.s16.totalorder %v19966_v42, 0  ;;  %v8987_v2 = vld [vmem:[#allocation2 + $0x80] sm:$0xf]  ;;  %v19969_v57 = vld [vmem:[#allocation28_spill] sm:$0xff]  ;;  %vm19978_vm3 = vcmp.ne.s16.totalorder %v16089_v60, 0 }
 0x5dc   : > { %v9237_v31 = vsel %vm1676_vm0, %v9227_v61, %v9236_v32  ;;  %v18727_v22 = vor.u32 %v8927_v56, %v8924_v45  ;;  %v9241_v20 = vrot.slane %v9239_v17, 4  ;;  %11367 = vmatmul.mubr.bf16.gmra.mrb[76].mxu0 %v9219_v18  ;;  %v9304_v61 = vld [vmem:[#allocation2 + $0x88] sm:$0xf]  ;;  %vm19968_vm12 = vmmov %vm19967_vm13  ;;  %vm19970_vm5 = vcmp.ne.s16.totalorder %v19969_v57, 0  ;;  %v9086_v23 = vld [vmem:[#allocation2 + $0x80] sm:$0x1f] }
 0x5dd   : > { %v9464_v4 = vsel %vm1854_vm8, %v9454_v28, %v18723_v50  ;;  %v9244_v40 = vrot.slane %v9242_v39, 5  ;;  %11374 = vmatprep.mubr.bf16.mxu0 %v9446_v44  ;;  %v18739_v28 = vld [vmem:[#allocation2 + $0x10] sm:$0xff]  ;;  %v8786_v18 = vsel %vm19968_vm12, %v8769_v46, 0  ;;  %v9622_v44 = vsel %vm19970_vm5, %v9605_v25, 0 }
 0x5de   : > { %v8929_v3 = vsel %vm1854_vm8, %v8919_v29, %v18727_v22  ;;  %v9321_v29 = vsel %vm19967_vm13, %v9304_v61, 0  ;;  %v8931_v19 = vshrl.u32 %v8786_v18, 16  ;;  %v9640_v45 = vshrl.u32 %v9622_v44, 16  ;;  %v10042_v61 = vld [vmem:[#allocation2 + $0x18] sm:$0xff] }
 0x5df   : > { %v18734_v11 = vor.u32 %v9244_v40, %v9241_v20  ;;  %v9469_v37 = vshll.u32 %v9321_v29, 16  ;;  %v9643_v56 = vshll.u32 %v9622_v44, 16  ;;  %v19972_v20 = vld [vmem:[#allocation53_spill] sm:$0xff]  ;;  %vm19980_vm13 = vcmp.ne.s16.totalorder %v16146_v30, 0 }
 0x5e0   : > { %11214 = vmatmul.mubr.bf16.gmra.mrb[144].mxu1 %v8911_v36  ;;  %v9623_v36 = vsel %vm2411_vm1, %v18739_v28, 0  ;;  %vm19973_vm2 = vcmp.ne.s16.totalorder %v19972_v20, 0  ;;  %v8933_v46 = vrot.slane %v8931_v19, 3  ;;  %vm19981_vm12 = vcmp.ne.s16.totalorder %v19911_v41, 0 }
 0x5e1   : > { %v9246_v34 = vsel %vm1676_vm0, %v9236_v32, %v18734_v11  ;;  %11221 = vmatprep.mubr.bf16.mxu1 %v18688_v12  ;;  %v9036_v32 = vrot.slane %v8987_v2, 4  ;;  %v9648_v43 = vshrl.u32 %v9623_v36, 16  ;;  %v9651_v17 = vshll.u32 %v9623_v36, 16  ;;  %v9823_v12 = vld [vmem:[#allocation2 + $0x10] sm:$0xf8] }
 0x5e2   : > { %v9471_v39 = vrot.slane %v9469_v37, 4  ;;  %v9103_v40 = vsel %vm19973_vm2, %v9086_v23, 0  ;;  %v9624_v37 = vsel %vm2412_vm10, %v10042_v61, 0  ;;  %vm19982_vm5 = vcmp.ne.s16.totalorder %v19915_v9, 0 }
 0x5e3   : > { %v9037_v25 = vsel %vm1256_vm4, %v9034_v15, %v9036_v32  ;;  %v9650_v2 = vrot.slane %v9648_v43, 4  ;;  %v9653_v44 = vrot.slane %v9651_v17, 5  ;;  %v9248_v36 = vshrl.u32 %v9103_v40, 16  ;;  %v19975_v32 = vld [vmem:[#allocation27_spill] sm:$0xff]  ;;  %v10041_v43 = vld [vmem:[#allocation2 + $0x10] sm:$0xf0] }
 0x5e4   : > { %11375 = vmatmul.mubr.bf16.gmra.mrb[80].mxu0 %v9228_v38  ;;  %v9466_v38 = vshrl.u32 %v9321_v29, 16  ;;  %v9642_v29 = vrot.slane %v9640_v45, 4  ;;  %v9657_v19 = vshrl.u32 %v9624_v37, 16  ;;  %vm19976_vm11 = vcmp.ne.s16.totalorder %v19975_v32, 0 }
 0x5e5   : > { %11382 = vmatprep.mubr.bf16.mxu0 %v9455_v10  ;;  %v8934_v10 = vshll.u32 %v8786_v18, 16  ;;  %v9645_v18 = vrot.slane %v9643_v56, 5  ;;  %v9654_v13 = vor.u32 %v9653_v44, %v9650_v2  ;;  %v9250_v42 = vrot.slane %v9248_v36, 4 }
 0x5e6   : > { %v9841_v45 = vsel %vm19976_vm11, %v10042_v61, 0  ;;  %v9541_v36 = vrot.slane %v18739_v28, 4  ;;  %vm19983_vm2 = vcmp.ne.s16.totalorder %v16315_v59, 0  ;;  %vm19984_vm11 = vcmp.ne.s16.totalorder %v19919_v52, 0 }
 0x5e8   : > { %11222 = vmatmul.mubr.bf16.gmra.mrb[148].mxu1 %v8920_v53  ;;  %v9468_v53 = vrot.slane %v9466_v38, 3 }
 0x5e9   : > { %11229 = vmatprep.mubr.bf16.mxu1 %v9035_v35  ;;  %v8936_v35 = vrot.slane %v8934_v10, 4  ;;  %v9660_v10 = vshll.u32 %v9624_v37, 16 }
 0x5ea   : > { %v9472_v23 = vor.u32 %v9471_v39, %v9468_v53  ;;  %v9840_v53 = vsel %vm1820_vm9, %v9823_v12, 0  ;;  %v18765_v39 = vld [vmem:[#allocation2 + $0x20] sm:$0xff]  ;;  %vm19979_vm9 = vcmp.ne.s16.totalorder %v19900_v54, 0 }
 0x5eb   : > { %v8937_v57 = vor.u32 %v8936_v35, %v8933_v46  ;;  %v9659_v46 = vrot.slane %v9657_v19, 4  ;;  %v9662_v35 = vrot.slane %v9660_v10, 5  ;;  %v9858_v2 = vshrl.u32 %v9840_v53, 16  ;;  %v18774_v10 = vld [vmem:[#allocation2 + $0x28] sm:$0xff] }
 0x5ec   : > { %11383 = vmatmul.mubr.bf16.gmra.mrb[84].mxu0 %v9237_v31  ;;  %v9251_v31 = vshll.u32 %v9103_v40, 16  ;;  %v9506_v40 = vld [vmem:[#allocation2 + $0x8] sm:$0xf0]  ;;  %v9861_v44 = vshll.u32 %v9840_v53, 16  ;;  %v10078_v54 = vrot.slane %v18765_v39, 4 }
 0x5ed   : > { %11390 = vmatprep.mubr.bf16.mxu0 %v9464_v4  ;;  %v9646_v4 = vor.u32 %v9645_v18, %v9642_v29  ;;  %v8938_v56 = vsel %vm1854_vm8, %v18727_v22, %v8937_v57  ;;  %v9869_v29 = vshll.u32 %v9841_v45, 16  ;;  %v9625_v22 = vsel %vm19978_vm3, %v18765_v39, 0 }
 0x5ee   : > { %v9253_v15 = vrot.slane %v9251_v31, 5  ;;  %v10075_v57 = vrot.slane %v10041_v43, 4  ;;  %v9540_v12 = vrot.slane %v9506_v40, 4  ;;  %v9663_v31 = vor.u32 %v9662_v35, %v9659_v46 }
 0x5ef   : > { %v9863_v32 = vrot.slane %v9861_v44, 4  ;;  %v9843_v44 = vsel %vm19981_vm12, %v18774_v10, 0  ;;  %vm19985_vm3 = vcmp.ne.s16.totalorder %v19922_v58, 0  ;;  %vm19988_vm12 = vcmp.ne.s16.totalorder %v19929_v27, 0 }
 0x5f0   : > { %11230 = vmatmul.mubr.bf16.gmra.mrb[152].mxu1 %v8929_v3  ;;  %v9473_v3 = vsel %vm1854_vm8, %v18723_v50, %v9472_v23  ;;  %v9254_v18 = vor.u32 %v9253_v15, %v9250_v42  ;;  %v10076_v50 = vrot.slane %v10042_v61, 4  ;;  %v9871_v23 = vrot.slane %v9869_v29, 4 }
 0x5f1   : > { %11237 = vmatprep.mubr.bf16.mxu1 %v9037_v25  ;;  %v9866_v25 = vshrl.u32 %v9841_v45, 16  ;;  %v9669_v42 = vshll.u32 %v9625_v22, 16  ;;  %v9860_v15 = vrot.slane %v9858_v2, 3  ;;  %v9842_v45 = vsel %vm19979_vm9, %v18765_v39, 0 }
 0x5f2   : > { %v9255_v19 = vsel %vm1676_vm0, %v18734_v11, %v9254_v18  ;;  %v10077_v61 = vsel %vm1256_vm4, %v10075_v57, %v10076_v50  ;;  %v9542_v28 = vsel %vm1256_vm4, %v9540_v12, %v9541_v36  ;;  %v9626_v11 = vsel %vm19980_vm13, %v18774_v10, 0  ;;  %v18793_v57 = vld [vmem:[#allocation2 + $0x30] sm:$0xff] }
 0x5f3   : > { %v9868_v37 = vrot.slane %v9866_v25, 3  ;;  %v9671_v17 = vrot.slane %v9669_v42, 5  ;;  %v9875_v53 = vshrl.u32 %v9842_v45, 16  ;;  %v9878_v40 = vshll.u32 %v9842_v45, 16  ;;  %v14884_v45 = vld [vmem:[#allocation11 + $0x218] sm:$0xff]  }
 0x5f4   : > { %11391 = vmatmul.mubr.bf16.gmra.mrb[88].mxu0 %v9246_v34  ;;  %v9655_v34 = vsel %vm1676_vm0, %v9646_v4, %v9654_v13  ;;  %v9666_v4 = vshrl.u32 %v9625_v22, 16  ;;  %v9864_v46 = vor.u32 %v9863_v32, %v9860_v15  ;;  %v9675_v25 = vshrl.u32 %v9626_v11, 16  ;;  %v18800_v32 = vld [vmem:[#allocation2 + $0x38] sm:$0xff] }
 0x5f5   : > { %11398 = vmatprep.mubr.bf16.mxu0 %v9473_v3  ;;  %v9664_v3 = vsel %vm1676_vm0, %v9654_v13, %v9663_v31  ;;  %v9678_v29 = vshll.u32 %v9626_v11, 16  ;;  %v9877_v18 = vrot.slane %v9875_v53, 3  ;;  %v9880_v2 = vrot.slane %v9878_v40, 4  ;;  %v14885_v40 = vld [vmem:[#allocation11 + $0x220] sm:$0xff]  }
 0x5f6   : > { %v9668_v43 = vrot.slane %v9666_v4, 4  ;;  %v10079_v22 = vsel %vm1256_vm4, %v10076_v50, %v10078_v54  ;;  %v9544_v39 = vsel %vm1256_vm4, %v9541_v36, %v10076_v50  ;;  %v9677_v12 = vrot.slane %v9675_v25, 4  ;;  %v14883_v4 = vld [vmem:[#allocation11 + $0x210] sm:$0xff]  }
 0x5f7   : > { %v9881_v42 = vor.u32 %v9880_v2, %v9877_v18  ;;  %v10082_v25 = vrot.slane %v18793_v57, 4  ;;  %v9845_v2 = vsel %vm19984_vm11, %v18800_v32, 0  ;;  %vm19986_vm9 = vcmp.ne.s16.totalorder %v19800_v49, 0 }
 0x5f8   : > { %11238 = vmatmul.mubr.bf16.gmra.mrb[156].mxu1 %v8938_v56  ;;  %v9872_v56 = vor.u32 %v9871_v23, %v9868_v37  ;;  %v9672_v13 = vor.u32 %v9671_v17, %v9668_v43  ;;  %v9680_v37 = vrot.slane %v9678_v29, 5  ;;  %v9884_v23 = vshrl.u32 %v9843_v44, 16 }
 0x5f9   : > { %11439 = vmatprep.mubr.bf16.mxu1 %v9655_v34  ;;  %v14882_v34 = vld [vmem:[#allocation11 + $0x208] sm:$0xff]   ;;  %v9628_v43 = vsel %vm19983_vm2, %v18800_v32, 0  ;;  %vm19987_vm13 = vcmp.ne.s16.totalorder %v19926_v8, 0  ;;  %v18841_v8 = vld [vmem:[#allocation2 + $0x58] sm:$0xff]  ;;  %vm19990_vm2 = vcmp.ne.s16.totalorder %v19933_v6, 0  ;;  %vm19991_vm11 = vcmp.ne.s16.totalorder %v16146_v30, 0 }
 0x5fa   : > { %v9873_v35 = vsel %vm1854_vm8, %v9864_v46, %v9872_v56  ;;  %v9673_v41 = vsel %vm1676_vm0, %v9663_v31, %v9672_v13  ;;  %v9681_v50 = vor.u32 %v9680_v37, %v9677_v12  ;;  %v9886_v36 = vrot.slane %v9884_v23, 3 }
 0x5fb   : > { %v9696_v29 = vshll.u32 %v9628_v43, 16 }
 0x5fc   : > { %11399 = vmatmul.mubr.bf16.gmra.mrb[92].mxu0 %v9255_v19  ;;  %v9887_v19 = vshll.u32 %v9843_v44, 16  ;;  %v18815_v44 = vld [vmem:[#allocation2 + $0x40] sm:$0xff] }
 0x5fd   : > { %11600 = vmatprep.mubr.bf16.mxu0 %v10077_v61  ;;  %v10080_v61 = vrot.slane %v18774_v10, 4  ;;  %v9844_v10 = vsel %vm19982_vm5, %v18793_v57, 0  ;;  %v9698_v23 = vrot.slane %v9696_v29, 5  ;;  %v9629_v52 = vsel %vm2417_vm14, %v18815_v44, 0 }
 0x5fe   : > { %v9889_v15 = vrot.slane %v9887_v19, 4  ;;  %v9893_v17 = vshrl.u32 %v9844_v10, 16  ;;  %v9896_v53 = vshll.u32 %v9844_v10, 16  ;;  %v9902_v19 = vshrl.u32 %v9845_v2, 16 }
 0x5ff   : > { %v10081_v11 = vsel %vm1256_vm4, %v10078_v54, %v10080_v61  ;;  %v9693_v54 = vshrl.u32 %v9628_v43, 16  ;;  %v10083_v12 = vsel %vm1256_vm4, %v10080_v61, %v10082_v25  ;;  %v10084_v61 = vrot.slane %v18800_v32, 4 }
 0x600   : > { %11440 = vmatmul.mubr.bf16.vlgmr.msra.gmra.mrb[160].mxu1 %v9542_v28  ;;  %v9882_v28 = vsel %vm1854_vm8, %v9872_v56, %v9881_v42  ;;  %v9682_v56 = vsel %vm1676_vm0, %v9672_v13, %v9681_v50  ;;  %v9890_v46 = vor.u32 %v9889_v15, %v9886_v36  ;;  %v9898_v18 = vrot.slane %v9896_v53, 4  ;;  %v14887_v36 = vld [vmem:[#allocation11 + $0x230] sm:$0xff]  }
 0x601   : > { %11447 = vmatprep.mubr.bf16.mxu1 %v9664_v3  ;;  %v9695_v37 = vrot.slane %v9693_v54, 4  ;;  %v9846_v15 = vsel %vm19985_vm3, %v18815_v44, 0  ;;  %vm19989_vm5 = vcmp.ne.s16.totalorder %v19940_v63, 0  ;;  %vm19992_vm3 = vcmp.ne.s16.totalorder %v19945_v47, 0 }
 0x602   : > { %v9891_v13 = vsel %vm1854_vm8, %v9881_v42, %v9890_v46  ;;  %v9914_v53 = vshll.u32 %v9846_v15, 16 }
 0x604   : > { %11601 = vmatmul.mubr.bf16.vlgmr.msra.gmra.mrb[96].mxu0 %v9873_v35 }
 0x605   : > { %11608 = vmatprep.mubr.bf16.mxu0 %v10079_v22  ;;  %14414 = vmatpush3.bf16.msra.mxu0 %v18516_v5  ;;  %v9627_v5 = vsel %vm2415_vm6, %v18793_v57, 0 }
 0x606   : > { %14415 = vmatprep.subr.bf16.mxu0 %v14882_v34  ;;  %v9684_v3 = vshrl.u32 %v9627_v5, 16  ;;  %v9687_v31 = vshll.u32 %v9627_v5, 16 }
 0x608   : > { %11448 = vmatmul.mubr.bf16.gmra.mrb[164].mxu1 %v9544_v39  ;;  %v9686_v35 = vrot.slane %v9684_v3, 4  ;;  %v9689_v9 = vrot.slane %v9687_v31, 5  ;;  %v9705_v3 = vshll.u32 %v9629_v52, 16 }
 0x609   : > { %11455 = vmatprep.mubr.bf16.mxu1 %v9673_v41  ;;  %14416 = vmatpush3.bf16.msra.mxu0 %v14882_v34  ;;  %v9895_v34 = vrot.slane %v9893_v17, 3  ;;  %v18822_v41 = vld [vmem:[#allocation2 + $0x48] sm:$0xff]  ;;  %v9911_v17 = vshrl.u32 %v9846_v15, 16 }
 0x60a   : > { %14417 = vmatprep.subr.bf16.mxu0 %v14883_v4  ;;  %v9690_v39 = vor.u32 %v9689_v9, %v9686_v35  ;;  %v9630_v31 = vsel %vm19986_vm9, %v18822_v41, 0  ;;  %v9847_v10 = vsel %vm19987_vm13, %v18822_v41, 0  ;;  %vm19993_vm9 = vcmp.ne.s16.totalorder %v16315_v59, 0 }
 0x60b   : > { %v9899_v5 = vor.u32 %v9898_v18, %v9895_v34  ;;  %v9711_v35 = vshrl.u32 %v9630_v31, 16  ;;  %v9714_v9 = vshll.u32 %v9630_v31, 16  ;;  %v9920_v54 = vshrl.u32 %v9847_v10, 16 }
 0x60c   : > { %11609 = vmatmul.mubr.bf16.gmra.mrb[100].mxu0 %v9882_v28  ;;  %v9691_v42 = vsel %vm1676_vm0, %v9681_v50, %v9690_v39  ;;  %v9702_v28 = vshrl.u32 %v9629_v52, 16  ;;  %v9699_v50 = vor.u32 %v9698_v23, %v9695_v37  ;;  %v9923_v29 = vshll.u32 %v9847_v10, 16 }
 0x60d   : > { %11616 = vmatprep.mubr.bf16.mxu0 %v10081_v11  ;;  %14418 = vmatpush3.bf16.msra.mxu0 %v14883_v4  ;;  %v9905_v4 = vshll.u32 %v9845_v2, 16  ;;  %v9900_v58 = vsel %vm1854_vm8, %v9890_v46, %v9899_v5  ;;  %v10085_v34 = vsel %vm1256_vm4, %v10082_v25, %v10084_v61  ;;  %v10086_v46 = vrot.slane %v18815_v44, 4 }
 0x60e   : > { %14419 = vmatprep.subr.bf16.mxu0 %v14884_v45  ;;  %v9704_v18 = vrot.slane %v9702_v28, 4  ;;  %v9707_v2 = vrot.slane %v9705_v3, 5  ;;  %v9916_v52 = vrot.slane %v9914_v53, 4  ;;  %v9632_v25 = vsel %vm19989_vm5, %v18841_v8, 0 }
 0x60f   : > { %v9907_v43 = vrot.slane %v9905_v4, 4  ;;  %v9913_v4 = vrot.slane %v9911_v17, 3  ;;  %v9716_v15 = vrot.slane %v9714_v9, 5  ;;  %v9922_v28 = vrot.slane %v9920_v54, 3 }
 0x610   : > { %11456 = vmatmul.mubr.bf16.gmra.mrb[168].mxu1 %v10079_v22  ;;  %v14886_v22 = vld [vmem:[#allocation11 + $0x228] sm:$0xff]   ;;  %v9708_v3 = vor.u32 %v9707_v2, %v9704_v18  ;;  %v10088_v31 = vrot.slane %v18822_v41, 4  ;;  %v10092_v9 = vrot.slane %v18841_v8, 4  ;;  %v9849_v54 = vsel %vm19990_vm2, %v18841_v8, 0 }
 0x611   : > { %11463 = vmatprep.mubr.bf16.mxu1 %v9682_v56  ;;  %14420 = vmatpush3.bf16.msra.mxu0 %v14884_v45  ;;  %v18829_v45 = vld [vmem:[#allocation2 + $0x50] sm:$0xff]  ;;  %v9917_v53 = vor.u32 %v9916_v52, %v9913_v4  ;;  %v9938_v4 = vshrl.u32 %v9849_v54, 16  ;;  %v9941_v52 = vshll.u32 %v9849_v54, 16  ;;  %v10164_v59 = vsel %vm2417_vm14, %v18822_v41, 0  ;;  %vm19995_vm14 = vmmov %vm19989_vm5 }
 0x612   : > { %14421 = vmatprep.subr.bf16.mxu0 %v14885_v40  ;;  %v14888_v56 = vld [vmem:[#allocation11 + $0x238] sm:$0xff]   ;;  %v9848_v23 = vsel %vm19988_vm12, %v18829_v45, 0  ;;  %v9709_v2 = vsel %vm1676_vm0, %v9699_v50, %v9708_v3  ;;  %vm19997_vm13 = vcmp.ne.s16.totalorder %v19950_v16, 0  ;;  %vm19998_vm12 = vcmp.ne.s16.totalorder %v19959_v0, 0 }
 0x613   : > { %v9929_v27 = vshrl.u32 %v9848_v23, 16  ;;  %v9932_v10 = vshll.u32 %v9848_v23, 16  ;;  %v18870_v23 = vld [vmem:[#allocation2 + $0x60] sm:$0xff]  ;;  %vm19999_vm5 = vcmp.ne.s16.totalorder %v19964_v1, 0  ;;  %vm20000_vm2 = vcmp.ne.s16.totalorder %v19937_v26, 0 }
 0x614   : > { %11617 = vmatmul.mubr.bf16.gmra.mrb[104].mxu0 %v9891_v13  ;;  %v18891_v30 = vsel %vm19992_vm3, %v18870_v23, 0 }
 0x615   : > { %11624 = vmatprep.mubr.bf16.mxu0 %v10083_v12  ;;  %14422 = vmatpush3.bf16.msra.mxu0 %v14885_v40  ;;  %v9631_v40 = vsel %vm2419_vm15, %v18829_v45, 0  ;;  %v9934_v18 = vrot.slane %v9932_v10, 4 }
 0x616   : > { %14423 = vmatprep.subr.bf16.mxu0 %v14886_v22  ;;  %v9720_v13 = vshrl.u32 %v9631_v40, 16  ;;  %v9723_v37 = vshll.u32 %v9631_v40, 16 }
 0x618   : > { %11464 = vmatmul.mubr.bf16.gmra.mrb[172].mxu1 %v10081_v11  ;;  %v9904_v11 = vrot.slane %v9902_v19, 3 }
 0x619   : > { %11471 = vmatprep.mubr.bf16.mxu1 %v9691_v42  ;;  %14424 = vmatpush3.bf16.msra.mxu0 %v14886_v22  ;;  %v9700_v22 = vsel %vm1676_vm0, %v9690_v39, %v9699_v50  ;;  %v9713_v42 = vrot.slane %v9711_v35, 4  ;;  %v9925_v39 = vrot.slane %v9923_v29, 4  ;;  %v10087_v29 = vsel %vm1256_vm4, %v10084_v61, %v10086_v46 }
 0x61a   : > { %14425 = vmatprep.subr.bf16.mxu0 %v14887_v36  ;;  %v9908_v19 = vor.u32 %v9907_v43, %v9904_v11  ;;  %v9725_v11 = vrot.slane %v9723_v37, 5  ;;  %v9729_v43 = vshrl.u32 %v9632_v25, 16  ;;  %v10161_v61 = vsel %vm19991_vm11, %v18793_v57, 0  ;;  %vm20001_vm11 = vmmov %vm19997_vm13 }
 0x61b   : > { %v9717_v40 = vor.u32 %v9716_v15, %v9713_v42  ;;  %v9926_v35 = vor.u32 %v9925_v39, %v9922_v28  ;;  %v10210_v57 = vshrl.u32 %v10161_v61, 16  ;;  %v10162_v39 = vsel %vm2415_vm6, %v18800_v32, 0 }
 0x61c   : > { %11625 = vmatmul.mubr.bf16.gmra.mrb[108].mxu0 %v9900_v58  ;;  %v9732_v58 = vshll.u32 %v9632_v25, 16  ;;  %v9909_v17 = vsel %vm1854_vm8, %v9899_v5, %v9908_v19  ;;  %v9931_v5 = vrot.slane %v9929_v27, 3  ;;  %v9918_v6 = vsel %vm1854_vm8, %v9908_v19, %v9917_v53 }
 0x61d   : > { %11632 = vmatprep.mubr.bf16.mxu0 %v10085_v34  ;;  %14426 = vmatpush3.bf16.msra.mxu0 %v14887_v36  ;;  %v9722_v36 = vrot.slane %v9720_v13, 4  ;;  %v9731_v13 = vrot.slane %v9729_v43, 4  ;;  %v9927_v25 = vsel %vm1854_vm8, %v9917_v53, %v9926_v35  ;;  %v18907_v27 = vrot.slane %v9941_v52, 4 }
 0x61e   : > { %14427 = vmatprep.subr.bf16.mxu0 %v14888_v56  ;;  %v9734_v37 = vrot.slane %v9732_v58, 5  ;;  %v18886_v19 = vor.u32 %v9934_v18, %v9931_v5  ;;  %v10212_v10 = vrot.slane %v10210_v57, 4  ;;  %v10219_v43 = vshrl.u32 %v10162_v39, 16 }
 0x61f   : > { %v10222_v58 = vshll.u32 %v10162_v39, 16  ;;  %vm19994_vm6 = vcmp.ne.s16.totalorder %v19800_v49, 0  ;;  %v9741_v53 = vshll.u32 %v18891_v30, 16  ;;  %v10237_v18 = vshrl.u32 %v10164_v59, 16 }
 0x620   : > { %11472 = vmatmul.mubr.bf16.gmra.mrb[176].mxu1 %v10083_v12  ;;  %v10090_v12 = vrot.slane %v18829_v45, 4  ;;  %v18897_v28 = vor.u32 %v9734_v37, %v9731_v13  ;;  %v18912_v21 = vsel %vm1854_vm8, %v9926_v35, %v18886_v19  ;;  %v10166_v49 = vsel %vm2419_vm15, %v18841_v8, 0  ;;  %vm19996_vm15 = vmmov %vm19992_vm3 }
 0x621   : > { %11479 = vmatprep.mubr.bf16.mxu1 %v9700_v22  ;;  %14428 = vmatpush3.bf16.msra.mxu0 %v14888_v56  ;;  %v18865_v56 = vsel %vm1256_vm4, %v10086_v46, %v10088_v31  ;;  %v18868_v22 = vor.u32 %v9725_v11, %v9722_v36  ;;  %v9718_v46 = vsel %vm1676_vm0, %v9708_v3, %v9717_v40  ;;  %v10163_v3 = vsel %vm19993_vm9, %v18815_v44, 0  ;;  %vm20004_vm9 = vmmov %vm19998_vm12 }
 0x622   : > { %v18879_v50 = vsel %vm1256_vm4, %v10088_v31, %v10090_v12  ;;  %v18884_v42 = vsel %vm1256_vm4, %v10090_v12, %v10092_v9  ;;  %v18905_v31 = vrot.slane %v9938_v4, 3  ;;  %v9738_v11 = vshrl.u32 %v18891_v30, 16 }
 0x623   : > { %v18895_v15 = vsel %vm1676_vm0, %v9717_v40, %v18868_v22  ;;  %v10231_v32 = vshll.u32 %v10163_v3, 16  ;;  %v10165_v44 = vsel %vm19994_vm6, %v18829_v45, 0  ;;  %v10221_v12 = vrot.slane %v10219_v43, 4  ;;  %v18927_v45 = vld [vmem:[#allocation2 + $0x68] sm:$0xff] }
 0x624   : > { %11633 = vmatmul.mubr.bf16.gmra.mrb[112].mxu0 %v9909_v17  ;;  %v10228_v17 = vshrl.u32 %v10163_v3, 16  ;;  %v10224_v40 = vrot.slane %v10222_v58, 5  ;;  %v10246_v62 = vshrl.u32 %v10165_v44, 16  ;;  %v10249_v41 = vshll.u32 %v10165_v44, 16 }
 0x625   : > { %11640 = vmatprep.mubr.bf16.mxu0 %v10087_v29  ;;  %v10233_v35 = vrot.slane %v10231_v32, 5  ;;  %v10167_v52 = vsel %vm19995_vm14, %v18870_v23, 0  ;;  %v10255_v33 = vshrl.u32 %v10166_v49, 16  ;;  %v10258_v3 = vshll.u32 %v10166_v49, 16  ;;  %v18946_v32 = vld [vmem:[#allocation2 + $0x80] sm:$0xff]  ;;  %vm20006_vm14 = vmmov %vm19999_vm5 }
 0x626   : > { %v10230_v54 = vrot.slane %v10228_v17, 4  ;;  %v10225_v13 = vor.u32 %v10224_v40, %v10221_v12  ;;  %v10248_v57 = vrot.slane %v10246_v62, 4  ;;  %v10267_v58 = vshll.u32 %v10167_v52, 16 }
 0x627   : > { %v10257_v63 = vrot.slane %v10255_v33, 4  ;;  %v10168_v17 = vsel %vm19996_vm15, %v18927_v45, 0  ;;  %v10260_v44 = vrot.slane %v10258_v3, 5  ;;  %v9736_v26 = vsel %vm1676_vm0, %v18868_v22, %v18897_v28 }
 0x628   : > { %11480 = vmatmul.mubr.bf16.gmra.mrb[180].mxu1 %v10085_v34  ;;  %v10213_v34 = vshll.u32 %v10161_v61, 16  ;;  %v10234_v37 = vor.u32 %v10233_v35, %v10230_v54  ;;  %v18932_v61 = vld [vmem:[#allocation2 + $0x70] sm:$0xff]  ;;  %v10269_v35 = vrot.slane %v10267_v58, 5  ;;  %v10273_v47 = vshrl.u32 %v10168_v17, 16 }
 0x629   : > { %11487 = vmatprep.mubr.bf16.mxu1 %v9709_v2  ;;  %v10240_v2 = vshll.u32 %v10164_v59, 16  ;;  %v10169_v40 = vsel %vm19997_vm13, %v18932_v61, 0  ;;  %vm20002_vm3 = vcmp.ne.s16.totalorder %v19942_v48, 0  ;;  %v9635_v8 = vsel %vm2423_vm7, %v18932_v61, 0 }
 0x62a   : > { %v10215_v36 = vrot.slane %v10213_v34, 5  ;;  %v10251_v34 = vrot.slane %v10249_v41, 5  ;;  %v18962_v41 = vld [vmem:[#allocation2 + $0x88] sm:$0xff]  ;;  %vm20005_vm6 = vcmp.ne.s16.totalorder %v19952_v24, 0  ;;  %vm20007_vm15 = vcmp.ne.s16.totalorder %v19956_v14, 0 }
 0x62b   : > { %v10242_v4 = vrot.slane %v10240_v2, 5  ;;  %v10282_v2 = vshrl.u32 %v10169_v40, 16  ;;  %v9854_v1 = vsel %vm20007_vm15, %v18946_v32, 0  ;;  %vm20008_vm13 = vcmp.ne.s16.totalorder %v19972_v20, 0 }
 0x62c   : > { %11641 = vmatmul.mubr.bf16.gmra.mrb[116].mxu0 %v9918_v6  ;;  %v18922_v5 = vor.u32 %v10215_v36, %v10212_v10  ;;  %v10239_v6 = vrot.slane %v10237_v18, 4  ;;  %v10264_v10 = vshrl.u32 %v10167_v52, 16  ;;  %v18941_v36 = vld [vmem:[#allocation2 + $0x78] sm:$0xff]  ;;  %v10252_v43 = vor.u32 %v10251_v34, %v10248_v57 }
 0x62d   : > { %11648 = vmatprep.mubr.bf16.mxu0 %v18865_v56  ;;  %v10276_v18 = vshll.u32 %v10168_v17, 16  ;;  %v10170_v62 = vsel %vm2423_vm7, %v18941_v36, 0  ;;  %v10284_v57 = vrot.slane %v10282_v2, 4  ;;  %v9944_v2 = vor.u32 %v18907_v27, %v18905_v31 }
 0x62e   : > { %v10243_v39 = vor.u32 %v10242_v4, %v10239_v6  ;;  %v10266_v12 = vrot.slane %v10264_v10, 4  ;;  %v10171_v4 = vsel %vm19998_vm12, %v18946_v32, 0  ;;  %v10291_v33 = vshrl.u32 %v10170_v62, 16 }
 0x62f   : > { %v10278_v6 = vrot.slane %v10276_v18, 5  ;;  %v10294_v3 = vshll.u32 %v10170_v62, 16  ;;  %v10300_v10 = vshrl.u32 %v10171_v4, 16  ;;  %v10303_v17 = vshll.u32 %v10171_v4, 16 }
 0x630   : > { %11488 = vmatmul.mubr.bf16.gmra.mrb[184].mxu1 %v10087_v29  ;;  %v18936_v29 = vsel %vm1676_vm0, %v18922_v5, %v10225_v13  ;;  %v18949_v59 = vsel %vm1676_vm0, %v10234_v37, %v10243_v39  ;;  %v18956_v54 = vsel %vm1676_vm0, %v10243_v39, %v10252_v43  ;;  %v10270_v49 = vor.u32 %v10269_v35, %v10266_v12 }
 0x631   : > { %11495 = vmatprep.mubr.bf16.mxu1 %v9718_v46  ;;  %v18939_v46 = vsel %vm1676_vm0, %v10225_v13, %v10234_v37  ;;  %v10285_v13 = vshll.u32 %v10169_v40, 16  ;;  %v10275_v37 = vrot.slane %v10273_v47, 4  ;;  %v10293_v58 = vrot.slane %v10291_v33, 4 }
 0x632   : > { %v10296_v12 = vrot.slane %v10294_v3, 5  ;;  %v10302_v40 = vrot.slane %v10300_v10, 4  ;;  %v10305_v47 = vrot.slane %v10303_v17, 5  ;;  %v9743_v4 = vrot.slane %v9741_v53, 5 }
 0x633   : > { %v10287_v34 = vrot.slane %v10285_v13, 5  ;;  %v9740_v13 = vrot.slane %v9738_v11, 4  ;;  %v10094_v27 = vrot.slane %v18870_v23, 4  ;;  %vm20003_vm7 = vcmp.ne.s16.totalorder %v19947_v51, 0 }
 0x634   : > { %11649 = vmatmul.mubr.bf16.gmra.mrb[120].mxu0 %v9927_v25  ;;  %v10261_v25 = vor.u32 %v10260_v44, %v10257_v63  ;;  %v10172_v44 = vsel %vm19999_vm5, %v18962_v41, 0  ;;  %v10297_v62 = vor.u32 %v10296_v12, %v10293_v58  ;;  %vm20009_vm12 = vcmp.ne.s16.totalorder %v19961_v7, 0 }
 0x635   : > { %11656 = vmatprep.mubr.bf16.mxu0 %v18879_v50  ;;  %v10288_v63 = vor.u32 %v10287_v34, %v10284_v57  ;;  %v10309_v18 = vshrl.u32 %v10172_v44, 16  ;;  %v10095_v58 = vsel %vm1256_vm4, %v10092_v9, %v10094_v27  ;;  %v10096_v9 = vrot.slane %v18927_v45, 4 }
 0x636   : > { %v18969_v52 = vsel %vm1676_vm0, %v10252_v43, %v10261_v25  ;;  %v18972_v39 = vsel %vm1676_vm0, %v10261_v25, %v10270_v49  ;;  %v10312_v25 = vshll.u32 %v10172_v44, 16 }
 0x637   : > { %v19002_v31 = vsel %vm1676_vm0, %v10288_v63, %v10297_v62  ;;  %v10097_v55 = vsel %vm1256_vm4, %v10094_v27, %v10096_v9 }
 0x638   : > { %11496 = vmatmul.mubr.bf16.gmra.mrb[188].mxu1 %v18865_v56  ;;  %v10279_v56 = vor.u32 %v10278_v6, %v10275_v37  ;;  %v10311_v37 = vrot.slane %v10309_v18, 4  ;;  %v10314_v6 = vrot.slane %v10312_v25, 5  ;;  %v19022_v18 = vld [vmem:[#allocation16] ss:$0 sm:$0xff] }
 0x639   : > { %11503 = vmatprep.mubr.bf16.mxu1 %v18895_v15  ;;  %v9850_v15 = vsel %vm20000_vm2, %v18870_v23, 0  ;;  %v9851_v23 = vsel %vm20002_vm3, %v18927_v45, 0 }
 0x63a   : > { %v18981_v43 = vsel %vm1676_vm0, %v10270_v49, %v10279_v56  ;;  %v18985_v35 = vsel %vm1676_vm0, %v10279_v56, %v10288_v63  ;;  %v10306_v49 = vor.u32 %v10305_v47, %v10302_v40  ;;  %v9947_v22 = vshrl.u32 %v9850_v15, 16 }
 0x63b   : > { %v9950_v57 = vshll.u32 %v9850_v15, 16  ;;  %v19008_v16 = vor.u32 %v10314_v6, %v10311_v37  ;;  %v9744_v56 = vor.u32 %v9743_v4, %v9740_v13  ;;  %v9956_v40 = vshrl.u32 %v9851_v23, 16 }
 0x63c   : > { %11657 = vmatmul.mubr.bf16.gmra.mrb[124].mxu0 %v18912_v21  ;;  %v9634_v21 = vsel %vm20001_vm11, %v18927_v45, 0  ;;  %v19006_v11 = vsel %vm1676_vm0, %v10297_v62, %v10306_v49  ;;  %v9949_v3 = vrot.slane %v9947_v22, 3  ;;  %v9959_v47 = vshll.u32 %v9851_v23, 16 }
 0x63d   : > { %11664 = vmatprep.mubr.bf16.mxu0 %v18884_v42  ;;  %v9747_v34 = vshrl.u32 %v9634_v21, 16  ;;  %v9750_v33 = vshll.u32 %v9634_v21, 16  ;;  %v19014_v53 = vsel %vm1676_vm0, %v10306_v49, %v19008_v16  ;;  %v9952_v10 = vrot.slane %v9950_v57, 4 }
 0x63e   : > { %v9745_v48 = vsel %vm1676_vm0, %v18897_v28, %v9744_v56  ;;  %v9958_v49 = vrot.slane %v9956_v40, 3  ;;  %v9961_v37 = vrot.slane %v9959_v47, 4  ;;  %v9756_v4 = vshrl.u32 %v9635_v8, 16 }
 0x63f   : > { %v9749_v44 = vrot.slane %v9747_v34, 4  ;;  %v9752_v12 = vrot.slane %v9750_v33, 5  ;;  %v9759_v34 = vshll.u32 %v9635_v8, 16  ;;  %v9852_v45 = vsel %vm20003_vm7, %v18932_v61, 0 }
 0x640   : > { %11504 = vmatmul.mubr.bf16.gmra.mrb[192].mxu1 %v18879_v50  ;;  %v9945_v50 = vsel %vm1854_vm8, %v18886_v19, %v9944_v2  ;;  %v9968_v51 = vshll.u32 %v9852_v45, 16 }
 0x641   : > { %11511 = vmatprep.mubr.bf16.mxu1 %v9736_v26  ;;  %v13813_v30 = vpop.f32.mrb[96].mxu1  ;;  %v9953_v26 = vor.u32 %v9952_v10, %v9949_v3  ;;  %v9753_v21 = vor.u32 %v9752_v12, %v9749_v44  ;;  %v9758_v10 = vrot.slane %v9756_v4, 4 }
 0x642   : > { %v13814_v63 = vpop.f32.mrb[97].mxu1 }
 0x643   : > { %v13815_v19 = vadd.f32 %v13814_v63, %v13813_v30  ;;  %v13816_v17 = vpop.f32.mrb[98].mxu1  ;;  %v9754_v3 = vsel %vm1676_vm0, %v9744_v56, %v9753_v21  ;;  %v9636_v63 = vsel %vm20004_vm9, %v18941_v36, 0 }
 0x644   : > { %11665 = vmatmul.mubr.bf16.gmra.mrb[128].mxu0 %v9945_v50  ;;  %v13817_v15 = vpop.f32.mrb[99].mxu1  ;;  %v9765_v47 = vshrl.u32 %v9636_v63, 16 }
 0x645   : > { %11672 = vmatprep.mubr.bf16.mxu0 %v10095_v58  ;;  %v13818_v25 = vadd.f32 %v13817_v15, %v13816_v17  ;;  %v11120_v13 = vadd.f32 %v13815_v19, %v19022_v18  ;;  %v9761_v19 = vrot.slane %v9759_v34, 5  ;;  %v9965_v17 = vshrl.u32 %v9852_v45, 16 }
 0x646   : > { %v10098_v15 = vrot.slane %v18932_v61, 4  ;;  %v9767_v4 = vrot.slane %v9765_v47, 4 }
 0x647   : > { %v13925_v62 = vpop.f32.mrb[32].mxu0  ;;  %v11123_v28 = vadd.f32 %v13818_v25, %v19022_v18  ;;  %v9768_v25 = vshll.u32 %v9636_v63, 16  ;;  %v9762_v0 = vor.u32 %v9761_v19, %v9758_v10 }
 0x648   : > { %11512 = vmatmul.mubr.bf16.gmra.mrb[196].mxu1 %v18884_v42  ;;  %v13926_v6 = vpop.f32.mrb[33].mxu0  ;;  %v9954_v42 = vsel %vm1854_vm8, %v9944_v2, %v9953_v26  ;;  %v9962_v2 = vor.u32 %v9961_v37, %v9958_v49  ;;  %v10099_v49 = vsel %vm1256_vm4, %v10096_v9, %v10098_v15  ;;  %v9637_v9 = vsel %vm20006_vm14, %v18946_v32, 0 }
 0x649   : > { %11519 = vmatprep.mubr.bf16.mxu1 %v9745_v48  ;;  %v13927_v22 = vadd.f32 %v13926_v6, %v13925_v62  ;;  %v13928_v57 = vpop.f32.mrb[34].mxu0  ;;  %v9853_v62 = vsel %vm20005_vm6, %v18941_v36, 0  ;;  %v9763_v24 = vsel %vm1676_vm0, %v9753_v21, %v9762_v0 }
 0x64a   : > { %v13929_v50 = vpop.f32.mrb[35].mxu0  ;;  %v9963_v48 = vsel %vm1854_vm8, %v9953_v26, %v9962_v2  ;;  %v9977_v34 = vshll.u32 %v9853_v62, 16 }
 0x64b   : > { %v19038_v33 = vadd.f32 %v13927_v22, %v11120_v13  ;;  %v13930_v30 = vadd.f32 %v13929_v50, %v13928_v57  ;;  %v9967_v13 = vrot.slane %v9965_v17, 3  ;;  %v9974_v57 = vshrl.u32 %v9853_v62, 16 }
 0x64c   : > { %11673 = vmatmul.mubr.bf16.gmra.mrb[132].mxu0 %v9954_v42  ;;  %v9770_v42 = vrot.slane %v9768_v25, 5  ;;  %v9979_v17 = vrot.slane %v9977_v34, 4 }
 0x64d   : > { %11680 = vmatprep.mubr.bf16.mxu0 %v10097_v55  ;;  %v19044_v27 = vadd.f32 %v13930_v30, %v11123_v28  ;;  %v10100_v30 = vrot.slane %v18941_v36, 4  ;;  %v9976_v19 = vrot.slane %v9974_v57, 3 }
 0x64f   : > { %v13819_v23 = vpop.f32.mrb[100].mxu1 }
 0x650   : > { %11520 = vmatmul.mubr.bf16.gmra.mrb[200].mxu1 %v10095_v58  ;;  %v13820_v44 = vpop.f32.mrb[101].mxu1  ;;  %v9970_v58 = vrot.slane %v9968_v51, 4  ;;  %v9777_v51 = vshll.u32 %v9637_v9, 16 }
 0x651   : > { %11527 = vmatprep.mubr.bf16.mxu1 %v9754_v3  ;;  %v13821_v12 = vadd.f32 %v13820_v44, %v13819_v23  ;;  %v13822_v40 = vpop.f32.mrb[102].mxu1  ;;  %v9771_v23 = vor.u32 %v9770_v42, %v9767_v4  ;;  %v10101_v44 = vsel %vm1256_vm4, %v10098_v15, %v10100_v30  ;;  %v9983_v15 = vshrl.u32 %v9854_v1, 16 }
 0x652   : > { %v13823_v56 = vpop.f32.mrb[103].mxu1  ;;  %v9971_v50 = vor.u32 %v9970_v58, %v9967_v13  ;;  %v9779_v13 = vrot.slane %v9777_v51, 5  ;;  %v9986_v58 = vshll.u32 %v9854_v1, 16  ;;  %v9839_v1 = vld [vmem:[#allocation2 + $0x90] sm:$0xf] }
 0x653   : > { %v13824_v8 = vadd.f32 %v13823_v56, %v13822_v40  ;;  %v11128_v61 = vadd.f32 %v13821_v12, %v19022_v18  ;;  %v13931_v37 = vpop.f32.mrb[36].mxu0  ;;  %v9772_v12 = vsel %vm1676_vm0, %v9762_v0, %v9771_v23  ;;  %v9980_v40 = vor.u32 %v9979_v17, %v9976_v19 }
 0x654   : > { %11681 = vmatmul.mubr.bf16.gmra.mrb[136].mxu0 %v9963_v48  ;;  %v13932_v6 = vpop.f32.mrb[37].mxu0  ;;  %v9972_v21 = vsel %vm1854_vm8, %v9962_v2, %v9971_v50  ;;  %v19070_v56 = vrot.slane %v18946_v32, 4  ;;  %v9621_v48 = vld [vmem:[#allocation2 + $0x88] sm:$0x1f]  ;;  %v9985_v57 = vrot.slane %v9983_v15, 3  ;;  %v9988_v34 = vrot.slane %v9986_v58, 4 }
 0x655   : > { %11688 = vmatprep.mubr.bf16.mxu0 %v10099_v49  ;;  %v11131_v26 = vadd.f32 %v13824_v8, %v19022_v18  ;;  %v13933_v28 = vadd.f32 %v13932_v6, %v13931_v37  ;;  %v13934_v22 = vpop.f32.mrb[38].mxu0  ;;  %v9638_v32 = vsel %vm20008_vm13, %v9621_v48, 0  ;;  %v9981_v6 = vsel %vm1854_vm8, %v9971_v50, %v9980_v40  ;;  %v20010_v15 = vld [vmem:[#allocation51_spill] sm:$0xff] }
 0x656   : > { %v13935_v45 = vpop.f32.mrb[39].mxu0  ;;  %v9855_v50 = vsel %vm20009_vm12, %v18962_v41, 0  ;;  %v9989_v17 = vor.u32 %v9988_v34, %v9985_v57  ;;  %vm20011_vm5 = vcmp.ne.s16.totalorder %v20010_v15, 0 }
 0x657   : > { %v19059_v3 = vadd.f32 %v13933_v28, %v11128_v61  ;;  %v13936_v10 = vadd.f32 %v13935_v45, %v13934_v22 }
 0x658   : > { %11528 = vmatmul.mubr.bf16.gmra.mrb[204].mxu1 %v10097_v55  ;;  %v9774_v55 = vshrl.u32 %v9637_v9, 16  ;;  %v9783_v9 = vshrl.u32 %v9638_v32, 16  ;;  %v9990_v7 = vsel %vm1854_vm8, %v9980_v40, %v9989_v17 }
 0x659   : > { %11535 = vmatprep.mubr.bf16.mxu1 %v9763_v24  ;;  %v19061_v63 = vadd.f32 %v13936_v10, %v11131_v26  ;;  %v9786_v10 = vshll.u32 %v9638_v32, 16 }
 0x65a   : > { %v9776_v25 = vrot.slane %v9774_v55, 4 }
 0x65b   : > { %v9788_v51 = vrot.slane %v9786_v10, 5 }
 0x65c   : > { %11689 = vmatmul.mubr.bf16.gmra.mrb[140].mxu0 %v9972_v21  ;;  %v9780_v22 = vor.u32 %v9779_v13, %v9776_v25  ;;  %v9785_v21 = vrot.slane %v9783_v9, 4  ;;  %v10104_v25 = vrot.slane %v18962_v41, 4  ;;  %v10140_v41 = vld [vmem:[#allocation2 + $0x10] sm:$0xf0] }
 0x65d   : > { %11696 = vmatprep.mubr.bf16.mxu0 %v10101_v44  ;;  %v13825_v36 = vpop.f32.mrb[104].mxu1 }
 0x65e   : > { %v13826_v47 = vpop.f32.mrb[105].mxu1  ;;  %v10105_v58 = vsel %vm1256_vm4, %v19070_v56, %v10104_v25 }
 0x65f   : > { %v13827_v2 = vadd.f32 %v13826_v47, %v13825_v36  ;;  %v13828_v8 = vpop.f32.mrb[106].mxu1  ;;  %v13937_v14 = vpop.f32.mrb[40].mxu0  ;;  %v9995_v47 = vshll.u32 %v9855_v50, 16 }
 0x660   : > { %11536 = vmatmul.mubr.bf16.gmra.mrb[208].mxu1 %v10099_v49  ;;  %v13829_v62 = vpop.f32.mrb[107].mxu1  ;;  %v13938_v0 = vpop.f32.mrb[41].mxu0  ;;  %v10103_v49 = vsel %vm1256_vm4, %v10100_v30, %v19070_v56  ;;  %v9781_v30 = vsel %vm1676_vm0, %v9771_v23, %v9780_v22  ;;  %v9856_v23 = vsel %vm20011_vm5, %v9839_v1, 0 }
 0x661   : > { %11543 = vmatprep.mubr.bf16.mxu1 %v9772_v12  ;;  %v11136_v61 = vadd.f32 %v13827_v2, %v19022_v18  ;;  %v13830_v37 = vadd.f32 %v13829_v62, %v13828_v8  ;;  %v13939_v4 = vadd.f32 %v13938_v0, %v13937_v14  ;;  %v13940_v42 = vpop.f32.mrb[42].mxu0  ;;  %v9992_v12 = vshrl.u32 %v9855_v50, 16  ;;  %v10141_v8 = vld [vmem:[#allocation2 + $0x18] sm:$0xff]  ;;  %v9522_v50 = vld [vmem:[#allocation2 + $0x88] sm:$0xf] }
 0x662   : > { %v13941_v28 = vpop.f32.mrb[43].mxu0  ;;  %v9997_v40 = vrot.slane %v9995_v47, 4 }
 0x663   : > { %v11139_v26 = vadd.f32 %v13830_v37, %v19022_v18  ;;  %v19079_v24 = vadd.f32 %v13939_v4, %v11136_v61  ;;  %v13942_v45 = vadd.f32 %v13941_v28, %v13940_v42  ;;  %v9789_v37 = vor.u32 %v9788_v51, %v9785_v21  ;;  %v10057_v4 = vld [vmem:[#allocation2 + $0x90] sm:$0xf] }
 0x664   : > { %11697 = vmatmul.mubr.bf16.gmra.mrb[144].mxu0 %v9981_v6  ;;  %v9994_v6 = vrot.slane %v9992_v12, 3  ;;  %v10106_v51 = vrot.slane %v10057_v4, 4 }
 0x665   : > { %11704 = vmatprep.mubr.bf16.mxu0 %v10103_v49  ;;  %v19081_v19 = vadd.f32 %v13942_v45, %v11139_v26  ;;  %v10158_v26 = vsel %vm2411_vm1, %v10141_v8, 0  ;;  %v9790_v34 = vsel %vm1676_vm0, %v9780_v22, %v9789_v37  ;;  %v10001_v45 = vshrl.u32 %v9856_v23, 16 }
 0x666   : > { %v10183_v1 = vshrl.u32 %v10158_v26, 16  ;;  %v9998_v47 = vor.u32 %v9997_v40, %v9994_v6  ;;  %vm20015_vm1 = vcmp.ne.s16.totalorder %v16089_v60, 0 }
 0x668   : > { %11544 = vmatmul.mubr.bf16.gmra.mrb[212].mxu1 %v10101_v44  ;;  %v13831_v55 = vpop.f32.mrb[108].mxu1  ;;  %v10185_v37 = vrot.slane %v10183_v1, 4 }
 0x669   : > { %11551 = vmatprep.mubr.bf16.mxu1 %v9781_v30  ;;  %v13832_v36 = vpop.f32.mrb[109].mxu1  ;;  %v10004_v30 = vshll.u32 %v9856_v23, 16  ;;  %v14900_v23 = vld [vmem:[#allocation2 + $0x20] sm:$0xff] }
 0x66a   : > { %v13833_v48 = vadd.f32 %v13832_v36, %v13831_v55  ;;  %v13834_v2 = vpop.f32.mrb[110].mxu1  ;;  %v20013_v55 = vld [vmem:[#allocation28_spill] sm:$0xff]  ;;  %v10186_v36 = vshll.u32 %v10158_v26, 16 }
 0x66b   : > { %v13943_v13 = vpop.f32.mrb[44].mxu0  ;;  %v13835_v44 = vpop.f32.mrb[111].mxu1  ;;  %vm20014_vm2 = vcmp.ne.s16.totalorder %v20013_v55, 0  ;;  %v10006_v15 = vrot.slane %v10004_v30, 4 }
 0x66c   : > { %11705 = vmatmul.mubr.bf16.gmra.mrb[148].mxu0 %v9990_v7  ;;  %v11144_v14 = vadd.f32 %v13833_v48, %v19022_v18  ;;  %v13836_v62 = vadd.f32 %v13835_v44, %v13834_v2  ;;  %v13944_v61 = vpop.f32.mrb[45].mxu0  ;;  %v10157_v21 = vsel %vm20014_vm2, %v10140_v41, 0  ;;  %v9571_v2 = vrot.slane %v9522_v50, 4  ;;  %v10143_v7 = vld [vmem:[#allocation2 + $0x28] sm:$0xff] }
 0x66d   : > { %11712 = vmatprep.mubr.bf16.mxu0 %v10105_v58  ;;  %v13945_v0 = vadd.f32 %v13944_v61, %v13943_v13  ;;  %v13946_v32 = vpop.f32.mrb[46].mxu0  ;;  %v10175_v22 = vshrl.u32 %v10157_v21, 16  ;;  %v10178_v8 = vshll.u32 %v10157_v21, 16  ;;  %v9999_v13 = vsel %vm1854_vm8, %v9989_v17, %v9998_v47 }
 0x66e   : > { %v11147_v28 = vadd.f32 %v13836_v62, %v19022_v18  ;;  %v13947_v57 = vpop.f32.mrb[47].mxu0  ;;  %v10003_v44 = vrot.slane %v10001_v45, 3  ;;  %v10159_v58 = vsel %vm2412_vm10, %v14900_v23, 0  ;;  %v10188_v41 = vrot.slane %v10186_v36, 5 }
 0x66f   : > { %v19098_v9 = vadd.f32 %v13945_v0, %v11144_v14  ;;  %v13948_v10 = vadd.f32 %v13947_v57, %v13946_v32  ;;  %v10107_v14 = vsel %vm1256_vm4, %v10104_v25, %v10106_v51  ;;  %v9572_v32 = vsel %vm1256_vm4, %v19070_v56, %v9571_v2  ;;  %vm20016_vm4 = vmmov %vm20008_vm13 }
 0x670   : > { %11552 = vmatmul.mubr.bf16.gmra.mrb[216].mxu1 %v10103_v49  ;;  %v10160_v17 = vsel %vm20015_vm1, %v10143_v7, 0  ;;  %v10177_v40 = vrot.slane %v10175_v22, 4  ;;  %v10180_v4 = vrot.slane %v10178_v8, 5  ;;  %v10192_v38 = vshrl.u32 %v10159_v58, 16 }
 0x671   : > { %11559 = vmatprep.mubr.bf16.mxu1 %v9790_v34  ;;  %v19102_v12 = vadd.f32 %v13948_v10, %v11147_v28  ;;  %v10007_v25 = vor.u32 %v10006_v15, %v10003_v44  ;;  %v10195_v28 = vshll.u32 %v10159_v58, 16  ;;  %v10189_v34 = vor.u32 %v10188_v41, %v10185_v37 }
 0x672   : > { %v10201_v45 = vshrl.u32 %v10160_v17, 16  ;;  %v10204_v10 = vshll.u32 %v10160_v17, 16  ;;  %v10181_v21 = vor.u32 %v10180_v4, %v10177_v40  ;;  %v10194_v51 = vrot.slane %v10192_v38, 4 }
 0x673   : > { %v13837_v48 = vpop.f32.mrb[112].mxu1  ;;  %v10197_v2 = vrot.slane %v10195_v28, 5 }
 0x674   : > { %v13838_v49 = vpop.f32.mrb[113].mxu1  ;;  %11713 = vmatmul.mubr.bf16.gmra.mrb[152].mxu0 %v9999_v13  ;;  %v10190_v8 = vsel %vm1676_vm0, %v10181_v21, %v10189_v34  ;;  %v10206_v44 = vrot.slane %v10204_v10, 5 }
 0x675   : > { %v13839_v62 = vadd.f32 %v13838_v49, %v13837_v48  ;;  %v13840_v61 = vpop.f32.mrb[114].mxu1  ;;  %11720 = vmatprep.mubr.bf16.mxu0 %v10107_v14  ;;  %v10008_v48 = vsel %vm1854_vm8, %v9998_v47, %v10007_v25  ;;  %v10203_v49 = vrot.slane %v10201_v45, 4  ;;  %v10198_v14 = vor.u32 %v10197_v2, %v10194_v51 }
 0x676   : > { %v13841_v0 = vpop.f32.mrb[115].mxu1 }
 0x677   : > { %v13842_v6 = vadd.f32 %v13841_v0, %v13840_v61  ;;  %v11152_v42 = vadd.f32 %v13839_v62, %v19022_v18  ;;  %v13949_v26 = vpop.f32.mrb[48].mxu0  ;;  %v10207_v47 = vor.u32 %v10206_v44, %v10203_v49  ;;  %v10199_v40 = vsel %vm1676_vm0, %v10189_v34, %v10198_v14 }
 0x678   : > { %11560 = vmatmul.mubr.bf16.gmra.mrb[220].mxu1 %v9572_v32  ;;  %v13950_v57 = vpop.f32.mrb[49].mxu0 }
 0x679   : > { %v11155_v50 = vadd.f32 %v13842_v6, %v19022_v18  ;;  %v13951_v56 = vadd.f32 %v13950_v57, %v13949_v26  ;;  %v13952_v30 = vpop.f32.mrb[50].mxu0  ;;  %v10208_v26 = vsel %vm1676_vm0, %v10198_v14, %v10207_v47 }
 0x67a   : > { %v13953_v60 = vpop.f32.mrb[51].mxu0 }
 0x67b   : > { %v13843_v55 = vpop.f32.mrb[116].mxu1  ;;  %v19114_v1 = vadd.f32 %v13951_v56, %v11152_v42  ;;  %v13954_v36 = vadd.f32 %v13953_v60, %v13952_v30 }
 0x67c   : > { %v13844_v22 = vpop.f32.mrb[117].mxu1  ;;  %11721 = vmatmul.mubr.bf16.gmra.mrb[156].mxu0 %v10008_v48 }
 0x67d   : > { %v13845_v7 = vadd.f32 %v13844_v22, %v13843_v55  ;;  %v13846_v13 = vpop.f32.mrb[118].mxu1  ;;  %v19118_v15 = vadd.f32 %v13954_v36, %v11155_v50  ;;  %14429 = vmatprep.mubr.bf16.mxu0 %v10190_v8  ;;  %v10217_v36 = vsel %vm1676_vm0, %v10207_v47, %v18922_v5 }
 0x67e   : > { %v13847_v23 = vpop.f32.mrb[119].mxu1 }
 0x67f   : > { %v13848_v58 = vadd.f32 %v13847_v23, %v13846_v13  ;;  %v11160_v62 = vadd.f32 %v13845_v7, %v19022_v18  ;;  %v13955_v61 = vpop.f32.mrb[52].mxu0 }
 0x680   : > { %v13956_v37 = vpop.f32.mrb[53].mxu0 }
 0x681   : > { %v11163_v41 = vadd.f32 %v13848_v58, %v19022_v18  ;;  %v13957_v0 = vadd.f32 %v13956_v37, %v13955_v61  ;;  %v13958_v32 = vpop.f32.mrb[54].mxu0 }
 0x682   : > { %v13959_v17 = vpop.f32.mrb[55].mxu0 }
 0x683   : > { %v13849_v6 = vpop.f32.mrb[120].mxu1  ;;  %v19123_v4 = vadd.f32 %v13957_v0, %v11160_v62  ;;  %v13960_v38 = vadd.f32 %v13959_v17, %v13958_v32 }
 0x684   : > { %v13850_v42 = vpop.f32.mrb[121].mxu1  ;;  %14430 = vmatmul.mubr.bf16.vlgmr.msra.gmra.mrb[160].mxu0 %v10199_v40 }
 0x685   : > { %v13851_v25 = vadd.f32 %v13850_v42, %v13849_v6  ;;  %v13852_v28 = vpop.f32.mrb[122].mxu1  ;;  %v19126_v57 = vadd.f32 %v13960_v38, %v11163_v41  ;;  %14433 = vmatprep.mubr.bf16.mxu0 %v10208_v26 }
 0x686   : > { %v13853_v45 = vpop.f32.mrb[123].mxu1 }
 0x687   : > { %v13854_v10 = vadd.f32 %v13853_v45, %v13852_v28  ;;  %v11168_v50 = vadd.f32 %v13851_v25, %v19022_v18  ;;  %v13961_v56 = vpop.f32.mrb[56].mxu0 }
 0x688   : > { %v13962_v30 = vpop.f32.mrb[57].mxu0 }
 0x689   : > { %v11171_v34 = vadd.f32 %v13854_v10, %v19022_v18  ;;  %v13963_v60 = vadd.f32 %v13962_v30, %v13961_v56  ;;  %v13964_v55 = vpop.f32.mrb[58].mxu0 }
 0x68a   : > { %v13965_v21 = vpop.f32.mrb[59].mxu0 }
 0x68b   : > { %v13855_v51 = vpop.f32.mrb[124].mxu1  ;;  %v19132_v48 = vadd.f32 %v13963_v60, %v11168_v50  ;;  %v13966_v2 = vadd.f32 %v13965_v21, %v13964_v55 }
 0x68c   : > { %v13856_v22 = vpop.f32.mrb[125].mxu1  ;;  %14434 = vmatmul.mubr.bf16.gmra.mrb[164].mxu0 %v10217_v36 }
 0x68d   : > { %v13857_v8 = vadd.f32 %v13856_v22, %v13855_v51  ;;  %v13858_v7 = vpop.f32.mrb[126].mxu1  ;;  %v19134_v13 = vadd.f32 %v13966_v2, %v11171_v34  ;;  %14437 = vmatprep.mubr.bf16.mxu0 %v18936_v29 }
 0x68e   : > { %v13859_v49 = vpop.f32.mrb[127].mxu1 }
 0x68f   : > { %v13860_v44 = vadd.f32 %v13859_v49, %v13858_v7  ;;  %v11176_v23 = vadd.f32 %v13857_v8, %v19022_v18  ;;  %v13967_v58 = vpop.f32.mrb[60].mxu0 }
 0x690   : > { %v13968_v14 = vpop.f32.mrb[61].mxu0 }
 0x691   : > { %v11179_v62 = vadd.f32 %v13860_v44, %v19022_v18  ;;  %v13969_v5 = vadd.f32 %v13968_v14, %v13967_v58  ;;  %v13970_v61 = vpop.f32.mrb[62].mxu0 }
 0x692   : > { %v13971_v37 = vpop.f32.mrb[63].mxu0 }
 0x693   : > { %v13861_v47 = vpop.f32.mrb[128].mxu1  ;;  %v19139_v41 = vadd.f32 %v13969_v5, %v11176_v23  ;;  %v13972_v0 = vadd.f32 %v13971_v37, %v13970_v61 }
 0x694   : > { %v13862_v32 = vpop.f32.mrb[129].mxu1  ;;  %14438 = vmatmul.mubr.bf16.gmra.mrb[168].mxu0 %v18939_v46 }
 0x695   : > { %v13863_v17 = vadd.f32 %v13862_v32, %v13861_v47  ;;  %v13864_v29 = vpop.f32.mrb[130].mxu1  ;;  %v19142_v6 = vadd.f32 %v13972_v0, %v11179_v62  ;;  %14441 = vmatprep.mubr.bf16.mxu0 %v18949_v59 }
 0x696   : > { %v13865_v40 = vpop.f32.mrb[131].mxu1 }
 0x697   : > { %v13866_v38 = vadd.f32 %v13865_v40, %v13864_v29  ;;  %v11184_v42 = vadd.f32 %v13863_v17, %v19022_v18  ;;  %v13973_v26 = vpop.f32.mrb[64].mxu0 }
 0x698   : > { %v13974_v25 = vpop.f32.mrb[65].mxu0 }
 0x699   : > { %v11187_v28 = vadd.f32 %v13866_v38, %v19022_v18  ;;  %v13975_v45 = vadd.f32 %v13974_v25, %v13973_v26  ;;  %v13976_v10 = vpop.f32.mrb[66].mxu0  ;;  %v10156_v38 = vld [vmem:[#allocation2 + $0x90] sm:$0x1f] }
 0x69a   : > { %v13977_v50 = vpop.f32.mrb[67].mxu0 }
 0x69b   : > { %v13867_v56 = vpop.f32.mrb[132].mxu1  ;;  %v19147_v30 = vadd.f32 %v13975_v45, %v11184_v42  ;;  %v13978_v46 = vadd.f32 %v13977_v50, %v13976_v10  ;;  %v10173_v10 = vsel %vm20016_vm4, %v10156_v38, 0 }
 0x69c   : > { %v13868_v34 = vpop.f32.mrb[133].mxu1  ;;  %14442 = vmatmul.mubr.bf16.gmra.mrb[172].mxu0 %v18956_v54 }
 0x69d   : > { %v13869_v60 = vadd.f32 %v13868_v34, %v13867_v56  ;;  %v13870_v59 = vpop.f32.mrb[134].mxu1  ;;  %v19150_v55 = vadd.f32 %v13978_v46, %v11187_v28  ;;  %14445 = vmatprep.mubr.bf16.mxu0 %v18969_v52 }
 0x69e   : > { %v13871_v21 = vpop.f32.mrb[135].mxu1 }
 0x69f   : > { %v13872_v51 = vadd.f32 %v13871_v21, %v13870_v59  ;;  %v11192_v36 = vadd.f32 %v13869_v60, %v19022_v18  ;;  %v13979_v2 = vpop.f32.mrb[68].mxu0  ;;  %v10318_v59 = vshrl.u32 %v10173_v10, 16  ;;  %v10321_v21 = vshll.u32 %v10173_v10, 16 }
 0x6a0   : > { %v13980_v22 = vpop.f32.mrb[69].mxu0 }
 0x6a1   : > { %v11195_v8 = vadd.f32 %v13872_v51, %v19022_v18  ;;  %v13981_v7 = vadd.f32 %v13980_v22, %v13979_v2  ;;  %v13982_v49 = vpop.f32.mrb[70].mxu0 }
 0x6a2   : > { %v13983_v44 = vpop.f32.mrb[71].mxu0 }
 0x6a3   : > { %v13873_v23 = vpop.f32.mrb[136].mxu1  ;;  %v19155_v58 = vadd.f32 %v13981_v7, %v11192_v36  ;;  %v13984_v54 = vadd.f32 %v13983_v44, %v13982_v49  ;;  %v10320_v49 = vrot.slane %v10318_v59, 4  ;;  %v10323_v44 = vrot.slane %v10321_v21, 5 }
 0x6a4   : > { %v13874_v14 = vpop.f32.mrb[137].mxu1  ;;  %14446 = vmatmul.mubr.bf16.gmra.mrb[176].mxu0 %v18972_v39 }
 0x6a5   : > { %v13875_v62 = vadd.f32 %v13874_v14, %v13873_v23  ;;  %v13876_v52 = vpop.f32.mrb[138].mxu1  ;;  %v19158_v5 = vadd.f32 %v13984_v54, %v11195_v8  ;;  %14449 = vmatprep.mubr.bf16.mxu0 %v18981_v43 }
 0x6a6   : > { %v13877_v61 = vpop.f32.mrb[139].mxu1 }
 0x6a7   : > { %v13878_v37 = vadd.f32 %v13877_v61, %v13876_v52  ;;  %v11200_v47 = vadd.f32 %v13875_v62, %v19022_v18  ;;  %v13985_v0 = vpop.f32.mrb[72].mxu0  ;;  %v10324_v61 = vor.u32 %v10323_v44, %v10320_v49 }
 0x6a8   : > { %v13986_v32 = vpop.f32.mrb[73].mxu0 }
 0x6a9   : > { %v11203_v17 = vadd.f32 %v13878_v37, %v19022_v18  ;;  %v13987_v29 = vadd.f32 %v13986_v32, %v13985_v0  ;;  %v13988_v40 = vpop.f32.mrb[74].mxu0 }
 0x6aa   : > { %v13989_v42 = vpop.f32.mrb[75].mxu0 }
 0x6ab   : > { %v13879_v26 = vpop.f32.mrb[140].mxu1  ;;  %v19163_v39 = vadd.f32 %v13987_v29, %v11200_v47  ;;  %v13990_v25 = vadd.f32 %v13989_v42, %v13988_v40 }
 0x6ac   : > { %v13880_v28 = vpop.f32.mrb[141].mxu1  ;;  %14450 = vmatmul.mubr.bf16.gmra.mrb[180].mxu0 %v18985_v35 }
 0x6ad   : > { %v13881_v43 = vadd.f32 %v13880_v28, %v13879_v26  ;;  %v13882_v45 = vpop.f32.mrb[142].mxu1  ;;  %v19168_v50 = vadd.f32 %v13990_v25, %v11203_v17  ;;  %14453 = vmatprep.mubr.bf16.mxu0 %v19002_v31 }
 0x6ae   : > { %v13883_v56 = vpop.f32.mrb[143].mxu1 }
 0x6af   : > { %v13884_v46 = vadd.f32 %v13883_v56, %v13882_v45  ;;  %v11208_v34 = vadd.f32 %v13881_v43, %v19022_v18  ;;  %v13991_v60 = vpop.f32.mrb[76].mxu0 }
 0x6b0   : > { %v13992_v51 = vpop.f32.mrb[77].mxu0 }
 0x6b1   : > { %v11211_v36 = vadd.f32 %v13884_v46, %v19022_v18  ;;  %v13993_v35 = vadd.f32 %v13992_v51, %v13991_v60  ;;  %v13994_v2 = vpop.f32.mrb[78].mxu0 }
 0x6b2   : > { %v13995_v22 = vpop.f32.mrb[79].mxu0 }
 0x6b3   : > { %v13885_v8 = vpop.f32.mrb[144].mxu1  ;;  %v19173_v20 = vadd.f32 %v13993_v35, %v11208_v34  ;;  %v13996_v7 = vadd.f32 %v13995_v22, %v13994_v2 }
 0x6b4   : > { %v13886_v31 = vpop.f32.mrb[145].mxu1  ;;  %14454 = vmatmul.mubr.bf16.gmra.mrb[184].mxu0 %v19006_v11  ;;  %v10325_v11 = vsel %vm1676_vm0, %v19008_v16, %v10324_v61 }
 0x6b5   : > { %v13887_v23 = vadd.f32 %v13886_v31, %v13885_v8  ;;  %v13888_v54 = vpop.f32.mrb[146].mxu1  ;;  %v19176_v14 = vadd.f32 %v13996_v7, %v11211_v36  ;;  %14457 = vmatprep.mubr.bf16.mxu0 %v19014_v53 }
 0x6b6   : > { %v13889_v62 = vpop.f32.mrb[147].mxu1 }
 0x6b7   : > { %v13890_v52 = vadd.f32 %v13889_v62, %v13888_v54  ;;  %v11216_v37 = vadd.f32 %v13887_v23, %v19022_v18  ;;  %v13997_v47 = vpop.f32.mrb[80].mxu0 }
 0x6b8   : > { %v13998_v0 = vpop.f32.mrb[81].mxu0 }
 0x6b9   : > { %v11219_v32 = vadd.f32 %v13890_v52, %v19022_v18  ;;  %v13999_v17 = vadd.f32 %v13998_v0, %v13997_v47  ;;  %v14000_v29 = vpop.f32.mrb[82].mxu0 }
 0x6ba   : > { %v14001_v40 = vpop.f32.mrb[83].mxu0 }
 0x6bb   : > { %v13891_v38 = vpop.f32.mrb[148].mxu1  ;;  %v19183_v42 = vadd.f32 %v13999_v17, %v11216_v37  ;;  %v14002_v26 = vadd.f32 %v14001_v40, %v14000_v29 }
 0x6bc   : > { %v13892_v53 = vpop.f32.mrb[149].mxu1  ;;  %14458 = vmatmul.mubr.bf16.gmra.mrb[188].mxu0 %v10325_v11 }
 0x6bd   : > { %v13893_v25 = vadd.f32 %v13892_v53, %v13891_v38  ;;  %v13894_v28 = vpop.f32.mrb[150].mxu1  ;;  %v19185_v43 = vadd.f32 %v14002_v26, %v11219_v32 }
 0x6be   : > { %v13895_v45 = vpop.f32.mrb[151].mxu1 }
 0x6bf   : > { %v13896_v10 = vadd.f32 %v13895_v45, %v13894_v28  ;;  %v11224_v56 = vadd.f32 %v13893_v25, %v19022_v18  ;;  %v14003_v46 = vpop.f32.mrb[84].mxu0 }
 0x6c0   : > { %v14004_v34 = vpop.f32.mrb[85].mxu0 }
 0x6c1   : > { %v11227_v60 = vadd.f32 %v13896_v10, %v19022_v18  ;;  %v14005_v59 = vadd.f32 %v14004_v34, %v14003_v46  ;;  %v14006_v21 = vpop.f32.mrb[86].mxu0 }
 0x6c2   : > { %v14007_v16 = vpop.f32.mrb[87].mxu0 }
 0x6c3   : > { %v13897_v51 = vpop.f32.mrb[152].mxu1  ;;  %v19189_v36 = vadd.f32 %v14005_v59, %v11224_v56  ;;  %v14008_v35 = vadd.f32 %v14007_v16, %v14006_v21 }
 0x6c4   : > { %v13898_v2 = vpop.f32.mrb[153].mxu1 }
 0x6c5   : > { %v13899_v22 = vadd.f32 %v13898_v2, %v13897_v51  ;;  %v13900_v8 = vpop.f32.mrb[154].mxu1  ;;  %v19191_v7 = vadd.f32 %v14008_v35, %v11227_v60 }
 0x6c6   : > { %v13901_v49 = vpop.f32.mrb[155].mxu1 }
 0x6c7   : > { %v13902_v44 = vadd.f32 %v13901_v49, %v13900_v8  ;;  %v11232_v31 = vadd.f32 %v13899_v22, %v19022_v18  ;;  %v14009_v23 = vpop.f32.mrb[88].mxu0 }
 0x6c8   : > { %v14010_v54 = vpop.f32.mrb[89].mxu0 }
 0x6c9   : > { %v11235_v62 = vadd.f32 %v13902_v44, %v19022_v18  ;;  %v14011_v52 = vadd.f32 %v14010_v54, %v14009_v23  ;;  %v14012_v61 = vpop.f32.mrb[90].mxu0 }
 0x6ca   : > { %v14013_v37 = vpop.f32.mrb[91].mxu0 }
 0x6cb   : > { %v13903_v47 = vpop.f32.mrb[156].mxu1  ;;  %v19195_v0 = vadd.f32 %v14011_v52, %v11232_v31  ;;  %v14014_v32 = vadd.f32 %v14013_v37, %v14012_v61 }
 0x6cc   : > { %v13904_v17 = vpop.f32.mrb[157].mxu1 }
 0x6cd   : > { %v13905_v29 = vadd.f32 %v13904_v17, %v13903_v47  ;;  %v13906_v40 = vpop.f32.mrb[158].mxu1  ;;  %v19197_v38 = vadd.f32 %v14014_v32, %v11235_v62 }
 0x6ce   : > { %v13907_v11 = vpop.f32.mrb[159].mxu1 }
 0x6cf   : > { %v13908_v26 = vadd.f32 %v13907_v11, %v13906_v40  ;;  %v11240_v53 = vadd.f32 %v13905_v29, %v19022_v18  ;;  %v14015_v25 = vpop.f32.mrb[92].mxu0  ;;  %v20017_v40 = vld [vmem:[#allocation56_spill] sm:$0xff] }
 0x6d0   : > { %v14016_v28 = vpop.f32.mrb[93].mxu0 }
 0x6d1   : > { %v11243_v45 = vadd.f32 %v13908_v26, %v19022_v18  ;;  %v14017_v10 = vadd.f32 %v14016_v28, %v14015_v25  ;;  %v14018_v56 = vpop.f32.mrb[94].mxu0 }
 0x6d2   : > { %v14019_v46 = vpop.f32.mrb[95].mxu0 }
 0x6d3   : > { %v14037_v34 = vpop.f32.mrb[160].mxu1  ;;  %v19201_v60 = vadd.f32 %v14017_v10, %v11240_v53  ;;  %v14020_v59 = vadd.f32 %v14019_v46, %v14018_v56  ;;  %v20018_v10 = vld [vmem:[#allocation58_spill] sm:$0xff] }
 0x6d4   : > { %v14038_v21 = vpop.f32.mrb[161].mxu1 }
 0x6d5   : > { %v14039_v16 = vadd.f32 %v14038_v21, %v14037_v34  ;;  %v14040_v51 = vpop.f32.mrb[162].mxu1  ;;  %v19203_v35 = vadd.f32 %v14020_v59, %v11243_v45 }
 0x6d6   : > { %v14041_v2 = vpop.f32.mrb[163].mxu1 }
 0x6d7   : > { %v11442_v22 = vadd.f32 %v14039_v16, %v19038_v33  ;;  %v14042_v8 = vadd.f32 %v14041_v2, %v14040_v51  ;;  %v14149_v49 = vpop.f32.mrb[96].mxu0 }
 0x6d8   : > { %v14150_v18 = vpop.f32.mrb[97].mxu0 }
 0x6d9   : > { %v11445_v44 = vadd.f32 %v14042_v8, %v19044_v27  ;;  %v14151_v31 = vadd.f32 %v14150_v18, %v14149_v49  ;;  %v14152_v23 = vpop.f32.mrb[98].mxu0 }
 0x6da   : > { %v14153_v54 = vpop.f32.mrb[99].mxu0 }
 0x6db   : > { %v14043_v62 = vpop.f32.mrb[164].mxu1  ;;  %v11603_v52 = vadd.f32 %v14151_v31, %v11442_v22  ;;  %v14154_v61 = vadd.f32 %v14153_v54, %v14152_v23  ;;  %v20020_v31 = vld [vmem:[#allocation57_spill] sm:$0xff] }
 0x6dc   : > { %v14044_v37 = vpop.f32.mrb[165].mxu1 }
 0x6dd   : > { %v14045_v47 = vadd.f32 %v14044_v37, %v14043_v62  ;;  %v14046_v32 = vpop.f32.mrb[166].mxu1  ;;  %v11606_v17 = vadd.f32 %v14154_v61, %v11445_v44  ;;  %v19208_v11 = vadd.f32 %v11603_v52, %v20017_v40 }
 0x6de   : > { %v14047_v29 = vpop.f32.mrb[167].mxu1 }
 0x6df   : > { %v11450_v33 = vadd.f32 %v14045_v47, %v19059_v3  ;;  %v14048_v26 = vadd.f32 %v14047_v29, %v14046_v32  ;;  %v14155_v53 = vpop.f32.mrb[100].mxu0  ;;  %v19213_v56 = vadd.f32 %v11606_v17, %v20018_v10  ;;  %v20019_v3 = vld [vmem:[#allocation55_spill] sm:$0xff] }
 0x6e0   : > { %v14156_v25 = vpop.f32.mrb[101].mxu0 }
 0x6e1   : > { %v11453_v27 = vadd.f32 %v14048_v26, %v19061_v63  ;;  %v14157_v28 = vadd.f32 %v14156_v25, %v14155_v53  ;;  %v14158_v45 = vpop.f32.mrb[102].mxu0 }
 0x6e2   : > { %v14159_v46 = vpop.f32.mrb[103].mxu0 }
 0x6e3   : > { %v14049_v34 = vpop.f32.mrb[168].mxu1  ;;  %v11611_v59 = vadd.f32 %v14157_v28, %v11450_v33  ;;  %v14160_v21 = vadd.f32 %v14159_v46, %v14158_v45 }
 0x6e4   : > { %v14050_v16 = vpop.f32.mrb[169].mxu1 }
 0x6e5   : > { %v14051_v51 = vadd.f32 %v14050_v16, %v14049_v34  ;;  %v14052_v2 = vpop.f32.mrb[170].mxu1  ;;  %v11614_v22 = vadd.f32 %v14160_v21, %v11453_v27  ;;  %v19216_v49 = vadd.f32 %v20019_v3, %v11611_v59 }
 0x6e6   : > { %v14053_v8 = vpop.f32.mrb[171].mxu1 }
 0x6e7   : > { %v11458_v63 = vadd.f32 %v14051_v51, %v19079_v24  ;;  %v14054_v44 = vadd.f32 %v14053_v8, %v14052_v2  ;;  %v14161_v18 = vpop.f32.mrb[104].mxu0  ;;  %v19220_v23 = vadd.f32 %v20020_v31, %v11614_v22  ;;  %v20021_v24 = vld [vmem:[#allocation60_spill] sm:$0xff] }
 0x6e8   : > { %v14162_v62 = vpop.f32.mrb[105].mxu0 }
 0x6e9   : > { %v11461_v54 = vadd.f32 %v14054_v44, %v19081_v19  ;;  %v14163_v52 = vadd.f32 %v14162_v62, %v14161_v18  ;;  %v14164_v61 = vpop.f32.mrb[106].mxu0  ;;  %v20022_v19 = vld [vmem:[#allocation62_spill] sm:$0xff] }
 0x6ea   : > { %v14165_v37 = vpop.f32.mrb[107].mxu0 }
 0x6eb   : > { %v14055_v47 = vpop.f32.mrb[172].mxu1  ;;  %v11619_v32 = vadd.f32 %v14163_v52, %v11458_v63  ;;  %v14166_v17 = vadd.f32 %v14165_v37, %v14164_v61 }
 0x6ec   : > { %v14056_v29 = vpop.f32.mrb[173].mxu1 }
 0x6ed   : > { %v14057_v40 = vadd.f32 %v14056_v29, %v14055_v47  ;;  %v14058_v33 = vpop.f32.mrb[174].mxu1  ;;  %v11622_v26 = vadd.f32 %v14166_v17, %v11461_v54  ;;  %v19224_v27 = vadd.f32 %v11619_v32, %v20021_v24 }
 0x6ee   : > { %v14059_v53 = vpop.f32.mrb[175].mxu1 }
 0x6ef   : > { %v11466_v25 = vadd.f32 %v14057_v40, %v19098_v9  ;;  %v14060_v28 = vadd.f32 %v14059_v53, %v14058_v33  ;;  %v14167_v45 = vpop.f32.mrb[108].mxu0  ;;  %v19228_v10 = vadd.f32 %v11622_v26, %v20022_v19  ;;  %v20023_v9 = vld [vmem:[#allocation59_spill] sm:$0xff] }
 0x6f0   : > { %v14168_v34 = vpop.f32.mrb[109].mxu0 }
 0x6f1   : > { %v11469_v46 = vadd.f32 %v14060_v28, %v19102_v12  ;;  %v14169_v59 = vadd.f32 %v14168_v34, %v14167_v45  ;;  %v14170_v21 = vpop.f32.mrb[110].mxu0  ;;  %v20024_v12 = vld [vmem:[#allocation61_spill] sm:$0xff] }
 0x6f2   : > { %v14171_v16 = vpop.f32.mrb[111].mxu0 }
 0x6f3   : > { %v14061_v51 = vpop.f32.mrb[176].mxu1  ;;  %v11627_v2 = vadd.f32 %v14169_v59, %v11466_v25  ;;  %v14172_v22 = vadd.f32 %v14171_v16, %v14170_v21 }
 0x6f4   : > { %v14062_v8 = vpop.f32.mrb[177].mxu1 }
 0x6f5   : > { %v14063_v3 = vadd.f32 %v14062_v8, %v14061_v51  ;;  %v14064_v63 = vpop.f32.mrb[178].mxu1  ;;  %v11630_v44 = vadd.f32 %v14172_v22, %v11469_v46  ;;  %v19232_v31 = vadd.f32 %v20023_v9, %v11627_v2 }
 0x6f6   : > { %v14065_v18 = vpop.f32.mrb[179].mxu1 }
 0x6f7   : > { %v11474_v54 = vadd.f32 %v14063_v3, %v19114_v1  ;;  %v14066_v62 = vadd.f32 %v14065_v18, %v14064_v63  ;;  %v14173_v52 = vpop.f32.mrb[112].mxu0  ;;  %v19236_v61 = vadd.f32 %v20024_v12, %v11630_v44  ;;  %v20025_v1 = vld [vmem:[#allocation64_spill] sm:$0xff] }
 0x6f8   : > { %v14174_v47 = vpop.f32.mrb[113].mxu0 }
 0x6f9   : > { %v11477_v37 = vadd.f32 %v14066_v62, %v19118_v15  ;;  %v14175_v32 = vadd.f32 %v14174_v47, %v14173_v52  ;;  %v14176_v17 = vpop.f32.mrb[114].mxu0  ;;  %v20026_v15 = vld [vmem:[#allocation66_spill] sm:$0xff] }
 0x6fa   : > { %v14177_v29 = vpop.f32.mrb[115].mxu0 }
 0x6fb   : > { %v14067_v40 = vpop.f32.mrb[180].mxu1  ;;  %v11635_v33 = vadd.f32 %v14175_v32, %v11474_v54  ;;  %v14178_v26 = vadd.f32 %v14177_v29, %v14176_v17 }
 0x6fc   : > { %v14068_v53 = vpop.f32.mrb[181].mxu1 }
 0x6fd   : > { %v14069_v24 = vadd.f32 %v14068_v53, %v14067_v40  ;;  %v14070_v25 = vpop.f32.mrb[182].mxu1  ;;  %v11638_v28 = vadd.f32 %v14178_v26, %v11477_v37  ;;  %v19240_v19 = vadd.f32 %v11635_v33, %v20025_v1 }
 0x6fe   : > { %v14071_v45 = vpop.f32.mrb[183].mxu1 }
 0x6ff   : > { %v11482_v46 = vadd.f32 %v14069_v24, %v19123_v4  ;;  %v14072_v34 = vadd.f32 %v14071_v45, %v14070_v25  ;;  %v14179_v59 = vpop.f32.mrb[116].mxu0  ;;  %v19244_v21 = vadd.f32 %v11638_v28, %v20026_v15  ;;  %v20027_v4 = vld [vmem:[#allocation63_spill] sm:$0xff] }
 0x700   : > { %v14180_v51 = vpop.f32.mrb[117].mxu0 }
 0x701   : > { %v11485_v16 = vadd.f32 %v14072_v34, %v19126_v57  ;;  %v14181_v2 = vadd.f32 %v14180_v51, %v14179_v59  ;;  %v14182_v22 = vpop.f32.mrb[118].mxu0  ;;  %v20028_v57 = vld [vmem:[#allocation65_spill] sm:$0xff] }
 0x702   : > { %v14183_v8 = vpop.f32.mrb[119].mxu0 }
 0x703   : > { %v14073_v3 = vpop.f32.mrb[184].mxu1  ;;  %v11643_v63 = vadd.f32 %v14181_v2, %v11482_v46  ;;  %v14184_v44 = vadd.f32 %v14183_v8, %v14182_v22 }
 0x704   : > { %v14074_v18 = vpop.f32.mrb[185].mxu1 }
 0x705   : > { %v14075_v9 = vadd.f32 %v14074_v18, %v14073_v3  ;;  %v14076_v54 = vpop.f32.mrb[186].mxu1  ;;  %v11646_v62 = vadd.f32 %v14184_v44, %v11485_v16  ;;  %v19248_v12 = vadd.f32 %v20027_v4, %v11643_v63 }
 0x706   : > { %v14077_v52 = vpop.f32.mrb[187].mxu1 }
 0x707   : > { %v11490_v37 = vadd.f32 %v14075_v9, %v19132_v48  ;;  %v14078_v47 = vadd.f32 %v14077_v52, %v14076_v54  ;;  %v14185_v32 = vpop.f32.mrb[120].mxu0  ;;  %v19252_v17 = vadd.f32 %v20028_v57, %v11646_v62  ;;  %v20029_v48 = vld [vmem:[#allocation68_spill] sm:$0xff] }
 0x708   : > { %v14186_v40 = vpop.f32.mrb[121].mxu0 }
 0x709   : > { %v11493_v29 = vadd.f32 %v14078_v47, %v19134_v13  ;;  %v14187_v33 = vadd.f32 %v14186_v40, %v14185_v32  ;;  %v14188_v26 = vpop.f32.mrb[122].mxu0  ;;  %v20030_v13 = vld [vmem:[#allocation70_spill] sm:$0xff] }
 0x70a   : > { %v14189_v53 = vpop.f32.mrb[123].mxu0 }
 0x70b   : > { %v14079_v24 = vpop.f32.mrb[188].mxu1  ;;  %v11651_v25 = vadd.f32 %v14187_v33, %v11490_v37  ;;  %v14190_v28 = vadd.f32 %v14189_v53, %v14188_v26 }
 0x70c   : > { %v14080_v45 = vpop.f32.mrb[189].mxu1 }
 0x70d   : > { %v14081_v1 = vadd.f32 %v14080_v45, %v14079_v24  ;;  %v14082_v46 = vpop.f32.mrb[190].mxu1  ;;  %v11654_v34 = vadd.f32 %v14190_v28, %v11493_v29  ;;  %v19256_v15 = vadd.f32 %v11651_v25, %v20029_v48 }
 0x70e   : > { %v14083_v59 = vpop.f32.mrb[191].mxu1 }
 0x70f   : > { %v11498_v16 = vadd.f32 %v14081_v1, %v19139_v41  ;;  %v14084_v51 = vadd.f32 %v14083_v59, %v14082_v46  ;;  %v14191_v2 = vpop.f32.mrb[124].mxu0  ;;  %v19260_v22 = vadd.f32 %v11654_v34, %v20030_v13  ;;  %v20031_v41 = vld [vmem:[#allocation67_spill] sm:$0xff] }
 0x710   : > { %v14192_v3 = vpop.f32.mrb[125].mxu0 }
 0x711   : > { %v11501_v8 = vadd.f32 %v14084_v51, %v19142_v6  ;;  %v14193_v63 = vadd.f32 %v14192_v3, %v14191_v2  ;;  %v14194_v44 = vpop.f32.mrb[126].mxu0  ;;  %v20032_v6 = vld [vmem:[#allocation69_spill] sm:$0xff] }
 0x712   : > { %v14195_v18 = vpop.f32.mrb[127].mxu0 }
 0x713   : > { %v14085_v9 = vpop.f32.mrb[192].mxu1  ;;  %v11659_v54 = vadd.f32 %v14193_v63, %v11498_v16  ;;  %v14196_v62 = vadd.f32 %v14195_v18, %v14194_v44 }
 0x714   : > { %v14086_v52 = vpop.f32.mrb[193].mxu1 }
 0x715   : > { %v14087_v4 = vadd.f32 %v14086_v52, %v14085_v9  ;;  %v14088_v37 = vpop.f32.mrb[194].mxu1  ;;  %v11662_v47 = vadd.f32 %v14196_v62, %v11501_v8  ;;  %v19264_v57 = vadd.f32 %v20031_v41, %v11659_v54 }
 0x716   : > { %v14089_v32 = vpop.f32.mrb[195].mxu1 }
 0x717   : > { %v11506_v29 = vadd.f32 %v14087_v4, %v19147_v30  ;;  %v14090_v40 = vadd.f32 %v14089_v32, %v14088_v37  ;;  %v14197_v33 = vpop.f32.mrb[128].mxu0  ;;  %v19268_v26 = vadd.f32 %v20032_v6, %v11662_v47  ;;  %v20033_v30 = vld [vmem:[#allocation72_spill] sm:$0xff] }
 0x718   : > { %v14198_v24 = vpop.f32.mrb[129].mxu0 }
 0x719   : > { %v11509_v53 = vadd.f32 %v14090_v40, %v19150_v55  ;;  %v14199_v25 = vadd.f32 %v14198_v24, %v14197_v33  ;;  %v14200_v28 = vpop.f32.mrb[130].mxu0  ;;  %v20034_v55 = vld [vmem:[#allocation74_spill] sm:$0xff] }
 0x71a   : > { %v14201_v45 = vpop.f32.mrb[131].mxu0 }
 0x71b   : > { %v14091_v1 = vpop.f32.mrb[196].mxu1  ;;  %v11667_v46 = vadd.f32 %v14199_v25, %v11506_v29  ;;  %v14202_v34 = vadd.f32 %v14201_v45, %v14200_v28 }
 0x71c   : > { %v14092_v59 = vpop.f32.mrb[197].mxu1 }
 0x71d   : > { %v14093_v48 = vadd.f32 %v14092_v59, %v14091_v1  ;;  %v14094_v16 = vpop.f32.mrb[198].mxu1  ;;  %v11670_v51 = vadd.f32 %v14202_v34, %v11509_v53  ;;  %v19272_v13 = vadd.f32 %v11667_v46, %v20033_v30 }
 0x71e   : > { %v14095_v2 = vpop.f32.mrb[199].mxu1 }
 0x71f   : > { %v11514_v8 = vadd.f32 %v14093_v48, %v19155_v58  ;;  %v14096_v3 = vadd.f32 %v14095_v2, %v14094_v16  ;;  %v14203_v63 = vpop.f32.mrb[132].mxu0  ;;  %v19276_v44 = vadd.f32 %v11670_v51, %v20034_v55  ;;  %v20035_v58 = vld [vmem:[#allocation71_spill] sm:$0xff] }
 0x720   : > { %v14204_v9 = vpop.f32.mrb[133].mxu0 }
 0x721   : > { %v11517_v18 = vadd.f32 %v14096_v3, %v19158_v5  ;;  %v14205_v54 = vadd.f32 %v14204_v9, %v14203_v63  ;;  %v14206_v62 = vpop.f32.mrb[134].mxu0  ;;  %v20036_v5 = vld [vmem:[#allocation73_spill] sm:$0xff] }
 0x722   : > { %v14207_v52 = vpop.f32.mrb[135].mxu0 }
 0x723   : > { %v14097_v4 = vpop.f32.mrb[200].mxu1  ;;  %v11675_v37 = vadd.f32 %v14205_v54, %v11514_v8  ;;  %v14208_v47 = vadd.f32 %v14207_v52, %v14206_v62 }
 0x724   : > { %v14098_v32 = vpop.f32.mrb[201].mxu1 }
 0x725   : > { %v14099_v41 = vadd.f32 %v14098_v32, %v14097_v4  ;;  %v14100_v29 = vpop.f32.mrb[202].mxu1  ;;  %v11678_v40 = vadd.f32 %v14208_v47, %v11517_v18  ;;  %v19280_v6 = vadd.f32 %v20035_v58, %v11675_v37 }
 0x726   : > { %v14101_v33 = vpop.f32.mrb[203].mxu1 }
 0x727   : > { %v11522_v53 = vadd.f32 %v14099_v41, %v19163_v39  ;;  %v14102_v24 = vadd.f32 %v14101_v33, %v14100_v29  ;;  %v14209_v25 = vpop.f32.mrb[136].mxu0  ;;  %v19284_v28 = vadd.f32 %v20036_v5, %v11678_v40  ;;  %v20037_v39 = vld [vmem:[#allocation76_spill] sm:$0xff] }
 0x728   : > { %v14210_v1 = vpop.f32.mrb[137].mxu0 }
 0x729   : > { %v11525_v45 = vadd.f32 %v14102_v24, %v19168_v50  ;;  %v14211_v46 = vadd.f32 %v14210_v1, %v14209_v25  ;;  %v14212_v34 = vpop.f32.mrb[138].mxu0  ;;  %v20038_v50 = vld [vmem:[#allocation78_spill] sm:$0xff] }
 0x72a   : > { %v14213_v59 = vpop.f32.mrb[139].mxu0 }
 0x72b   : > { %v14103_v48 = vpop.f32.mrb[204].mxu1  ;;  %v11683_v16 = vadd.f32 %v14211_v46, %v11522_v53  ;;  %v14214_v51 = vadd.f32 %v14213_v59, %v14212_v34 }
 0x72c   : > { %v14104_v2 = vpop.f32.mrb[205].mxu1 }
 0x72d   : > { %v14105_v30 = vadd.f32 %v14104_v2, %v14103_v48  ;;  %v14106_v8 = vpop.f32.mrb[206].mxu1  ;;  %v11686_v3 = vadd.f32 %v14214_v51, %v11525_v45  ;;  %v19288_v55 = vadd.f32 %v11683_v16, %v20037_v39 }
 0x72e   : > { %v14107_v63 = vpop.f32.mrb[207].mxu1 }
 0x72f   : > { %v11530_v18 = vadd.f32 %v14105_v30, %v19173_v20  ;;  %v14108_v9 = vadd.f32 %v14107_v63, %v14106_v8  ;;  %v14215_v54 = vpop.f32.mrb[140].mxu0  ;;  %v19292_v62 = vadd.f32 %v11686_v3, %v20038_v50  ;;  %v20039_v20 = vld [vmem:[#allocation75_spill] sm:$0xff] }
 0x730   : > { %v14216_v4 = vpop.f32.mrb[141].mxu0 }
 0x731   : > { %v11533_v52 = vadd.f32 %v14108_v9, %v19176_v14  ;;  %v14217_v37 = vadd.f32 %v14216_v4, %v14215_v54  ;;  %v14218_v47 = vpop.f32.mrb[142].mxu0  ;;  %v20040_v14 = vld [vmem:[#allocation77_spill] sm:$0xff] }
 0x732   : > { %v14219_v32 = vpop.f32.mrb[143].mxu0 }
 0x733   : > { %v14109_v41 = vpop.f32.mrb[208].mxu1  ;;  %v11691_v29 = vadd.f32 %v14217_v37, %v11530_v18  ;;  %v14220_v40 = vadd.f32 %v14219_v32, %v14218_v47 }
 0x734   : > { %v14110_v33 = vpop.f32.mrb[209].mxu1 }
 0x735   : > { %v14111_v58 = vadd.f32 %v14110_v33, %v14109_v41  ;;  %v14112_v53 = vpop.f32.mrb[210].mxu1  ;;  %v11694_v24 = vadd.f32 %v14220_v40, %v11533_v52  ;;  %v19296_v5 = vadd.f32 %v20039_v20, %v11691_v29 }
 0x736   : > { %v14113_v25 = vpop.f32.mrb[211].mxu1 }
 0x737   : > { %v11538_v45 = vadd.f32 %v14111_v58, %v19183_v42  ;;  %v14114_v1 = vadd.f32 %v14113_v25, %v14112_v53  ;;  %v14221_v46 = vpop.f32.mrb[144].mxu0  ;;  %v19300_v34 = vadd.f32 %v20040_v14, %v11694_v24  ;;  %v20041_v42 = vld [vmem:[#allocation80_spill] sm:$0xff] }
 0x738   : > { %v14222_v48 = vpop.f32.mrb[145].mxu0 }
 0x739   : > { %v11541_v59 = vadd.f32 %v14114_v1, %v19185_v43  ;;  %v14223_v16 = vadd.f32 %v14222_v48, %v14221_v46  ;;  %v14224_v51 = vpop.f32.mrb[146].mxu0  ;;  %v20042_v43 = vld [vmem:[#allocation82_spill] sm:$0xff] }
 0x73a   : > { %v14225_v2 = vpop.f32.mrb[147].mxu0 }
 0x73b   : > { %v14115_v30 = vpop.f32.mrb[212].mxu1  ;;  %v11699_v8 = vadd.f32 %v14223_v16, %v11538_v45  ;;  %v14226_v3 = vadd.f32 %v14225_v2, %v14224_v51 }
 0x73c   : > { %v14116_v63 = vpop.f32.mrb[213].mxu1 }
 0x73d   : > { %v14117_v39 = vadd.f32 %v14116_v63, %v14115_v30  ;;  %v14118_v18 = vpop.f32.mrb[214].mxu1  ;;  %v11702_v9 = vadd.f32 %v14226_v3, %v11541_v59  ;;  %v19304_v50 = vadd.f32 %v11699_v8, %v20041_v42 }
 0x73e   : > { %v14119_v54 = vpop.f32.mrb[215].mxu1 }
 0x73f   : > { %v11546_v52 = vadd.f32 %v14117_v39, %v19189_v36  ;;  %v14120_v4 = vadd.f32 %v14119_v54, %v14118_v18  ;;  %v14227_v37 = vpop.f32.mrb[148].mxu0  ;;  %v19308_v47 = vadd.f32 %v11702_v9, %v20042_v43  ;;  %v20043_v36 = vld [vmem:[#allocation79_spill] sm:$0xff] }
 0x740   : > { %v14228_v41 = vpop.f32.mrb[149].mxu0 }
 0x741   : > { %v11549_v32 = vadd.f32 %v14120_v4, %v19191_v7  ;;  %v14229_v29 = vadd.f32 %v14228_v41, %v14227_v37  ;;  %v14230_v40 = vpop.f32.mrb[150].mxu0  ;;  %v20044_v7 = vld [vmem:[#allocation81_spill] sm:$0xff] }
 0x742   : > { %v14231_v33 = vpop.f32.mrb[151].mxu0 }
 0x743   : > { %v14121_v58 = vpop.f32.mrb[216].mxu1  ;;  %v11707_v53 = vadd.f32 %v14229_v29, %v11546_v52  ;;  %v14232_v24 = vadd.f32 %v14231_v33, %v14230_v40 }
 0x744   : > { %v14122_v25 = vpop.f32.mrb[217].mxu1 }
 0x745   : > { %v14123_v20 = vadd.f32 %v14122_v25, %v14121_v58  ;;  %v14124_v45 = vpop.f32.mrb[218].mxu1  ;;  %v11710_v1 = vadd.f32 %v14232_v24, %v11549_v32  ;;  %v19312_v14 = vadd.f32 %v20043_v36, %v11707_v53 }
 0x746   : > { %v14125_v46 = vpop.f32.mrb[219].mxu1 }
 0x747   : > { %v11554_v59 = vadd.f32 %v14123_v20, %v19195_v0  ;;  %v14126_v48 = vadd.f32 %v14125_v46, %v14124_v45  ;;  %v14233_v16 = vpop.f32.mrb[152].mxu0  ;;  %v19316_v51 = vadd.f32 %v20044_v7, %v11710_v1  ;;  %v20045_v0 = vld [vmem:[#allocation84_spill] sm:$0xff]  ;;  %v20047_v46 = vld [vmem:[#allocation83_spill] sm:$0xff] }
 0x748   : > { %v14234_v30 = vpop.f32.mrb[153].mxu0 }
 0x749   : > { %v11557_v2 = vadd.f32 %v14126_v48, %v19197_v38  ;;  %v14235_v8 = vadd.f32 %v14234_v30, %v14233_v16  ;;  %v14236_v3 = vpop.f32.mrb[154].mxu0  ;;  %v20046_v38 = vld [vmem:[#allocation86_spill] sm:$0xff]  ;;  %v20048_v48 = vld [vmem:[#allocation85_spill] sm:$0xff] }
 0x74a   : > { %v14237_v63 = vpop.f32.mrb[155].mxu0 }
 0x74b   : > { %v14127_v39 = vpop.f32.mrb[220].mxu1  ;;  %v11715_v18 = vadd.f32 %v14235_v8, %v11554_v59  ;;  %v14238_v9 = vadd.f32 %v14237_v63, %v14236_v3 }
 0x74c   : > { %v14128_v54 = vpop.f32.mrb[221].mxu1 }
 0x74d   : > { %v14129_v42 = vadd.f32 %v14128_v54, %v14127_v39  ;;  %v14130_v52 = vpop.f32.mrb[222].mxu1  ;;  %v11718_v4 = vadd.f32 %v14238_v9, %v11557_v2  ;;  %v19320_v43 = vadd.f32 %v11715_v18, %v20045_v0 }
 0x74e   : > { %v14131_v37 = vpop.f32.mrb[223].mxu1 }
 0x74f   : > { %v11562_v32 = vadd.f32 %v14129_v42, %v19201_v60  ;;  %v14132_v41 = vadd.f32 %v14131_v37, %v14130_v52  ;;  %v14239_v29 = vpop.f32.mrb[156].mxu0  ;;  %v19324_v40 = vadd.f32 %v11718_v4, %v20046_v38 }
 0x750   : > { %v14240_v58 = vpop.f32.mrb[157].mxu0 }
 0x751   : > { %v11565_v33 = vadd.f32 %v14132_v41, %v19203_v35  ;;  %v14241_v53 = vadd.f32 %v14240_v58, %v14239_v29  ;;  %v14242_v24 = vpop.f32.mrb[158].mxu0 }
 0x752   : > { %v14243_v25 = vpop.f32.mrb[159].mxu0 }
 0x753   : > { %v11723_v20 = vadd.f32 %v14241_v53, %v11562_v32  ;;  %v14244_v45 = vadd.f32 %v14243_v25, %v14242_v24 }
 0x755   : > { %v11726_v1 = vadd.f32 %v14244_v45, %v11565_v33  ;;  %v19328_v36 = vadd.f32 %v20047_v46, %v11723_v20 }
 0x757   : > { %v14431_v59 = vpop.f32.mrb[160].mxu0  ;;  %v19331_v60 = vadd.f32 %v20048_v48, %v11726_v1 }
 0x758   : > { %v14462_v16 = vadd.f32 %v19216_v49, %v14431_v59  ;;  %v11763_v7 = vpop.f32.mrb[161].mxu0 }
 0x759   : > { %v14464_v2 = vadd.f32 %v19208_v11, %v11763_v7  ;;  %v14432_v35 = vpop.f32.mrb[162].mxu0 }
 0x75a   : > { %v11988_v30 = vmul.f32 0.01, %v14462_v16  ;;  %v14466_v8 = vadd.f32 %v19220_v23, %v14432_v35  ;;  %v11766_v3 = vpop.f32.mrb[163].mxu0  ;;  %vm11956_vm0 = vcmp.ge.f32.partialorder %v14462_v16, 0.0 }
 0x75b   : > { %v11986_v63 = vmul.f32 0.01, %v14464_v2  ;;  %v14468_v39 = vadd.f32 %v19213_v56, %v11766_v3  ;;  %vm11954_vm8 = vcmp.ge.f32.partialorder %v14464_v2, 0.0 }
 0x75c   : > { %vm11957_vm10 = vcmp.ge.f32.partialorder %v14466_v8, 0.0  ;;  %v11989_v18 = vmul.f32 0.01, %v14466_v8  ;;  %v12020_v54 = vsel %vm11956_vm0, %v14462_v16, %v11988_v30 }
 0x75d   : > { %vm11955_vm11 = vcmp.ge.f32.partialorder %v14468_v39, 0.0  ;;  %v11987_v9 = vmul.f32 0.01, %v14468_v39  ;;  %v12018_v42 = vsel %vm11954_vm8, %v14464_v2, %v11986_v63 }
 0x75e   : > { %v12021_v49 = vsel %vm11957_vm10, %v14466_v8, %v11989_v18 }
 0x75f   : > { %v12742_v52 = vpack.c.bf16 %v12021_v49, %v12020_v54  ;;  %v12019_v11 = vsel %vm11955_vm11, %v14468_v39, %v11987_v9  ;;  %v14435_v4 = vpop.f32.mrb[164].mxu0 }
 0x760   : > { %v12737_v37 = vpack.c.bf16 %v12019_v11, %v12018_v42  ;;  %v14470_v23 = vadd.f32 %v19232_v31, %v14435_v4  ;;  %v11779_v0 = vpop.f32.mrb[165].mxu0 }
 0x761   : > { %12814 = vst [vmem:[%s19340_s1 + $0x8] sm:$0xff] %v12742_v52   ;;  %v14472_v56 = vadd.f32 %v19224_v27, %v11779_v0  ;;  %v14436_v32 = vpop.f32.mrb[166].mxu0 }
 0x762   : > { %12738 = vst [vmem:[%s19340_s1] sm:$0xff] %v12737_v37   ;;  %v11992_v41 = vmul.f32 0.01, %v14470_v23  ;;  %v14474_v29 = vadd.f32 %v19236_v61, %v14436_v32  ;;  %v11782_v38 = vpop.f32.mrb[167].mxu0  ;;  %vm11960_vm3 = vcmp.ge.f32.partialorder %v14470_v23, 0.0 }
 0x763   : > { %v11990_v33 = vmul.f32 0.01, %v14472_v56  ;;  %v14476_v31 = vadd.f32 %v19228_v10, %v11782_v38  ;;  %vm11958_vm7 = vcmp.ge.f32.partialorder %v14472_v56, 0.0 }
 0x764   : > { %vm11961_vm9 = vcmp.ge.f32.partialorder %v14474_v29, 0.0  ;;  %v11993_v58 = vmul.f32 0.01, %v14474_v29  ;;  %v12024_v24 = vsel %vm11960_vm3, %v14470_v23, %v11992_v41 }
 0x765   : > { %vm11959_vm6 = vcmp.ge.f32.partialorder %v14476_v31, 0.0  ;;  %v11991_v53 = vmul.f32 0.01, %v14476_v31  ;;  %v12022_v27 = vsel %vm11958_vm7, %v14472_v56, %v11990_v33 }
 0x766   : > { %v12025_v25 = vsel %vm11961_vm9, %v14474_v29, %v11993_v58 }
 0x767   : > { %v12752_v20 = vpack.c.bf16 %v12025_v25, %v12024_v24  ;;  %v12023_v45 = vsel %vm11959_vm6, %v14476_v31, %v11991_v53  ;;  %v14439_v1 = vpop.f32.mrb[168].mxu0 }
 0x768   : > { %v12747_v46 = vpack.c.bf16 %v12023_v45, %v12022_v27  ;;  %v14478_v61 = vadd.f32 %v19248_v12, %v14439_v1  ;;  %v11795_v59 = vpop.f32.mrb[169].mxu0 }
 0x769   : > { %12816 = vst [vmem:[%s19340_s1 + $0x18] sm:$0xff] %v12752_v20   ;;  %v14480_v48 = vadd.f32 %v19240_v19, %v11795_v59  ;;  %v14440_v10 = vpop.f32.mrb[170].mxu0 }
 0x76a   : > { %12815 = vst [vmem:[%s19340_s1 + $0x10] sm:$0xff] %v12747_v46   ;;  %v11996_v16 = vmul.f32 0.01, %v14478_v61  ;;  %v14482_v7 = vadd.f32 %v19252_v17, %v14440_v10  ;;  %v11798_v2 = vpop.f32.mrb[171].mxu0  ;;  %vm11964_vm14 = vcmp.ge.f32.partialorder %v14478_v61, 0.0 }
 0x76b   : > { %v11994_v35 = vmul.f32 0.01, %v14480_v48  ;;  %v14484_v30 = vadd.f32 %v19244_v21, %v11798_v2  ;;  %vm11962_vm15 = vcmp.ge.f32.partialorder %v14480_v48, 0.0 }
 0x76c   : > { %vm11965_vm13 = vcmp.ge.f32.partialorder %v14482_v7, 0.0  ;;  %v11997_v8 = vmul.f32 0.01, %v14482_v7  ;;  %v12028_v3 = vsel %vm11964_vm14, %v14478_v61, %v11996_v16 }
 0x76d   : > { %vm11963_vm12 = vcmp.ge.f32.partialorder %v14484_v30, 0.0  ;;  %v11995_v12 = vmul.f32 0.01, %v14484_v30  ;;  %v12026_v19 = vsel %vm11962_vm15, %v14480_v48, %v11994_v35 }
 0x76e   : > { %v12029_v63 = vsel %vm11965_vm13, %v14482_v7, %v11997_v8 }
 0x76f   : > { %v12762_v39 = vpack.c.bf16 %v12029_v63, %v12028_v3  ;;  %v12027_v18 = vsel %vm11963_vm12, %v14484_v30, %v11995_v12  ;;  %v14443_v9 = vpop.f32.mrb[172].mxu0 }
 0x770   : > { %v12757_v54 = vpack.c.bf16 %v12027_v18, %v12026_v19  ;;  %v14486_v17 = vadd.f32 %v19264_v57, %v14443_v9  ;;  %v11811_v49 = vpop.f32.mrb[173].mxu0 }
 0x771   : > { %12818 = vst [vmem:[%s19340_s1 + $0x28] sm:$0xff] %v12762_v39   ;;  %v14488_v42 = vadd.f32 %v19256_v15, %v11811_v49  ;;  %v14444_v21 = vpop.f32.mrb[174].mxu0 }
 0x772   : > { %12817 = vst [vmem:[%s19340_s1 + $0x20] sm:$0xff] %v12757_v54   ;;  %v12000_v52 = vmul.f32 0.01, %v14486_v17  ;;  %v14490_v11 = vadd.f32 %v19268_v26, %v14444_v21  ;;  %v11814_v4 = vpop.f32.mrb[175].mxu0  ;;  %vm11968_vm5 = vcmp.ge.f32.partialorder %v14486_v17, 0.0 }
 0x773   : > { %v11998_v37 = vmul.f32 0.01, %v14488_v42  ;;  %v14492_v23 = vadd.f32 %v19260_v22, %v11814_v4  ;;  %vm11966_vm2 = vcmp.ge.f32.partialorder %v14488_v42, 0.0 }
 0x774   : > { %vm11969_vm1 = vcmp.ge.f32.partialorder %v14490_v11, 0.0  ;;  %v12001_v0 = vmul.f32 0.01, %v14490_v11  ;;  %v12032_v56 = vsel %vm11968_vm5, %v14486_v17, %v12000_v52 }
 0x775   : > { %vm11967_vm4 = vcmp.ge.f32.partialorder %v14492_v23, 0.0  ;;  %v11999_v57 = vmul.f32 0.01, %v14492_v23  ;;  %v12030_v15 = vsel %vm11966_vm2, %v14488_v42, %v11998_v37 }
 0x776   : > { %v12033_v32 = vsel %vm11969_vm1, %v14490_v11, %v12001_v0 }
 0x777   : > { %v12772_v41 = vpack.c.bf16 %v12033_v32, %v12032_v56  ;;  %v12031_v29 = vsel %vm11967_vm4, %v14492_v23, %v11999_v57  ;;  %v14447_v38 = vpop.f32.mrb[176].mxu0 }
 0x778   : > { %v12767_v33 = vpack.c.bf16 %v12031_v29, %v12030_v15  ;;  %v14494_v26 = vadd.f32 %v19280_v6, %v14447_v38  ;;  %v11827_v31 = vpop.f32.mrb[177].mxu0 }
 0x779   : > { %12820 = vst [vmem:[%s19340_s1 + $0x38] sm:$0xff] %v12772_v41   ;;  %v14496_v58 = vadd.f32 %v19272_v13, %v11827_v31  ;;  %v14448_v22 = vpop.f32.mrb[178].mxu0 }
 0x77a   : > { %12819 = vst [vmem:[%s19340_s1 + $0x30] sm:$0xff] %v12767_v33   ;;  %v12004_v53 = vmul.f32 0.01, %v14494_v26  ;;  %v14498_v24 = vadd.f32 %v19284_v28, %v14448_v22  ;;  %v11830_v25 = vpop.f32.mrb[179].mxu0  ;;  %vm11972_vm0 = vcmp.ge.f32.partialorder %v14494_v26, 0.0 }
 0x77b   : > { %v12002_v27 = vmul.f32 0.01, %v14496_v58  ;;  %v14500_v20 = vadd.f32 %v19276_v44, %v11830_v25  ;;  %vm11970_vm8 = vcmp.ge.f32.partialorder %v14496_v58, 0.0 }
 0x77c   : > { %vm11973_vm10 = vcmp.ge.f32.partialorder %v14498_v24, 0.0  ;;  %v12005_v45 = vmul.f32 0.01, %v14498_v24  ;;  %v12036_v1 = vsel %vm11972_vm0, %v14494_v26, %v12004_v53 }
 0x77d   : > { %vm11971_vm11 = vcmp.ge.f32.partialorder %v14500_v20, 0.0  ;;  %v12003_v6 = vmul.f32 0.01, %v14500_v20  ;;  %v12034_v13 = vsel %vm11970_vm8, %v14496_v58, %v12002_v27 }
 0x77e   : > { %v12037_v46 = vsel %vm11973_vm10, %v14498_v24, %v12005_v45 }
 0x77f   : > { %v12782_v61 = vpack.c.bf16 %v12037_v46, %v12036_v1  ;;  %v12035_v59 = vsel %vm11971_vm11, %v14500_v20, %v12003_v6  ;;  %v14451_v48 = vpop.f32.mrb[180].mxu0 }
 0x780   : > { %v12777_v10 = vpack.c.bf16 %v12035_v59, %v12034_v13  ;;  %v14502_v28 = vadd.f32 %v19296_v5, %v14451_v48  ;;  %v11843_v16 = vpop.f32.mrb[181].mxu0 }
 0x781   : > { %12822 = vst [vmem:[%s19340_s1 + $0x48] sm:$0xff] %v12782_v61   ;;  %v14504_v7 = vadd.f32 %v19288_v55, %v11843_v16  ;;  %v14452_v44 = vpop.f32.mrb[182].mxu0 }
 0x782   : > { %12821 = vst [vmem:[%s19340_s1 + $0x40] sm:$0xff] %v12777_v10   ;;  %v12008_v2 = vmul.f32 0.01, %v14502_v28  ;;  %v14506_v35 = vadd.f32 %v19300_v34, %v14452_v44  ;;  %v11846_v30 = vpop.f32.mrb[183].mxu0  ;;  %vm11976_vm3 = vcmp.ge.f32.partialorder %v14502_v28, 0.0 }
 0x783   : > { %v12006_v8 = vmul.f32 0.01, %v14504_v7  ;;  %v14508_v12 = vadd.f32 %v19292_v62, %v11846_v30  ;;  %vm11974_vm7 = vcmp.ge.f32.partialorder %v14504_v7, 0.0 }
 0x784   : > { %vm11977_vm9 = vcmp.ge.f32.partialorder %v14506_v35, 0.0  ;;  %v12009_v3 = vmul.f32 0.01, %v14506_v35  ;;  %v12040_v63 = vsel %vm11976_vm3, %v14502_v28, %v12008_v2 }
 0x785   : > { %vm11975_vm6 = vcmp.ge.f32.partialorder %v14508_v12, 0.0  ;;  %v12007_v5 = vmul.f32 0.01, %v14508_v12  ;;  %v12038_v55 = vsel %vm11974_vm7, %v14504_v7, %v12006_v8 }
 0x786   : > { %v12041_v19 = vsel %vm11977_vm9, %v14506_v35, %v12009_v3 }
 0x787   : > { %v12792_v39 = vpack.c.bf16 %v12041_v19, %v12040_v63  ;;  %v12039_v18 = vsel %vm11975_vm6, %v14508_v12, %v12007_v5  ;;  %v14455_v9 = vpop.f32.mrb[184].mxu0 }
 0x788   : > { %v12787_v54 = vpack.c.bf16 %v12039_v18, %v12038_v55  ;;  %v14510_v34 = vadd.f32 %v19312_v14, %v14455_v9  ;;  %v11859_v17 = vpop.f32.mrb[185].mxu0 }
 0x789   : > { %12824 = vst [vmem:[%s19340_s1 + $0x58] sm:$0xff] %v12792_v39   ;;  %v14512_v49 = vadd.f32 %v19304_v50, %v11859_v17  ;;  %v14456_v62 = vpop.f32.mrb[186].mxu0 }
 0x78a   : > { %12823 = vst [vmem:[%s19340_s1 + $0x50] sm:$0xff] %v12787_v54   ;;  %v12012_v42 = vmul.f32 0.01, %v14510_v34  ;;  %v14514_v21 = vadd.f32 %v19316_v51, %v14456_v62  ;;  %v11862_v52 = vpop.f32.mrb[187].mxu0  ;;  %vm11980_vm14 = vcmp.ge.f32.partialorder %v14510_v34, 0.0 }
 0x78b   : > { %v12010_v11 = vmul.f32 0.01, %v14512_v49  ;;  %v14516_v4 = vadd.f32 %v19308_v47, %v11862_v52  ;;  %vm11978_vm15 = vcmp.ge.f32.partialorder %v14512_v49, 0.0 }
 0x78c   : > { %vm11981_vm13 = vcmp.ge.f32.partialorder %v14514_v21, 0.0  ;;  %v12013_v37 = vmul.f32 0.01, %v14514_v21  ;;  %v12044_v23 = vsel %vm11980_vm14, %v14510_v34, %v12012_v42 }
 0x78d   : > { %vm11979_vm12 = vcmp.ge.f32.partialorder %v14516_v4, 0.0  ;;  %v12011_v14 = vmul.f32 0.01, %v14516_v4  ;;  %v12042_v50 = vsel %vm11978_vm15, %v14512_v49, %v12010_v11 }
 0x78e   : > { %v12045_v0 = vsel %vm11981_vm13, %v14514_v21, %v12013_v37 }
 0x78f   : > { %v12802_v57 = vpack.c.bf16 %v12045_v0, %v12044_v23  ;;  %v12043_v56 = vsel %vm11979_vm12, %v14516_v4, %v12011_v14  ;;  %v14459_v32 = vpop.f32.mrb[188].mxu0 }
 0x790   : > { %v12797_v15 = vpack.c.bf16 %v12043_v56, %v12042_v50  ;;  %v14518_v51 = vadd.f32 %v19328_v36, %v14459_v32  ;;  %v11875_v41 = vpop.f32.mrb[189].mxu0 }
 0x791   : > { %12826 = vst [vmem:[%s19340_s1 + $0x68] sm:$0xff] %v12802_v57   ;;  %v14520_v47 = vadd.f32 %v19320_v43, %v11875_v41  ;;  %v14460_v29 = vpop.f32.mrb[190].mxu0 }
 0x792   : > { %12825 = vst [vmem:[%s19340_s1 + $0x60] sm:$0xff] %v12797_v15   ;;  %v12016_v38 = vmul.f32 0.01, %v14518_v51  ;;  %v14522_v33 = vadd.f32 %v19331_v60, %v14460_v29  ;;  %v11878_v26 = vpop.f32.mrb[191].mxu0  ;;  %vm11984_vm5 = vcmp.ge.f32.partialorder %v14518_v51, 0.0 }
 0x793   : > { %v12014_v31 = vmul.f32 0.01, %v14520_v47  ;;  %v14524_v58 = vadd.f32 %v19324_v40, %v11878_v26  ;;  %vm11982_vm2 = vcmp.ge.f32.partialorder %v14520_v47, 0.0 }
 0x794   : > { %vm11985_vm1 = vcmp.ge.f32.partialorder %v14522_v33, 0.0  ;;  %v12017_v36 = vmul.f32 0.01, %v14522_v33  ;;  %v12048_v22 = vsel %vm11984_vm5, %v14518_v51, %v12016_v38 }
 0x795   : > { %vm11983_vm4 = vcmp.ge.f32.partialorder %v14524_v58, 0.0  ;;  %v12015_v43 = vmul.f32 0.01, %v14524_v58  ;;  %v12046_v24 = vsel %vm11982_vm2, %v14520_v47, %v12014_v31 }
 0x796   : > { %v12049_v53 = vsel %vm11985_vm1, %v14522_v33, %v12017_v36 }
 0x797   : > { %v12812_v60 = vpack.c.bf16 %v12049_v53, %v12048_v22  ;;  %v12047_v25 = vsel %vm11983_vm4, %v14524_v58, %v12015_v43 }
 0x798   : > { %v12807_v40 = vpack.c.bf16 %v12047_v25, %v12046_v24 }
 0x799   : > { %12828 = vst [vmem:[%s19340_s1 + $0x78] sm:$0xff] %v12812_v60  }
 0x79a   : > { %12827 = vst [vmem:[%s19340_s1 + $0x70] sm:$0xff] %v12807_v40  }
 0x79b   : > { %15140 = shalt.err (!%p15137_p10)
}
 0x79c   : > { %s15141_s19 = scalar_lea.hbm %s19388_s21, 2048  ;;  %s15145_s15 = scalar_lea.hbm %s19444_s8, 4096 }
 0x79d   : > { %p15142_p11 = scmp.ne.s32.totalorder %s19388_s21, %s15141_s19  ;;  %p15146_p9 = scmp.lt.u32.totalorder %s19388_s21, %s19444_s8 }
 0x79e   : > { %p15147_p7 = scmp.lt.u32.totalorder %s15145_s15, %s15141_s19  ;;  %p15149_p12 = scmp.lt.u32.totalorder %s15141_s19, %s19388_s21 }
 0x79f   : > { %p15143_p3 = pnand %p15142_p11, %p20049_p1 }
 0x7a0   : > { %p15148_p4 = por %p15147_p7, %p15146_p9 }
 0x7a1   : > { %p15144_p5 = pneg %p15143_p3 }
 0x7a2   : > { %p15150_p13 = por %p15149_p12, %p15148_p4 }
 0x7a4   : > { %p15151_p0 = pnand %p15150_p13, %p15144_p5 }
 0x7a6   : > { %15154 = shalt.err (!%p15151_p0)
}
 0x7a7   : > { %s15224_s24 = smov 64   ;;  %s15225_s10 = smov 4  }
 0x7a8   : > { %14555 = dma.vmem_to_hbm [thread:$0]  (%p20049_p1), %s19390_s18, 2048, %s19388_s21, %s12211_s11, %s15224_s24, %s15224_s24, %s15225_s10  }
 0x7a9 PF: > { %s12239_s13 = sand.u32 1, %s15197_s27   ;;  %p20050_p2 = scmp.ne.s32.totalorder %s19581_s17, 0 }
 0x7aa   : > { %p20051_p8 = scmp.ge.s32.totalorder %s15209_s30, 2  ;;  %s12240_s16 = scalar_lea.sflag [#allocation7], %s12239_s13 }
 0x7ac   : > { %p14584_p6 = pnand %p20051_p8, %p20050_p2 }
 0x7ae   : > { %15192 = dma.done.wait (!%p14584_p6), %s12240_s16, 2048  }
 0x7af   : > { %15194 = vsyncadd (!%p14584_p6), %s12240_s16, 4294965248  ;;  %p25_p10 = scmp.ge.s32.totalorder %s15478_s23, 4   ;;  %s20052_s27 = smov %s15201_s28 }
 0x7b0   : > { %s20053_s28 = smov %s15205_s29  ;;  %s20054_s29 = smov %s15490_s14 }
 0x7b1   : > { %s20055_s30 = smov %s15478_s23  ;;  %27 = sbr.rel (!%p25_p10) target bundleno = 12 (0xc), region = 125 }
 0x7b8   :  { %12245 = vsyncpa [#allocation6], 1 }
 0x7b9   :  { %12247 = vsyncpa [#allocation6 + $0x1], 1 }
 0x7ba   :  { %12248 = vsyncpa [#allocation9], 1 }
 0x7bb   :  { %12249 = vsyncpa [#allocation12], 1 }
 0x7bc   :  { %12250 = vsyncpa [#allocation15], 1 }
 0x7bd   :  { %12251 = vsyncpa [#allocation18], 1 }
 0x7be   :  { %12252 = vsyncpa [#allocation7], 1 }
 0x7bf   :  { %12254 = vsyncpa [#allocation7 + $0x1], 1 }

</bundles_post_ra>
